<compile_context>
chip_gen: v6e
topology: v6e:2x2x1
jax: 0.10.0
libtpu: 0.0.40
codegen_flags: <defaults>
</compile_context>

<pallas_src>
import functools
import math

import jax
import jax.numpy as jnp
from jax.experimental import pallas as pl
from jax.experimental.pallas import tpu as pltpu

NEG_SLOPE = 0.2                 # LeakyReLU slope used by B.conv_block in ESRGAN
RES_SCALE = 0.2                 # residual scaling inside RDB / RRDB
COMPUTE_DTYPE = jnp.float32     # switch to jnp.bfloat16 to halve memory traffic

# 3x3 taps as (dy, dx) offsets relative to the output pixel; tap index t = ky*3+kx
_TAPS = [(oy, ox) for oy in (-1, 0, 1) for ox in (-1, 0, 1)]


# ----------------------------- in-kernel helpers ---------------------------- #

def _leaky_relu(x):
    return jnp.where(x > 0, x, x * NEG_SLOPE)


def _shift_flat(a, s, hw):
    # result[:, i] = a[:, i + s] if 0 <= i + s < hw else 0   (static shift s)
    if s == 0:
        return a
    c = a.shape[0]
    z = jnp.zeros((c, abs(s)), a.dtype)
    if s > 0:
        return jnp.concatenate([a[:, s:], z], axis=1)
    return jnp.concatenate([z, a[:, :hw + s]], axis=1)


def _scatter_patches(p_ref, a, base, m_neg, m_pos, W, hw):
    """Write the 9 shifted 3x3-tap copies of activation `a` (C, H*W) into
    p_ref rows [base, base + 9*C)  (tap-major, then channel).  Zero padding at
    the image border is realized via lane masks (only the w-direction needs a
    mask; out-of-range rows fall outside [0, HW) and are zero-filled)."""
    c = a.shape[0]
    for t, (oy, ox) in enumerate(_TAPS):
        v = _shift_flat(a, oy * W + ox, hw)
        if ox == -1:
            v = v * m_neg
        elif ox == 1:
            v = v * m_pos
        p_ref[base + t * c: base + (t + 1) * c, :] = v.astype(p_ref.dtype)


# --------------------------------- kernels ---------------------------------- #

def _rdb_kernel(x_ref, m_ref, w1, w2, w3, w4, w5,
                b1, b2, b3, b4, b5, *rest, H, W, nf, gc, fold_outer):
    # Fused ResidualDenseBlock_5C for one batch element.
    # x_ref: (1, nf, H*W)    m_ref: (2, H*W) border masks (ox=-1 / ox=+1)
    # w_j:   (Cout_j, 9*Cin_j)  tap-major, per-source blocks
    # b_j:   (Cout_j, 1)
    # rest = ([outer_res], out, patch_scratch(9*(nf+4gc), H*W))
    if fold_outer:
        r_ref, o_ref, p_ref = rest
    else:
        o_ref, p_ref = rest
    hw = H * W
    m_neg = m_ref[0:1, :]
    m_pos = m_ref[1:2, :]

    x = x_ref[0]                                           # (nf, H*W)
    _scatter_patches(p_ref, x, 0, m_neg, m_pos, W, hw)

    ws = (w1, w2, w3, w4)
    bs = (b1, b2, b3, b4)
    base = 9 * nf
    for j in range(4):                                     # conv1..conv4 + LeakyReLU
        k = 9 * (nf + j * gc)
        acc = jnp.dot(ws[j][...], p_ref[0:k, :],
                      preferred_element_type=jnp.float32)  # (gc, H*W)
        acc = _leaky_relu(acc + bs[j][...].astype(jnp.float32))
        _scatter_patches(p_ref, acc.astype(p_ref.dtype), base, m_neg, m_pos, W, hw)
        base += 9 * gc

    k5 = 9 * (nf + 4 * gc)                                 # conv5 (no activation)
    acc = jnp.dot(w5[...], p_ref[0:k5, :], preferred_element_type=jnp.float32)
    acc = acc + b5[...].astype(jnp.float32)

    xf = x.astype(jnp.float32)
    if fold_outer:
        # (x5*0.2 + x)*0.2 + r  ==  x5*0.04 + x*0.2 + r   (outer RRDB residual folded)
        out = acc * (RES_SCALE * RES_SCALE) + xf * RES_SCALE \
              + r_ref[0].astype(jnp.float32)
    else:
        out = acc * RES_SCALE + xf
    o_ref[0] = out.astype(o_ref.dtype)


def _conv_kernel(x_ref, m_ref, w_ref, b_ref, *rest, H, W, act, has_res):
    # Generic fused 3x3 conv (+bias, optional LeakyReLU, optional residual add)
    # for fea_conv / LR_conv(+shortcut) / upconv / HR convs.
    if has_res:
        r_ref, o_ref, p_ref = rest
    else:
        o_ref, p_ref = rest
    hw = H * W
    m_neg = m_ref[0:1, :]
    m_pos = m_ref[1:2, :]
    _scatter_patches(p_ref, x_ref[0], 0, m_neg, m_pos, W, hw)
    acc = jnp.dot(w_ref[...], p_ref[...], preferred_element_type=jnp.float32)
    acc = acc + b_ref[...].astype(jnp.float32)
    if act:
        acc = _leaky_relu(acc)
    if has_res:
        acc = acc + r_ref[0].astype(jnp.float32)
    o_ref[0] = acc.astype(o_ref.dtype)


# ------------------------------ kernel wrappers ------------------------------ #

def _make_wmask(H, W):
    w = jnp.arange(H * W, dtype=jnp.int32) % W
    return jnp.stack([(w >= 1), (w <= W - 2)], axis=0).astype(COMPUTE_DTYPE)


def _rdb_call(x, p, wmask, H, W, nf, gc, outer_res=None):
    N = x.shape[0]
    hw = H * W
    fold = outer_res is not None
    kernel = functools.partial(_rdb_kernel, H=H, W=W, nf=nf, gc=gc, fold_outer=fold)
    cins = [nf + j * gc for j in range(5)]
    couts = [gc, gc, gc, gc, nf]
    in_specs = [pl.BlockSpec((1, nf, hw), lambda n: (n, 0, 0)),
                pl.BlockSpec((2, hw), lambda n: (0, 0))]
    in_specs += [pl.BlockSpec((co, 9 * ci), lambda n: (0, 0))
                 for ci, co in zip(cins, couts)]
    in_specs += [pl.BlockSpec((co, 1), lambda n: (0, 0)) for co in couts]
    args = [x, wmask] + [p[f"w{i}"] for i in range(1, 6)] \
                      + [p[f"b{i}"] for i in range(1, 6)]
    if fold:
        in_specs.append(pl.BlockSpec((1, nf, hw), lambda n: (n, 0, 0)))
        args.append(outer_res)
    return pl.pallas_call(
        kernel,
        out_shape=jax.ShapeDtypeStruct((N, nf, hw), x.dtype),
        grid_spec=pltpu.PrefetchScalarGridSpec(
            num_scalar_prefetch=0,
            grid=(N,),
            in_specs=in_specs,
            out_specs=pl.BlockSpec((1, nf, hw), lambda n: (n, 0, 0)),
            scratch_shapes=[pltpu.VMEM((9 * (nf + 4 * gc), hw), x.dtype)],
        ),
        compiler_params=pltpu.CompilerParams(dimension_semantics=("parallel",)),
    )(*args)


def _conv_call(x, w, b, wmask, H, W, act, residual=None):
    N, cin, hw = x.shape
    cout = w.shape[0]
    has_res = residual is not None
    kernel = functools.partial(_conv_kernel, H=H, W=W, act=act, has_res=has_res)
    in_specs = [pl.BlockSpec((1, cin, hw), lambda n: (n, 0, 0)),
                pl.BlockSpec((2, hw), lambda n: (0, 0)),
                pl.BlockSpec((cout, 9 * cin), lambda n: (0, 0)),
                pl.BlockSpec((cout, 1), lambda n: (0, 0))]
    args = [x, wmask, w, b]
    if has_res:
        in_specs.append(pl.BlockSpec((1, cout, hw), lambda n: (n, 0, 0)))
        args.append(residual)
    return pl.pallas_call(
        kernel,
        out_shape=jax.ShapeDtypeStruct((N, cout, hw), x.dtype),
        grid_spec=pltpu.PrefetchScalarGridSpec(
            num_scalar_prefetch=0,
            grid=(N,),
            in_specs=in_specs,
            out_specs=pl.BlockSpec((1, cout, hw), lambda n: (n, 0, 0)),
            scratch_shapes=[pltpu.VMEM((9 * cin, hw), x.dtype)],
        ),
        compiler_params=pltpu.CompilerParams(dimension_semantics=("parallel",)),
    )(*args)


# -------------------------------- model glue -------------------------------- #

def rrdb_forward(x, p, wmask, H, W, nf, gc):
    # TODO(synk): conv1x1 / noise branches of some RRDBNet variants are never
    #             defined in the given __init__, so they are treated as disabled.
    out = _rdb_call(x, p["rdb1"], wmask, H, W, nf, gc)
    out = _rdb_call(out, p["rdb2"], wmask, H, W, nf, gc)
    # RDB3 with the outer RRDB residual (out*0.2 + x) folded into its epilogue.
    return _rdb_call(out, p["rdb3"], wmask, H, W, nf, gc, outer_res=x)


def _nearest_up2(x, H, W):
    # TODO(synk): nearest-neighbor 2x upsample is plain-JAX glue between kernels;
    #             it could be folded into the following conv's patch build.
    N, C, _ = x.shape
    x = x.reshape(N, C, H, W)
    x = jnp.repeat(jnp.repeat(x, 2, axis=2), 2, axis=3)
    return x.reshape(N, C, 4 * H * W)


def rrdbnet_forward(x_nchw, params, nf, gc, outm=None):
    """RRDBNet.forward: fea_conv -> Shortcut(nb x RRDB -> LR_conv) ->
    upsamplers -> HR_conv0 -> HR_conv1 (+ optional output activation)."""
    N, in_nc, H, W = x_nchw.shape
    in_dtype = x_nchw.dtype
    x = x_nchw.reshape(N, in_nc, H * W).astype(COMPUTE_DTYPE)
    wmask = _make_wmask(H, W)

    fea = _conv_call(x, params["fea"]["w"], params["fea"]["b"], wmask, H, W, act=False)
    out = fea
    for rb in params["rrdbs"]:
        out = rrdb_forward(out, rb, wmask, H, W, nf, gc)
    # LR_conv fused with the ShortcutBlock residual add: out = LR_conv(out) + fea
    out = _conv_call(out, params["lr"]["w"], params["lr"]["b"], wmask, H, W,
                     act=False, residual=fea)
    for up in params["ups"]:
        out = _nearest_up2(out, H, W)
        H, W = 2 * H, 2 * W
        wmask = _make_wmask(H, W)
        out = _conv_call(out, up["w"], up["b"], wmask, H, W, act=True)
    out = _conv_call(out, params["hr0"]["w"], params["hr0"]["b"], wmask, H, W, act=True)
    out = _conv_call(out, params["hr1"]["w"], params["hr1"]["b"], wmask, H, W, act=False)

    out = out.reshape(N, out.shape[1], H, W).astype(in_dtype)
    if outm == "scaltanh":
        return (jnp.tanh(out) + 1.0) / 2.0
    if outm == "tanh":
        return jnp.tanh(out)
    if outm == "sigmoid":
        return jax.nn.sigmoid(out)
    if outm == "clamp":
        return jnp.clip(out, 0.0, 1.0)
    return out


# ------------------------------ parameter init ------------------------------ #

def _init_conv(key, cin, cout):
    # deterministic synthetic init, weights in torch (Cout, Cin, 3, 3) layout
    kw, kb = jax.random.split(key)
    fan_in = 9 * cin
    w = jax.random.normal(kw, (cout, cin, 3, 3), jnp.float32) * (0.1 / math.sqrt(fan_in))
    b = 0.01 * jax.random.normal(kb, (cout,), jnp.float32)
    return w, b


def _pack_conv_weight(w_oihw, split_sizes):
    """torch (Cout, Cin, 3, 3) -> (Cout, 9*Cin): columns ordered source-major,
    then tap-major (ky*3+kx), then channel — matching the in-kernel patch buffer."""
    cout = w_oihw.shape[0]
    blocks, off = [], 0
    for cs in split_sizes:
        blk = w_oihw[:, off:off + cs, :, :]               # (Cout, Cs, 3, 3)
        blk = jnp.transpose(blk, (0, 2, 3, 1))            # (Cout, 3, 3, Cs)
        blocks.append(blk.reshape(cout, 9 * cs))
        off += cs
    return jnp.concatenate(blocks, axis=1).astype(COMPUTE_DTYPE)


def _init_plain_conv(key, cin, cout):
    w, b = _init_conv(key, cin, cout)
    return {"w": _pack_conv_weight(w, [cin]),
            "b": b.reshape(cout, 1).astype(COMPUTE_DTYPE)}


def init_rdb_params(key, nf, gc):
    keys = jax.random.split(key, 5)
    cins = [nf + j * gc for j in range(5)]
    couts = [gc, gc, gc, gc, nf]
    p = {}
    for i, (k, cin, cout) in enumerate(zip(keys, cins, couts), start=1):
        w, b = _init_conv(k, cin, cout)
        p[f"w{i}"] = _pack_conv_weight(w, [nf] + [gc] * (i - 1))
        p[f"b{i}"] = b.reshape(cout, 1).astype(COMPUTE_DTYPE)
    return p


def init_rrdb_params(key, nf, gc):
    k1, k2, k3 = jax.random.split(key, 3)
    return {"rdb1": init_rdb_params(k1, nf, gc),
            "rdb2": init_rdb_params(k2, nf, gc),
            "rdb3": init_rdb_params(k3, nf, gc)}


def init_rrdbnet_params(key, in_nc, out_nc, nf, gc, nb, upscale):
    n_up = int(math.log(upscale, 2))
    keys = jax.random.split(key, nb + n_up + 4)
    return {
        "fea": _init_plain_conv(keys[0], in_nc, nf),
        "rrdbs": [init_rrdb_params(keys[1 + i], nf, gc) for i in range(nb)],
        "lr": _init_plain_conv(keys[1 + nb], nf, nf),
        "ups": [_init_plain_conv(keys[2 + nb + i], nf, nf) for i in range(n_up)],
        "hr0": _init_plain_conv(keys[2 + nb + n_up], nf, nf),
        "hr1": _init_plain_conv(keys[3 + nb + n_up], nf, out_nc),
    }


# ----------------------------------- main ------------------------------------ #

if __name__ == "__main__":
    in_nc, out_nc, nf, gc = 4, 4, 8, 8
    nb, upscale = 2, 4
    N, H, W = 2, 16, 16

    key = jax.random.PRNGKey(0)
    kx, kp = jax.random.split(key)
    x = jax.random.normal(kx, (N, in_nc, H, W), jnp.float32)   # NCHW, like PyTorch
    params = init_rrdbnet_params(kp, in_nc, out_nc, nf, gc, nb, upscale)

    fwd = jax.jit(functools.partial(rrdbnet_forward, nf=nf, gc=gc))
    out = jax.block_until_ready(fwd(x, params))

    assert out.shape == (N, out_nc, H * upscale, W * upscale), out.shape
    assert out.dtype == x.dtype
    assert bool(jnp.all(jnp.isfinite(out)))
    print("KERNEL_OK")
</pallas_src>

<mosaic_0001>
module attributes {stable_mosaic.version = 11 : i64} {
  func.func @_conv_kernel(%arg0: i32, %arg1: memref<1x8x256xf32, #tpu.memory_space<vmem>>, %arg2: memref<2x256xf32, #tpu.memory_space<vmem>>, %arg3: memref<8x72xf32, #tpu.memory_space<vmem>>, %arg4: memref<8x1xf32, #tpu.memory_space<vmem>>, %arg5: memref<1x8x256xf32, #tpu.memory_space<vmem>>, %arg6: memref<1x8x256xf32, #tpu.memory_space<vmem>>, %arg7: memref<72x256xf32, #tpu.memory_space<vmem>>) attributes {dimension_semantics = [#tpu.dimension_semantics<parallel>], iteration_bounds = array<i64: 2>, scalar_prefetch = 0 : i64, scratch_operands = 1 : i64, tpu.core_type = #tpu.core_type<tc>, window_params = [{transform_indices = @transform_0, window_bounds = array<i64: 1, 8, 256>}, {pipeline_mode = #tpu.pipeline_mode<synchronous>, transform_indices = @transform_1, window_bounds = array<i64: 2, 256>}, {pipeline_mode = #tpu.pipeline_mode<synchronous>, transform_indices = @transform_2, window_bounds = array<i64: 8, 72>}, {pipeline_mode = #tpu.pipeline_mode<synchronous>, transform_indices = @transform_3, window_bounds = array<i64: 8, 1>}, {transform_indices = @transform_4, window_bounds = array<i64: 1, 8, 256>}, {transform_indices = @transform_5, window_bounds = array<i64: 1, 8, 256>}]} {
    %c0 = arith.constant 0 : index
    %c0_0 = arith.constant 0 : index
    %0 = vector.load %arg2[%c0, %c0_0] : memref<2x256xf32, #tpu.memory_space<vmem>>, vector<1x256xf32>
    %c1 = arith.constant 1 : index
    %c0_1 = arith.constant 0 : index
    %1 = vector.load %arg2[%c1, %c0_1] : memref<2x256xf32, #tpu.memory_space<vmem>>, vector<1x256xf32>
    %c0_2 = arith.constant 0 : index
    %c0_3 = arith.constant 0 : index
    %c0_4 = arith.constant 0 : index
    %2 = vector.load %arg1[%c0_2, %c0_3, %c0_4] : memref<1x8x256xf32, #tpu.memory_space<vmem>>, vector<1x8x256xf32>
    %3 = vector.shape_cast %2 : vector<1x8x256xf32> to vector<8x256xf32>
    %cst = arith.constant 0.000000e+00 : f32
    %4 = vector.broadcast %cst : f32 to vector<8x17xf32>
    %5 = vector.extract_strided_slice %3 {offsets = [0, 0], sizes = [8, 239], strides = [1, 1]} : vector<8x256xf32> to vector<8x239xf32>
    %6 = tpu.concatenate %4, %5 in 1 : vector<8x17xf32>, vector<8x239xf32> -> vector<8x256xf32>
    %7 = vector.broadcast %0 : vector<1x256xf32> to vector<8x256xf32>
    %8 = arith.mulf %6, %7 : vector<8x256xf32>
    %c0_5 = arith.constant 0 : index
    %c0_6 = arith.constant 0 : index
    %9 = vector.load %arg7[%c0_5, %c0_6] : memref<72x256xf32, #tpu.memory_space<vmem>>, vector<8x256xf32>
    tpu.vector_store %arg7[%c0_5, %c0_6], %8 {strides = array<i32>} : memref<72x256xf32, #tpu.memory_space<vmem>>, vector<8x256xf32>,
    %cst_7 = arith.constant 0.000000e+00 : f32
    %10 = vector.broadcast %cst_7 : f32 to vector<8x16xf32>
    %11 = vector.extract_strided_slice %3 {offsets = [0, 0], sizes = [8, 240], strides = [1, 1]} : vector<8x256xf32> to vector<8x240xf32>
    %12 = tpu.concatenate %10, %11 in 1 : vector<8x16xf32>, vector<8x240xf32> -> vector<8x256xf32>
    %c8 = arith.constant 8 : index
    %c0_8 = arith.constant 0 : index
    %13 = vector.load %arg7[%c8, %c0_8] : memref<72x256xf32, #tpu.memory_space<vmem>>, vector<8x256xf32>
    tpu.vector_store %arg7[%c8, %c0_8], %12 {strides = array<i32>} : memref<72x256xf32, #tpu.memory_space<vmem>>, vector<8x256xf32>,
    %cst_9 = arith.constant 0.000000e+00 : f32
    %14 = vector.broadcast %cst_9 : f32 to vector<8x15xf32>
    %15 = vector.extract_strided_slice %3 {offsets = [0, 0], sizes = [8, 241], strides = [1, 1]} : vector<8x256xf32> to vector<8x241xf32>
    %16 = tpu.concatenate %14, %15 in 1 : vector<8x15xf32>, vector<8x241xf32> -> vector<8x256xf32>
    %17 = vector.broadcast %1 : vector<1x256xf32> to vector<8x256xf32>
    %18 = arith.mulf %16, %17 : vector<8x256xf32>
    %c16 = arith.constant 16 : index
    %c0_10 = arith.constant 0 : index
    %19 = vector.load %arg7[%c16, %c0_10] : memref<72x256xf32, #tpu.memory_space<vmem>>, vector<8x256xf32>
    tpu.vector_store %arg7[%c16, %c0_10], %18 {strides = array<i32>} : memref<72x256xf32, #tpu.memory_space<vmem>>, vector<8x256xf32>,
    %cst_11 = arith.constant 0.000000e+00 : f32
    %20 = vector.broadcast %cst_11 : f32 to vector<8x1xf32>
    %21 = vector.extract_strided_slice %3 {offsets = [0, 0], sizes = [8, 255], strides = [1, 1]} : vector<8x256xf32> to vector<8x255xf32>
    %22 = tpu.concatenate %20, %21 in 1 : vector<8x1xf32>, vector<8x255xf32> -> vector<8x256xf32>
    %23 = vector.broadcast %0 : vector<1x256xf32> to vector<8x256xf32>
    %24 = arith.mulf %22, %23 : vector<8x256xf32>
    %c24 = arith.constant 24 : index
    %c0_12 = arith.constant 0 : index
    %25 = vector.load %arg7[%c24, %c0_12] : memref<72x256xf32, #tpu.memory_space<vmem>>, vector<8x256xf32>
    tpu.vector_store %arg7[%c24, %c0_12], %24 {strides = array<i32>} : memref<72x256xf32, #tpu.memory_space<vmem>>, vector<8x256xf32>,
    %c32 = arith.constant 32 : index
    %c0_13 = arith.constant 0 : index
    %26 = vector.load %arg7[%c32, %c0_13] : memref<72x256xf32, #tpu.memory_space<vmem>>, vector<8x256xf32>
    tpu.vector_store %arg7[%c32, %c0_13], %3 {strides = array<i32>} : memref<72x256xf32, #tpu.memory_space<vmem>>, vector<8x256xf32>,
    %cst_14 = arith.constant 0.000000e+00 : f32
    %27 = vector.broadcast %cst_14 : f32 to vector<8x1xf32>
    %28 = vector.extract_strided_slice %3 {offsets = [0, 1], sizes = [8, 255], strides = [1, 1]} : vector<8x256xf32> to vector<8x255xf32>
    %29 = tpu.concatenate %28, %27 in 1 : vector<8x255xf32>, vector<8x1xf32> -> vector<8x256xf32>
    %30 = vector.broadcast %1 : vector<1x256xf32> to vector<8x256xf32>
    %31 = arith.mulf %29, %30 : vector<8x256xf32>
    %c40 = arith.constant 40 : index
    %c0_15 = arith.constant 0 : index
    %32 = vector.load %arg7[%c40, %c0_15] : memref<72x256xf32, #tpu.memory_space<vmem>>, vector<8x256xf32>
    tpu.vector_store %arg7[%c40, %c0_15], %31 {strides = array<i32>} : memref<72x256xf32, #tpu.memory_space<vmem>>, vector<8x256xf32>,
    %cst_16 = arith.constant 0.000000e+00 : f32
    %33 = vector.broadcast %cst_16 : f32 to vector<8x15xf32>
    %34 = vector.extract_strided_slice %3 {offsets = [0, 15], sizes = [8, 241], strides = [1, 1]} : vector<8x256xf32> to vector<8x241xf32>
    %35 = tpu.concatenate %34, %33 in 1 : vector<8x241xf32>, vector<8x15xf32> -> vector<8x256xf32>
    %36 = vector.broadcast %0 : vector<1x256xf32> to vector<8x256xf32>
    %37 = arith.mulf %35, %36 : vector<8x256xf32>
    %c48 = arith.constant 48 : index
    %c0_17 = arith.constant 0 : index
    %38 = vector.load %arg7[%c48, %c0_17] : memref<72x256xf32, #tpu.memory_space<vmem>>, vector<8x256xf32>
    tpu.vector_store %arg7[%c48, %c0_17], %37 {strides = array<i32>} : memref<72x256xf32, #tpu.memory_space<vmem>>, vector<8x256xf32>,
    %cst_18 = arith.constant 0.000000e+00 : f32
    %39 = vector.broadcast %cst_18 : f32 to vector<8x16xf32>
    %40 = vector.extract_strided_slice %3 {offsets = [0, 16], sizes = [8, 240], strides = [1, 1]} : vector<8x256xf32> to vector<8x240xf32>
    %41 = tpu.concatenate %40, %39 in 1 : vector<8x240xf32>, vector<8x16xf32> -> vector<8x256xf32>
    %c56 = arith.constant 56 : index
    %c0_19 = arith.constant 0 : index
    %42 = vector.load %arg7[%c56, %c0_19] : memref<72x256xf32, #tpu.memory_space<vmem>>, vector<8x256xf32>
    tpu.vector_store %arg7[%c56, %c0_19], %41 {strides = array<i32>} : memref<72x256xf32, #tpu.memory_space<vmem>>, vector<8x256xf32>,
    %cst_20 = arith.constant 0.000000e+00 : f32
    %43 = vector.broadcast %cst_20 : f32 to vector<8x17xf32>
    %44 = vector.extract_strided_slice %3 {offsets = [0, 17], sizes = [8, 239], strides = [1, 1]} : vector<8x256xf32> to vector<8x239xf32>
    %45 = tpu.concatenate %44, %43 in 1 : vector<8x239xf32>, vector<8x17xf32> -> vector<8x256xf32>
    %46 = vector.broadcast %1 : vector<1x256xf32> to vector<8x256xf32>
    %47 = arith.mulf %45, %46 : vector<8x256xf32>
    %c64 = arith.constant 64 : index
    %c0_21 = arith.constant 0 : index
    %48 = vector.load %arg7[%c64, %c0_21] : memref<72x256xf32, #tpu.memory_space<vmem>>, vector<8x256xf32>
    tpu.vector_store %arg7[%c64, %c0_21], %47 {strides = array<i32>} : memref<72x256xf32, #tpu.memory_space<vmem>>, vector<8x256xf32>,
    %c0_22 = arith.constant 0 : index
    %c0_23 = arith.constant 0 : index
    %49 = vector.load %arg3[%c0_22, %c0_23] : memref<8x72xf32, #tpu.memory_space<vmem>>, vector<8x72xf32>
    %c0_24 = arith.constant 0 : index
    %c0_25 = arith.constant 0 : index
    %50 = vector.load %arg7[%c0_24, %c0_25] : memref<72x256xf32, #tpu.memory_space<vmem>>, vector<72x256xf32>
    %cst_26 = arith.constant dense<0.000000e+00> : vector<8x256xf32>
    %51 = tpu.matmul %49, %50, %cst_26 {dimension_numbers = #tpu.dot_dimension_numbers<[1], [0], [0], [1], [0, 0, 1, 1], [], []>} : vector<8x72xf32>, vector<72x256xf32>, vector<8x256xf32> -> vector<8x256xf32>
    %c0_27 = arith.constant 0 : index
    %c0_28 = arith.constant 0 : index
    %52 = vector.load %arg4[%c0_27, %c0_28] : memref<8x1xf32, #tpu.memory_space<vmem>>, vector<8x1xf32>
    %53 = vector.broadcast %52 : vector<8x1xf32> to vector<8x256xf32>
    %54 = arith.addf %51, %53 : vector<8x256xf32>
    %c0_29 = arith.constant 0 : index
    %c0_30 = arith.constant 0 : index
    %c0_31 = arith.constant 0 : index
    %55 = vector.load %arg5[%c0_29, %c0_30, %c0_31] : memref<1x8x256xf32, #tpu.memory_space<vmem>>, vector<1x8x256xf32>
    %56 = vector.shape_cast %55 : vector<1x8x256xf32> to vector<8x256xf32>
    %57 = arith.addf %54, %56 : vector<8x256xf32>
    %c0_32 = arith.constant 0 : index
    %c0_33 = arith.constant 0 : index
    %c0_34 = arith.constant 0 : index
    %58 = vector.load %arg6[%c0_32, %c0_33, %c0_34] : memref<1x8x256xf32, #tpu.memory_space<vmem>>, vector<1x8x256xf32>
    %59 = vector.shape_cast %58 : vector<1x8x256xf32> to vector<8x256xf32>
    %60 = vector.shape_cast %57 : vector<8x256xf32> to vector<1x8x256xf32>
    tpu.vector_store %arg6[%c0_32, %c0_33, %c0_34], %60 {strides = array<i32>} : memref<1x8x256xf32, #tpu.memory_space<vmem>>, vector<1x8x256xf32>,
    return
  }
  func.func @transform_0(%arg0: i32) -> (i32, i32, i32) {
    %c0_i32 = arith.constant 0 : i32
    %c0_i32_0 = arith.constant 0 : i32
    %c0_i32_1 = arith.constant 0 : i32
    return %arg0, %c0_i32, %c0_i32_0 : i32, i32, i32
  }
  func.func @transform_1(%arg0: i32) -> (i32, i32) {
    %c0_i32 = arith.constant 0 : i32
    %c0_i32_0 = arith.constant 0 : i32
    %c0_i32_1 = arith.constant 0 : i32
    return %c0_i32, %c0_i32_0 : i32, i32
  }
  func.func @transform_2(%arg0: i32) -> (i32, i32) {
    %c0_i32 = arith.constant 0 : i32
    %c0_i32_0 = arith.constant 0 : i32
    %c0_i32_1 = arith.constant 0 : i32
    return %c0_i32, %c0_i32_0 : i32, i32
  }
  func.func @transform_3(%arg0: i32) -> (i32, i32) {
    %c0_i32 = arith.constant 0 : i32
    %c0_i32_0 = arith.constant 0 : i32
    %c0_i32_1 = arith.constant 0 : i32
    return %c0_i32, %c0_i32_0 : i32, i32
  }
  func.func @transform_4(%arg0: i32) -> (i32, i32, i32) {
    %c0_i32 = arith.constant 0 : i32
    %c0_i32_0 = arith.constant 0 : i32
    %c0_i32_1 = arith.constant 0 : i32
    return %arg0, %c0_i32, %c0_i32_0 : i32, i32, i32
  }
  func.func @transform_5(%arg0: i32) -> (i32, i32, i32) {
    %c0_i32 = arith.constant 0 : i32
    %c0_i32_0 = arith.constant 0 : i32
    %c0_i32_1 = arith.constant 0 : i32
    return %arg0, %c0_i32, %c0_i32_0 : i32, i32, i32
  }
}

module attributes {stable_mosaic.version = 11 : i64} {
  func.func @_rdb_kernel(%arg0: i32, %arg1: memref<1x8x256xf32, #tpu.memory_space<vmem>>, %arg2: memref<2x256xf32, #tpu.memory_space<vmem>>, %arg3: memref<8x72xf32, #tpu.memory_space<vmem>>, %arg4: memref<8x144xf32, #tpu.memory_space<vmem>>, %arg5: memref<8x216xf32, #tpu.memory_space<vmem>>, %arg6: memref<8x288xf32, #tpu.memory_space<vmem>>, %arg7: memref<8x360xf32, #tpu.memory_space<vmem>>, %arg8: memref<8x1xf32, #tpu.memory_space<vmem>>, %arg9: memref<8x1xf32, #tpu.memory_space<vmem>>, %arg10: memref<8x1xf32, #tpu.memory_space<vmem>>, %arg11: memref<8x1xf32, #tpu.memory_space<vmem>>, %arg12: memref<8x1xf32, #tpu.memory_space<vmem>>, %arg13: memref<1x8x256xf32, #tpu.memory_space<vmem>>, %arg14: memref<360x256xf32, #tpu.memory_space<vmem>>) attributes {dimension_semantics = [#tpu.dimension_semantics<parallel>], iteration_bounds = array<i64: 2>, scalar_prefetch = 0 : i64, scratch_operands = 1 : i64, tpu.core_type = #tpu.core_type<tc>, window_params = [{transform_indices = @transform_0, window_bounds = array<i64: 1, 8, 256>}, {pipeline_mode = #tpu.pipeline_mode<synchronous>, transform_indices = @transform_1, window_bounds = array<i64: 2, 256>}, {pipeline_mode = #tpu.pipeline_mode<synchronous>, transform_indices = @transform_2, window_bounds = array<i64: 8, 72>}, {pipeline_mode = #tpu.pipeline_mode<synchronous>, transform_indices = @transform_3, window_bounds = array<i64: 8, 144>}, {pipeline_mode = #tpu.pipeline_mode<synchronous>, transform_indices = @transform_4, window_bounds = array<i64: 8, 216>}, {pipeline_mode = #tpu.pipeline_mode<synchronous>, transform_indices = @transform_5, window_bounds = array<i64: 8, 288>}, {pipeline_mode = #tpu.pipeline_mode<synchronous>, transform_indices = @transform_6, window_bounds = array<i64: 8, 360>}, {pipeline_mode = #tpu.pipeline_mode<synchronous>, transform_indices = @transform_7, window_bounds = array<i64: 8, 1>}, {pipeline_mode = #tpu.pipeline_mode<synchronous>, transform_indices = @transform_8, window_bounds = array<i64: 8, 1>}, {pipeline_mode = #tpu.pipeline_mode<synchronous>, transform_indices = @transform_9, window_bounds = array<i64: 8, 1>}, {pipeline_mode = #tpu.pipeline_mode<synchronous>, transform_indices = @transform_10, window_bounds = array<i64: 8, 1>}, {pipeline_mode = #tpu.pipeline_mode<synchronous>, transform_indices = @transform_11, window_bounds = array<i64: 8, 1>}, {transform_indices = @transform_12, window_bounds = array<i64: 1, 8, 256>}]} {
    %c0 = arith.constant 0 : index
    %c0_0 = arith.constant 0 : index
    %0 = vector.load %arg2[%c0, %c0_0] : memref<2x256xf32, #tpu.memory_space<vmem>>, vector<1x256xf32>
    %c1 = arith.constant 1 : index
    %c0_1 = arith.constant 0 : index
    %1 = vector.load %arg2[%c1, %c0_1] : memref<2x256xf32, #tpu.memory_space<vmem>>, vector<1x256xf32>
    %c0_2 = arith.constant 0 : index
    %c0_3 = arith.constant 0 : index
    %c0_4 = arith.constant 0 : index
    %2 = vector.load %arg1[%c0_2, %c0_3, %c0_4] : memref<1x8x256xf32, #tpu.memory_space<vmem>>, vector<1x8x256xf32>
    %3 = vector.shape_cast %2 : vector<1x8x256xf32> to vector<8x256xf32>
    %cst = arith.constant 0.000000e+00 : f32
    %4 = vector.broadcast %cst : f32 to vector<8x17xf32>
    %5 = vector.extract_strided_slice %3 {offsets = [0, 0], sizes = [8, 239], strides = [1, 1]} : vector<8x256xf32> to vector<8x239xf32>
    %6 = tpu.concatenate %4, %5 in 1 : vector<8x17xf32>, vector<8x239xf32> -> vector<8x256xf32>
    %7 = vector.broadcast %0 : vector<1x256xf32> to vector<8x256xf32>
    %8 = arith.mulf %6, %7 : vector<8x256xf32>
    %c0_5 = arith.constant 0 : index
    %c0_6 = arith.constant 0 : index
    %9 = vector.load %arg14[%c0_5, %c0_6] : memref<360x256xf32, #tpu.memory_space<vmem>>, vector<8x256xf32>
    tpu.vector_store %arg14[%c0_5, %c0_6], %8 {strides = array<i32>} : memref<360x256xf32, #tpu.memory_space<vmem>>, vector<8x256xf32>,
    %cst_7 = arith.constant 0.000000e+00 : f32
    %10 = vector.broadcast %cst_7 : f32 to vector<8x16xf32>
    %11 = vector.extract_strided_slice %3 {offsets = [0, 0], sizes = [8, 240], strides = [1, 1]} : vector<8x256xf32> to vector<8x240xf32>
    %12 = tpu.concatenate %10, %11 in 1 : vector<8x16xf32>, vector<8x240xf32> -> vector<8x256xf32>
    %c8 = arith.constant 8 : index
    %c0_8 = arith.constant 0 : index
    %13 = vector.load %arg14[%c8, %c0_8] : memref<360x256xf32, #tpu.memory_space<vmem>>, vector<8x256xf32>
    tpu.vector_store %arg14[%c8, %c0_8], %12 {strides = array<i32>} : memref<360x256xf32, #tpu.memory_space<vmem>>, vector<8x256xf32>,
    %cst_9 = arith.constant 0.000000e+00 : f32
    %14 = vector.broadcast %cst_9 : f32 to vector<8x15xf32>
    %15 = vector.extract_strided_slice %3 {offsets = [0, 0], sizes = [8, 241], strides = [1, 1]} : vector<8x256xf32> to vector<8x241xf32>
    %16 = tpu.concatenate %14, %15 in 1 : vector<8x15xf32>, vector<8x241xf32> -> vector<8x256xf32>
    %17 = vector.broadcast %1 : vector<1x256xf32> to vector<8x256xf32>
    %18 = arith.mulf %16, %17 : vector<8x256xf32>
    %c16 = arith.constant 16 : index
    %c0_10 = arith.constant 0 : index
    %19 = vector.load %arg14[%c16, %c0_10] : memref<360x256xf32, #tpu.memory_space<vmem>>, vector<8x256xf32>
    tpu.vector_store %arg14[%c16, %c0_10], %18 {strides = array<i32>} : memref<360x256xf32, #tpu.memory_space<vmem>>, vector<8x256xf32>,
    %cst_11 = arith.constant 0.000000e+00 : f32
    %20 = vector.broadcast %cst_11 : f32 to vector<8x1xf32>
    %21 = vector.extract_strided_slice %3 {offsets = [0, 0], sizes = [8, 255], strides = [1, 1]} : vector<8x256xf32> to vector<8x255xf32>
    %22 = tpu.concatenate %20, %21 in 1 : vector<8x1xf32>, vector<8x255xf32> -> vector<8x256xf32>
    %23 = vector.broadcast %0 : vector<1x256xf32> to vector<8x256xf32>
    %24 = arith.mulf %22, %23 : vector<8x256xf32>
    %c24 = arith.constant 24 : index
    %c0_12 = arith.constant 0 : index
    %25 = vector.load %arg14[%c24, %c0_12] : memref<360x256xf32, #tpu.memory_space<vmem>>, vector<8x256xf32>
    tpu.vector_store %arg14[%c24, %c0_12], %24 {strides = array<i32>} : memref<360x256xf32, #tpu.memory_space<vmem>>, vector<8x256xf32>,
    %c32 = arith.constant 32 : index
    %c0_13 = arith.constant 0 : index
    %26 = vector.load %arg14[%c32, %c0_13] : memref<360x256xf32, #tpu.memory_space<vmem>>, vector<8x256xf32>
    tpu.vector_store %arg14[%c32, %c0_13], %3 {strides = array<i32>} : memref<360x256xf32, #tpu.memory_space<vmem>>, vector<8x256xf32>,
    %cst_14 = arith.constant 0.000000e+00 : f32
    %27 = vector.broadcast %cst_14 : f32 to vector<8x1xf32>
    %28 = vector.extract_strided_slice %3 {offsets = [0, 1], sizes = [8, 255], strides = [1, 1]} : vector<8x256xf32> to vector<8x255xf32>
    %29 = tpu.concatenate %28, %27 in 1 : vector<8x255xf32>, vector<8x1xf32> -> vector<8x256xf32>
    %30 = vector.broadcast %1 : vector<1x256xf32> to vector<8x256xf32>
    %31 = arith.mulf %29, %30 : vector<8x256xf32>
    %c40 = arith.constant 40 : index
    %c0_15 = arith.constant 0 : index
    %32 = vector.load %arg14[%c40, %c0_15] : memref<360x256xf32, #tpu.memory_space<vmem>>, vector<8x256xf32>
    tpu.vector_store %arg14[%c40, %c0_15], %31 {strides = array<i32>} : memref<360x256xf32, #tpu.memory_space<vmem>>, vector<8x256xf32>,
    %cst_16 = arith.constant 0.000000e+00 : f32
    %33 = vector.broadcast %cst_16 : f32 to vector<8x15xf32>
    %34 = vector.extract_strided_slice %3 {offsets = [0, 15], sizes = [8, 241], strides = [1, 1]} : vector<8x256xf32> to vector<8x241xf32>
    %35 = tpu.concatenate %34, %33 in 1 : vector<8x241xf32>, vector<8x15xf32> -> vector<8x256xf32>
    %36 = vector.broadcast %0 : vector<1x256xf32> to vector<8x256xf32>
    %37 = arith.mulf %35, %36 : vector<8x256xf32>
    %c48 = arith.constant 48 : index
    %c0_17 = arith.constant 0 : index
    %38 = vector.load %arg14[%c48, %c0_17] : memref<360x256xf32, #tpu.memory_space<vmem>>, vector<8x256xf32>
    tpu.vector_store %arg14[%c48, %c0_17], %37 {strides = array<i32>} : memref<360x256xf32, #tpu.memory_space<vmem>>, vector<8x256xf32>,
    %cst_18 = arith.constant 0.000000e+00 : f32
    %39 = vector.broadcast %cst_18 : f32 to vector<8x16xf32>
    %40 = vector.extract_strided_slice %3 {offsets = [0, 16], sizes = [8, 240], strides = [1, 1]} : vector<8x256xf32> to vector<8x240xf32>
    %41 = tpu.concatenate %40, %39 in 1 : vector<8x240xf32>, vector<8x16xf32> -> vector<8x256xf32>
    %c56 = arith.constant 56 : index
    %c0_19 = arith.constant 0 : index
    %42 = vector.load %arg14[%c56, %c0_19] : memref<360x256xf32, #tpu.memory_space<vmem>>, vector<8x256xf32>
    tpu.vector_store %arg14[%c56, %c0_19], %41 {strides = array<i32>} : memref<360x256xf32, #tpu.memory_space<vmem>>, vector<8x256xf32>,
    %cst_20 = arith.constant 0.000000e+00 : f32
    %43 = vector.broadcast %cst_20 : f32 to vector<8x17xf32>
    %44 = vector.extract_strided_slice %3 {offsets = [0, 17], sizes = [8, 239], strides = [1, 1]} : vector<8x256xf32> to vector<8x239xf32>
    %45 = tpu.concatenate %44, %43 in 1 : vector<8x239xf32>, vector<8x17xf32> -> vector<8x256xf32>
    %46 = vector.broadcast %1 : vector<1x256xf32> to vector<8x256xf32>
    %47 = arith.mulf %45, %46 : vector<8x256xf32>
    %c64 = arith.constant 64 : index
    %c0_21 = arith.constant 0 : index
    %48 = vector.load %arg14[%c64, %c0_21] : memref<360x256xf32, #tpu.memory_space<vmem>>, vector<8x256xf32>
    tpu.vector_store %arg14[%c64, %c0_21], %47 {strides = array<i32>} : memref<360x256xf32, #tpu.memory_space<vmem>>, vector<8x256xf32>,
    %c0_22 = arith.constant 0 : index
    %c0_23 = arith.constant 0 : index
    %49 = vector.load %arg3[%c0_22, %c0_23] : memref<8x72xf32, #tpu.memory_space<vmem>>, vector<8x72xf32>
    %c0_24 = arith.constant 0 : index
    %c0_25 = arith.constant 0 : index
    %50 = vector.load %arg14[%c0_24, %c0_25] : memref<360x256xf32, #tpu.memory_space<vmem>>, vector<72x256xf32>
    %cst_26 = arith.constant dense<0.000000e+00> : vector<8x256xf32>
    %51 = tpu.matmul %49, %50, %cst_26 {dimension_numbers = #tpu.dot_dimension_numbers<[1], [0], [0], [1], [0, 0, 1, 1], [], []>} : vector<8x72xf32>, vector<72x256xf32>, vector<8x256xf32> -> vector<8x256xf32>
    %c0_27 = arith.constant 0 : index
    %c0_28 = arith.constant 0 : index
    %52 = vector.load %arg8[%c0_27, %c0_28] : memref<8x1xf32, #tpu.memory_space<vmem>>, vector<8x1xf32>
    %53 = vector.broadcast %52 : vector<8x1xf32> to vector<8x256xf32>
    %54 = arith.addf %51, %53 : vector<8x256xf32>
    %cst_29 = arith.constant 0.000000e+00 : f32
    %55 = vector.broadcast %cst_29 : f32 to vector<8x256xf32>
    %56 = arith.cmpf ogt, %54, %55 : vector<8x256xf32>
    %cst_30 = arith.constant 2.000000e-01 : f32
    %57 = vector.broadcast %cst_30 : f32 to vector<8x256xf32>
    %58 = arith.mulf %54, %57 : vector<8x256xf32>
    %59 = arith.select %56, %54, %58 : vector<8x256xi1>, vector<8x256xf32>
    %cst_31 = arith.constant 0.000000e+00 : f32
    %60 = vector.broadcast %cst_31 : f32 to vector<8x17xf32>
    %61 = vector.extract_strided_slice %59 {offsets = [0, 0], sizes = [8, 239], strides = [1, 1]} : vector<8x256xf32> to vector<8x239xf32>
    %62 = tpu.concatenate %60, %61 in 1 : vector<8x17xf32>, vector<8x239xf32> -> vector<8x256xf32>
    %63 = vector.broadcast %0 : vector<1x256xf32> to vector<8x256xf32>
    %64 = arith.mulf %62, %63 : vector<8x256xf32>
    %c72 = arith.constant 72 : index
    %c0_32 = arith.constant 0 : index
    %65 = vector.load %arg14[%c72, %c0_32] : memref<360x256xf32, #tpu.memory_space<vmem>>, vector<8x256xf32>
    tpu.vector_store %arg14[%c72, %c0_32], %64 {strides = array<i32>} : memref<360x256xf32, #tpu.memory_space<vmem>>, vector<8x256xf32>,
    %cst_33 = arith.constant 0.000000e+00 : f32
    %66 = vector.broadcast %cst_33 : f32 to vector<8x16xf32>
    %67 = vector.extract_strided_slice %59 {offsets = [0, 0], sizes = [8, 240], strides = [1, 1]} : vector<8x256xf32> to vector<8x240xf32>
    %68 = tpu.concatenate %66, %67 in 1 : vector<8x16xf32>, vector<8x240xf32> -> vector<8x256xf32>
    %c80 = arith.constant 80 : index
    %c0_34 = arith.constant 0 : index
    %69 = vector.load %arg14[%c80, %c0_34] : memref<360x256xf32, #tpu.memory_space<vmem>>, vector<8x256xf32>
    tpu.vector_store %arg14[%c80, %c0_34], %68 {strides = array<i32>} : memref<360x256xf32, #tpu.memory_space<vmem>>, vector<8x256xf32>,
    %cst_35 = arith.constant 0.000000e+00 : f32
    %70 = vector.broadcast %cst_35 : f32 to vector<8x15xf32>
    %71 = vector.extract_strided_slice %59 {offsets = [0, 0], sizes = [8, 241], strides = [1, 1]} : vector<8x256xf32> to vector<8x241xf32>
    %72 = tpu.concatenate %70, %71 in 1 : vector<8x15xf32>, vector<8x241xf32> -> vector<8x256xf32>
    %73 = vector.broadcast %1 : vector<1x256xf32> to vector<8x256xf32>
    %74 = arith.mulf %72, %73 : vector<8x256xf32>
    %c88 = arith.constant 88 : index
    %c0_36 = arith.constant 0 : index
    %75 = vector.load %arg14[%c88, %c0_36] : memref<360x256xf32, #tpu.memory_space<vmem>>, vector<8x256xf32>
    tpu.vector_store %arg14[%c88, %c0_36], %74 {strides = array<i32>} : memref<360x256xf32, #tpu.memory_space<vmem>>, vector<8x256xf32>,
    %cst_37 = arith.constant 0.000000e+00 : f32
    %76 = vector.broadcast %cst_37 : f32 to vector<8x1xf32>
    %77 = vector.extract_strided_slice %59 {offsets = [0, 0], sizes = [8, 255], strides = [1, 1]} : vector<8x256xf32> to vector<8x255xf32>
    %78 = tpu.concatenate %76, %77 in 1 : vector<8x1xf32>, vector<8x255xf32> -> vector<8x256xf32>
    %79 = vector.broadcast %0 : vector<1x256xf32> to vector<8x256xf32>
    %80 = arith.mulf %78, %79 : vector<8x256xf32>
    %c96 = arith.constant 96 : index
    %c0_38 = arith.constant 0 : index
    %81 = vector.load %arg14[%c96, %c0_38] : memref<360x256xf32, #tpu.memory_space<vmem>>, vector<8x256xf32>
    tpu.vector_store %arg14[%c96, %c0_38], %80 {strides = array<i32>} : memref<360x256xf32, #tpu.memory_space<vmem>>, vector<8x256xf32>,
    %c104 = arith.constant 104 : index
    %c0_39 = arith.constant 0 : index
    %82 = vector.load %arg14[%c104, %c0_39] : memref<360x256xf32, #tpu.memory_space<vmem>>, vector<8x256xf32>
    tpu.vector_store %arg14[%c104, %c0_39], %59 {strides = array<i32>} : memref<360x256xf32, #tpu.memory_space<vmem>>, vector<8x256xf32>,
    %cst_40 = arith.constant 0.000000e+00 : f32
    %83 = vector.broadcast %cst_40 : f32 to vector<8x1xf32>
    %84 = vector.extract_strided_slice %59 {offsets = [0, 1], sizes = [8, 255], strides = [1, 1]} : vector<8x256xf32> to vector<8x255xf32>
    %85 = tpu.concatenate %84, %83 in 1 : vector<8x255xf32>, vector<8x1xf32> -> vector<8x256xf32>
    %86 = vector.broadcast %1 : vector<1x256xf32> to vector<8x256xf32>
    %87 = arith.mulf %85, %86 : vector<8x256xf32>
    %c112 = arith.constant 112 : index
    %c0_41 = arith.constant 0 : index
    %88 = vector.load %arg14[%c112, %c0_41] : memref<360x256xf32, #tpu.memory_space<vmem>>, vector<8x256xf32>
    tpu.vector_store %arg14[%c112, %c0_41], %87 {strides = array<i32>} : memref<360x256xf32, #tpu.memory_space<vmem>>, vector<8x256xf32>,
    %cst_42 = arith.constant 0.000000e+00 : f32
    %89 = vector.broadcast %cst_42 : f32 to vector<8x15xf32>
    %90 = vector.extract_strided_slice %59 {offsets = [0, 15], sizes = [8, 241], strides = [1, 1]} : vector<8x256xf32> to vector<8x241xf32>
    %91 = tpu.concatenate %90, %89 in 1 : vector<8x241xf32>, vector<8x15xf32> -> vector<8x256xf32>
    %92 = vector.broadcast %0 : vector<1x256xf32> to vector<8x256xf32>
    %93 = arith.mulf %91, %92 : vector<8x256xf32>
    %c120 = arith.constant 120 : index
    %c0_43 = arith.constant 0 : index
    %94 = vector.load %arg14[%c120, %c0_43] : memref<360x256xf32, #tpu.memory_space<vmem>>, vector<8x256xf32>
    tpu.vector_store %arg14[%c120, %c0_43], %93 {strides = array<i32>} : memref<360x256xf32, #tpu.memory_space<vmem>>, vector<8x256xf32>,
    %cst_44 = arith.constant 0.000000e+00 : f32
    %95 = vector.broadcast %cst_44 : f32 to vector<8x16xf32>
    %96 = vector.extract_strided_slice %59 {offsets = [0, 16], sizes = [8, 240], strides = [1, 1]} : vector<8x256xf32> to vector<8x240xf32>
    %97 = tpu.concatenate %96, %95 in 1 : vector<8x240xf32>, vector<8x16xf32> -> vector<8x256xf32>
    %c128 = arith.constant 128 : index
    %c0_45 = arith.constant 0 : index
    %98 = vector.load %arg14[%c128, %c0_45] : memref<360x256xf32, #tpu.memory_space<vmem>>, vector<8x256xf32>
    tpu.vector_store %arg14[%c128, %c0_45], %97 {strides = array<i32>} : memref<360x256xf32, #tpu.memory_space<vmem>>, vector<8x256xf32>,
    %cst_46 = arith.constant 0.000000e+00 : f32
    %99 = vector.broadcast %cst_46 : f32 to vector<8x17xf32>
    %100 = vector.extract_strided_slice %59 {offsets = [0, 17], sizes = [8, 239], strides = [1, 1]} : vector<8x256xf32> to vector<8x239xf32>
    %101 = tpu.concatenate %100, %99 in 1 : vector<8x239xf32>, vector<8x17xf32> -> vector<8x256xf32>
    %102 = vector.broadcast %1 : vector<1x256xf32> to vector<8x256xf32>
    %103 = arith.mulf %101, %102 : vector<8x256xf32>
    %c136 = arith.constant 136 : index
    %c0_47 = arith.constant 0 : index
    %104 = vector.load %arg14[%c136, %c0_47] : memref<360x256xf32, #tpu.memory_space<vmem>>, vector<8x256xf32>
    tpu.vector_store %arg14[%c136, %c0_47], %103 {strides = array<i32>} : memref<360x256xf32, #tpu.memory_space<vmem>>, vector<8x256xf32>,
    %c0_48 = arith.constant 0 : index
    %c0_49 = arith.constant 0 : index
    %105 = vector.load %arg4[%c0_48, %c0_49] : memref<8x144xf32, #tpu.memory_space<vmem>>, vector<8x144xf32>
    %c0_50 = arith.constant 0 : index
    %c0_51 = arith.constant 0 : index
    %106 = vector.load %arg14[%c0_50, %c0_51] : memref<360x256xf32, #tpu.memory_space<vmem>>, vector<144x256xf32>
    %cst_52 = arith.constant dense<0.000000e+00> : vector<8x256xf32>
    %107 = tpu.matmul %105, %106, %cst_52 {dimension_numbers = #tpu.dot_dimension_numbers<[1], [0], [0], [1], [0, 0, 1, 1], [], []>} : vector<8x144xf32>, vector<144x256xf32>, vector<8x256xf32> -> vector<8x256xf32>
    %c0_53 = arith.constant 0 : index
    %c0_54 = arith.constant 0 : index
    %108 = vector.load %arg9[%c0_53, %c0_54] : memref<8x1xf32, #tpu.memory_space<vmem>>, vector<8x1xf32>
    %109 = vector.broadcast %108 : vector<8x1xf32> to vector<8x256xf32>
    %110 = arith.addf %107, %109 : vector<8x256xf32>
    %cst_55 = arith.constant 0.000000e+00 : f32
    %111 = vector.broadcast %cst_55 : f32 to vector<8x256xf32>
    %112 = arith.cmpf ogt, %110, %111 : vector<8x256xf32>
    %cst_56 = arith.constant 2.000000e-01 : f32
    %113 = vector.broadcast %cst_56 : f32 to vector<8x256xf32>
    %114 = arith.mulf %110, %113 : vector<8x256xf32>
    %115 = arith.select %112, %110, %114 : vector<8x256xi1>, vector<8x256xf32>
    %cst_57 = arith.constant 0.000000e+00 : f32
    %116 = vector.broadcast %cst_57 : f32 to vector<8x17xf32>
    %117 = vector.extract_strided_slice %115 {offsets = [0, 0], sizes = [8, 239], strides = [1, 1]} : vector<8x256xf32> to vector<8x239xf32>
    %118 = tpu.concatenate %116, %117 in 1 : vector<8x17xf32>, vector<8x239xf32> -> vector<8x256xf32>
    %119 = vector.broadcast %0 : vector<1x256xf32> to vector<8x256xf32>
    %120 = arith.mulf %118, %119 : vector<8x256xf32>
    %c144 = arith.constant 144 : index
    %c0_58 = arith.constant 0 : index
    %121 = vector.load %arg14[%c144, %c0_58] : memref<360x256xf32, #tpu.memory_space<vmem>>, vector<8x256xf32>
    tpu.vector_store %arg14[%c144, %c0_58], %120 {strides = array<i32>} : memref<360x256xf32, #tpu.memory_space<vmem>>, vector<8x256xf32>,
    %cst_59 = arith.constant 0.000000e+00 : f32
    %122 = vector.broadcast %cst_59 : f32 to vector<8x16xf32>
    %123 = vector.extract_strided_slice %115 {offsets = [0, 0], sizes = [8, 240], strides = [1, 1]} : vector<8x256xf32> to vector<8x240xf32>
    %124 = tpu.concatenate %122, %123 in 1 : vector<8x16xf32>, vector<8x240xf32> -> vector<8x256xf32>
    %c152 = arith.constant 152 : index
    %c0_60 = arith.constant 0 : index
    %125 = vector.load %arg14[%c152, %c0_60] : memref<360x256xf32, #tpu.memory_space<vmem>>, vector<8x256xf32>
    tpu.vector_store %arg14[%c152, %c0_60], %124 {strides = array<i32>} : memref<360x256xf32, #tpu.memory_space<vmem>>, vector<8x256xf32>,
    %cst_61 = arith.constant 0.000000e+00 : f32
    %126 = vector.broadcast %cst_61 : f32 to vector<8x15xf32>
    %127 = vector.extract_strided_slice %115 {offsets = [0, 0], sizes = [8, 241], strides = [1, 1]} : vector<8x256xf32> to vector<8x241xf32>
    %128 = tpu.concatenate %126, %127 in 1 : vector<8x15xf32>, vector<8x241xf32> -> vector<8x256xf32>
    %129 = vector.broadcast %1 : vector<1x256xf32> to vector<8x256xf32>
    %130 = arith.mulf %128, %129 : vector<8x256xf32>
    %c160 = arith.constant 160 : index
    %c0_62 = arith.constant 0 : index
    %131 = vector.load %arg14[%c160, %c0_62] : memref<360x256xf32, #tpu.memory_space<vmem>>, vector<8x256xf32>
    tpu.vector_store %arg14[%c160, %c0_62], %130 {strides = array<i32>} : memref<360x256xf32, #tpu.memory_space<vmem>>, vector<8x256xf32>,
    %cst_63 = arith.constant 0.000000e+00 : f32
    %132 = vector.broadcast %cst_63 : f32 to vector<8x1xf32>
    %133 = vector.extract_strided_slice %115 {offsets = [0, 0], sizes = [8, 255], strides = [1, 1]} : vector<8x256xf32> to vector<8x255xf32>
    %134 = tpu.concatenate %132, %133 in 1 : vector<8x1xf32>, vector<8x255xf32> -> vector<8x256xf32>
    %135 = vector.broadcast %0 : vector<1x256xf32> to vector<8x256xf32>
    %136 = arith.mulf %134, %135 : vector<8x256xf32>
    %c168 = arith.constant 168 : index
    %c0_64 = arith.constant 0 : index
    %137 = vector.load %arg14[%c168, %c0_64] : memref<360x256xf32, #tpu.memory_space<vmem>>, vector<8x256xf32>
    tpu.vector_store %arg14[%c168, %c0_64], %136 {strides = array<i32>} : memref<360x256xf32, #tpu.memory_space<vmem>>, vector<8x256xf32>,
    %c176 = arith.constant 176 : index
    %c0_65 = arith.constant 0 : index
    %138 = vector.load %arg14[%c176, %c0_65] : memref<360x256xf32, #tpu.memory_space<vmem>>, vector<8x256xf32>
    tpu.vector_store %arg14[%c176, %c0_65], %115 {strides = array<i32>} : memref<360x256xf32, #tpu.memory_space<vmem>>, vector<8x256xf32>,
    %cst_66 = arith.constant 0.000000e+00 : f32
    %139 = vector.broadcast %cst_66 : f32 to vector<8x1xf32>
    %140 = vector.extract_strided_slice %115 {offsets = [0, 1], sizes = [8, 255], strides = [1, 1]} : vector<8x256xf32> to vector<8x255xf32>
    %141 = tpu.concatenate %140, %139 in 1 : vector<8x255xf32>, vector<8x1xf32> -> vector<8x256xf32>
    %142 = vector.broadcast %1 : vector<1x256xf32> to vector<8x256xf32>
    %143 = arith.mulf %141, %142 : vector<8x256xf32>
    %c184 = arith.constant 184 : index
    %c0_67 = arith.constant 0 : index
    %144 = vector.load %arg14[%c184, %c0_67] : memref<360x256xf32, #tpu.memory_space<vmem>>, vector<8x256xf32>
    tpu.vector_store %arg14[%c184, %c0_67], %143 {strides = array<i32>} : memref<360x256xf32, #tpu.memory_space<vmem>>, vector<8x256xf32>,
    %cst_68 = arith.constant 0.000000e+00 : f32
    %145 = vector.broadcast %cst_68 : f32 to vector<8x15xf32>
    %146 = vector.extract_strided_slice %115 {offsets = [0, 15], sizes = [8, 241], strides = [1, 1]} : vector<8x256xf32> to vector<8x241xf32>
    %147 = tpu.concatenate %146, %145 in 1 : vector<8x241xf32>, vector<8x15xf32> -> vector<8x256xf32>
    %148 = vector.broadcast %0 : vector<1x256xf32> to vector<8x256xf32>
    %149 = arith.mulf %147, %148 : vector<8x256xf32>
    %c192 = arith.constant 192 : index
    %c0_69 = arith.constant 0 : index
    %150 = vector.load %arg14[%c192, %c0_69] : memref<360x256xf32, #tpu.memory_space<vmem>>, vector<8x256xf32>
    tpu.vector_store %arg14[%c192, %c0_69], %149 {strides = array<i32>} : memref<360x256xf32, #tpu.memory_space<vmem>>, vector<8x256xf32>,
    %cst_70 = arith.constant 0.000000e+00 : f32
    %151 = vector.broadcast %cst_70 : f32 to vector<8x16xf32>
    %152 = vector.extract_strided_slice %115 {offsets = [0, 16], sizes = [8, 240], strides = [1, 1]} : vector<8x256xf32> to vector<8x240xf32>
    %153 = tpu.concatenate %152, %151 in 1 : vector<8x240xf32>, vector<8x16xf32> -> vector<8x256xf32>
    %c200 = arith.constant 200 : index
    %c0_71 = arith.constant 0 : index
    %154 = vector.load %arg14[%c200, %c0_71] : memref<360x256xf32, #tpu.memory_space<vmem>>, vector<8x256xf32>
    tpu.vector_store %arg14[%c200, %c0_71], %153 {strides = array<i32>} : memref<360x256xf32, #tpu.memory_space<vmem>>, vector<8x256xf32>,
    %cst_72 = arith.constant 0.000000e+00 : f32
    %155 = vector.broadcast %cst_72 : f32 to vector<8x17xf32>
    %156 = vector.extract_strided_slice %115 {offsets = [0, 17], sizes = [8, 239], strides = [1, 1]} : vector<8x256xf32> to vector<8x239xf32>
    %157 = tpu.concatenate %156, %155 in 1 : vector<8x239xf32>, vector<8x17xf32> -> vector<8x256xf32>
    %158 = vector.broadcast %1 : vector<1x256xf32> to vector<8x256xf32>
    %159 = arith.mulf %157, %158 : vector<8x256xf32>
    %c208 = arith.constant 208 : index
    %c0_73 = arith.constant 0 : index
    %160 = vector.load %arg14[%c208, %c0_73] : memref<360x256xf32, #tpu.memory_space<vmem>>, vector<8x256xf32>
    tpu.vector_store %arg14[%c208, %c0_73], %159 {strides = array<i32>} : memref<360x256xf32, #tpu.memory_space<vmem>>, vector<8x256xf32>,
    %c0_74 = arith.constant 0 : index
    %c0_75 = arith.constant 0 : index
    %161 = vector.load %arg5[%c0_74, %c0_75] : memref<8x216xf32, #tpu.memory_space<vmem>>, vector<8x216xf32>
    %c0_76 = arith.constant 0 : index
    %c0_77 = arith.constant 0 : index
    %162 = vector.load %arg14[%c0_76, %c0_77] : memref<360x256xf32, #tpu.memory_space<vmem>>, vector<216x256xf32>
    %cst_78 = arith.constant dense<0.000000e+00> : vector<8x256xf32>
    %163 = tpu.matmul %161, %162, %cst_78 {dimension_numbers = #tpu.dot_dimension_numbers<[1], [0], [0], [1], [0, 0, 1, 1], [], []>} : vector<8x216xf32>, vector<216x256xf32>, vector<8x256xf32> -> vector<8x256xf32>
    %c0_79 = arith.constant 0 : index
    %c0_80 = arith.constant 0 : index
    %164 = vector.load %arg10[%c0_79, %c0_80] : memref<8x1xf32, #tpu.memory_space<vmem>>, vector<8x1xf32>
    %165 = vector.broadcast %164 : vector<8x1xf32> to vector<8x256xf32>
    %166 = arith.addf %163, %165 : vector<8x256xf32>
    %cst_81 = arith.constant 0.000000e+00 : f32
    %167 = vector.broadcast %cst_81 : f32 to vector<8x256xf32>
    %168 = arith.cmpf ogt, %166, %167 : vector<8x256xf32>
    %cst_82 = arith.constant 2.000000e-01 : f32
    %169 = vector.broadcast %cst_82 : f32 to vector<8x256xf32>
    %170 = arith.mulf %166, %169 : vector<8x256xf32>
    %171 = arith.select %168, %166, %170 : vector<8x256xi1>, vector<8x256xf32>
    %cst_83 = arith.constant 0.000000e+00 : f32
    %172 = vector.broadcast %cst_83 : f32 to vector<8x17xf32>
    %173 = vector.extract_strided_slice %171 {offsets = [0, 0], sizes = [8, 239], strides = [1, 1]} : vector<8x256xf32> to vector<8x239xf32>
    %174 = tpu.concatenate %172, %173 in 1 : vector<8x17xf32>, vector<8x239xf32> -> vector<8x256xf32>
    %175 = vector.broadcast %0 : vector<1x256xf32> to vector<8x256xf32>
    %176 = arith.mulf %174, %175 : vector<8x256xf32>
    %c216 = arith.constant 216 : index
    %c0_84 = arith.constant 0 : index
    %177 = vector.load %arg14[%c216, %c0_84] : memref<360x256xf32, #tpu.memory_space<vmem>>, vector<8x256xf32>
    tpu.vector_store %arg14[%c216, %c0_84], %176 {strides = array<i32>} : memref<360x256xf32, #tpu.memory_space<vmem>>, vector<8x256xf32>,
    %cst_85 = arith.constant 0.000000e+00 : f32
    %178 = vector.broadcast %cst_85 : f32 to vector<8x16xf32>
    %179 = vector.extract_strided_slice %171 {offsets = [0, 0], sizes = [8, 240], strides = [1, 1]} : vector<8x256xf32> to vector<8x240xf32>
    %180 = tpu.concatenate %178, %179 in 1 : vector<8x16xf32>, vector<8x240xf32> -> vector<8x256xf32>
    %c224 = arith.constant 224 : index
    %c0_86 = arith.constant 0 : index
    %181 = vector.load %arg14[%c224, %c0_86] : memref<360x256xf32, #tpu.memory_space<vmem>>, vector<8x256xf32>
    tpu.vector_store %arg14[%c224, %c0_86], %180 {strides = array<i32>} : memref<360x256xf32, #tpu.memory_space<vmem>>, vector<8x256xf32>,
    %cst_87 = arith.constant 0.000000e+00 : f32
    %182 = vector.broadcast %cst_87 : f32 to vector<8x15xf32>
    %183 = vector.extract_strided_slice %171 {offsets = [0, 0], sizes = [8, 241], strides = [1, 1]} : vector<8x256xf32> to vector<8x241xf32>
    %184 = tpu.concatenate %182, %183 in 1 : vector<8x15xf32>, vector<8x241xf32> -> vector<8x256xf32>
    %185 = vector.broadcast %1 : vector<1x256xf32> to vector<8x256xf32>
    %186 = arith.mulf %184, %185 : vector<8x256xf32>
    %c232 = arith.constant 232 : index
    %c0_88 = arith.constant 0 : index
    %187 = vector.load %arg14[%c232, %c0_88] : memref<360x256xf32, #tpu.memory_space<vmem>>, vector<8x256xf32>
    tpu.vector_store %arg14[%c232, %c0_88], %186 {strides = array<i32>} : memref<360x256xf32, #tpu.memory_space<vmem>>, vector<8x256xf32>,
    %cst_89 = arith.constant 0.000000e+00 : f32
    %188 = vector.broadcast %cst_89 : f32 to vector<8x1xf32>
    %189 = vector.extract_strided_slice %171 {offsets = [0, 0], sizes = [8, 255], strides = [1, 1]} : vector<8x256xf32> to vector<8x255xf32>
    %190 = tpu.concatenate %188, %189 in 1 : vector<8x1xf32>, vector<8x255xf32> -> vector<8x256xf32>
    %191 = vector.broadcast %0 : vector<1x256xf32> to vector<8x256xf32>
    %192 = arith.mulf %190, %191 : vector<8x256xf32>
    %c240 = arith.constant 240 : index
    %c0_90 = arith.constant 0 : index
    %193 = vector.load %arg14[%c240, %c0_90] : memref<360x256xf32, #tpu.memory_space<vmem>>, vector<8x256xf32>
    tpu.vector_store %arg14[%c240, %c0_90], %192 {strides = array<i32>} : memref<360x256xf32, #tpu.memory_space<vmem>>, vector<8x256xf32>,
    %c248 = arith.constant 248 : index
    %c0_91 = arith.constant 0 : index
    %194 = vector.load %arg14[%c248, %c0_91] : memref<360x256xf32, #tpu.memory_space<vmem>>, vector<8x256xf32>
    tpu.vector_store %arg14[%c248, %c0_91], %171 {strides = array<i32>} : memref<360x256xf32, #tpu.memory_space<vmem>>, vector<8x256xf32>,
    %cst_92 = arith.constant 0.000000e+00 : f32
    %195 = vector.broadcast %cst_92 : f32 to vector<8x1xf32>
    %196 = vector.extract_strided_slice %171 {offsets = [0, 1], sizes = [8, 255], strides = [1, 1]} : vector<8x256xf32> to vector<8x255xf32>
    %197 = tpu.concatenate %196, %195 in 1 : vector<8x255xf32>, vector<8x1xf32> -> vector<8x256xf32>
    %198 = vector.broadcast %1 : vector<1x256xf32> to vector<8x256xf32>
    %199 = arith.mulf %197, %198 : vector<8x256xf32>
    %c256 = arith.constant 256 : index
    %c0_93 = arith.constant 0 : index
    %200 = vector.load %arg14[%c256, %c0_93] : memref<360x256xf32, #tpu.memory_space<vmem>>, vector<8x256xf32>
    tpu.vector_store %arg14[%c256, %c0_93], %199 {strides = array<i32>} : memref<360x256xf32, #tpu.memory_space<vmem>>, vector<8x256xf32>,
    %cst_94 = arith.constant 0.000000e+00 : f32
    %201 = vector.broadcast %cst_94 : f32 to vector<8x15xf32>
    %202 = vector.extract_strided_slice %171 {offsets = [0, 15], sizes = [8, 241], strides = [1, 1]} : vector<8x256xf32> to vector<8x241xf32>
    %203 = tpu.concatenate %202, %201 in 1 : vector<8x241xf32>, vector<8x15xf32> -> vector<8x256xf32>
    %204 = vector.broadcast %0 : vector<1x256xf32> to vector<8x256xf32>
    %205 = arith.mulf %203, %204 : vector<8x256xf32>
    %c264 = arith.constant 264 : index
    %c0_95 = arith.constant 0 : index
    %206 = vector.load %arg14[%c264, %c0_95] : memref<360x256xf32, #tpu.memory_space<vmem>>, vector<8x256xf32>
    tpu.vector_store %arg14[%c264, %c0_95], %205 {strides = array<i32>} : memref<360x256xf32, #tpu.memory_space<vmem>>, vector<8x256xf32>,
    %cst_96 = arith.constant 0.000000e+00 : f32
    %207 = vector.broadcast %cst_96 : f32 to vector<8x16xf32>
    %208 = vector.extract_strided_slice %171 {offsets = [0, 16], sizes = [8, 240], strides = [1, 1]} : vector<8x256xf32> to vector<8x240xf32>
    %209 = tpu.concatenate %208, %207 in 1 : vector<8x240xf32>, vector<8x16xf32> -> vector<8x256xf32>
    %c272 = arith.constant 272 : index
    %c0_97 = arith.constant 0 : index
    %210 = vector.load %arg14[%c272, %c0_97] : memref<360x256xf32, #tpu.memory_space<vmem>>, vector<8x256xf32>
    tpu.vector_store %arg14[%c272, %c0_97], %209 {strides = array<i32>} : memref<360x256xf32, #tpu.memory_space<vmem>>, vector<8x256xf32>,
    %cst_98 = arith.constant 0.000000e+00 : f32
    %211 = vector.broadcast %cst_98 : f32 to vector<8x17xf32>
    %212 = vector.extract_strided_slice %171 {offsets = [0, 17], sizes = [8, 239], strides = [1, 1]} : vector<8x256xf32> to vector<8x239xf32>
    %213 = tpu.concatenate %212, %211 in 1 : vector<8x239xf32>, vector<8x17xf32> -> vector<8x256xf32>
    %214 = vector.broadcast %1 : vector<1x256xf32> to vector<8x256xf32>
    %215 = arith.mulf %213, %214 : vector<8x256xf32>
    %c280 = arith.constant 280 : index
    %c0_99 = arith.constant 0 : index
    %216 = vector.load %arg14[%c280, %c0_99] : memref<360x256xf32, #tpu.memory_space<vmem>>, vector<8x256xf32>
    tpu.vector_store %arg14[%c280, %c0_99], %215 {strides = array<i32>} : memref<360x256xf32, #tpu.memory_space<vmem>>, vector<8x256xf32>,
    %c0_100 = arith.constant 0 : index
    %c0_101 = arith.constant 0 : index
    %217 = vector.load %arg6[%c0_100, %c0_101] : memref<8x288xf32, #tpu.memory_space<vmem>>, vector<8x288xf32>
    %c0_102 = arith.constant 0 : index
    %c0_103 = arith.constant 0 : index
    %218 = vector.load %arg14[%c0_102, %c0_103] : memref<360x256xf32, #tpu.memory_space<vmem>>, vector<288x256xf32>
    %cst_104 = arith.constant dense<0.000000e+00> : vector<8x256xf32>
    %219 = tpu.matmul %217, %218, %cst_104 {dimension_numbers = #tpu.dot_dimension_numbers<[1], [0], [0], [1], [0, 0, 1, 1], [], []>} : vector<8x288xf32>, vector<288x256xf32>, vector<8x256xf32> -> vector<8x256xf32>
    %c0_105 = arith.constant 0 : index
    %c0_106 = arith.constant 0 : index
    %220 = vector.load %arg11[%c0_105, %c0_106] : memref<8x1xf32, #tpu.memory_space<vmem>>, vector<8x1xf32>
    %221 = vector.broadcast %220 : vector<8x1xf32> to vector<8x256xf32>
    %222 = arith.addf %219, %221 : vector<8x256xf32>
    %cst_107 = arith.constant 0.000000e+00 : f32
    %223 = vector.broadcast %cst_107 : f32 to vector<8x256xf32>
    %224 = arith.cmpf ogt, %222, %223 : vector<8x256xf32>
    %cst_108 = arith.constant 2.000000e-01 : f32
    %225 = vector.broadcast %cst_108 : f32 to vector<8x256xf32>
    %226 = arith.mulf %222, %225 : vector<8x256xf32>
    %227 = arith.select %224, %222, %226 : vector<8x256xi1>, vector<8x256xf32>
    %cst_109 = arith.constant 0.000000e+00 : f32
    %228 = vector.broadcast %cst_109 : f32 to vector<8x17xf32>
    %229 = vector.extract_strided_slice %227 {offsets = [0, 0], sizes = [8, 239], strides = [1, 1]} : vector<8x256xf32> to vector<8x239xf32>
    %230 = tpu.concatenate %228, %229 in 1 : vector<8x17xf32>, vector<8x239xf32> -> vector<8x256xf32>
    %231 = vector.broadcast %0 : vector<1x256xf32> to vector<8x256xf32>
    %232 = arith.mulf %230, %231 : vector<8x256xf32>
    %c288 = arith.constant 288 : index
    %c0_110 = arith.constant 0 : index
    %233 = vector.load %arg14[%c288, %c0_110] : memref<360x256xf32, #tpu.memory_space<vmem>>, vector<8x256xf32>
    tpu.vector_store %arg14[%c288, %c0_110], %232 {strides = array<i32>} : memref<360x256xf32, #tpu.memory_space<vmem>>, vector<8x256xf32>,
    %cst_111 = arith.constant 0.000000e+00 : f32
    %234 = vector.broadcast %cst_111 : f32 to vector<8x16xf32>
    %235 = vector.extract_strided_slice %227 {offsets = [0, 0], sizes = [8, 240], strides = [1, 1]} : vector<8x256xf32> to vector<8x240xf32>
    %236 = tpu.concatenate %234, %235 in 1 : vector<8x16xf32>, vector<8x240xf32> -> vector<8x256xf32>
    %c296 = arith.constant 296 : index
    %c0_112 = arith.constant 0 : index
    %237 = vector.load %arg14[%c296, %c0_112] : memref<360x256xf32, #tpu.memory_space<vmem>>, vector<8x256xf32>
    tpu.vector_store %arg14[%c296, %c0_112], %236 {strides = array<i32>} : memref<360x256xf32, #tpu.memory_space<vmem>>, vector<8x256xf32>,
    %cst_113 = arith.constant 0.000000e+00 : f32
    %238 = vector.broadcast %cst_113 : f32 to vector<8x15xf32>
    %239 = vector.extract_strided_slice %227 {offsets = [0, 0], sizes = [8, 241], strides = [1, 1]} : vector<8x256xf32> to vector<8x241xf32>
    %240 = tpu.concatenate %238, %239 in 1 : vector<8x15xf32>, vector<8x241xf32> -> vector<8x256xf32>
    %241 = vector.broadcast %1 : vector<1x256xf32> to vector<8x256xf32>
    %242 = arith.mulf %240, %241 : vector<8x256xf32>
    %c304 = arith.constant 304 : index
    %c0_114 = arith.constant 0 : index
    %243 = vector.load %arg14[%c304, %c0_114] : memref<360x256xf32, #tpu.memory_space<vmem>>, vector<8x256xf32>
    tpu.vector_store %arg14[%c304, %c0_114], %242 {strides = array<i32>} : memref<360x256xf32, #tpu.memory_space<vmem>>, vector<8x256xf32>,
    %cst_115 = arith.constant 0.000000e+00 : f32
    %244 = vector.broadcast %cst_115 : f32 to vector<8x1xf32>
    %245 = vector.extract_strided_slice %227 {offsets = [0, 0], sizes = [8, 255], strides = [1, 1]} : vector<8x256xf32> to vector<8x255xf32>
    %246 = tpu.concatenate %244, %245 in 1 : vector<8x1xf32>, vector<8x255xf32> -> vector<8x256xf32>
    %247 = vector.broadcast %0 : vector<1x256xf32> to vector<8x256xf32>
    %248 = arith.mulf %246, %247 : vector<8x256xf32>
    %c312 = arith.constant 312 : index
    %c0_116 = arith.constant 0 : index
    %249 = vector.load %arg14[%c312, %c0_116] : memref<360x256xf32, #tpu.memory_space<vmem>>, vector<8x256xf32>
    tpu.vector_store %arg14[%c312, %c0_116], %248 {strides = array<i32>} : memref<360x256xf32, #tpu.memory_space<vmem>>, vector<8x256xf32>,
    %c320 = arith.constant 320 : index
    %c0_117 = arith.constant 0 : index
    %250 = vector.load %arg14[%c320, %c0_117] : memref<360x256xf32, #tpu.memory_space<vmem>>, vector<8x256xf32>
    tpu.vector_store %arg14[%c320, %c0_117], %227 {strides = array<i32>} : memref<360x256xf32, #tpu.memory_space<vmem>>, vector<8x256xf32>,
    %cst_118 = arith.constant 0.000000e+00 : f32
    %251 = vector.broadcast %cst_118 : f32 to vector<8x1xf32>
    %252 = vector.extract_strided_slice %227 {offsets = [0, 1], sizes = [8, 255], strides = [1, 1]} : vector<8x256xf32> to vector<8x255xf32>
    %253 = tpu.concatenate %252, %251 in 1 : vector<8x255xf32>, vector<8x1xf32> -> vector<8x256xf32>
    %254 = vector.broadcast %1 : vector<1x256xf32> to vector<8x256xf32>
    %255 = arith.mulf %253, %254 : vector<8x256xf32>
    %c328 = arith.constant 328 : index
    %c0_119 = arith.constant 0 : index
    %256 = vector.load %arg14[%c328, %c0_119] : memref<360x256xf32, #tpu.memory_space<vmem>>, vector<8x256xf32>
    tpu.vector_store %arg14[%c328, %c0_119], %255 {strides = array<i32>} : memref<360x256xf32, #tpu.memory_space<vmem>>, vector<8x256xf32>,
    %cst_120 = arith.constant 0.000000e+00 : f32
    %257 = vector.broadcast %cst_120 : f32 to vector<8x15xf32>
    %258 = vector.extract_strided_slice %227 {offsets = [0, 15], sizes = [8, 241], strides = [1, 1]} : vector<8x256xf32> to vector<8x241xf32>
    %259 = tpu.concatenate %258, %257 in 1 : vector<8x241xf32>, vector<8x15xf32> -> vector<8x256xf32>
    %260 = vector.broadcast %0 : vector<1x256xf32> to vector<8x256xf32>
    %261 = arith.mulf %259, %260 : vector<8x256xf32>
    %c336 = arith.constant 336 : index
    %c0_121 = arith.constant 0 : index
    %262 = vector.load %arg14[%c336, %c0_121] : memref<360x256xf32, #tpu.memory_space<vmem>>, vector<8x256xf32>
    tpu.vector_store %arg14[%c336, %c0_121], %261 {strides = array<i32>} : memref<360x256xf32, #tpu.memory_space<vmem>>, vector<8x256xf32>,
    %cst_122 = arith.constant 0.000000e+00 : f32
    %263 = vector.broadcast %cst_122 : f32 to vector<8x16xf32>
    %264 = vector.extract_strided_slice %227 {offsets = [0, 16], sizes = [8, 240], strides = [1, 1]} : vector<8x256xf32> to vector<8x240xf32>
    %265 = tpu.concatenate %264, %263 in 1 : vector<8x240xf32>, vector<8x16xf32> -> vector<8x256xf32>
    %c344 = arith.constant 344 : index
    %c0_123 = arith.constant 0 : index
    %266 = vector.load %arg14[%c344, %c0_123] : memref<360x256xf32, #tpu.memory_space<vmem>>, vector<8x256xf32>
    tpu.vector_store %arg14[%c344, %c0_123], %265 {strides = array<i32>} : memref<360x256xf32, #tpu.memory_space<vmem>>, vector<8x256xf32>,
    %cst_124 = arith.constant 0.000000e+00 : f32
    %267 = vector.broadcast %cst_124 : f32 to vector<8x17xf32>
    %268 = vector.extract_strided_slice %227 {offsets = [0, 17], sizes = [8, 239], strides = [1, 1]} : vector<8x256xf32> to vector<8x239xf32>
    %269 = tpu.concatenate %268, %267 in 1 : vector<8x239xf32>, vector<8x17xf32> -> vector<8x256xf32>
    %270 = vector.broadcast %1 : vector<1x256xf32> to vector<8x256xf32>
    %271 = arith.mulf %269, %270 : vector<8x256xf32>
    %c352 = arith.constant 352 : index
    %c0_125 = arith.constant 0 : index
    %272 = vector.load %arg14[%c352, %c0_125] : memref<360x256xf32, #tpu.memory_space<vmem>>, vector<8x256xf32>
    tpu.vector_store %arg14[%c352, %c0_125], %271 {strides = array<i32>} : memref<360x256xf32, #tpu.memory_space<vmem>>, vector<8x256xf32>,
    %c0_126 = arith.constant 0 : index
    %c0_127 = arith.constant 0 : index
    %273 = vector.load %arg7[%c0_126, %c0_127] : memref<8x360xf32, #tpu.memory_space<vmem>>, vector<8x360xf32>
    %c0_128 = arith.constant 0 : index
    %c0_129 = arith.constant 0 : index
    %274 = vector.load %arg14[%c0_128, %c0_129] : memref<360x256xf32, #tpu.memory_space<vmem>>, vector<360x256xf32>
    %cst_130 = arith.constant dense<0.000000e+00> : vector<8x256xf32>
    %275 = tpu.matmul %273, %274, %cst_130 {dimension_numbers = #tpu.dot_dimension_numbers<[1], [0], [0], [1], [0, 0, 1, 1], [], []>} : vector<8x360xf32>, vector<360x256xf32>, vector<8x256xf32> -> vector<8x256xf32>
    %c0_131 = arith.constant 0 : index
    %c0_132 = arith.constant 0 : index
    %276 = vector.load %arg12[%c0_131, %c0_132] : memref<8x1xf32, #tpu.memory_space<vmem>>, vector<8x1xf32>
    %277 = vector.broadcast %276 : vector<8x1xf32> to vector<8x256xf32>
    %278 = arith.addf %275, %277 : vector<8x256xf32>
    %cst_133 = arith.constant 2.000000e-01 : f32
    %279 = vector.broadcast %cst_133 : f32 to vector<8x256xf32>
    %280 = arith.mulf %278, %279 : vector<8x256xf32>
    %281 = arith.addf %280, %3 : vector<8x256xf32>
    %c0_134 = arith.constant 0 : index
    %c0_135 = arith.constant 0 : index
    %c0_136 = arith.constant 0 : index
    %282 = vector.load %arg13[%c0_134, %c0_135, %c0_136] : memref<1x8x256xf32, #tpu.memory_space<vmem>>, vector<1x8x256xf32>
    %283 = vector.shape_cast %282 : vector<1x8x256xf32> to vector<8x256xf32>
    %284 = vector.shape_cast %281 : vector<8x256xf32> to vector<1x8x256xf32>
    tpu.vector_store %arg13[%c0_134, %c0_135, %c0_136], %284 {strides = array<i32>} : memref<1x8x256xf32, #tpu.memory_space<vmem>>, vector<1x8x256xf32>,
    return
  }
  func.func @transform_0(%arg0: i32) -> (i32, i32, i32) {
    %c0_i32 = arith.constant 0 : i32
    %c0_i32_0 = arith.constant 0 : i32
    %c0_i32_1 = arith.constant 0 : i32
    return %arg0, %c0_i32, %c0_i32_0 : i32, i32, i32
  }
  func.func @transform_1(%arg0: i32) -> (i32, i32) {
    %c0_i32 = arith.constant 0 : i32
    %c0_i32_0 = arith.constant 0 : i32
    %c0_i32_1 = arith.constant 0 : i32
    return %c0_i32, %c0_i32_0 : i32, i32
  }
  func.func @transform_2(%arg0: i32) -> (i32, i32) {
    %c0_i32 = arith.constant 0 : i32
    %c0_i32_0 = arith.constant 0 : i32
    %c0_i32_1 = arith.constant 0 : i32
    return %c0_i32, %c0_i32_0 : i32, i32
  }
  func.func @transform_3(%arg0: i32) -> (i32, i32) {
    %c0_i32 = arith.constant 0 : i32
    %c0_i32_0 = arith.constant 0 : i32
    %c0_i32_1 = arith.constant 0 : i32
    return %c0_i32, %c0_i32_0 : i32, i32
  }
  func.func @transform_4(%arg0: i32) -> (i32, i32) {
    %c0_i32 = arith.constant 0 : i32
    %c0_i32_0 = arith.constant 0 : i32
    %c0_i32_1 = arith.constant 0 : i32
    return %c0_i32, %c0_i32_0 : i32, i32
  }
  func.func @transform_5(%arg0: i32) -> (i32, i32) {
    %c0_i32 = arith.constant 0 : i32
    %c0_i32_0 = arith.constant 0 : i32
    %c0_i32_1 = arith.constant 0 : i32
    return %c0_i32, %c0_i32_0 : i32, i32
  }
  func.func @transform_6(%arg0: i32) -> (i32, i32) {
    %c0_i32 = arith.constant 0 : i32
    %c0_i32_0 = arith.constant 0 : i32
    %c0_i32_1 = arith.constant 0 : i32
    return %c0_i32, %c0_i32_0 : i32, i32
  }
  func.func @transform_7(%arg0: i32) -> (i32, i32) {
    %c0_i32 = arith.constant 0 : i32
    %c0_i32_0 = arith.constant 0 : i32
    %c0_i32_1 = arith.constant 0 : i32
    return %c0_i32, %c0_i32_0 : i32, i32
  }
  func.func @transform_8(%arg0: i32) -> (i32, i32) {
    %c0_i32 = arith.constant 0 : i32
    %c0_i32_0 = arith.constant 0 : i32
    %c0_i32_1 = arith.constant 0 : i32
    return %c0_i32, %c0_i32_0 : i32, i32
  }
  func.func @transform_9(%arg0: i32) -> (i32, i32) {
    %c0_i32 = arith.constant 0 : i32
    %c0_i32_0 = arith.constant 0 : i32
    %c0_i32_1 = arith.constant 0 : i32
    return %c0_i32, %c0_i32_0 : i32, i32
  }
  func.func @transform_10(%arg0: i32) -> (i32, i32) {
    %c0_i32 = arith.constant 0 : i32
    %c0_i32_0 = arith.constant 0 : i32
    %c0_i32_1 = arith.constant 0 : i32
    return %c0_i32, %c0_i32_0 : i32, i32
  }
  func.func @transform_11(%arg0: i32) -> (i32, i32) {
    %c0_i32 = arith.constant 0 : i32
    %c0_i32_0 = arith.constant 0 : i32
    %c0_i32_1 = arith.constant 0 : i32
    return %c0_i32, %c0_i32_0 : i32, i32
  }
  func.func @transform_12(%arg0: i32) -> (i32, i32, i32) {
    %c0_i32 = arith.constant 0 : i32
    %c0_i32_0 = arith.constant 0 : i32
    %c0_i32_1 = arith.constant 0 : i32
    return %arg0, %c0_i32, %c0_i32_0 : i32, i32, i32
  }
}

module attributes {stable_mosaic.version = 11 : i64} {
  func.func @_rdb_kernel(%arg0: i32, %arg1: memref<1x8x256xf32, #tpu.memory_space<vmem>>, %arg2: memref<2x256xf32, #tpu.memory_space<vmem>>, %arg3: memref<8x72xf32, #tpu.memory_space<vmem>>, %arg4: memref<8x144xf32, #tpu.memory_space<vmem>>, %arg5: memref<8x216xf32, #tpu.memory_space<vmem>>, %arg6: memref<8x288xf32, #tpu.memory_space<vmem>>, %arg7: memref<8x360xf32, #tpu.memory_space<vmem>>, %arg8: memref<8x1xf32, #tpu.memory_space<vmem>>, %arg9: memref<8x1xf32, #tpu.memory_space<vmem>>, %arg10: memref<8x1xf32, #tpu.memory_space<vmem>>, %arg11: memref<8x1xf32, #tpu.memory_space<vmem>>, %arg12: memref<8x1xf32, #tpu.memory_space<vmem>>, %arg13: memref<1x8x256xf32, #tpu.memory_space<vmem>>, %arg14: memref<1x8x256xf32, #tpu.memory_space<vmem>>, %arg15: memref<360x256xf32, #tpu.memory_space<vmem>>) attributes {dimension_semantics = [#tpu.dimension_semantics<parallel>], iteration_bounds = array<i64: 2>, scalar_prefetch = 0 : i64, scratch_operands = 1 : i64, tpu.core_type = #tpu.core_type<tc>, window_params = [{transform_indices = @transform_0, window_bounds = array<i64: 1, 8, 256>}, {pipeline_mode = #tpu.pipeline_mode<synchronous>, transform_indices = @transform_1, window_bounds = array<i64: 2, 256>}, {pipeline_mode = #tpu.pipeline_mode<synchronous>, transform_indices = @transform_2, window_bounds = array<i64: 8, 72>}, {pipeline_mode = #tpu.pipeline_mode<synchronous>, transform_indices = @transform_3, window_bounds = array<i64: 8, 144>}, {pipeline_mode = #tpu.pipeline_mode<synchronous>, transform_indices = @transform_4, window_bounds = array<i64: 8, 216>}, {pipeline_mode = #tpu.pipeline_mode<synchronous>, transform_indices = @transform_5, window_bounds = array<i64: 8, 288>}, {pipeline_mode = #tpu.pipeline_mode<synchronous>, transform_indices = @transform_6, window_bounds = array<i64: 8, 360>}, {pipeline_mode = #tpu.pipeline_mode<synchronous>, transform_indices = @transform_7, window_bounds = array<i64: 8, 1>}, {pipeline_mode = #tpu.pipeline_mode<synchronous>, transform_indices = @transform_8, window_bounds = array<i64: 8, 1>}, {pipeline_mode = #tpu.pipeline_mode<synchronous>, transform_indices = @transform_9, window_bounds = array<i64: 8, 1>}, {pipeline_mode = #tpu.pipeline_mode<synchronous>, transform_indices = @transform_10, window_bounds = array<i64: 8, 1>}, {pipeline_mode = #tpu.pipeline_mode<synchronous>, transform_indices = @transform_11, window_bounds = array<i64: 8, 1>}, {transform_indices = @transform_12, window_bounds = array<i64: 1, 8, 256>}, {transform_indices = @transform_13, window_bounds = array<i64: 1, 8, 256>}]} {
    %c0 = arith.constant 0 : index
    %c0_0 = arith.constant 0 : index
    %0 = vector.load %arg2[%c0, %c0_0] : memref<2x256xf32, #tpu.memory_space<vmem>>, vector<1x256xf32>
    %c1 = arith.constant 1 : index
    %c0_1 = arith.constant 0 : index
    %1 = vector.load %arg2[%c1, %c0_1] : memref<2x256xf32, #tpu.memory_space<vmem>>, vector<1x256xf32>
    %c0_2 = arith.constant 0 : index
    %c0_3 = arith.constant 0 : index
    %c0_4 = arith.constant 0 : index
    %2 = vector.load %arg1[%c0_2, %c0_3, %c0_4] : memref<1x8x256xf32, #tpu.memory_space<vmem>>, vector<1x8x256xf32>
    %3 = vector.shape_cast %2 : vector<1x8x256xf32> to vector<8x256xf32>
    %cst = arith.constant 0.000000e+00 : f32
    %4 = vector.broadcast %cst : f32 to vector<8x17xf32>
    %5 = vector.extract_strided_slice %3 {offsets = [0, 0], sizes = [8, 239], strides = [1, 1]} : vector<8x256xf32> to vector<8x239xf32>
    %6 = tpu.concatenate %4, %5 in 1 : vector<8x17xf32>, vector<8x239xf32> -> vector<8x256xf32>
    %7 = vector.broadcast %0 : vector<1x256xf32> to vector<8x256xf32>
    %8 = arith.mulf %6, %7 : vector<8x256xf32>
    %c0_5 = arith.constant 0 : index
    %c0_6 = arith.constant 0 : index
    %9 = vector.load %arg15[%c0_5, %c0_6] : memref<360x256xf32, #tpu.memory_space<vmem>>, vector<8x256xf32>
    tpu.vector_store %arg15[%c0_5, %c0_6], %8 {strides = array<i32>} : memref<360x256xf32, #tpu.memory_space<vmem>>, vector<8x256xf32>,
    %cst_7 = arith.constant 0.000000e+00 : f32
    %10 = vector.broadcast %cst_7 : f32 to vector<8x16xf32>
    %11 = vector.extract_strided_slice %3 {offsets = [0, 0], sizes = [8, 240], strides = [1, 1]} : vector<8x256xf32> to vector<8x240xf32>
    %12 = tpu.concatenate %10, %11 in 1 : vector<8x16xf32>, vector<8x240xf32> -> vector<8x256xf32>
    %c8 = arith.constant 8 : index
    %c0_8 = arith.constant 0 : index
    %13 = vector.load %arg15[%c8, %c0_8] : memref<360x256xf32, #tpu.memory_space<vmem>>, vector<8x256xf32>
    tpu.vector_store %arg15[%c8, %c0_8], %12 {strides = array<i32>} : memref<360x256xf32, #tpu.memory_space<vmem>>, vector<8x256xf32>,
    %cst_9 = arith.constant 0.000000e+00 : f32
    %14 = vector.broadcast %cst_9 : f32 to vector<8x15xf32>
    %15 = vector.extract_strided_slice %3 {offsets = [0, 0], sizes = [8, 241], strides = [1, 1]} : vector<8x256xf32> to vector<8x241xf32>
    %16 = tpu.concatenate %14, %15 in 1 : vector<8x15xf32>, vector<8x241xf32> -> vector<8x256xf32>
    %17 = vector.broadcast %1 : vector<1x256xf32> to vector<8x256xf32>
    %18 = arith.mulf %16, %17 : vector<8x256xf32>
    %c16 = arith.constant 16 : index
    %c0_10 = arith.constant 0 : index
    %19 = vector.load %arg15[%c16, %c0_10] : memref<360x256xf32, #tpu.memory_space<vmem>>, vector<8x256xf32>
    tpu.vector_store %arg15[%c16, %c0_10], %18 {strides = array<i32>} : memref<360x256xf32, #tpu.memory_space<vmem>>, vector<8x256xf32>,
    %cst_11 = arith.constant 0.000000e+00 : f32
    %20 = vector.broadcast %cst_11 : f32 to vector<8x1xf32>
    %21 = vector.extract_strided_slice %3 {offsets = [0, 0], sizes = [8, 255], strides = [1, 1]} : vector<8x256xf32> to vector<8x255xf32>
    %22 = tpu.concatenate %20, %21 in 1 : vector<8x1xf32>, vector<8x255xf32> -> vector<8x256xf32>
    %23 = vector.broadcast %0 : vector<1x256xf32> to vector<8x256xf32>
    %24 = arith.mulf %22, %23 : vector<8x256xf32>
    %c24 = arith.constant 24 : index
    %c0_12 = arith.constant 0 : index
    %25 = vector.load %arg15[%c24, %c0_12] : memref<360x256xf32, #tpu.memory_space<vmem>>, vector<8x256xf32>
    tpu.vector_store %arg15[%c24, %c0_12], %24 {strides = array<i32>} : memref<360x256xf32, #tpu.memory_space<vmem>>, vector<8x256xf32>,
    %c32 = arith.constant 32 : index
    %c0_13 = arith.constant 0 : index
    %26 = vector.load %arg15[%c32, %c0_13] : memref<360x256xf32, #tpu.memory_space<vmem>>, vector<8x256xf32>
    tpu.vector_store %arg15[%c32, %c0_13], %3 {strides = array<i32>} : memref<360x256xf32, #tpu.memory_space<vmem>>, vector<8x256xf32>,
    %cst_14 = arith.constant 0.000000e+00 : f32
    %27 = vector.broadcast %cst_14 : f32 to vector<8x1xf32>
    %28 = vector.extract_strided_slice %3 {offsets = [0, 1], sizes = [8, 255], strides = [1, 1]} : vector<8x256xf32> to vector<8x255xf32>
    %29 = tpu.concatenate %28, %27 in 1 : vector<8x255xf32>, vector<8x1xf32> -> vector<8x256xf32>
    %30 = vector.broadcast %1 : vector<1x256xf32> to vector<8x256xf32>
    %31 = arith.mulf %29, %30 : vector<8x256xf32>
    %c40 = arith.constant 40 : index
    %c0_15 = arith.constant 0 : index
    %32 = vector.load %arg15[%c40, %c0_15] : memref<360x256xf32, #tpu.memory_space<vmem>>, vector<8x256xf32>
    tpu.vector_store %arg15[%c40, %c0_15], %31 {strides = array<i32>} : memref<360x256xf32, #tpu.memory_space<vmem>>, vector<8x256xf32>,
    %cst_16 = arith.constant 0.000000e+00 : f32
    %33 = vector.broadcast %cst_16 : f32 to vector<8x15xf32>
    %34 = vector.extract_strided_slice %3 {offsets = [0, 15], sizes = [8, 241], strides = [1, 1]} : vector<8x256xf32> to vector<8x241xf32>
    %35 = tpu.concatenate %34, %33 in 1 : vector<8x241xf32>, vector<8x15xf32> -> vector<8x256xf32>
    %36 = vector.broadcast %0 : vector<1x256xf32> to vector<8x256xf32>
    %37 = arith.mulf %35, %36 : vector<8x256xf32>
    %c48 = arith.constant 48 : index
    %c0_17 = arith.constant 0 : index
    %38 = vector.load %arg15[%c48, %c0_17] : memref<360x256xf32, #tpu.memory_space<vmem>>, vector<8x256xf32>
    tpu.vector_store %arg15[%c48, %c0_17], %37 {strides = array<i32>} : memref<360x256xf32, #tpu.memory_space<vmem>>, vector<8x256xf32>,
    %cst_18 = arith.constant 0.000000e+00 : f32
    %39 = vector.broadcast %cst_18 : f32 to vector<8x16xf32>
    %40 = vector.extract_strided_slice %3 {offsets = [0, 16], sizes = [8, 240], strides = [1, 1]} : vector<8x256xf32> to vector<8x240xf32>
    %41 = tpu.concatenate %40, %39 in 1 : vector<8x240xf32>, vector<8x16xf32> -> vector<8x256xf32>
    %c56 = arith.constant 56 : index
    %c0_19 = arith.constant 0 : index
    %42 = vector.load %arg15[%c56, %c0_19] : memref<360x256xf32, #tpu.memory_space<vmem>>, vector<8x256xf32>
    tpu.vector_store %arg15[%c56, %c0_19], %41 {strides = array<i32>} : memref<360x256xf32, #tpu.memory_space<vmem>>, vector<8x256xf32>,
    %cst_20 = arith.constant 0.000000e+00 : f32
    %43 = vector.broadcast %cst_20 : f32 to vector<8x17xf32>
    %44 = vector.extract_strided_slice %3 {offsets = [0, 17], sizes = [8, 239], strides = [1, 1]} : vector<8x256xf32> to vector<8x239xf32>
    %45 = tpu.concatenate %44, %43 in 1 : vector<8x239xf32>, vector<8x17xf32> -> vector<8x256xf32>
    %46 = vector.broadcast %1 : vector<1x256xf32> to vector<8x256xf32>
    %47 = arith.mulf %45, %46 : vector<8x256xf32>
    %c64 = arith.constant 64 : index
    %c0_21 = arith.constant 0 : index
    %48 = vector.load %arg15[%c64, %c0_21] : memref<360x256xf32, #tpu.memory_space<vmem>>, vector<8x256xf32>
    tpu.vector_store %arg15[%c64, %c0_21], %47 {strides = array<i32>} : memref<360x256xf32, #tpu.memory_space<vmem>>, vector<8x256xf32>,
    %c0_22 = arith.constant 0 : index
    %c0_23 = arith.constant 0 : index
    %49 = vector.load %arg3[%c0_22, %c0_23] : memref<8x72xf32, #tpu.memory_space<vmem>>, vector<8x72xf32>
    %c0_24 = arith.constant 0 : index
    %c0_25 = arith.constant 0 : index
    %50 = vector.load %arg15[%c0_24, %c0_25] : memref<360x256xf32, #tpu.memory_space<vmem>>, vector<72x256xf32>
    %cst_26 = arith.constant dense<0.000000e+00> : vector<8x256xf32>
    %51 = tpu.matmul %49, %50, %cst_26 {dimension_numbers = #tpu.dot_dimension_numbers<[1], [0], [0], [1], [0, 0, 1, 1], [], []>} : vector<8x72xf32>, vector<72x256xf32>, vector<8x256xf32> -> vector<8x256xf32>
    %c0_27 = arith.constant 0 : index
    %c0_28 = arith.constant 0 : index
    %52 = vector.load %arg8[%c0_27, %c0_28] : memref<8x1xf32, #tpu.memory_space<vmem>>, vector<8x1xf32>
    %53 = vector.broadcast %52 : vector<8x1xf32> to vector<8x256xf32>
    %54 = arith.addf %51, %53 : vector<8x256xf32>
    %cst_29 = arith.constant 0.000000e+00 : f32
    %55 = vector.broadcast %cst_29 : f32 to vector<8x256xf32>
    %56 = arith.cmpf ogt, %54, %55 : vector<8x256xf32>
    %cst_30 = arith.constant 2.000000e-01 : f32
    %57 = vector.broadcast %cst_30 : f32 to vector<8x256xf32>
    %58 = arith.mulf %54, %57 : vector<8x256xf32>
    %59 = arith.select %56, %54, %58 : vector<8x256xi1>, vector<8x256xf32>
    %cst_31 = arith.constant 0.000000e+00 : f32
    %60 = vector.broadcast %cst_31 : f32 to vector<8x17xf32>
    %61 = vector.extract_strided_slice %59 {offsets = [0, 0], sizes = [8, 239], strides = [1, 1]} : vector<8x256xf32> to vector<8x239xf32>
    %62 = tpu.concatenate %60, %61 in 1 : vector<8x17xf32>, vector<8x239xf32> -> vector<8x256xf32>
    %63 = vector.broadcast %0 : vector<1x256xf32> to vector<8x256xf32>
    %64 = arith.mulf %62, %63 : vector<8x256xf32>
    %c72 = arith.constant 72 : index
    %c0_32 = arith.constant 0 : index
    %65 = vector.load %arg15[%c72, %c0_32] : memref<360x256xf32, #tpu.memory_space<vmem>>, vector<8x256xf32>
    tpu.vector_store %arg15[%c72, %c0_32], %64 {strides = array<i32>} : memref<360x256xf32, #tpu.memory_space<vmem>>, vector<8x256xf32>,
    %cst_33 = arith.constant 0.000000e+00 : f32
    %66 = vector.broadcast %cst_33 : f32 to vector<8x16xf32>
    %67 = vector.extract_strided_slice %59 {offsets = [0, 0], sizes = [8, 240], strides = [1, 1]} : vector<8x256xf32> to vector<8x240xf32>
    %68 = tpu.concatenate %66, %67 in 1 : vector<8x16xf32>, vector<8x240xf32> -> vector<8x256xf32>
    %c80 = arith.constant 80 : index
    %c0_34 = arith.constant 0 : index
    %69 = vector.load %arg15[%c80, %c0_34] : memref<360x256xf32, #tpu.memory_space<vmem>>, vector<8x256xf32>
    tpu.vector_store %arg15[%c80, %c0_34], %68 {strides = array<i32>} : memref<360x256xf32, #tpu.memory_space<vmem>>, vector<8x256xf32>,
    %cst_35 = arith.constant 0.000000e+00 : f32
    %70 = vector.broadcast %cst_35 : f32 to vector<8x15xf32>
    %71 = vector.extract_strided_slice %59 {offsets = [0, 0], sizes = [8, 241], strides = [1, 1]} : vector<8x256xf32> to vector<8x241xf32>
    %72 = tpu.concatenate %70, %71 in 1 : vector<8x15xf32>, vector<8x241xf32> -> vector<8x256xf32>
    %73 = vector.broadcast %1 : vector<1x256xf32> to vector<8x256xf32>
    %74 = arith.mulf %72, %73 : vector<8x256xf32>
    %c88 = arith.constant 88 : index
    %c0_36 = arith.constant 0 : index
    %75 = vector.load %arg15[%c88, %c0_36] : memref<360x256xf32, #tpu.memory_space<vmem>>, vector<8x256xf32>
    tpu.vector_store %arg15[%c88, %c0_36], %74 {strides = array<i32>} : memref<360x256xf32, #tpu.memory_space<vmem>>, vector<8x256xf32>,
    %cst_37 = arith.constant 0.000000e+00 : f32
    %76 = vector.broadcast %cst_37 : f32 to vector<8x1xf32>
    %77 = vector.extract_strided_slice %59 {offsets = [0, 0], sizes = [8, 255], strides = [1, 1]} : vector<8x256xf32> to vector<8x255xf32>
    %78 = tpu.concatenate %76, %77 in 1 : vector<8x1xf32>, vector<8x255xf32> -> vector<8x256xf32>
    %79 = vector.broadcast %0 : vector<1x256xf32> to vector<8x256xf32>
    %80 = arith.mulf %78, %79 : vector<8x256xf32>
    %c96 = arith.constant 96 : index
    %c0_38 = arith.constant 0 : index
    %81 = vector.load %arg15[%c96, %c0_38] : memref<360x256xf32, #tpu.memory_space<vmem>>, vector<8x256xf32>
    tpu.vector_store %arg15[%c96, %c0_38], %80 {strides = array<i32>} : memref<360x256xf32, #tpu.memory_space<vmem>>, vector<8x256xf32>,
    %c104 = arith.constant 104 : index
    %c0_39 = arith.constant 0 : index
    %82 = vector.load %arg15[%c104, %c0_39] : memref<360x256xf32, #tpu.memory_space<vmem>>, vector<8x256xf32>
    tpu.vector_store %arg15[%c104, %c0_39], %59 {strides = array<i32>} : memref<360x256xf32, #tpu.memory_space<vmem>>, vector<8x256xf32>,
    %cst_40 = arith.constant 0.000000e+00 : f32
    %83 = vector.broadcast %cst_40 : f32 to vector<8x1xf32>
    %84 = vector.extract_strided_slice %59 {offsets = [0, 1], sizes = [8, 255], strides = [1, 1]} : vector<8x256xf32> to vector<8x255xf32>
    %85 = tpu.concatenate %84, %83 in 1 : vector<8x255xf32>, vector<8x1xf32> -> vector<8x256xf32>
    %86 = vector.broadcast %1 : vector<1x256xf32> to vector<8x256xf32>
    %87 = arith.mulf %85, %86 : vector<8x256xf32>
    %c112 = arith.constant 112 : index
    %c0_41 = arith.constant 0 : index
    %88 = vector.load %arg15[%c112, %c0_41] : memref<360x256xf32, #tpu.memory_space<vmem>>, vector<8x256xf32>
    tpu.vector_store %arg15[%c112, %c0_41], %87 {strides = array<i32>} : memref<360x256xf32, #tpu.memory_space<vmem>>, vector<8x256xf32>,
    %cst_42 = arith.constant 0.000000e+00 : f32
    %89 = vector.broadcast %cst_42 : f32 to vector<8x15xf32>
    %90 = vector.extract_strided_slice %59 {offsets = [0, 15], sizes = [8, 241], strides = [1, 1]} : vector<8x256xf32> to vector<8x241xf32>
    %91 = tpu.concatenate %90, %89 in 1 : vector<8x241xf32>, vector<8x15xf32> -> vector<8x256xf32>
    %92 = vector.broadcast %0 : vector<1x256xf32> to vector<8x256xf32>
    %93 = arith.mulf %91, %92 : vector<8x256xf32>
    %c120 = arith.constant 120 : index
    %c0_43 = arith.constant 0 : index
    %94 = vector.load %arg15[%c120, %c0_43] : memref<360x256xf32, #tpu.memory_space<vmem>>, vector<8x256xf32>
    tpu.vector_store %arg15[%c120, %c0_43], %93 {strides = array<i32>} : memref<360x256xf32, #tpu.memory_space<vmem>>, vector<8x256xf32>,
    %cst_44 = arith.constant 0.000000e+00 : f32
    %95 = vector.broadcast %cst_44 : f32 to vector<8x16xf32>
    %96 = vector.extract_strided_slice %59 {offsets = [0, 16], sizes = [8, 240], strides = [1, 1]} : vector<8x256xf32> to vector<8x240xf32>
    %97 = tpu.concatenate %96, %95 in 1 : vector<8x240xf32>, vector<8x16xf32> -> vector<8x256xf32>
    %c128 = arith.constant 128 : index
    %c0_45 = arith.constant 0 : index
    %98 = vector.load %arg15[%c128, %c0_45] : memref<360x256xf32, #tpu.memory_space<vmem>>, vector<8x256xf32>
    tpu.vector_store %arg15[%c128, %c0_45], %97 {strides = array<i32>} : memref<360x256xf32, #tpu.memory_space<vmem>>, vector<8x256xf32>,
    %cst_46 = arith.constant 0.000000e+00 : f32
    %99 = vector.broadcast %cst_46 : f32 to vector<8x17xf32>
    %100 = vector.extract_strided_slice %59 {offsets = [0, 17], sizes = [8, 239], strides = [1, 1]} : vector<8x256xf32> to vector<8x239xf32>
    %101 = tpu.concatenate %100, %99 in 1 : vector<8x239xf32>, vector<8x17xf32> -> vector<8x256xf32>
    %102 = vector.broadcast %1 : vector<1x256xf32> to vector<8x256xf32>
    %103 = arith.mulf %101, %102 : vector<8x256xf32>
    %c136 = arith.constant 136 : index
    %c0_47 = arith.constant 0 : index
    %104 = vector.load %arg15[%c136, %c0_47] : memref<360x256xf32, #tpu.memory_space<vmem>>, vector<8x256xf32>
    tpu.vector_store %arg15[%c136, %c0_47], %103 {strides = array<i32>} : memref<360x256xf32, #tpu.memory_space<vmem>>, vector<8x256xf32>,
    %c0_48 = arith.constant 0 : index
    %c0_49 = arith.constant 0 : index
    %105 = vector.load %arg4[%c0_48, %c0_49] : memref<8x144xf32, #tpu.memory_space<vmem>>, vector<8x144xf32>
    %c0_50 = arith.constant 0 : index
    %c0_51 = arith.constant 0 : index
    %106 = vector.load %arg15[%c0_50, %c0_51] : memref<360x256xf32, #tpu.memory_space<vmem>>, vector<144x256xf32>
    %cst_52 = arith.constant dense<0.000000e+00> : vector<8x256xf32>
    %107 = tpu.matmul %105, %106, %cst_52 {dimension_numbers = #tpu.dot_dimension_numbers<[1], [0], [0], [1], [0, 0, 1, 1], [], []>} : vector<8x144xf32>, vector<144x256xf32>, vector<8x256xf32> -> vector<8x256xf32>
    %c0_53 = arith.constant 0 : index
    %c0_54 = arith.constant 0 : index
    %108 = vector.load %arg9[%c0_53, %c0_54] : memref<8x1xf32, #tpu.memory_space<vmem>>, vector<8x1xf32>
    %109 = vector.broadcast %108 : vector<8x1xf32> to vector<8x256xf32>
    %110 = arith.addf %107, %109 : vector<8x256xf32>
    %cst_55 = arith.constant 0.000000e+00 : f32
    %111 = vector.broadcast %cst_55 : f32 to vector<8x256xf32>
    %112 = arith.cmpf ogt, %110, %111 : vector<8x256xf32>
    %cst_56 = arith.constant 2.000000e-01 : f32
    %113 = vector.broadcast %cst_56 : f32 to vector<8x256xf32>
    %114 = arith.mulf %110, %113 : vector<8x256xf32>
    %115 = arith.select %112, %110, %114 : vector<8x256xi1>, vector<8x256xf32>
    %cst_57 = arith.constant 0.000000e+00 : f32
    %116 = vector.broadcast %cst_57 : f32 to vector<8x17xf32>
    %117 = vector.extract_strided_slice %115 {offsets = [0, 0], sizes = [8, 239], strides = [1, 1]} : vector<8x256xf32> to vector<8x239xf32>
    %118 = tpu.concatenate %116, %117 in 1 : vector<8x17xf32>, vector<8x239xf32> -> vector<8x256xf32>
    %119 = vector.broadcast %0 : vector<1x256xf32> to vector<8x256xf32>
    %120 = arith.mulf %118, %119 : vector<8x256xf32>
    %c144 = arith.constant 144 : index
    %c0_58 = arith.constant 0 : index
    %121 = vector.load %arg15[%c144, %c0_58] : memref<360x256xf32, #tpu.memory_space<vmem>>, vector<8x256xf32>
    tpu.vector_store %arg15[%c144, %c0_58], %120 {strides = array<i32>} : memref<360x256xf32, #tpu.memory_space<vmem>>, vector<8x256xf32>,
    %cst_59 = arith.constant 0.000000e+00 : f32
    %122 = vector.broadcast %cst_59 : f32 to vector<8x16xf32>
    %123 = vector.extract_strided_slice %115 {offsets = [0, 0], sizes = [8, 240], strides = [1, 1]} : vector<8x256xf32> to vector<8x240xf32>
    %124 = tpu.concatenate %122, %123 in 1 : vector<8x16xf32>, vector<8x240xf32> -> vector<8x256xf32>
    %c152 = arith.constant 152 : index
    %c0_60 = arith.constant 0 : index
    %125 = vector.load %arg15[%c152, %c0_60] : memref<360x256xf32, #tpu.memory_space<vmem>>, vector<8x256xf32>
    tpu.vector_store %arg15[%c152, %c0_60], %124 {strides = array<i32>} : memref<360x256xf32, #tpu.memory_space<vmem>>, vector<8x256xf32>,
    %cst_61 = arith.constant 0.000000e+00 : f32
    %126 = vector.broadcast %cst_61 : f32 to vector<8x15xf32>
    %127 = vector.extract_strided_slice %115 {offsets = [0, 0], sizes = [8, 241], strides = [1, 1]} : vector<8x256xf32> to vector<8x241xf32>
    %128 = tpu.concatenate %126, %127 in 1 : vector<8x15xf32>, vector<8x241xf32> -> vector<8x256xf32>
    %129 = vector.broadcast %1 : vector<1x256xf32> to vector<8x256xf32>
    %130 = arith.mulf %128, %129 : vector<8x256xf32>
    %c160 = arith.constant 160 : index
    %c0_62 = arith.constant 0 : index
    %131 = vector.load %arg15[%c160, %c0_62] : memref<360x256xf32, #tpu.memory_space<vmem>>, vector<8x256xf32>
    tpu.vector_store %arg15[%c160, %c0_62], %130 {strides = array<i32>} : memref<360x256xf32, #tpu.memory_space<vmem>>, vector<8x256xf32>,
    %cst_63 = arith.constant 0.000000e+00 : f32
    %132 = vector.broadcast %cst_63 : f32 to vector<8x1xf32>
    %133 = vector.extract_strided_slice %115 {offsets = [0, 0], sizes = [8, 255], strides = [1, 1]} : vector<8x256xf32> to vector<8x255xf32>
    %134 = tpu.concatenate %132, %133 in 1 : vector<8x1xf32>, vector<8x255xf32> -> vector<8x256xf32>
    %135 = vector.broadcast %0 : vector<1x256xf32> to vector<8x256xf32>
    %136 = arith.mulf %134, %135 : vector<8x256xf32>
    %c168 = arith.constant 168 : index
    %c0_64 = arith.constant 0 : index
    %137 = vector.load %arg15[%c168, %c0_64] : memref<360x256xf32, #tpu.memory_space<vmem>>, vector<8x256xf32>
    tpu.vector_store %arg15[%c168, %c0_64], %136 {strides = array<i32>} : memref<360x256xf32, #tpu.memory_space<vmem>>, vector<8x256xf32>,
    %c176 = arith.constant 176 : index
    %c0_65 = arith.constant 0 : index
    %138 = vector.load %arg15[%c176, %c0_65] : memref<360x256xf32, #tpu.memory_space<vmem>>, vector<8x256xf32>
    tpu.vector_store %arg15[%c176, %c0_65], %115 {strides = array<i32>} : memref<360x256xf32, #tpu.memory_space<vmem>>, vector<8x256xf32>,
    %cst_66 = arith.constant 0.000000e+00 : f32
    %139 = vector.broadcast %cst_66 : f32 to vector<8x1xf32>
    %140 = vector.extract_strided_slice %115 {offsets = [0, 1], sizes = [8, 255], strides = [1, 1]} : vector<8x256xf32> to vector<8x255xf32>
    %141 = tpu.concatenate %140, %139 in 1 : vector<8x255xf32>, vector<8x1xf32> -> vector<8x256xf32>
    %142 = vector.broadcast %1 : vector<1x256xf32> to vector<8x256xf32>
    %143 = arith.mulf %141, %142 : vector<8x256xf32>
    %c184 = arith.constant 184 : index
    %c0_67 = arith.constant 0 : index
    %144 = vector.load %arg15[%c184, %c0_67] : memref<360x256xf32, #tpu.memory_space<vmem>>, vector<8x256xf32>
    tpu.vector_store %arg15[%c184, %c0_67], %143 {strides = array<i32>} : memref<360x256xf32, #tpu.memory_space<vmem>>, vector<8x256xf32>,
    %cst_68 = arith.constant 0.000000e+00 : f32
    %145 = vector.broadcast %cst_68 : f32 to vector<8x15xf32>
    %146 = vector.extract_strided_slice %115 {offsets = [0, 15], sizes = [8, 241], strides = [1, 1]} : vector<8x256xf32> to vector<8x241xf32>
    %147 = tpu.concatenate %146, %145 in 1 : vector<8x241xf32>, vector<8x15xf32> -> vector<8x256xf32>
    %148 = vector.broadcast %0 : vector<1x256xf32> to vector<8x256xf32>
    %149 = arith.mulf %147, %148 : vector<8x256xf32>
    %c192 = arith.constant 192 : index
    %c0_69 = arith.constant 0 : index
    %150 = vector.load %arg15[%c192, %c0_69] : memref<360x256xf32, #tpu.memory_space<vmem>>, vector<8x256xf32>
    tpu.vector_store %arg15[%c192, %c0_69], %149 {strides = array<i32>} : memref<360x256xf32, #tpu.memory_space<vmem>>, vector<8x256xf32>,
    %cst_70 = arith.constant 0.000000e+00 : f32
    %151 = vector.broadcast %cst_70 : f32 to vector<8x16xf32>
    %152 = vector.extract_strided_slice %115 {offsets = [0, 16], sizes = [8, 240], strides = [1, 1]} : vector<8x256xf32> to vector<8x240xf32>
    %153 = tpu.concatenate %152, %151 in 1 : vector<8x240xf32>, vector<8x16xf32> -> vector<8x256xf32>
    %c200 = arith.constant 200 : index
    %c0_71 = arith.constant 0 : index
    %154 = vector.load %arg15[%c200, %c0_71] : memref<360x256xf32, #tpu.memory_space<vmem>>, vector<8x256xf32>
    tpu.vector_store %arg15[%c200, %c0_71], %153 {strides = array<i32>} : memref<360x256xf32, #tpu.memory_space<vmem>>, vector<8x256xf32>,
    %cst_72 = arith.constant 0.000000e+00 : f32
    %155 = vector.broadcast %cst_72 : f32 to vector<8x17xf32>
    %156 = vector.extract_strided_slice %115 {offsets = [0, 17], sizes = [8, 239], strides = [1, 1]} : vector<8x256xf32> to vector<8x239xf32>
    %157 = tpu.concatenate %156, %155 in 1 : vector<8x239xf32>, vector<8x17xf32> -> vector<8x256xf32>
    %158 = vector.broadcast %1 : vector<1x256xf32> to vector<8x256xf32>
    %159 = arith.mulf %157, %158 : vector<8x256xf32>
    %c208 = arith.constant 208 : index
    %c0_73 = arith.constant 0 : index
    %160 = vector.load %arg15[%c208, %c0_73] : memref<360x256xf32, #tpu.memory_space<vmem>>, vector<8x256xf32>
    tpu.vector_store %arg15[%c208, %c0_73], %159 {strides = array<i32>} : memref<360x256xf32, #tpu.memory_space<vmem>>, vector<8x256xf32>,
    %c0_74 = arith.constant 0 : index
    %c0_75 = arith.constant 0 : index
    %161 = vector.load %arg5[%c0_74, %c0_75] : memref<8x216xf32, #tpu.memory_space<vmem>>, vector<8x216xf32>
    %c0_76 = arith.constant 0 : index
    %c0_77 = arith.constant 0 : index
    %162 = vector.load %arg15[%c0_76, %c0_77] : memref<360x256xf32, #tpu.memory_space<vmem>>, vector<216x256xf32>
    %cst_78 = arith.constant dense<0.000000e+00> : vector<8x256xf32>
    %163 = tpu.matmul %161, %162, %cst_78 {dimension_numbers = #tpu.dot_dimension_numbers<[1], [0], [0], [1], [0, 0, 1, 1], [], []>} : vector<8x216xf32>, vector<216x256xf32>, vector<8x256xf32> -> vector<8x256xf32>
    %c0_79 = arith.constant 0 : index
    %c0_80 = arith.constant 0 : index
    %164 = vector.load %arg10[%c0_79, %c0_80] : memref<8x1xf32, #tpu.memory_space<vmem>>, vector<8x1xf32>
    %165 = vector.broadcast %164 : vector<8x1xf32> to vector<8x256xf32>
    %166 = arith.addf %163, %165 : vector<8x256xf32>
    %cst_81 = arith.constant 0.000000e+00 : f32
    %167 = vector.broadcast %cst_81 : f32 to vector<8x256xf32>
    %168 = arith.cmpf ogt, %166, %167 : vector<8x256xf32>
    %cst_82 = arith.constant 2.000000e-01 : f32
    %169 = vector.broadcast %cst_82 : f32 to vector<8x256xf32>
    %170 = arith.mulf %166, %169 : vector<8x256xf32>
    %171 = arith.select %168, %166, %170 : vector<8x256xi1>, vector<8x256xf32>
    %cst_83 = arith.constant 0.000000e+00 : f32
    %172 = vector.broadcast %cst_83 : f32 to vector<8x17xf32>
    %173 = vector.extract_strided_slice %171 {offsets = [0, 0], sizes = [8, 239], strides = [1, 1]} : vector<8x256xf32> to vector<8x239xf32>
    %174 = tpu.concatenate %172, %173 in 1 : vector<8x17xf32>, vector<8x239xf32> -> vector<8x256xf32>
    %175 = vector.broadcast %0 : vector<1x256xf32> to vector<8x256xf32>
    %176 = arith.mulf %174, %175 : vector<8x256xf32>
    %c216 = arith.constant 216 : index
    %c0_84 = arith.constant 0 : index
    %177 = vector.load %arg15[%c216, %c0_84] : memref<360x256xf32, #tpu.memory_space<vmem>>, vector<8x256xf32>
    tpu.vector_store %arg15[%c216, %c0_84], %176 {strides = array<i32>} : memref<360x256xf32, #tpu.memory_space<vmem>>, vector<8x256xf32>,
    %cst_85 = arith.constant 0.000000e+00 : f32
    %178 = vector.broadcast %cst_85 : f32 to vector<8x16xf32>
    %179 = vector.extract_strided_slice %171 {offsets = [0, 0], sizes = [8, 240], strides = [1, 1]} : vector<8x256xf32> to vector<8x240xf32>
    %180 = tpu.concatenate %178, %179 in 1 : vector<8x16xf32>, vector<8x240xf32> -> vector<8x256xf32>
    %c224 = arith.constant 224 : index
    %c0_86 = arith.constant 0 : index
    %181 = vector.load %arg15[%c224, %c0_86] : memref<360x256xf32, #tpu.memory_space<vmem>>, vector<8x256xf32>
    tpu.vector_store %arg15[%c224, %c0_86], %180 {strides = array<i32>} : memref<360x256xf32, #tpu.memory_space<vmem>>, vector<8x256xf32>,
    %cst_87 = arith.constant 0.000000e+00 : f32
    %182 = vector.broadcast %cst_87 : f32 to vector<8x15xf32>
    %183 = vector.extract_strided_slice %171 {offsets = [0, 0], sizes = [8, 241], strides = [1, 1]} : vector<8x256xf32> to vector<8x241xf32>
    %184 = tpu.concatenate %182, %183 in 1 : vector<8x15xf32>, vector<8x241xf32> -> vector<8x256xf32>
    %185 = vector.broadcast %1 : vector<1x256xf32> to vector<8x256xf32>
    %186 = arith.mulf %184, %185 : vector<8x256xf32>
    %c232 = arith.constant 232 : index
    %c0_88 = arith.constant 0 : index
    %187 = vector.load %arg15[%c232, %c0_88] : memref<360x256xf32, #tpu.memory_space<vmem>>, vector<8x256xf32>
    tpu.vector_store %arg15[%c232, %c0_88], %186 {strides = array<i32>} : memref<360x256xf32, #tpu.memory_space<vmem>>, vector<8x256xf32>,
    %cst_89 = arith.constant 0.000000e+00 : f32
    %188 = vector.broadcast %cst_89 : f32 to vector<8x1xf32>
    %189 = vector.extract_strided_slice %171 {offsets = [0, 0], sizes = [8, 255], strides = [1, 1]} : vector<8x256xf32> to vector<8x255xf32>
    %190 = tpu.concatenate %188, %189 in 1 : vector<8x1xf32>, vector<8x255xf32> -> vector<8x256xf32>
    %191 = vector.broadcast %0 : vector<1x256xf32> to vector<8x256xf32>
    %192 = arith.mulf %190, %191 : vector<8x256xf32>
    %c240 = arith.constant 240 : index
    %c0_90 = arith.constant 0 : index
    %193 = vector.load %arg15[%c240, %c0_90] : memref<360x256xf32, #tpu.memory_space<vmem>>, vector<8x256xf32>
    tpu.vector_store %arg15[%c240, %c0_90], %192 {strides = array<i32>} : memref<360x256xf32, #tpu.memory_space<vmem>>, vector<8x256xf32>,
    %c248 = arith.constant 248 : index
    %c0_91 = arith.constant 0 : index
    %194 = vector.load %arg15[%c248, %c0_91] : memref<360x256xf32, #tpu.memory_space<vmem>>, vector<8x256xf32>
    tpu.vector_store %arg15[%c248, %c0_91], %171 {strides = array<i32>} : memref<360x256xf32, #tpu.memory_space<vmem>>, vector<8x256xf32>,
    %cst_92 = arith.constant 0.000000e+00 : f32
    %195 = vector.broadcast %cst_92 : f32 to vector<8x1xf32>
    %196 = vector.extract_strided_slice %171 {offsets = [0, 1], sizes = [8, 255], strides = [1, 1]} : vector<8x256xf32> to vector<8x255xf32>
    %197 = tpu.concatenate %196, %195 in 1 : vector<8x255xf32>, vector<8x1xf32> -> vector<8x256xf32>
    %198 = vector.broadcast %1 : vector<1x256xf32> to vector<8x256xf32>
    %199 = arith.mulf %197, %198 : vector<8x256xf32>
    %c256 = arith.constant 256 : index
    %c0_93 = arith.constant 0 : index
    %200 = vector.load %arg15[%c256, %c0_93] : memref<360x256xf32, #tpu.memory_space<vmem>>, vector<8x256xf32>
    tpu.vector_store %arg15[%c256, %c0_93], %199 {strides = array<i32>} : memref<360x256xf32, #tpu.memory_space<vmem>>, vector<8x256xf32>,
    %cst_94 = arith.constant 0.000000e+00 : f32
    %201 = vector.broadcast %cst_94 : f32 to vector<8x15xf32>
    %202 = vector.extract_strided_slice %171 {offsets = [0, 15], sizes = [8, 241], strides = [1, 1]} : vector<8x256xf32> to vector<8x241xf32>
    %203 = tpu.concatenate %202, %201 in 1 : vector<8x241xf32>, vector<8x15xf32> -> vector<8x256xf32>
    %204 = vector.broadcast %0 : vector<1x256xf32> to vector<8x256xf32>
    %205 = arith.mulf %203, %204 : vector<8x256xf32>
    %c264 = arith.constant 264 : index
    %c0_95 = arith.constant 0 : index
    %206 = vector.load %arg15[%c264, %c0_95] : memref<360x256xf32, #tpu.memory_space<vmem>>, vector<8x256xf32>
    tpu.vector_store %arg15[%c264, %c0_95], %205 {strides = array<i32>} : memref<360x256xf32, #tpu.memory_space<vmem>>, vector<8x256xf32>,
    %cst_96 = arith.constant 0.000000e+00 : f32
    %207 = vector.broadcast %cst_96 : f32 to vector<8x16xf32>
    %208 = vector.extract_strided_slice %171 {offsets = [0, 16], sizes = [8, 240], strides = [1, 1]} : vector<8x256xf32> to vector<8x240xf32>
    %209 = tpu.concatenate %208, %207 in 1 : vector<8x240xf32>, vector<8x16xf32> -> vector<8x256xf32>
    %c272 = arith.constant 272 : index
    %c0_97 = arith.constant 0 : index
    %210 = vector.load %arg15[%c272, %c0_97] : memref<360x256xf32, #tpu.memory_space<vmem>>, vector<8x256xf32>
    tpu.vector_store %arg15[%c272, %c0_97], %209 {strides = array<i32>} : memref<360x256xf32, #tpu.memory_space<vmem>>, vector<8x256xf32>,
    %cst_98 = arith.constant 0.000000e+00 : f32
    %211 = vector.broadcast %cst_98 : f32 to vector<8x17xf32>
    %212 = vector.extract_strided_slice %171 {offsets = [0, 17], sizes = [8, 239], strides = [1, 1]} : vector<8x256xf32> to vector<8x239xf32>
    %213 = tpu.concatenate %212, %211 in 1 : vector<8x239xf32>, vector<8x17xf32> -> vector<8x256xf32>
    %214 = vector.broadcast %1 : vector<1x256xf32> to vector<8x256xf32>
    %215 = arith.mulf %213, %214 : vector<8x256xf32>
    %c280 = arith.constant 280 : index
    %c0_99 = arith.constant 0 : index
    %216 = vector.load %arg15[%c280, %c0_99] : memref<360x256xf32, #tpu.memory_space<vmem>>, vector<8x256xf32>
    tpu.vector_store %arg15[%c280, %c0_99], %215 {strides = array<i32>} : memref<360x256xf32, #tpu.memory_space<vmem>>, vector<8x256xf32>,
    %c0_100 = arith.constant 0 : index
    %c0_101 = arith.constant 0 : index
    %217 = vector.load %arg6[%c0_100, %c0_101] : memref<8x288xf32, #tpu.memory_space<vmem>>, vector<8x288xf32>
    %c0_102 = arith.constant 0 : index
    %c0_103 = arith.constant 0 : index
    %218 = vector.load %arg15[%c0_102, %c0_103] : memref<360x256xf32, #tpu.memory_space<vmem>>, vector<288x256xf32>
    %cst_104 = arith.constant dense<0.000000e+00> : vector<8x256xf32>
    %219 = tpu.matmul %217, %218, %cst_104 {dimension_numbers = #tpu.dot_dimension_numbers<[1], [0], [0], [1], [0, 0, 1, 1], [], []>} : vector<8x288xf32>, vector<288x256xf32>, vector<8x256xf32> -> vector<8x256xf32>
    %c0_105 = arith.constant 0 : index
    %c0_106 = arith.constant 0 : index
    %220 = vector.load %arg11[%c0_105, %c0_106] : memref<8x1xf32, #tpu.memory_space<vmem>>, vector<8x1xf32>
    %221 = vector.broadcast %220 : vector<8x1xf32> to vector<8x256xf32>
    %222 = arith.addf %219, %221 : vector<8x256xf32>
    %cst_107 = arith.constant 0.000000e+00 : f32
    %223 = vector.broadcast %cst_107 : f32 to vector<8x256xf32>
    %224 = arith.cmpf ogt, %222, %223 : vector<8x256xf32>
    %cst_108 = arith.constant 2.000000e-01 : f32
    %225 = vector.broadcast %cst_108 : f32 to vector<8x256xf32>
    %226 = arith.mulf %222, %225 : vector<8x256xf32>
    %227 = arith.select %224, %222, %226 : vector<8x256xi1>, vector<8x256xf32>
    %cst_109 = arith.constant 0.000000e+00 : f32
    %228 = vector.broadcast %cst_109 : f32 to vector<8x17xf32>
    %229 = vector.extract_strided_slice %227 {offsets = [0, 0], sizes = [8, 239], strides = [1, 1]} : vector<8x256xf32> to vector<8x239xf32>
    %230 = tpu.concatenate %228, %229 in 1 : vector<8x17xf32>, vector<8x239xf32> -> vector<8x256xf32>
    %231 = vector.broadcast %0 : vector<1x256xf32> to vector<8x256xf32>
    %232 = arith.mulf %230, %231 : vector<8x256xf32>
    %c288 = arith.constant 288 : index
    %c0_110 = arith.constant 0 : index
    %233 = vector.load %arg15[%c288, %c0_110] : memref<360x256xf32, #tpu.memory_space<vmem>>, vector<8x256xf32>
    tpu.vector_store %arg15[%c288, %c0_110], %232 {strides = array<i32>} : memref<360x256xf32, #tpu.memory_space<vmem>>, vector<8x256xf32>,
    %cst_111 = arith.constant 0.000000e+00 : f32
    %234 = vector.broadcast %cst_111 : f32 to vector<8x16xf32>
    %235 = vector.extract_strided_slice %227 {offsets = [0, 0], sizes = [8, 240], strides = [1, 1]} : vector<8x256xf32> to vector<8x240xf32>
    %236 = tpu.concatenate %234, %235 in 1 : vector<8x16xf32>, vector<8x240xf32> -> vector<8x256xf32>
    %c296 = arith.constant 296 : index
    %c0_112 = arith.constant 0 : index
    %237 = vector.load %arg15[%c296, %c0_112] : memref<360x256xf32, #tpu.memory_space<vmem>>, vector<8x256xf32>
    tpu.vector_store %arg15[%c296, %c0_112], %236 {strides = array<i32>} : memref<360x256xf32, #tpu.memory_space<vmem>>, vector<8x256xf32>,
    %cst_113 = arith.constant 0.000000e+00 : f32
    %238 = vector.broadcast %cst_113 : f32 to vector<8x15xf32>
    %239 = vector.extract_strided_slice %227 {offsets = [0, 0], sizes = [8, 241], strides = [1, 1]} : vector<8x256xf32> to vector<8x241xf32>
    %240 = tpu.concatenate %238, %239 in 1 : vector<8x15xf32>, vector<8x241xf32> -> vector<8x256xf32>
    %241 = vector.broadcast %1 : vector<1x256xf32> to vector<8x256xf32>
    %242 = arith.mulf %240, %241 : vector<8x256xf32>
    %c304 = arith.constant 304 : index
    %c0_114 = arith.constant 0 : index
    %243 = vector.load %arg15[%c304, %c0_114] : memref<360x256xf32, #tpu.memory_space<vmem>>, vector<8x256xf32>
    tpu.vector_store %arg15[%c304, %c0_114], %242 {strides = array<i32>} : memref<360x256xf32, #tpu.memory_space<vmem>>, vector<8x256xf32>,
    %cst_115 = arith.constant 0.000000e+00 : f32
    %244 = vector.broadcast %cst_115 : f32 to vector<8x1xf32>
    %245 = vector.extract_strided_slice %227 {offsets = [0, 0], sizes = [8, 255], strides = [1, 1]} : vector<8x256xf32> to vector<8x255xf32>
    %246 = tpu.concatenate %244, %245 in 1 : vector<8x1xf32>, vector<8x255xf32> -> vector<8x256xf32>
    %247 = vector.broadcast %0 : vector<1x256xf32> to vector<8x256xf32>
    %248 = arith.mulf %246, %247 : vector<8x256xf32>
    %c312 = arith.constant 312 : index
    %c0_116 = arith.constant 0 : index
    %249 = vector.load %arg15[%c312, %c0_116] : memref<360x256xf32, #tpu.memory_space<vmem>>, vector<8x256xf32>
    tpu.vector_store %arg15[%c312, %c0_116], %248 {strides = array<i32>} : memref<360x256xf32, #tpu.memory_space<vmem>>, vector<8x256xf32>,
    %c320 = arith.constant 320 : index
    %c0_117 = arith.constant 0 : index
    %250 = vector.load %arg15[%c320, %c0_117] : memref<360x256xf32, #tpu.memory_space<vmem>>, vector<8x256xf32>
    tpu.vector_store %arg15[%c320, %c0_117], %227 {strides = array<i32>} : memref<360x256xf32, #tpu.memory_space<vmem>>, vector<8x256xf32>,
    %cst_118 = arith.constant 0.000000e+00 : f32
    %251 = vector.broadcast %cst_118 : f32 to vector<8x1xf32>
    %252 = vector.extract_strided_slice %227 {offsets = [0, 1], sizes = [8, 255], strides = [1, 1]} : vector<8x256xf32> to vector<8x255xf32>
    %253 = tpu.concatenate %252, %251 in 1 : vector<8x255xf32>, vector<8x1xf32> -> vector<8x256xf32>
    %254 = vector.broadcast %1 : vector<1x256xf32> to vector<8x256xf32>
    %255 = arith.mulf %253, %254 : vector<8x256xf32>
    %c328 = arith.constant 328 : index
    %c0_119 = arith.constant 0 : index
    %256 = vector.load %arg15[%c328, %c0_119] : memref<360x256xf32, #tpu.memory_space<vmem>>, vector<8x256xf32>
    tpu.vector_store %arg15[%c328, %c0_119], %255 {strides = array<i32>} : memref<360x256xf32, #tpu.memory_space<vmem>>, vector<8x256xf32>,
    %cst_120 = arith.constant 0.000000e+00 : f32
    %257 = vector.broadcast %cst_120 : f32 to vector<8x15xf32>
    %258 = vector.extract_strided_slice %227 {offsets = [0, 15], sizes = [8, 241], strides = [1, 1]} : vector<8x256xf32> to vector<8x241xf32>
    %259 = tpu.concatenate %258, %257 in 1 : vector<8x241xf32>, vector<8x15xf32> -> vector<8x256xf32>
    %260 = vector.broadcast %0 : vector<1x256xf32> to vector<8x256xf32>
    %261 = arith.mulf %259, %260 : vector<8x256xf32>
    %c336 = arith.constant 336 : index
    %c0_121 = arith.constant 0 : index
    %262 = vector.load %arg15[%c336, %c0_121] : memref<360x256xf32, #tpu.memory_space<vmem>>, vector<8x256xf32>
    tpu.vector_store %arg15[%c336, %c0_121], %261 {strides = array<i32>} : memref<360x256xf32, #tpu.memory_space<vmem>>, vector<8x256xf32>,
    %cst_122 = arith.constant 0.000000e+00 : f32
    %263 = vector.broadcast %cst_122 : f32 to vector<8x16xf32>
    %264 = vector.extract_strided_slice %227 {offsets = [0, 16], sizes = [8, 240], strides = [1, 1]} : vector<8x256xf32> to vector<8x240xf32>
    %265 = tpu.concatenate %264, %263 in 1 : vector<8x240xf32>, vector<8x16xf32> -> vector<8x256xf32>
    %c344 = arith.constant 344 : index
    %c0_123 = arith.constant 0 : index
    %266 = vector.load %arg15[%c344, %c0_123] : memref<360x256xf32, #tpu.memory_space<vmem>>, vector<8x256xf32>
    tpu.vector_store %arg15[%c344, %c0_123], %265 {strides = array<i32>} : memref<360x256xf32, #tpu.memory_space<vmem>>, vector<8x256xf32>,
    %cst_124 = arith.constant 0.000000e+00 : f32
    %267 = vector.broadcast %cst_124 : f32 to vector<8x17xf32>
    %268 = vector.extract_strided_slice %227 {offsets = [0, 17], sizes = [8, 239], strides = [1, 1]} : vector<8x256xf32> to vector<8x239xf32>
    %269 = tpu.concatenate %268, %267 in 1 : vector<8x239xf32>, vector<8x17xf32> -> vector<8x256xf32>
    %270 = vector.broadcast %1 : vector<1x256xf32> to vector<8x256xf32>
    %271 = arith.mulf %269, %270 : vector<8x256xf32>
    %c352 = arith.constant 352 : index
    %c0_125 = arith.constant 0 : index
    %272 = vector.load %arg15[%c352, %c0_125] : memref<360x256xf32, #tpu.memory_space<vmem>>, vector<8x256xf32>
    tpu.vector_store %arg15[%c352, %c0_125], %271 {strides = array<i32>} : memref<360x256xf32, #tpu.memory_space<vmem>>, vector<8x256xf32>,
    %c0_126 = arith.constant 0 : index
    %c0_127 = arith.constant 0 : index
    %273 = vector.load %arg7[%c0_126, %c0_127] : memref<8x360xf32, #tpu.memory_space<vmem>>, vector<8x360xf32>
    %c0_128 = arith.constant 0 : index
    %c0_129 = arith.constant 0 : index
    %274 = vector.load %arg15[%c0_128, %c0_129] : memref<360x256xf32, #tpu.memory_space<vmem>>, vector<360x256xf32>
    %cst_130 = arith.constant dense<0.000000e+00> : vector<8x256xf32>
    %275 = tpu.matmul %273, %274, %cst_130 {dimension_numbers = #tpu.dot_dimension_numbers<[1], [0], [0], [1], [0, 0, 1, 1], [], []>} : vector<8x360xf32>, vector<360x256xf32>, vector<8x256xf32> -> vector<8x256xf32>
    %c0_131 = arith.constant 0 : index
    %c0_132 = arith.constant 0 : index
    %276 = vector.load %arg12[%c0_131, %c0_132] : memref<8x1xf32, #tpu.memory_space<vmem>>, vector<8x1xf32>
    %277 = vector.broadcast %276 : vector<8x1xf32> to vector<8x256xf32>
    %278 = arith.addf %275, %277 : vector<8x256xf32>
    %cst_133 = arith.constant 4.000000e-02 : f32
    %279 = vector.broadcast %cst_133 : f32 to vector<8x256xf32>
    %280 = arith.mulf %278, %279 : vector<8x256xf32>
    %cst_134 = arith.constant 2.000000e-01 : f32
    %281 = vector.broadcast %cst_134 : f32 to vector<8x256xf32>
    %282 = arith.mulf %3, %281 : vector<8x256xf32>
    %283 = arith.addf %280, %282 : vector<8x256xf32>
    %c0_135 = arith.constant 0 : index
    %c0_136 = arith.constant 0 : index
    %c0_137 = arith.constant 0 : index
    %284 = vector.load %arg13[%c0_135, %c0_136, %c0_137] : memref<1x8x256xf32, #tpu.memory_space<vmem>>, vector<1x8x256xf32>
    %285 = vector.shape_cast %284 : vector<1x8x256xf32> to vector<8x256xf32>
    %286 = arith.addf %283, %285 : vector<8x256xf32>
    %c0_138 = arith.constant 0 : index
    %c0_139 = arith.constant 0 : index
    %c0_140 = arith.constant 0 : index
    %287 = vector.load %arg14[%c0_138, %c0_139, %c0_140] : memref<1x8x256xf32, #tpu.memory_space<vmem>>, vector<1x8x256xf32>
    %288 = vector.shape_cast %287 : vector<1x8x256xf32> to vector<8x256xf32>
    %289 = vector.shape_cast %286 : vector<8x256xf32> to vector<1x8x256xf32>
    tpu.vector_store %arg14[%c0_138, %c0_139, %c0_140], %289 {strides = array<i32>} : memref<1x8x256xf32, #tpu.memory_space<vmem>>, vector<1x8x256xf32>,
    return
  }
  func.func @transform_0(%arg0: i32) -> (i32, i32, i32) {
    %c0_i32 = arith.constant 0 : i32
    %c0_i32_0 = arith.constant 0 : i32
    %c0_i32_1 = arith.constant 0 : i32
    return %arg0, %c0_i32, %c0_i32_0 : i32, i32, i32
  }
  func.func @transform_1(%arg0: i32) -> (i32, i32) {
    %c0_i32 = arith.constant 0 : i32
    %c0_i32_0 = arith.constant 0 : i32
    %c0_i32_1 = arith.constant 0 : i32
    return %c0_i32, %c0_i32_0 : i32, i32
  }
  func.func @transform_2(%arg0: i32) -> (i32, i32) {
    %c0_i32 = arith.constant 0 : i32
    %c0_i32_0 = arith.constant 0 : i32
    %c0_i32_1 = arith.constant 0 : i32
    return %c0_i32, %c0_i32_0 : i32, i32
  }
  func.func @transform_3(%arg0: i32) -> (i32, i32) {
    %c0_i32 = arith.constant 0 : i32
    %c0_i32_0 = arith.constant 0 : i32
    %c0_i32_1 = arith.constant 0 : i32
    return %c0_i32, %c0_i32_0 : i32, i32
  }
  func.func @transform_4(%arg0: i32) -> (i32, i32) {
    %c0_i32 = arith.constant 0 : i32
    %c0_i32_0 = arith.constant 0 : i32
    %c0_i32_1 = arith.constant 0 : i32
    return %c0_i32, %c0_i32_0 : i32, i32
  }
  func.func @transform_5(%arg0: i32) -> (i32, i32) {
    %c0_i32 = arith.constant 0 : i32
    %c0_i32_0 = arith.constant 0 : i32
    %c0_i32_1 = arith.constant 0 : i32
    return %c0_i32, %c0_i32_0 : i32, i32
  }
  func.func @transform_6(%arg0: i32) -> (i32, i32) {
    %c0_i32 = arith.constant 0 : i32
    %c0_i32_0 = arith.constant 0 : i32
    %c0_i32_1 = arith.constant 0 : i32
    return %c0_i32, %c0_i32_0 : i32, i32
  }
  func.func @transform_7(%arg0: i32) -> (i32, i32) {
    %c0_i32 = arith.constant 0 : i32
    %c0_i32_0 = arith.constant 0 : i32
    %c0_i32_1 = arith.constant 0 : i32
    return %c0_i32, %c0_i32_0 : i32, i32
  }
  func.func @transform_8(%arg0: i32) -> (i32, i32) {
    %c0_i32 = arith.constant 0 : i32
    %c0_i32_0 = arith.constant 0 : i32
    %c0_i32_1 = arith.constant 0 : i32
    return %c0_i32, %c0_i32_0 : i32, i32
  }
  func.func @transform_9(%arg0: i32) -> (i32, i32) {
    %c0_i32 = arith.constant 0 : i32
    %c0_i32_0 = arith.constant 0 : i32
    %c0_i32_1 = arith.constant 0 : i32
    return %c0_i32, %c0_i32_0 : i32, i32
  }
  func.func @transform_10(%arg0: i32) -> (i32, i32) {
    %c0_i32 = arith.constant 0 : i32
    %c0_i32_0 = arith.constant 0 : i32
    %c0_i32_1 = arith.constant 0 : i32
    return %c0_i32, %c0_i32_0 : i32, i32
  }
  func.func @transform_11(%arg0: i32) -> (i32, i32) {
    %c0_i32 = arith.constant 0 : i32
    %c0_i32_0 = arith.constant 0 : i32
    %c0_i32_1 = arith.constant 0 : i32
    return %c0_i32, %c0_i32_0 : i32, i32
  }
  func.func @transform_12(%arg0: i32) -> (i32, i32, i32) {
    %c0_i32 = arith.constant 0 : i32
    %c0_i32_0 = arith.constant 0 : i32
    %c0_i32_1 = arith.constant 0 : i32
    return %arg0, %c0_i32, %c0_i32_0 : i32, i32, i32
  }
  func.func @transform_13(%arg0: i32) -> (i32, i32, i32) {
    %c0_i32 = arith.constant 0 : i32
    %c0_i32_0 = arith.constant 0 : i32
    %c0_i32_1 = arith.constant 0 : i32
    return %arg0, %c0_i32, %c0_i32_0 : i32, i32, i32
  }
}

module attributes {stable_mosaic.version = 11 : i64} {
  func.func @_conv_kernel(%arg0: i32, %arg1: memref<1x4x256xf32, #tpu.memory_space<vmem>>, %arg2: memref<2x256xf32, #tpu.memory_space<vmem>>, %arg3: memref<8x36xf32, #tpu.memory_space<vmem>>, %arg4: memref<8x1xf32, #tpu.memory_space<vmem>>, %arg5: memref<1x8x256xf32, #tpu.memory_space<vmem>>, %arg6: memref<36x256xf32, #tpu.memory_space<vmem>>) attributes {dimension_semantics = [#tpu.dimension_semantics<parallel>], iteration_bounds = array<i64: 2>, scalar_prefetch = 0 : i64, scratch_operands = 1 : i64, tpu.core_type = #tpu.core_type<tc>, window_params = [{transform_indices = @transform_0, window_bounds = array<i64: 1, 4, 256>}, {pipeline_mode = #tpu.pipeline_mode<synchronous>, transform_indices = @transform_1, window_bounds = array<i64: 2, 256>}, {pipeline_mode = #tpu.pipeline_mode<synchronous>, transform_indices = @transform_2, window_bounds = array<i64: 8, 36>}, {pipeline_mode = #tpu.pipeline_mode<synchronous>, transform_indices = @transform_3, window_bounds = array<i64: 8, 1>}, {transform_indices = @transform_4, window_bounds = array<i64: 1, 8, 256>}]} {
    %c0 = arith.constant 0 : index
    %c0_0 = arith.constant 0 : index
    %0 = vector.load %arg2[%c0, %c0_0] : memref<2x256xf32, #tpu.memory_space<vmem>>, vector<1x256xf32>
    %c1 = arith.constant 1 : index
    %c0_1 = arith.constant 0 : index
    %1 = vector.load %arg2[%c1, %c0_1] : memref<2x256xf32, #tpu.memory_space<vmem>>, vector<1x256xf32>
    %c0_2 = arith.constant 0 : index
    %c0_3 = arith.constant 0 : index
    %c0_4 = arith.constant 0 : index
    %2 = vector.load %arg1[%c0_2, %c0_3, %c0_4] : memref<1x4x256xf32, #tpu.memory_space<vmem>>, vector<1x4x256xf32>
    %3 = vector.shape_cast %2 : vector<1x4x256xf32> to vector<4x256xf32>
    %cst = arith.constant 0.000000e+00 : f32
    %4 = vector.broadcast %cst : f32 to vector<4x17xf32>
    %5 = vector.extract_strided_slice %3 {offsets = [0, 0], sizes = [4, 239], strides = [1, 1]} : vector<4x256xf32> to vector<4x239xf32>
    %6 = tpu.concatenate %4, %5 in 1 : vector<4x17xf32>, vector<4x239xf32> -> vector<4x256xf32>
    %7 = vector.broadcast %0 : vector<1x256xf32> to vector<4x256xf32>
    %8 = arith.mulf %6, %7 : vector<4x256xf32>
    %c0_5 = arith.constant 0 : index
    %c0_6 = arith.constant 0 : index
    %9 = vector.load %arg6[%c0_5, %c0_6] : memref<36x256xf32, #tpu.memory_space<vmem>>, vector<4x256xf32>
    tpu.vector_store %arg6[%c0_5, %c0_6], %8 {strides = array<i32>} : memref<36x256xf32, #tpu.memory_space<vmem>>, vector<4x256xf32>,
    %cst_7 = arith.constant 0.000000e+00 : f32
    %10 = vector.broadcast %cst_7 : f32 to vector<4x16xf32>
    %11 = vector.extract_strided_slice %3 {offsets = [0, 0], sizes = [4, 240], strides = [1, 1]} : vector<4x256xf32> to vector<4x240xf32>
    %12 = tpu.concatenate %10, %11 in 1 : vector<4x16xf32>, vector<4x240xf32> -> vector<4x256xf32>
    %c4 = arith.constant 4 : index
    %c0_8 = arith.constant 0 : index
    %13 = vector.load %arg6[%c4, %c0_8] : memref<36x256xf32, #tpu.memory_space<vmem>>, vector<4x256xf32>
    tpu.vector_store %arg6[%c4, %c0_8], %12 {strides = array<i32>} : memref<36x256xf32, #tpu.memory_space<vmem>>, vector<4x256xf32>,
    %cst_9 = arith.constant 0.000000e+00 : f32
    %14 = vector.broadcast %cst_9 : f32 to vector<4x15xf32>
    %15 = vector.extract_strided_slice %3 {offsets = [0, 0], sizes = [4, 241], strides = [1, 1]} : vector<4x256xf32> to vector<4x241xf32>
    %16 = tpu.concatenate %14, %15 in 1 : vector<4x15xf32>, vector<4x241xf32> -> vector<4x256xf32>
    %17 = vector.broadcast %1 : vector<1x256xf32> to vector<4x256xf32>
    %18 = arith.mulf %16, %17 : vector<4x256xf32>
    %c8 = arith.constant 8 : index
    %c0_10 = arith.constant 0 : index
    %19 = vector.load %arg6[%c8, %c0_10] : memref<36x256xf32, #tpu.memory_space<vmem>>, vector<4x256xf32>
    tpu.vector_store %arg6[%c8, %c0_10], %18 {strides = array<i32>} : memref<36x256xf32, #tpu.memory_space<vmem>>, vector<4x256xf32>,
    %cst_11 = arith.constant 0.000000e+00 : f32
    %20 = vector.broadcast %cst_11 : f32 to vector<4x1xf32>
    %21 = vector.extract_strided_slice %3 {offsets = [0, 0], sizes = [4, 255], strides = [1, 1]} : vector<4x256xf32> to vector<4x255xf32>
    %22 = tpu.concatenate %20, %21 in 1 : vector<4x1xf32>, vector<4x255xf32> -> vector<4x256xf32>
    %23 = vector.broadcast %0 : vector<1x256xf32> to vector<4x256xf32>
    %24 = arith.mulf %22, %23 : vector<4x256xf32>
    %c12 = arith.constant 12 : index
    %c0_12 = arith.constant 0 : index
    %25 = vector.load %arg6[%c12, %c0_12] : memref<36x256xf32, #tpu.memory_space<vmem>>, vector<4x256xf32>
    tpu.vector_store %arg6[%c12, %c0_12], %24 {strides = array<i32>} : memref<36x256xf32, #tpu.memory_space<vmem>>, vector<4x256xf32>,
    %c16 = arith.constant 16 : index
    %c0_13 = arith.constant 0 : index
    %26 = vector.load %arg6[%c16, %c0_13] : memref<36x256xf32, #tpu.memory_space<vmem>>, vector<4x256xf32>
    tpu.vector_store %arg6[%c16, %c0_13], %3 {strides = array<i32>} : memref<36x256xf32, #tpu.memory_space<vmem>>, vector<4x256xf32>,
    %cst_14 = arith.constant 0.000000e+00 : f32
    %27 = vector.broadcast %cst_14 : f32 to vector<4x1xf32>
    %28 = vector.extract_strided_slice %3 {offsets = [0, 1], sizes = [4, 255], strides = [1, 1]} : vector<4x256xf32> to vector<4x255xf32>
    %29 = tpu.concatenate %28, %27 in 1 : vector<4x255xf32>, vector<4x1xf32> -> vector<4x256xf32>
    %30 = vector.broadcast %1 : vector<1x256xf32> to vector<4x256xf32>
    %31 = arith.mulf %29, %30 : vector<4x256xf32>
    %c20 = arith.constant 20 : index
    %c0_15 = arith.constant 0 : index
    %32 = vector.load %arg6[%c20, %c0_15] : memref<36x256xf32, #tpu.memory_space<vmem>>, vector<4x256xf32>
    tpu.vector_store %arg6[%c20, %c0_15], %31 {strides = array<i32>} : memref<36x256xf32, #tpu.memory_space<vmem>>, vector<4x256xf32>,
    %cst_16 = arith.constant 0.000000e+00 : f32
    %33 = vector.broadcast %cst_16 : f32 to vector<4x15xf32>
    %34 = vector.extract_strided_slice %3 {offsets = [0, 15], sizes = [4, 241], strides = [1, 1]} : vector<4x256xf32> to vector<4x241xf32>
    %35 = tpu.concatenate %34, %33 in 1 : vector<4x241xf32>, vector<4x15xf32> -> vector<4x256xf32>
    %36 = vector.broadcast %0 : vector<1x256xf32> to vector<4x256xf32>
    %37 = arith.mulf %35, %36 : vector<4x256xf32>
    %c24 = arith.constant 24 : index
    %c0_17 = arith.constant 0 : index
    %38 = vector.load %arg6[%c24, %c0_17] : memref<36x256xf32, #tpu.memory_space<vmem>>, vector<4x256xf32>
    tpu.vector_store %arg6[%c24, %c0_17], %37 {strides = array<i32>} : memref<36x256xf32, #tpu.memory_space<vmem>>, vector<4x256xf32>,
    %cst_18 = arith.constant 0.000000e+00 : f32
    %39 = vector.broadcast %cst_18 : f32 to vector<4x16xf32>
    %40 = vector.extract_strided_slice %3 {offsets = [0, 16], sizes = [4, 240], strides = [1, 1]} : vector<4x256xf32> to vector<4x240xf32>
    %41 = tpu.concatenate %40, %39 in 1 : vector<4x240xf32>, vector<4x16xf32> -> vector<4x256xf32>
    %c28 = arith.constant 28 : index
    %c0_19 = arith.constant 0 : index
    %42 = vector.load %arg6[%c28, %c0_19] : memref<36x256xf32, #tpu.memory_space<vmem>>, vector<4x256xf32>
    tpu.vector_store %arg6[%c28, %c0_19], %41 {strides = array<i32>} : memref<36x256xf32, #tpu.memory_space<vmem>>, vector<4x256xf32>,
    %cst_20 = arith.constant 0.000000e+00 : f32
    %43 = vector.broadcast %cst_20 : f32 to vector<4x17xf32>
    %44 = vector.extract_strided_slice %3 {offsets = [0, 17], sizes = [4, 239], strides = [1, 1]} : vector<4x256xf32> to vector<4x239xf32>
    %45 = tpu.concatenate %44, %43 in 1 : vector<4x239xf32>, vector<4x17xf32> -> vector<4x256xf32>
    %46 = vector.broadcast %1 : vector<1x256xf32> to vector<4x256xf32>
    %47 = arith.mulf %45, %46 : vector<4x256xf32>
    %c32 = arith.constant 32 : index
    %c0_21 = arith.constant 0 : index
    %48 = vector.load %arg6[%c32, %c0_21] : memref<36x256xf32, #tpu.memory_space<vmem>>, vector<4x256xf32>
    tpu.vector_store %arg6[%c32, %c0_21], %47 {strides = array<i32>} : memref<36x256xf32, #tpu.memory_space<vmem>>, vector<4x256xf32>,
    %c0_22 = arith.constant 0 : index
    %c0_23 = arith.constant 0 : index
    %49 = vector.load %arg3[%c0_22, %c0_23] : memref<8x36xf32, #tpu.memory_space<vmem>>, vector<8x36xf32>
    %c0_24 = arith.constant 0 : index
    %c0_25 = arith.constant 0 : index
    %50 = vector.load %arg6[%c0_24, %c0_25] : memref<36x256xf32, #tpu.memory_space<vmem>>, vector<36x256xf32>
    %cst_26 = arith.constant dense<0.000000e+00> : vector<8x256xf32>
    %51 = tpu.matmul %49, %50, %cst_26 {dimension_numbers = #tpu.dot_dimension_numbers<[1], [0], [0], [1], [0, 0, 1, 1], [], []>} : vector<8x36xf32>, vector<36x256xf32>, vector<8x256xf32> -> vector<8x256xf32>
    %c0_27 = arith.constant 0 : index
    %c0_28 = arith.constant 0 : index
    %52 = vector.load %arg4[%c0_27, %c0_28] : memref<8x1xf32, #tpu.memory_space<vmem>>, vector<8x1xf32>
    %53 = vector.broadcast %52 : vector<8x1xf32> to vector<8x256xf32>
    %54 = arith.addf %51, %53 : vector<8x256xf32>
    %c0_29 = arith.constant 0 : index
    %c0_30 = arith.constant 0 : index
    %c0_31 = arith.constant 0 : index
    %55 = vector.load %arg5[%c0_29, %c0_30, %c0_31] : memref<1x8x256xf32, #tpu.memory_space<vmem>>, vector<1x8x256xf32>
    %56 = vector.shape_cast %55 : vector<1x8x256xf32> to vector<8x256xf32>
    %57 = vector.shape_cast %54 : vector<8x256xf32> to vector<1x8x256xf32>
    tpu.vector_store %arg5[%c0_29, %c0_30, %c0_31], %57 {strides = array<i32>} : memref<1x8x256xf32, #tpu.memory_space<vmem>>, vector<1x8x256xf32>,
    return
  }
  func.func @transform_0(%arg0: i32) -> (i32, i32, i32) {
    %c0_i32 = arith.constant 0 : i32
    %c0_i32_0 = arith.constant 0 : i32
    %c0_i32_1 = arith.constant 0 : i32
    return %arg0, %c0_i32, %c0_i32_0 : i32, i32, i32
  }
  func.func @transform_1(%arg0: i32) -> (i32, i32) {
    %c0_i32 = arith.constant 0 : i32
    %c0_i32_0 = arith.constant 0 : i32
    %c0_i32_1 = arith.constant 0 : i32
    return %c0_i32, %c0_i32_0 : i32, i32
  }
  func.func @transform_2(%arg0: i32) -> (i32, i32) {
    %c0_i32 = arith.constant 0 : i32
    %c0_i32_0 = arith.constant 0 : i32
    %c0_i32_1 = arith.constant 0 : i32
    return %c0_i32, %c0_i32_0 : i32, i32
  }
  func.func @transform_3(%arg0: i32) -> (i32, i32) {
    %c0_i32 = arith.constant 0 : i32
    %c0_i32_0 = arith.constant 0 : i32
    %c0_i32_1 = arith.constant 0 : i32
    return %c0_i32, %c0_i32_0 : i32, i32
  }
  func.func @transform_4(%arg0: i32) -> (i32, i32, i32) {
    %c0_i32 = arith.constant 0 : i32
    %c0_i32_0 = arith.constant 0 : i32
    %c0_i32_1 = arith.constant 0 : i32
    return %arg0, %c0_i32, %c0_i32_0 : i32, i32, i32
  }
}

module attributes {stable_mosaic.version = 11 : i64} {
  func.func @_conv_kernel(%arg0: i32, %arg1: memref<1x8x1024xf32, #tpu.memory_space<vmem>>, %arg2: memref<2x1024xf32, #tpu.memory_space<vmem>>, %arg3: memref<8x72xf32, #tpu.memory_space<vmem>>, %arg4: memref<8x1xf32, #tpu.memory_space<vmem>>, %arg5: memref<1x8x1024xf32, #tpu.memory_space<vmem>>, %arg6: memref<72x1024xf32, #tpu.memory_space<vmem>>) attributes {dimension_semantics = [#tpu.dimension_semantics<parallel>], iteration_bounds = array<i64: 2>, scalar_prefetch = 0 : i64, scratch_operands = 1 : i64, tpu.core_type = #tpu.core_type<tc>, window_params = [{transform_indices = @transform_0, window_bounds = array<i64: 1, 8, 1024>}, {pipeline_mode = #tpu.pipeline_mode<synchronous>, transform_indices = @transform_1, window_bounds = array<i64: 2, 1024>}, {pipeline_mode = #tpu.pipeline_mode<synchronous>, transform_indices = @transform_2, window_bounds = array<i64: 8, 72>}, {pipeline_mode = #tpu.pipeline_mode<synchronous>, transform_indices = @transform_3, window_bounds = array<i64: 8, 1>}, {transform_indices = @transform_4, window_bounds = array<i64: 1, 8, 1024>}]} {
    %c0 = arith.constant 0 : index
    %c0_0 = arith.constant 0 : index
    %0 = vector.load %arg2[%c0, %c0_0] : memref<2x1024xf32, #tpu.memory_space<vmem>>, vector<1x1024xf32>
    %c1 = arith.constant 1 : index
    %c0_1 = arith.constant 0 : index
    %1 = vector.load %arg2[%c1, %c0_1] : memref<2x1024xf32, #tpu.memory_space<vmem>>, vector<1x1024xf32>
    %c0_2 = arith.constant 0 : index
    %c0_3 = arith.constant 0 : index
    %c0_4 = arith.constant 0 : index
    %2 = vector.load %arg1[%c0_2, %c0_3, %c0_4] : memref<1x8x1024xf32, #tpu.memory_space<vmem>>, vector<1x8x1024xf32>
    %3 = vector.shape_cast %2 : vector<1x8x1024xf32> to vector<8x1024xf32>
    %cst = arith.constant 0.000000e+00 : f32
    %4 = vector.broadcast %cst : f32 to vector<8x33xf32>
    %5 = vector.extract_strided_slice %3 {offsets = [0, 0], sizes = [8, 991], strides = [1, 1]} : vector<8x1024xf32> to vector<8x991xf32>
    %6 = tpu.concatenate %4, %5 in 1 : vector<8x33xf32>, vector<8x991xf32> -> vector<8x1024xf32>
    %7 = vector.broadcast %0 : vector<1x1024xf32> to vector<8x1024xf32>
    %8 = arith.mulf %6, %7 : vector<8x1024xf32>
    %c0_5 = arith.constant 0 : index
    %c0_6 = arith.constant 0 : index
    %9 = vector.load %arg6[%c0_5, %c0_6] : memref<72x1024xf32, #tpu.memory_space<vmem>>, vector<8x1024xf32>
    tpu.vector_store %arg6[%c0_5, %c0_6], %8 {strides = array<i32>} : memref<72x1024xf32, #tpu.memory_space<vmem>>, vector<8x1024xf32>,
    %cst_7 = arith.constant 0.000000e+00 : f32
    %10 = vector.broadcast %cst_7 : f32 to vector<8x32xf32>
    %11 = vector.extract_strided_slice %3 {offsets = [0, 0], sizes = [8, 992], strides = [1, 1]} : vector<8x1024xf32> to vector<8x992xf32>
    %12 = tpu.concatenate %10, %11 in 1 : vector<8x32xf32>, vector<8x992xf32> -> vector<8x1024xf32>
    %c8 = arith.constant 8 : index
    %c0_8 = arith.constant 0 : index
    %13 = vector.load %arg6[%c8, %c0_8] : memref<72x1024xf32, #tpu.memory_space<vmem>>, vector<8x1024xf32>
    tpu.vector_store %arg6[%c8, %c0_8], %12 {strides = array<i32>} : memref<72x1024xf32, #tpu.memory_space<vmem>>, vector<8x1024xf32>,
    %cst_9 = arith.constant 0.000000e+00 : f32
    %14 = vector.broadcast %cst_9 : f32 to vector<8x31xf32>
    %15 = vector.extract_strided_slice %3 {offsets = [0, 0], sizes = [8, 993], strides = [1, 1]} : vector<8x1024xf32> to vector<8x993xf32>
    %16 = tpu.concatenate %14, %15 in 1 : vector<8x31xf32>, vector<8x993xf32> -> vector<8x1024xf32>
    %17 = vector.broadcast %1 : vector<1x1024xf32> to vector<8x1024xf32>
    %18 = arith.mulf %16, %17 : vector<8x1024xf32>
    %c16 = arith.constant 16 : index
    %c0_10 = arith.constant 0 : index
    %19 = vector.load %arg6[%c16, %c0_10] : memref<72x1024xf32, #tpu.memory_space<vmem>>, vector<8x1024xf32>
    tpu.vector_store %arg6[%c16, %c0_10], %18 {strides = array<i32>} : memref<72x1024xf32, #tpu.memory_space<vmem>>, vector<8x1024xf32>,
    %cst_11 = arith.constant 0.000000e+00 : f32
    %20 = vector.broadcast %cst_11 : f32 to vector<8x1xf32>
    %21 = vector.extract_strided_slice %3 {offsets = [0, 0], sizes = [8, 1023], strides = [1, 1]} : vector<8x1024xf32> to vector<8x1023xf32>
    %22 = tpu.concatenate %20, %21 in 1 : vector<8x1xf32>, vector<8x1023xf32> -> vector<8x1024xf32>
    %23 = vector.broadcast %0 : vector<1x1024xf32> to vector<8x1024xf32>
    %24 = arith.mulf %22, %23 : vector<8x1024xf32>
    %c24 = arith.constant 24 : index
    %c0_12 = arith.constant 0 : index
    %25 = vector.load %arg6[%c24, %c0_12] : memref<72x1024xf32, #tpu.memory_space<vmem>>, vector<8x1024xf32>
    tpu.vector_store %arg6[%c24, %c0_12], %24 {strides = array<i32>} : memref<72x1024xf32, #tpu.memory_space<vmem>>, vector<8x1024xf32>,
    %c32 = arith.constant 32 : index
    %c0_13 = arith.constant 0 : index
    %26 = vector.load %arg6[%c32, %c0_13] : memref<72x1024xf32, #tpu.memory_space<vmem>>, vector<8x1024xf32>
    tpu.vector_store %arg6[%c32, %c0_13], %3 {strides = array<i32>} : memref<72x1024xf32, #tpu.memory_space<vmem>>, vector<8x1024xf32>,
    %cst_14 = arith.constant 0.000000e+00 : f32
    %27 = vector.broadcast %cst_14 : f32 to vector<8x1xf32>
    %28 = vector.extract_strided_slice %3 {offsets = [0, 1], sizes = [8, 1023], strides = [1, 1]} : vector<8x1024xf32> to vector<8x1023xf32>
    %29 = tpu.concatenate %28, %27 in 1 : vector<8x1023xf32>, vector<8x1xf32> -> vector<8x1024xf32>
    %30 = vector.broadcast %1 : vector<1x1024xf32> to vector<8x1024xf32>
    %31 = arith.mulf %29, %30 : vector<8x1024xf32>
    %c40 = arith.constant 40 : index
    %c0_15 = arith.constant 0 : index
    %32 = vector.load %arg6[%c40, %c0_15] : memref<72x1024xf32, #tpu.memory_space<vmem>>, vector<8x1024xf32>
    tpu.vector_store %arg6[%c40, %c0_15], %31 {strides = array<i32>} : memref<72x1024xf32, #tpu.memory_space<vmem>>, vector<8x1024xf32>,
    %cst_16 = arith.constant 0.000000e+00 : f32
    %33 = vector.broadcast %cst_16 : f32 to vector<8x31xf32>
    %34 = vector.extract_strided_slice %3 {offsets = [0, 31], sizes = [8, 993], strides = [1, 1]} : vector<8x1024xf32> to vector<8x993xf32>
    %35 = tpu.concatenate %34, %33 in 1 : vector<8x993xf32>, vector<8x31xf32> -> vector<8x1024xf32>
    %36 = vector.broadcast %0 : vector<1x1024xf32> to vector<8x1024xf32>
    %37 = arith.mulf %35, %36 : vector<8x1024xf32>
    %c48 = arith.constant 48 : index
    %c0_17 = arith.constant 0 : index
    %38 = vector.load %arg6[%c48, %c0_17] : memref<72x1024xf32, #tpu.memory_space<vmem>>, vector<8x1024xf32>
    tpu.vector_store %arg6[%c48, %c0_17], %37 {strides = array<i32>} : memref<72x1024xf32, #tpu.memory_space<vmem>>, vector<8x1024xf32>,
    %cst_18 = arith.constant 0.000000e+00 : f32
    %39 = vector.broadcast %cst_18 : f32 to vector<8x32xf32>
    %40 = vector.extract_strided_slice %3 {offsets = [0, 32], sizes = [8, 992], strides = [1, 1]} : vector<8x1024xf32> to vector<8x992xf32>
    %41 = tpu.concatenate %40, %39 in 1 : vector<8x992xf32>, vector<8x32xf32> -> vector<8x1024xf32>
    %c56 = arith.constant 56 : index
    %c0_19 = arith.constant 0 : index
    %42 = vector.load %arg6[%c56, %c0_19] : memref<72x1024xf32, #tpu.memory_space<vmem>>, vector<8x1024xf32>
    tpu.vector_store %arg6[%c56, %c0_19], %41 {strides = array<i32>} : memref<72x1024xf32, #tpu.memory_space<vmem>>, vector<8x1024xf32>,
    %cst_20 = arith.constant 0.000000e+00 : f32
    %43 = vector.broadcast %cst_20 : f32 to vector<8x33xf32>
    %44 = vector.extract_strided_slice %3 {offsets = [0, 33], sizes = [8, 991], strides = [1, 1]} : vector<8x1024xf32> to vector<8x991xf32>
    %45 = tpu.concatenate %44, %43 in 1 : vector<8x991xf32>, vector<8x33xf32> -> vector<8x1024xf32>
    %46 = vector.broadcast %1 : vector<1x1024xf32> to vector<8x1024xf32>
    %47 = arith.mulf %45, %46 : vector<8x1024xf32>
    %c64 = arith.constant 64 : index
    %c0_21 = arith.constant 0 : index
    %48 = vector.load %arg6[%c64, %c0_21] : memref<72x1024xf32, #tpu.memory_space<vmem>>, vector<8x1024xf32>
    tpu.vector_store %arg6[%c64, %c0_21], %47 {strides = array<i32>} : memref<72x1024xf32, #tpu.memory_space<vmem>>, vector<8x1024xf32>,
    %c0_22 = arith.constant 0 : index
    %c0_23 = arith.constant 0 : index
    %49 = vector.load %arg3[%c0_22, %c0_23] : memref<8x72xf32, #tpu.memory_space<vmem>>, vector<8x72xf32>
    %c0_24 = arith.constant 0 : index
    %c0_25 = arith.constant 0 : index
    %50 = vector.load %arg6[%c0_24, %c0_25] : memref<72x1024xf32, #tpu.memory_space<vmem>>, vector<72x1024xf32>
    %cst_26 = arith.constant dense<0.000000e+00> : vector<8x1024xf32>
    %51 = tpu.matmul %49, %50, %cst_26 {dimension_numbers = #tpu.dot_dimension_numbers<[1], [0], [0], [1], [0, 0, 1, 1], [], []>} : vector<8x72xf32>, vector<72x1024xf32>, vector<8x1024xf32> -> vector<8x1024xf32>
    %c0_27 = arith.constant 0 : index
    %c0_28 = arith.constant 0 : index
    %52 = vector.load %arg4[%c0_27, %c0_28] : memref<8x1xf32, #tpu.memory_space<vmem>>, vector<8x1xf32>
    %53 = vector.broadcast %52 : vector<8x1xf32> to vector<8x1024xf32>
    %54 = arith.addf %51, %53 : vector<8x1024xf32>
    %cst_29 = arith.constant 0.000000e+00 : f32
    %55 = vector.broadcast %cst_29 : f32 to vector<8x1024xf32>
    %56 = arith.cmpf ogt, %54, %55 : vector<8x1024xf32>
    %cst_30 = arith.constant 2.000000e-01 : f32
    %57 = vector.broadcast %cst_30 : f32 to vector<8x1024xf32>
    %58 = arith.mulf %54, %57 : vector<8x1024xf32>
    %59 = arith.select %56, %54, %58 : vector<8x1024xi1>, vector<8x1024xf32>
    %c0_31 = arith.constant 0 : index
    %c0_32 = arith.constant 0 : index
    %c0_33 = arith.constant 0 : index
    %60 = vector.load %arg5[%c0_31, %c0_32, %c0_33] : memref<1x8x1024xf32, #tpu.memory_space<vmem>>, vector<1x8x1024xf32>
    %61 = vector.shape_cast %60 : vector<1x8x1024xf32> to vector<8x1024xf32>
    %62 = vector.shape_cast %59 : vector<8x1024xf32> to vector<1x8x1024xf32>
    tpu.vector_store %arg5[%c0_31, %c0_32, %c0_33], %62 {strides = array<i32>} : memref<1x8x1024xf32, #tpu.memory_space<vmem>>, vector<1x8x1024xf32>,
    return
  }
  func.func @transform_0(%arg0: i32) -> (i32, i32, i32) {
    %c0_i32 = arith.constant 0 : i32
    %c0_i32_0 = arith.constant 0 : i32
    %c0_i32_1 = arith.constant 0 : i32
    return %arg0, %c0_i32, %c0_i32_0 : i32, i32, i32
  }
  func.func @transform_1(%arg0: i32) -> (i32, i32) {
    %c0_i32 = arith.constant 0 : i32
    %c0_i32_0 = arith.constant 0 : i32
    %c0_i32_1 = arith.constant 0 : i32
    return %c0_i32, %c0_i32_0 : i32, i32
  }
  func.func @transform_2(%arg0: i32) -> (i32, i32) {
    %c0_i32 = arith.constant 0 : i32
    %c0_i32_0 = arith.constant 0 : i32
    %c0_i32_1 = arith.constant 0 : i32
    return %c0_i32, %c0_i32_0 : i32, i32
  }
  func.func @transform_3(%arg0: i32) -> (i32, i32) {
    %c0_i32 = arith.constant 0 : i32
    %c0_i32_0 = arith.constant 0 : i32
    %c0_i32_1 = arith.constant 0 : i32
    return %c0_i32, %c0_i32_0 : i32, i32
  }
  func.func @transform_4(%arg0: i32) -> (i32, i32, i32) {
    %c0_i32 = arith.constant 0 : i32
    %c0_i32_0 = arith.constant 0 : i32
    %c0_i32_1 = arith.constant 0 : i32
    return %arg0, %c0_i32, %c0_i32_0 : i32, i32, i32
  }
}

module attributes {stable_mosaic.version = 11 : i64} {
  func.func @_conv_kernel(%arg0: i32, %arg1: memref<1x8x4096xf32, #tpu.memory_space<vmem>>, %arg2: memref<2x4096xf32, #tpu.memory_space<vmem>>, %arg3: memref<8x72xf32, #tpu.memory_space<vmem>>, %arg4: memref<8x1xf32, #tpu.memory_space<vmem>>, %arg5: memref<1x8x4096xf32, #tpu.memory_space<vmem>>, %arg6: memref<72x4096xf32, #tpu.memory_space<vmem>>) attributes {dimension_semantics = [#tpu.dimension_semantics<parallel>], iteration_bounds = array<i64: 2>, scalar_prefetch = 0 : i64, scratch_operands = 1 : i64, tpu.core_type = #tpu.core_type<tc>, window_params = [{transform_indices = @transform_0, window_bounds = array<i64: 1, 8, 4096>}, {pipeline_mode = #tpu.pipeline_mode<synchronous>, transform_indices = @transform_1, window_bounds = array<i64: 2, 4096>}, {pipeline_mode = #tpu.pipeline_mode<synchronous>, transform_indices = @transform_2, window_bounds = array<i64: 8, 72>}, {pipeline_mode = #tpu.pipeline_mode<synchronous>, transform_indices = @transform_3, window_bounds = array<i64: 8, 1>}, {transform_indices = @transform_4, window_bounds = array<i64: 1, 8, 4096>}]} {
    %c0 = arith.constant 0 : index
    %c0_0 = arith.constant 0 : index
    %0 = vector.load %arg2[%c0, %c0_0] : memref<2x4096xf32, #tpu.memory_space<vmem>>, vector<1x4096xf32>
    %c1 = arith.constant 1 : index
    %c0_1 = arith.constant 0 : index
    %1 = vector.load %arg2[%c1, %c0_1] : memref<2x4096xf32, #tpu.memory_space<vmem>>, vector<1x4096xf32>
    %c0_2 = arith.constant 0 : index
    %c0_3 = arith.constant 0 : index
    %c0_4 = arith.constant 0 : index
    %2 = vector.load %arg1[%c0_2, %c0_3, %c0_4] : memref<1x8x4096xf32, #tpu.memory_space<vmem>>, vector<1x8x4096xf32>
    %3 = vector.shape_cast %2 : vector<1x8x4096xf32> to vector<8x4096xf32>
    %cst = arith.constant 0.000000e+00 : f32
    %4 = vector.broadcast %cst : f32 to vector<8x65xf32>
    %5 = vector.extract_strided_slice %3 {offsets = [0, 0], sizes = [8, 4031], strides = [1, 1]} : vector<8x4096xf32> to vector<8x4031xf32>
    %6 = tpu.concatenate %4, %5 in 1 : vector<8x65xf32>, vector<8x4031xf32> -> vector<8x4096xf32>
    %7 = vector.broadcast %0 : vector<1x4096xf32> to vector<8x4096xf32>
    %8 = arith.mulf %6, %7 : vector<8x4096xf32>
    %c0_5 = arith.constant 0 : index
    %c0_6 = arith.constant 0 : index
    %9 = vector.load %arg6[%c0_5, %c0_6] : memref<72x4096xf32, #tpu.memory_space<vmem>>, vector<8x4096xf32>
    tpu.vector_store %arg6[%c0_5, %c0_6], %8 {strides = array<i32>} : memref<72x4096xf32, #tpu.memory_space<vmem>>, vector<8x4096xf32>,
    %cst_7 = arith.constant 0.000000e+00 : f32
    %10 = vector.broadcast %cst_7 : f32 to vector<8x64xf32>
    %11 = vector.extract_strided_slice %3 {offsets = [0, 0], sizes = [8, 4032], strides = [1, 1]} : vector<8x4096xf32> to vector<8x4032xf32>
    %12 = tpu.concatenate %10, %11 in 1 : vector<8x64xf32>, vector<8x4032xf32> -> vector<8x4096xf32>
    %c8 = arith.constant 8 : index
    %c0_8 = arith.constant 0 : index
    %13 = vector.load %arg6[%c8, %c0_8] : memref<72x4096xf32, #tpu.memory_space<vmem>>, vector<8x4096xf32>
    tpu.vector_store %arg6[%c8, %c0_8], %12 {strides = array<i32>} : memref<72x4096xf32, #tpu.memory_space<vmem>>, vector<8x4096xf32>,
    %cst_9 = arith.constant 0.000000e+00 : f32
    %14 = vector.broadcast %cst_9 : f32 to vector<8x63xf32>
    %15 = vector.extract_strided_slice %3 {offsets = [0, 0], sizes = [8, 4033], strides = [1, 1]} : vector<8x4096xf32> to vector<8x4033xf32>
    %16 = tpu.concatenate %14, %15 in 1 : vector<8x63xf32>, vector<8x4033xf32> -> vector<8x4096xf32>
    %17 = vector.broadcast %1 : vector<1x4096xf32> to vector<8x4096xf32>
    %18 = arith.mulf %16, %17 : vector<8x4096xf32>
    %c16 = arith.constant 16 : index
    %c0_10 = arith.constant 0 : index
    %19 = vector.load %arg6[%c16, %c0_10] : memref<72x4096xf32, #tpu.memory_space<vmem>>, vector<8x4096xf32>
    tpu.vector_store %arg6[%c16, %c0_10], %18 {strides = array<i32>} : memref<72x4096xf32, #tpu.memory_space<vmem>>, vector<8x4096xf32>,
    %cst_11 = arith.constant 0.000000e+00 : f32
    %20 = vector.broadcast %cst_11 : f32 to vector<8x1xf32>
    %21 = vector.extract_strided_slice %3 {offsets = [0, 0], sizes = [8, 4095], strides = [1, 1]} : vector<8x4096xf32> to vector<8x4095xf32>
    %22 = tpu.concatenate %20, %21 in 1 : vector<8x1xf32>, vector<8x4095xf32> -> vector<8x4096xf32>
    %23 = vector.broadcast %0 : vector<1x4096xf32> to vector<8x4096xf32>
    %24 = arith.mulf %22, %23 : vector<8x4096xf32>
    %c24 = arith.constant 24 : index
    %c0_12 = arith.constant 0 : index
    %25 = vector.load %arg6[%c24, %c0_12] : memref<72x4096xf32, #tpu.memory_space<vmem>>, vector<8x4096xf32>
    tpu.vector_store %arg6[%c24, %c0_12], %24 {strides = array<i32>} : memref<72x4096xf32, #tpu.memory_space<vmem>>, vector<8x4096xf32>,
    %c32 = arith.constant 32 : index
    %c0_13 = arith.constant 0 : index
    %26 = vector.load %arg6[%c32, %c0_13] : memref<72x4096xf32, #tpu.memory_space<vmem>>, vector<8x4096xf32>
    tpu.vector_store %arg6[%c32, %c0_13], %3 {strides = array<i32>} : memref<72x4096xf32, #tpu.memory_space<vmem>>, vector<8x4096xf32>,
    %cst_14 = arith.constant 0.000000e+00 : f32
    %27 = vector.broadcast %cst_14 : f32 to vector<8x1xf32>
    %28 = vector.extract_strided_slice %3 {offsets = [0, 1], sizes = [8, 4095], strides = [1, 1]} : vector<8x4096xf32> to vector<8x4095xf32>
    %29 = tpu.concatenate %28, %27 in 1 : vector<8x4095xf32>, vector<8x1xf32> -> vector<8x4096xf32>
    %30 = vector.broadcast %1 : vector<1x4096xf32> to vector<8x4096xf32>
    %31 = arith.mulf %29, %30 : vector<8x4096xf32>
    %c40 = arith.constant 40 : index
    %c0_15 = arith.constant 0 : index
    %32 = vector.load %arg6[%c40, %c0_15] : memref<72x4096xf32, #tpu.memory_space<vmem>>, vector<8x4096xf32>
    tpu.vector_store %arg6[%c40, %c0_15], %31 {strides = array<i32>} : memref<72x4096xf32, #tpu.memory_space<vmem>>, vector<8x4096xf32>,
    %cst_16 = arith.constant 0.000000e+00 : f32
    %33 = vector.broadcast %cst_16 : f32 to vector<8x63xf32>
    %34 = vector.extract_strided_slice %3 {offsets = [0, 63], sizes = [8, 4033], strides = [1, 1]} : vector<8x4096xf32> to vector<8x4033xf32>
    %35 = tpu.concatenate %34, %33 in 1 : vector<8x4033xf32>, vector<8x63xf32> -> vector<8x4096xf32>
    %36 = vector.broadcast %0 : vector<1x4096xf32> to vector<8x4096xf32>
    %37 = arith.mulf %35, %36 : vector<8x4096xf32>
    %c48 = arith.constant 48 : index
    %c0_17 = arith.constant 0 : index
    %38 = vector.load %arg6[%c48, %c0_17] : memref<72x4096xf32, #tpu.memory_space<vmem>>, vector<8x4096xf32>
    tpu.vector_store %arg6[%c48, %c0_17], %37 {strides = array<i32>} : memref<72x4096xf32, #tpu.memory_space<vmem>>, vector<8x4096xf32>,
    %cst_18 = arith.constant 0.000000e+00 : f32
    %39 = vector.broadcast %cst_18 : f32 to vector<8x64xf32>
    %40 = vector.extract_strided_slice %3 {offsets = [0, 64], sizes = [8, 4032], strides = [1, 1]} : vector<8x4096xf32> to vector<8x4032xf32>
    %41 = tpu.concatenate %40, %39 in 1 : vector<8x4032xf32>, vector<8x64xf32> -> vector<8x4096xf32>
    %c56 = arith.constant 56 : index
    %c0_19 = arith.constant 0 : index
    %42 = vector.load %arg6[%c56, %c0_19] : memref<72x4096xf32, #tpu.memory_space<vmem>>, vector<8x4096xf32>
    tpu.vector_store %arg6[%c56, %c0_19], %41 {strides = array<i32>} : memref<72x4096xf32, #tpu.memory_space<vmem>>, vector<8x4096xf32>,
    %cst_20 = arith.constant 0.000000e+00 : f32
    %43 = vector.broadcast %cst_20 : f32 to vector<8x65xf32>
    %44 = vector.extract_strided_slice %3 {offsets = [0, 65], sizes = [8, 4031], strides = [1, 1]} : vector<8x4096xf32> to vector<8x4031xf32>
    %45 = tpu.concatenate %44, %43 in 1 : vector<8x4031xf32>, vector<8x65xf32> -> vector<8x4096xf32>
    %46 = vector.broadcast %1 : vector<1x4096xf32> to vector<8x4096xf32>
    %47 = arith.mulf %45, %46 : vector<8x4096xf32>
    %c64 = arith.constant 64 : index
    %c0_21 = arith.constant 0 : index
    %48 = vector.load %arg6[%c64, %c0_21] : memref<72x4096xf32, #tpu.memory_space<vmem>>, vector<8x4096xf32>
    tpu.vector_store %arg6[%c64, %c0_21], %47 {strides = array<i32>} : memref<72x4096xf32, #tpu.memory_space<vmem>>, vector<8x4096xf32>,
    %c0_22 = arith.constant 0 : index
    %c0_23 = arith.constant 0 : index
    %49 = vector.load %arg3[%c0_22, %c0_23] : memref<8x72xf32, #tpu.memory_space<vmem>>, vector<8x72xf32>
    %c0_24 = arith.constant 0 : index
    %c0_25 = arith.constant 0 : index
    %50 = vector.load %arg6[%c0_24, %c0_25] : memref<72x4096xf32, #tpu.memory_space<vmem>>, vector<72x4096xf32>
    %cst_26 = arith.constant dense<0.000000e+00> : vector<8x4096xf32>
    %51 = tpu.matmul %49, %50, %cst_26 {dimension_numbers = #tpu.dot_dimension_numbers<[1], [0], [0], [1], [0, 0, 1, 1], [], []>} : vector<8x72xf32>, vector<72x4096xf32>, vector<8x4096xf32> -> vector<8x4096xf32>
    %c0_27 = arith.constant 0 : index
    %c0_28 = arith.constant 0 : index
    %52 = vector.load %arg4[%c0_27, %c0_28] : memref<8x1xf32, #tpu.memory_space<vmem>>, vector<8x1xf32>
    %53 = vector.broadcast %52 : vector<8x1xf32> to vector<8x4096xf32>
    %54 = arith.addf %51, %53 : vector<8x4096xf32>
    %cst_29 = arith.constant 0.000000e+00 : f32
    %55 = vector.broadcast %cst_29 : f32 to vector<8x4096xf32>
    %56 = arith.cmpf ogt, %54, %55 : vector<8x4096xf32>
    %cst_30 = arith.constant 2.000000e-01 : f32
    %57 = vector.broadcast %cst_30 : f32 to vector<8x4096xf32>
    %58 = arith.mulf %54, %57 : vector<8x4096xf32>
    %59 = arith.select %56, %54, %58 : vector<8x4096xi1>, vector<8x4096xf32>
    %c0_31 = arith.constant 0 : index
    %c0_32 = arith.constant 0 : index
    %c0_33 = arith.constant 0 : index
    %60 = vector.load %arg5[%c0_31, %c0_32, %c0_33] : memref<1x8x4096xf32, #tpu.memory_space<vmem>>, vector<1x8x4096xf32>
    %61 = vector.shape_cast %60 : vector<1x8x4096xf32> to vector<8x4096xf32>
    %62 = vector.shape_cast %59 : vector<8x4096xf32> to vector<1x8x4096xf32>
    tpu.vector_store %arg5[%c0_31, %c0_32, %c0_33], %62 {strides = array<i32>} : memref<1x8x4096xf32, #tpu.memory_space<vmem>>, vector<1x8x4096xf32>,
    return
  }
  func.func @transform_0(%arg0: i32) -> (i32, i32, i32) {
    %c0_i32 = arith.constant 0 : i32
    %c0_i32_0 = arith.constant 0 : i32
    %c0_i32_1 = arith.constant 0 : i32
    return %arg0, %c0_i32, %c0_i32_0 : i32, i32, i32
  }
  func.func @transform_1(%arg0: i32) -> (i32, i32) {
    %c0_i32 = arith.constant 0 : i32
    %c0_i32_0 = arith.constant 0 : i32
    %c0_i32_1 = arith.constant 0 : i32
    return %c0_i32, %c0_i32_0 : i32, i32
  }
  func.func @transform_2(%arg0: i32) -> (i32, i32) {
    %c0_i32 = arith.constant 0 : i32
    %c0_i32_0 = arith.constant 0 : i32
    %c0_i32_1 = arith.constant 0 : i32
    return %c0_i32, %c0_i32_0 : i32, i32
  }
  func.func @transform_3(%arg0: i32) -> (i32, i32) {
    %c0_i32 = arith.constant 0 : i32
    %c0_i32_0 = arith.constant 0 : i32
    %c0_i32_1 = arith.constant 0 : i32
    return %c0_i32, %c0_i32_0 : i32, i32
  }
  func.func @transform_4(%arg0: i32) -> (i32, i32, i32) {
    %c0_i32 = arith.constant 0 : i32
    %c0_i32_0 = arith.constant 0 : i32
    %c0_i32_1 = arith.constant 0 : i32
    return %arg0, %c0_i32, %c0_i32_0 : i32, i32, i32
  }
}

module attributes {stable_mosaic.version = 11 : i64} {
  func.func @_conv_kernel(%arg0: i32, %arg1: memref<1x8x4096xf32, #tpu.memory_space<vmem>>, %arg2: memref<2x4096xf32, #tpu.memory_space<vmem>>, %arg3: memref<4x72xf32, #tpu.memory_space<vmem>>, %arg4: memref<4x1xf32, #tpu.memory_space<vmem>>, %arg5: memref<1x4x4096xf32, #tpu.memory_space<vmem>>, %arg6: memref<72x4096xf32, #tpu.memory_space<vmem>>) attributes {dimension_semantics = [#tpu.dimension_semantics<parallel>], iteration_bounds = array<i64: 2>, scalar_prefetch = 0 : i64, scratch_operands = 1 : i64, tpu.core_type = #tpu.core_type<tc>, window_params = [{transform_indices = @transform_0, window_bounds = array<i64: 1, 8, 4096>}, {pipeline_mode = #tpu.pipeline_mode<synchronous>, transform_indices = @transform_1, window_bounds = array<i64: 2, 4096>}, {pipeline_mode = #tpu.pipeline_mode<synchronous>, transform_indices = @transform_2, window_bounds = array<i64: 4, 72>}, {pipeline_mode = #tpu.pipeline_mode<synchronous>, transform_indices = @transform_3, window_bounds = array<i64: 4, 1>}, {transform_indices = @transform_4, window_bounds = array<i64: 1, 4, 4096>}]} {
    %c0 = arith.constant 0 : index
    %c0_0 = arith.constant 0 : index
    %0 = vector.load %arg2[%c0, %c0_0] : memref<2x4096xf32, #tpu.memory_space<vmem>>, vector<1x4096xf32>
    %c1 = arith.constant 1 : index
    %c0_1 = arith.constant 0 : index
    %1 = vector.load %arg2[%c1, %c0_1] : memref<2x4096xf32, #tpu.memory_space<vmem>>, vector<1x4096xf32>
    %c0_2 = arith.constant 0 : index
    %c0_3 = arith.constant 0 : index
    %c0_4 = arith.constant 0 : index
    %2 = vector.load %arg1[%c0_2, %c0_3, %c0_4] : memref<1x8x4096xf32, #tpu.memory_space<vmem>>, vector<1x8x4096xf32>
    %3 = vector.shape_cast %2 : vector<1x8x4096xf32> to vector<8x4096xf32>
    %cst = arith.constant 0.000000e+00 : f32
    %4 = vector.broadcast %cst : f32 to vector<8x65xf32>
    %5 = vector.extract_strided_slice %3 {offsets = [0, 0], sizes = [8, 4031], strides = [1, 1]} : vector<8x4096xf32> to vector<8x4031xf32>
    %6 = tpu.concatenate %4, %5 in 1 : vector<8x65xf32>, vector<8x4031xf32> -> vector<8x4096xf32>
    %7 = vector.broadcast %0 : vector<1x4096xf32> to vector<8x4096xf32>
    %8 = arith.mulf %6, %7 : vector<8x4096xf32>
    %c0_5 = arith.constant 0 : index
    %c0_6 = arith.constant 0 : index
    %9 = vector.load %arg6[%c0_5, %c0_6] : memref<72x4096xf32, #tpu.memory_space<vmem>>, vector<8x4096xf32>
    tpu.vector_store %arg6[%c0_5, %c0_6], %8 {strides = array<i32>} : memref<72x4096xf32, #tpu.memory_space<vmem>>, vector<8x4096xf32>,
    %cst_7 = arith.constant 0.000000e+00 : f32
    %10 = vector.broadcast %cst_7 : f32 to vector<8x64xf32>
    %11 = vector.extract_strided_slice %3 {offsets = [0, 0], sizes = [8, 4032], strides = [1, 1]} : vector<8x4096xf32> to vector<8x4032xf32>
    %12 = tpu.concatenate %10, %11 in 1 : vector<8x64xf32>, vector<8x4032xf32> -> vector<8x4096xf32>
    %c8 = arith.constant 8 : index
    %c0_8 = arith.constant 0 : index
    %13 = vector.load %arg6[%c8, %c0_8] : memref<72x4096xf32, #tpu.memory_space<vmem>>, vector<8x4096xf32>
    tpu.vector_store %arg6[%c8, %c0_8], %12 {strides = array<i32>} : memref<72x4096xf32, #tpu.memory_space<vmem>>, vector<8x4096xf32>,
    %cst_9 = arith.constant 0.000000e+00 : f32
    %14 = vector.broadcast %cst_9 : f32 to vector<8x63xf32>
    %15 = vector.extract_strided_slice %3 {offsets = [0, 0], sizes = [8, 4033], strides = [1, 1]} : vector<8x4096xf32> to vector<8x4033xf32>
    %16 = tpu.concatenate %14, %15 in 1 : vector<8x63xf32>, vector<8x4033xf32> -> vector<8x4096xf32>
    %17 = vector.broadcast %1 : vector<1x4096xf32> to vector<8x4096xf32>
    %18 = arith.mulf %16, %17 : vector<8x4096xf32>
    %c16 = arith.constant 16 : index
    %c0_10 = arith.constant 0 : index
    %19 = vector.load %arg6[%c16, %c0_10] : memref<72x4096xf32, #tpu.memory_space<vmem>>, vector<8x4096xf32>
    tpu.vector_store %arg6[%c16, %c0_10], %18 {strides = array<i32>} : memref<72x4096xf32, #tpu.memory_space<vmem>>, vector<8x4096xf32>,
    %cst_11 = arith.constant 0.000000e+00 : f32
    %20 = vector.broadcast %cst_11 : f32 to vector<8x1xf32>
    %21 = vector.extract_strided_slice %3 {offsets = [0, 0], sizes = [8, 4095], strides = [1, 1]} : vector<8x4096xf32> to vector<8x4095xf32>
    %22 = tpu.concatenate %20, %21 in 1 : vector<8x1xf32>, vector<8x4095xf32> -> vector<8x4096xf32>
    %23 = vector.broadcast %0 : vector<1x4096xf32> to vector<8x4096xf32>
    %24 = arith.mulf %22, %23 : vector<8x4096xf32>
    %c24 = arith.constant 24 : index
    %c0_12 = arith.constant 0 : index
    %25 = vector.load %arg6[%c24, %c0_12] : memref<72x4096xf32, #tpu.memory_space<vmem>>, vector<8x4096xf32>
    tpu.vector_store %arg6[%c24, %c0_12], %24 {strides = array<i32>} : memref<72x4096xf32, #tpu.memory_space<vmem>>, vector<8x4096xf32>,
    %c32 = arith.constant 32 : index
    %c0_13 = arith.constant 0 : index
    %26 = vector.load %arg6[%c32, %c0_13] : memref<72x4096xf32, #tpu.memory_space<vmem>>, vector<8x4096xf32>
    tpu.vector_store %arg6[%c32, %c0_13], %3 {strides = array<i32>} : memref<72x4096xf32, #tpu.memory_space<vmem>>, vector<8x4096xf32>,
    %cst_14 = arith.constant 0.000000e+00 : f32
    %27 = vector.broadcast %cst_14 : f32 to vector<8x1xf32>
    %28 = vector.extract_strided_slice %3 {offsets = [0, 1], sizes = [8, 4095], strides = [1, 1]} : vector<8x4096xf32> to vector<8x4095xf32>
    %29 = tpu.concatenate %28, %27 in 1 : vector<8x4095xf32>, vector<8x1xf32> -> vector<8x4096xf32>
    %30 = vector.broadcast %1 : vector<1x4096xf32> to vector<8x4096xf32>
    %31 = arith.mulf %29, %30 : vector<8x4096xf32>
    %c40 = arith.constant 40 : index
    %c0_15 = arith.constant 0 : index
    %32 = vector.load %arg6[%c40, %c0_15] : memref<72x4096xf32, #tpu.memory_space<vmem>>, vector<8x4096xf32>
    tpu.vector_store %arg6[%c40, %c0_15], %31 {strides = array<i32>} : memref<72x4096xf32, #tpu.memory_space<vmem>>, vector<8x4096xf32>,
    %cst_16 = arith.constant 0.000000e+00 : f32
    %33 = vector.broadcast %cst_16 : f32 to vector<8x63xf32>
    %34 = vector.extract_strided_slice %3 {offsets = [0, 63], sizes = [8, 4033], strides = [1, 1]} : vector<8x4096xf32> to vector<8x4033xf32>
    %35 = tpu.concatenate %34, %33 in 1 : vector<8x4033xf32>, vector<8x63xf32> -> vector<8x4096xf32>
    %36 = vector.broadcast %0 : vector<1x4096xf32> to vector<8x4096xf32>
    %37 = arith.mulf %35, %36 : vector<8x4096xf32>
    %c48 = arith.constant 48 : index
    %c0_17 = arith.constant 0 : index
    %38 = vector.load %arg6[%c48, %c0_17] : memref<72x4096xf32, #tpu.memory_space<vmem>>, vector<8x4096xf32>
    tpu.vector_store %arg6[%c48, %c0_17], %37 {strides = array<i32>} : memref<72x4096xf32, #tpu.memory_space<vmem>>, vector<8x4096xf32>,
    %cst_18 = arith.constant 0.000000e+00 : f32
    %39 = vector.broadcast %cst_18 : f32 to vector<8x64xf32>
    %40 = vector.extract_strided_slice %3 {offsets = [0, 64], sizes = [8, 4032], strides = [1, 1]} : vector<8x4096xf32> to vector<8x4032xf32>
    %41 = tpu.concatenate %40, %39 in 1 : vector<8x4032xf32>, vector<8x64xf32> -> vector<8x4096xf32>
    %c56 = arith.constant 56 : index
    %c0_19 = arith.constant 0 : index
    %42 = vector.load %arg6[%c56, %c0_19] : memref<72x4096xf32, #tpu.memory_space<vmem>>, vector<8x4096xf32>
    tpu.vector_store %arg6[%c56, %c0_19], %41 {strides = array<i32>} : memref<72x4096xf32, #tpu.memory_space<vmem>>, vector<8x4096xf32>,
    %cst_20 = arith.constant 0.000000e+00 : f32
    %43 = vector.broadcast %cst_20 : f32 to vector<8x65xf32>
    %44 = vector.extract_strided_slice %3 {offsets = [0, 65], sizes = [8, 4031], strides = [1, 1]} : vector<8x4096xf32> to vector<8x4031xf32>
    %45 = tpu.concatenate %44, %43 in 1 : vector<8x4031xf32>, vector<8x65xf32> -> vector<8x4096xf32>
    %46 = vector.broadcast %1 : vector<1x4096xf32> to vector<8x4096xf32>
    %47 = arith.mulf %45, %46 : vector<8x4096xf32>
    %c64 = arith.constant 64 : index
    %c0_21 = arith.constant 0 : index
    %48 = vector.load %arg6[%c64, %c0_21] : memref<72x4096xf32, #tpu.memory_space<vmem>>, vector<8x4096xf32>
    tpu.vector_store %arg6[%c64, %c0_21], %47 {strides = array<i32>} : memref<72x4096xf32, #tpu.memory_space<vmem>>, vector<8x4096xf32>,
    %c0_22 = arith.constant 0 : index
    %c0_23 = arith.constant 0 : index
    %49 = vector.load %arg3[%c0_22, %c0_23] : memref<4x72xf32, #tpu.memory_space<vmem>>, vector<4x72xf32>
    %c0_24 = arith.constant 0 : index
    %c0_25 = arith.constant 0 : index
    %50 = vector.load %arg6[%c0_24, %c0_25] : memref<72x4096xf32, #tpu.memory_space<vmem>>, vector<72x4096xf32>
    %cst_26 = arith.constant dense<0.000000e+00> : vector<4x4096xf32>
    %51 = tpu.matmul %49, %50, %cst_26 {dimension_numbers = #tpu.dot_dimension_numbers<[1], [0], [0], [1], [0, 0, 1, 1], [], []>} : vector<4x72xf32>, vector<72x4096xf32>, vector<4x4096xf32> -> vector<4x4096xf32>
    %c0_27 = arith.constant 0 : index
    %c0_28 = arith.constant 0 : index
    %52 = vector.load %arg4[%c0_27, %c0_28] : memref<4x1xf32, #tpu.memory_space<vmem>>, vector<4x1xf32>
    %53 = vector.broadcast %52 : vector<4x1xf32> to vector<4x4096xf32>
    %54 = arith.addf %51, %53 : vector<4x4096xf32>
    %c0_29 = arith.constant 0 : index
    %c0_30 = arith.constant 0 : index
    %c0_31 = arith.constant 0 : index
    %55 = vector.load %arg5[%c0_29, %c0_30, %c0_31] : memref<1x4x4096xf32, #tpu.memory_space<vmem>>, vector<1x4x4096xf32>
    %56 = vector.shape_cast %55 : vector<1x4x4096xf32> to vector<4x4096xf32>
    %57 = vector.shape_cast %54 : vector<4x4096xf32> to vector<1x4x4096xf32>
    tpu.vector_store %arg5[%c0_29, %c0_30, %c0_31], %57 {strides = array<i32>} : memref<1x4x4096xf32, #tpu.memory_space<vmem>>, vector<1x4x4096xf32>,
    return
  }
  func.func @transform_0(%arg0: i32) -> (i32, i32, i32) {
    %c0_i32 = arith.constant 0 : i32
    %c0_i32_0 = arith.constant 0 : i32
    %c0_i32_1 = arith.constant 0 : i32
    return %arg0, %c0_i32, %c0_i32_0 : i32, i32, i32
  }
  func.func @transform_1(%arg0: i32) -> (i32, i32) {
    %c0_i32 = arith.constant 0 : i32
    %c0_i32_0 = arith.constant 0 : i32
    %c0_i32_1 = arith.constant 0 : i32
    return %c0_i32, %c0_i32_0 : i32, i32
  }
  func.func @transform_2(%arg0: i32) -> (i32, i32) {
    %c0_i32 = arith.constant 0 : i32
    %c0_i32_0 = arith.constant 0 : i32
    %c0_i32_1 = arith.constant 0 : i32
    return %c0_i32, %c0_i32_0 : i32, i32
  }
  func.func @transform_3(%arg0: i32) -> (i32, i32) {
    %c0_i32 = arith.constant 0 : i32
    %c0_i32_0 = arith.constant 0 : i32
    %c0_i32_1 = arith.constant 0 : i32
    return %c0_i32, %c0_i32_0 : i32, i32
  }
  func.func @transform_4(%arg0: i32) -> (i32, i32, i32) {
    %c0_i32 = arith.constant 0 : i32
    %c0_i32_0 = arith.constant 0 : i32
    %c0_i32_1 = arith.constant 0 : i32
    return %arg0, %c0_i32, %c0_i32_0 : i32, i32, i32
  }
}

</mosaic_0001>

<bundles_post_ra>
// kernel: rrdbnet_forward.19
= control target key start
LH: loop header
LB: loop body
LE: loop exit
PB: predicated region body
PF: predicated region fallthrough
CT: control target
= control target key end

     0   :  { %10 = vsyncpa [#allocation4], 0  ;;  %s706_s18 = smov 0   ;;  %s776_s0 = inlined_call_operand.vmem [shape: f32[2,8,256], index: 0, kind: input, shape index: {}]   ;;  %s777_s1 = inlined_call_operand.vmem [shape: f32[2,256], index: 1, kind: input, shape index: {}]   ;;  %s778_s2 = inlined_call_operand.hbm [shape: f32[8,72], index: 2, kind: input, shape index: {}]   ;;  %s779_s3 = inlined_call_operand.vmem [shape: f32[8,1], index: 3, kind: input, shape index: {}]   ;;  %s780_s4 = inlined_call_operand.vmem [shape: f32[2,8,256], index: 4, kind: input, shape index: {}]   ;;  %s781_s5 = inlined_call_operand.vmem [shape: f32[2,8,256], index: 5, kind: output, shape index: {}]  }
   0x1 LB: > { %s574_s19 = sadd.s32 4294967295, %s663_s18   ;;  %p576_p0 = scmp.ge.s32.totalorder %s663_s18, 1  ;;  %s663_s18 = sphi %s706_s18, %s16_s18  }
   0x2   : > { %p162_p1 = scmp.lt.s32.totalorder %s663_s18, 3  ;;  %p605_p3 = scmp.eq.s32.totalorder %s574_s19, 0 }
   0x3   : > { %s665_s21 = smov [#allocation3]  }
   0x4   : > { %p714_p2 = pnand %p576_p0, %p162_p1  ;;  %s178_s22 = sshll.u32 %s665_s21, 4  ;;  %s179_s22 = int_to_ptr.vmem [resolvable:$true] %s178_s22 }
   0x5   : > { %s638_s23 = scalar_lea.vmem %s179_s22, 128  ;;  %p646_p10 = scmp.lt.s32.totalorder %s179_s22, %s179_s22 }
   0x6   : > { %p601_p4 = pneg %p714_p2  ;;  %p639_p7 = scmp.ne.s32.totalorder %s179_s22, %s638_s23 }
   0x7   : > { %p647_p11 = scmp.lt.s32.totalorder %s638_s23, %s638_s23 }
   0x8   : > { %p602_p5 = pnand %p605_p3, %p601_p4 }
   0x9   : > { %p648_p12 = por %p647_p11, %p646_p10 }
   0xa   : > { %p629_p6 = pneg %p602_p5 }
   0xc   : > { %p641_p8 = pnand %p639_p7, %p629_p6 }
   0xe   : > { %p642_p9 = pneg %p641_p8 }
  0x10   : > { %p649_p13 = pnand %p648_p12, %p642_p9 }
  0x12   : > { %652 = shalt.err (!%p649_p13)
}
  0x13   : > { %604 = dma.hbm_to_vmem [thread:$0]  (!%p602_p5), %s778_s2, 128, %s179_s22, [#allocation4]  }
  0x14   : > { %210 = sbr.rel (%p714_p2) target bundleno = 380 (0x17c), region = 40 }
  0x19   : > { %658 = dma.done.wait (%p605_p3), [#allocation4], 128  }
  0x1a   : > { %660 = vsyncadd (%p605_p3), [#allocation4], 4294967168  ;;  %p243_p0 = scmp.lt.s32.totalorder %s574_s19, 1  ;;  %s666_s30 = smov 113   ;;  %v671_v2 = vmov 0.0   ;;  %v673_v3 = vmov 0   ;;  %v275_v5 = vlaneseq }
  0x1b   : > { %s667_s6 = smov 111   ;;  %s668_s7 = smov 112   ;;  %482 = vmatprep.mubr.f32.mxu0 %v671_v2  ;;  %626 = vset.pattern.permute.xlu0 %v673_v3  ;;  %v408_v4 = vld [vmem:[%s779_s3] sm:$0xff]  ;;  %vm380_vm0 = vcmask 908288   ;;  %vm356_vm1 = vcmask 924672   ;;  %vm369_vm2 = vcmask 916480  }
  0x1c   : > { %s784_s19 = smov (!%p243_p0, %s574_s19), 1  ;;  %s669_s8 = smov 127   ;;  %v276_v6 = vshrl.u32 %v275_v5, 7  ;;  %v587_v8 = vld [vmem:[%s777_s1 + $0x1] ss:$2 sm:$0x3] }
  0x1d   : > { %s728_s26 = sshll.u32 %s784_s19, 4  ;;  %s670_s9 = smov 1   ;;  %v258_v14 = vld [vmem:[%s777_s1] ss:$2 sm:$0x3]  ;;  %vm343_vm3 = vcmask 1039360  }
  0x1e   : > { %s247_s29 = scalar_lea.vmem %s776_s0, %s728_s26  ;;  %s672_s10 = smov 15   ;;  %v281_v7 = vsub.s32 1, %v276_v6  ;;  %v277_v9 = vsub.s32 0, %v276_v6  ;;  %vm328_vm4 = vcmask 7168   ;;  %vm304_vm5 = vcmask 121856   ;;  %v389_v57 = vld [vmem:[#allocation3] sm:$0xff] }
  0x1f   : > { %v734_v0 = vld [vmem:[%s247_s29 + $0x8] sm:$0xff]  ;;  %v738_v1 = vld [vmem:[%s247_s29] sm:$0xff]  ;;  %s674_s11 = smov 17   ;;  %s675_s12 = smov 16   ;;  %vm269_vm6 = vcmask 138240   ;;  %vm293_vm7 = vcmask 130048  }
  0x20   : > { %354 = vrot.lane.b32.xlu1 %v734_v0, %s666_s30  ;;  %378 = vrot.lane.b32.xlu0 %v734_v0, %s667_s6  ;;  %v317_v10 = vrot.slane %v587_v8, %v281_v7  ;;  %v313_v16 = vrot.slane %v587_v8, %v277_v9  ;;  %v282_v19 = vrot.slane %v258_v14, %v281_v7  ;;  %vm595_vm8 = vmneg %vm293_vm7  ;;  %vm414_vm9 = vcmask 588800   ;;  %s252_s22 = scalar_lea.vmem %s780_s4, %s728_s26  ;;  %s257_s25 = scalar_lea.vmem %s781_s5, %s728_s26 }
  0x21   : > { %v278_v22 = vrot.slane %v258_v14, %v277_v9  ;;  %v489_v60 = vld [vmem:[%s252_s22] sm:$0xff]  ;;  %v490_v63 = vld [vmem:[%s252_s22 + $0x8] sm:$0xff] }
  0x24   : > { %352 = vrot.lane.b32.xlu1 %v738_v1, %s666_s30  ;;  %376 = vrot.lane.b32.xlu0 %v738_v1, %s667_s6 }
  0x28   : > { %367 = vrot.lane.b32.xlu1 %v734_v0, %s668_s7  ;;  %365 = vrot.lane.b32.xlu0 %v738_v1, %s668_s7 }
  0x2c   : > { %339 = vrot.lane.b32.xlu1 %v738_v1, %s669_s8  ;;  %341 = vrot.lane.b32.xlu0 %v734_v0, %s669_s8 }
  0x30   : > { %326 = vrot.lane.b32.xlu1 %v734_v0, %s670_s9  ;;  %324 = vrot.lane.b32.xlu0 %v738_v1, %s670_s9 }
  0x34   : > { %302 = vrot.lane.b32.xlu1 %v734_v0, %s672_s10  ;;  %300 = vrot.lane.b32.xlu0 %v738_v1, %s672_s10 }
  0x38   : > { %267 = vrot.lane.b32.xlu1 %v734_v0, %s674_s11  ;;  %265 = vrot.lane.b32.xlu0 %v738_v1, %s674_s11 }
  0x3c   : > { %291 = vrot.lane.b32.xlu1 %v734_v0, %s675_s12  ;;  %289 = vrot.lane.b32.xlu0 %v738_v1, %s675_s12 }
  0x40   : > { %411 = vperm.xlu0 %626, %v408_v4  }
  0x92   : > { %v355_v11 = vpop.permute.xlu1 %354  ;;  %v379_v12 = vpop.permute.xlu0 %378 }
  0x93   : > { %v384_v13 = vsel %vm380_vm0, %v379_v12, 0.0  ;;  %v360_v21 = vsel %vm356_vm1, %v355_v11, 0.0 }
  0x94   : > { %v386_v15 = vmul.f32 %v384_v13, %v317_v10  ;;  %v362_v27 = vmul.f32 %v360_v21, %v282_v19 }
  0x96   : > { %v353_v17 = vpop.permute.xlu1 %352  ;;  %v377_v18 = vpop.permute.xlu0 %376  ;;  %432 = vmatprep.subr.mxu0 %v386_v15 }
  0x97   : > { %v381_v20 = vsel %vm380_vm0, %v377_v18, %v379_v12  ;;  %v357_v24 = vsel %vm356_vm1, %v353_v17, %v355_v11 }
  0x98   : > { %v385_v23 = vmul.f32 %v381_v20, %v313_v16  ;;  %v361_v29 = vmul.f32 %v357_v24, %v278_v22 }
  0x9a   : > { %v368_v25 = vpop.permute.xlu1 %367  ;;  %v366_v26 = vpop.permute.xlu0 %365  ;;  %433 = vmatpush1.msra.mxu0 %v385_v23 }
  0x9b   : > { %594 = vmatprep.subr.msk.mxu0 %vm369_vm2, %v368_v25  ;;  %v370_v28 = vsel %vm369_vm2, %v366_v26, %v368_v25 }
  0x9c   : > { %435 = vmatpush1.msra.mxu0 %v370_v28 }
  0x9d   : > { %436 = vmatprep.subr.mxu0 %v362_v27 }
  0x9e   : > { %v340_v30 = vpop.permute.xlu1 %339  ;;  %v342_v31 = vpop.permute.xlu0 %341  ;;  %437 = vmatpush1.msra.mxu0 %v361_v29 }
  0x9f   : > { %v344_v32 = vsel %vm343_vm3, %v340_v30, %v342_v31  ;;  %v347_v33 = vsel %vm343_vm3, %v342_v31, 0.0 }
  0xa0   : > { %v348_v34 = vmul.f32 %v344_v32, %v313_v16  ;;  %v349_v35 = vmul.f32 %v347_v33, %v317_v10 }
  0xa2   : > { %v327_v36 = vpop.permute.xlu1 %326  ;;  %v325_v37 = vpop.permute.xlu0 %324  ;;  %438 = vmatprep.subr.mxu0 %v349_v35 }
  0xa3   : > { %v329_v38 = vsel %vm328_vm4, %v325_v37, %v327_v36  ;;  %v332_v39 = vsel %vm328_vm4, 0.0, %v325_v37  ;;  %439 = vmatpush1.msra.mxu0 %v348_v34 }
  0xa4   : > { %v333_v40 = vmul.f32 %v332_v39, %v278_v22  ;;  %v334_v41 = vmul.f32 %v329_v38, %v282_v19  ;;  %440 = vmatprep.subr.mxu0 %v734_v0 }
  0xa5   : > { %441 = vmatpush1.msra.mxu0 %v738_v1 }
  0xa6   : > { %v303_v42 = vpop.permute.xlu1 %302  ;;  %v301_v43 = vpop.permute.xlu0 %300  ;;  %442 = vmatprep.subr.mxu0 %v334_v41 }
  0xa7   : > { %v305_v44 = vsel %vm304_vm5, %v301_v43, %v303_v42  ;;  %v308_v45 = vsel %vm304_vm5, 0.0, %v301_v43  ;;  %443 = vmatpush1.msra.mxu0 %v333_v40 }
  0xa8   : > { %v320_v46 = vmul.f32 %v313_v16, %v308_v45  ;;  %v321_v47 = vmul.f32 %v317_v10, %v305_v44 }
  0xaa   : > { %v268_v48 = vpop.permute.xlu1 %267  ;;  %v266_v49 = vpop.permute.xlu0 %265  ;;  %444 = vmatprep.subr.mxu0 %v321_v47 }
  0xab   : > { %445 = vmatpush1.msra.mxu0 %v320_v46  ;;  %v270_v50 = vsel %vm269_vm6, %v266_v49, %v268_v48  ;;  %v273_v51 = vsel %vm269_vm6, 0.0, %v266_v49 }
  0xac   : > { %v286_v55 = vmul.f32 %v282_v19, %v270_v50  ;;  %v285_v56 = vmul.f32 %v278_v22, %v273_v51 }
  0xae   : > { %v292_v52 = vpop.permute.xlu1 %291  ;;  %v290_v53 = vpop.permute.xlu0 %289 }
  0xaf   : > { %v294_v54 = vsel %vm293_vm7, %v290_v53, %v292_v52 }
  0xb0   : > { %446 = vmatprep.subr.mxu0 %v294_v54 }
  0xb1   : > { %596 = vmatpush1.msk.msra.mxu0 %vm595_vm8, %v290_v53 }
  0xb2   : > { %448 = vmatprep.subr.mxu0 %v286_v55 }
  0xb3   : > { %449 = vmatpush1.msra.mxu0 %v285_v56 }
  0xb4   : > { %588 = vmatmul.mubr.msk.f32.vlgmr.msra.gmra.mxu0 %vm414_vm9, %v389_v57 }
  0xbb   : > { %v412_v58 = vpop.permute.xlu0 %411 }
 0x174   : > { %v484_v59 = vpop.f32.mrf.mxu0 }
 0x175   : > { %v485_v61 = vadd.f32 %v484_v59, %v412_v58 }
 0x176   : > { %v486_v62 = vpop.f32.mrf.mxu0 }
 0x177   : > { %v491_v0 = vadd.f32 %v489_v60, %v485_v61  ;;  %v487_v1 = vadd.f32 %v486_v62, %v412_v58 }
 0x179   : > { %493 = vst [vmem:[%s257_s25] sm:$0xff] %v491_v0  ;;  %v492_v2 = vadd.f32 %v490_v63, %v487_v1 }
 0x17b   : > { %494 = vst [vmem:[%s257_s25 + $0x8] sm:$0xff] %v492_v2 }
 0x17c PF: > { %s16_s18 = sadd.s32 1, %s663_s18  }
 0x17d   : > { %p13_p1 = scmp.ge.s32.totalorder %s16_s18, 4  }
 0x17f   :  { %15 = sbr.rel (!%p13_p1) target bundleno = 1 (0x1), region = 79 }
 0x184   :  { %516 = vsyncpa [#allocation4], 1 }
 0x185   :  { %518 = vsyncpa [#allocation4 + $0x1], 1 }

// kernel: rrdbnet_forward.12
= control target key start
LH: loop header
LB: loop body
LE: loop exit
PB: predicated region body
PF: predicated region fallthrough
CT: control target
= control target key end

     0   :  { %9 = vsyncpa [#allocation4], 0  ;;  %s654_s15 = smov 0   ;;  %s707_s0 = inlined_call_operand.vmem [shape: f32[2,4,256], index: 0, kind: input, shape index: {}]   ;;  %s708_s1 = inlined_call_operand.vmem [shape: f32[2,256], index: 1, kind: input, shape index: {}]   ;;  %s709_s2 = inlined_call_operand.hbm [shape: f32[8,36], index: 2, kind: input, shape index: {}]   ;;  %s710_s3 = inlined_call_operand.vmem [shape: f32[8,1], index: 3, kind: input, shape index: {}]   ;;  %s711_s4 = inlined_call_operand.vmem [shape: f32[2,8,256], index: 4, kind: output, shape index: {}]  }
   0x1 LB: > { %s530_s16 = sadd.s32 4294967295, %s616_s15   ;;  %p532_p0 = scmp.ge.s32.totalorder %s616_s15, 1  ;;  %s616_s15 = sphi %s654_s15, %s15_s15  }
   0x2   : > { %p135_p1 = scmp.lt.s32.totalorder %s616_s15, 3  ;;  %p557_p3 = scmp.eq.s32.totalorder %s530_s16, 0 }
   0x3   : > { %s618_s18 = smov [#allocation3]  }
   0x4   : > { %p662_p2 = pnand %p532_p0, %p135_p1  ;;  %s151_s19 = sshll.u32 %s618_s18, 4  ;;  %s152_s19 = int_to_ptr.vmem [resolvable:$true] %s151_s19 }
   0x5   : > { %s591_s20 = scalar_lea.vmem %s152_s19, 128  ;;  %p599_p10 = scmp.lt.s32.totalorder %s152_s19, %s152_s19 }
   0x6   : > { %p553_p4 = pneg %p662_p2  ;;  %p592_p7 = scmp.ne.s32.totalorder %s152_s19, %s591_s20 }
   0x7   : > { %p600_p11 = scmp.lt.s32.totalorder %s591_s20, %s591_s20 }
   0x8   : > { %p554_p5 = pnand %p557_p3, %p553_p4 }
   0x9   : > { %p601_p12 = por %p600_p11, %p599_p10 }
   0xa   : > { %p582_p6 = pneg %p554_p5 }
   0xc   : > { %p594_p8 = pnand %p592_p7, %p582_p6 }
   0xe   : > { %p595_p9 = pneg %p594_p8 }
  0x10   : > { %p602_p13 = pnand %p601_p12, %p595_p9 }
  0x12   : > { %605 = shalt.err (!%p602_p13)
}
  0x13   : > { %556 = dma.hbm_to_vmem [thread:$0]  (!%p554_p5), %s709_s2, 128, %s152_s19, [#allocation4]  }
  0x14   : > { %175 = sbr.rel (%p662_p2) target bundleno = 386 (0x182), region = 36 }
  0x19   : > { %611 = dma.done.wait (%p557_p3), [#allocation4], 128  }
  0x1a   : > { %613 = vsyncadd (%p557_p3), [#allocation4], 4294967168  ;;  %p201_p0 = scmp.lt.s32.totalorder %s530_s16, 1  ;;  %s619_s27 = smov 127   ;;  %v626_v2 = vmov 0.0   ;;  %v628_v3 = vmov 0   ;;  %v227_v5 = vlaneseq }
  0x1b   : > { %s620_s28 = smov 111   ;;  %s621_s29 = smov 113   ;;  %454 = vmatprep.mubr.f32.mxu0 %v626_v2  ;;  %578 = vset.pattern.permute.xlu0 %v628_v3  ;;  %v373_v4 = vld [vmem:[%s710_s3] sm:$0xff]  ;;  %vm306_vm0 = vcmask 1039360   ;;  %vm353_vm1 = vcmask 908288   ;;  %vm325_vm2 = vcmask 924672  }
  0x1c   : > { %s714_s16 = smov (!%p201_p0, %s530_s16), 1  ;;  %s622_s30 = smov 112   ;;  %v228_v6 = vshrl.u32 %v227_v5, 7  ;;  %v541_v9 = vld [vmem:[%s708_s1 + $0x1] ss:$2 sm:$0x3] }
  0x1d   : > { %s547_s23 = sshll.u32 %s714_s16, 3  ;;  %s623_s5 = smov 1   ;;  %v211_v12 = vld [vmem:[%s708_s1] ss:$2 sm:$0x3]  ;;  %vm338_vm3 = vcmask 916480  }
  0x1e   : > { %s205_s26 = scalar_lea.vmem %s707_s0, %s547_s23  ;;  %s624_s6 = smov 15   ;;  %v229_v7 = vsub.s32 0, %v228_v6  ;;  %v233_v8 = vsub.s32 1, %v228_v6  ;;  %vm383_vm4 = vcmask 1043456   ;;  %vm284_vm5 = vcmask 7168  }
  0x1f   : > { %v214_v0 = vld [vmem:[%s205_s26] sm:$0xff]  ;;  %s625_s7 = smov 17   ;;  %s627_s8 = smov 16   ;;  %vm260_vm6 = vcmask 121856   ;;  %vm221_vm7 = vcmask 138240   ;;  %vm245_vm8 = vcmask 130048  }
  0x20   : > { %302 = vrot.lane.b32.xlu1 %v214_v0, %s619_s27  ;;  %300 = vst [vmem:[#allocation2 + $0x48] sm:$0xf] %v214_v0  ;;  %349 = vrot.lane.b32.xlu0 %v214_v0, %s620_s28  ;;  %v216_v1 = vcombine.high %v214_v0, %v214_v0  ;;  %v269_v13 = vrot.slane %v541_v9, %v229_v7  ;;  %vm379_vm9 = vcmask 293888   ;;  %s548_s17 = sshll.u32 %s714_s16, 4 }
  0x21   : > { %v273_v14 = vrot.slane %v541_v9, %v233_v8  ;;  %v691_v17 = vrot.slane %v211_v12, %v233_v8  ;;  %v230_v34 = vrot.slane %v211_v12, %v229_v7  ;;  %s210_s20 = scalar_lea.vmem %s711_s4, %s548_s17 }
  0x22   : > { %301 = vst [vmem:[#allocation2 + $0x28] sm:$0xf] %v216_v1 }
  0x24   : > { %304 = vrot.lane.b32.xlu1 %v216_v1, %s619_s27  ;;  %351 = vrot.lane.b32.xlu0 %v216_v1, %s620_s28 }
  0x28   : > { %323 = vrot.lane.b32.xlu1 %v216_v1, %s621_s29  ;;  %336 = vrot.lane.b32.xlu0 %v216_v1, %s622_s30 }
  0x2c   : > { %334 = vrot.lane.b32.xlu1 %v214_v0, %s622_s30  ;;  %321 = vrot.lane.b32.xlu0 %v214_v0, %s621_s29 }
  0x30   : > { %282 = vrot.lane.b32.xlu1 %v216_v1, %s623_s5  ;;  %280 = vrot.lane.b32.xlu0 %v214_v0, %s623_s5 }
  0x34   : > { %258 = vrot.lane.b32.xlu1 %v216_v1, %s624_s6  ;;  %256 = vrot.lane.b32.xlu0 %v214_v0, %s624_s6 }
  0x38   : > { %219 = vrot.lane.b32.xlu1 %v216_v1, %s625_s7  ;;  %217 = vrot.lane.b32.xlu0 %v214_v0, %s625_s7 }
  0x3c   : > { %243 = vrot.lane.b32.xlu1 %v216_v1, %s627_s8  ;;  %241 = vrot.lane.b32.xlu0 %v214_v0, %s627_s8 }
  0x40   : > { %376 = vperm.xlu0 %578, %v373_v4  }
  0x92   : > { %v303_v10 = vpop.permute.xlu1 %302  ;;  %v350_v11 = vpop.permute.xlu0 %349 }
  0x96   : > { %v305_v15 = vpop.permute.xlu1 %304  ;;  %v352_v16 = vpop.permute.xlu0 %351 }
  0x97   : > { %v307_v18 = vsel %vm306_vm0, %v303_v10, %v305_v15  ;;  %v310_v19 = vsel %vm306_vm0, %v305_v15, 0.0  ;;  %v354_v20 = vsel %vm353_vm1, %v350_v11, %v352_v16  ;;  %v357_v21 = vsel %vm353_vm1, %v352_v16, 0.0 }
  0x98   : > { %v311_v22 = vmul.f32 %v307_v18, %v269_v13  ;;  %v312_v23 = vmul.f32 %v310_v19, %v273_v14  ;;  %v358_v24 = vmul.f32 %v354_v20, %v269_v13  ;;  %v359_v25 = vmul.f32 %v357_v21, %v273_v14 }
  0x9a   : > { %v315_v26 = vrot.slane %v311_v22, 4  ;;  %v316_v27 = vrot.slane %v312_v23, 4  ;;  %360 = vst [vmem:[#allocation2 + $0x40] sm:$0xf] %v358_v24  ;;  %361 = vst [vmem:[#allocation2 + $0x38] sm:$0xf] %v359_v25  ;;  %v324_v28 = vpop.permute.xlu1 %323  ;;  %v337_v29 = vpop.permute.xlu0 %336 }
  0x9b   : > { %v329_v30 = vsel %vm325_vm2, %v324_v28, 0.0  ;;  %v341_v31 = vsel %vm338_vm3, %v337_v29, 0.0 }
  0x9c   : > { %319 = vst [vmem:[#allocation2 + $0x48] sm:$0xf0] %v315_v26  ;;  %320 = vst [vmem:[#allocation2 + $0x28] sm:$0xf0] %v316_v27  ;;  %v331_v32 = vmul.f32 %v329_v30, %v691_v17  ;;  %v344_v33 = vrot.slane %v341_v31, 4 }
  0x9e   : > { %333 = vst [vmem:[#allocation2 + $0x20] sm:$0xf] %v331_v32  ;;  %348 = vst [vmem:[#allocation2 + $0x20] sm:$0xf0] %v344_v33  ;;  %v335_v35 = vpop.permute.xlu1 %334  ;;  %v322_v36 = vpop.permute.xlu0 %321 }
  0x9f   : > { %v339_v37 = vsel %vm338_vm3, %v335_v35, %v337_v29  ;;  %v326_v38 = vsel %vm325_vm2, %v322_v36, %v324_v28 }
  0xa0   : > { %v343_v39 = vrot.slane %v339_v37, 4  ;;  %v330_v40 = vmul.f32 %v326_v38, %v230_v34 }
  0xa1   : > { %v372_v41 = vld [vmem:[#allocation2 + $0x38] sm:$0xf]  ;;  %v371_v42 = vld [vmem:[#allocation2 + $0x40] sm:$0xf] }
  0xa2   : > { %347 = vst [vmem:[#allocation2 + $0x8] sm:$0xf0] %v343_v39  ;;  %332 = vst [vmem:[#allocation2 + $0x8] sm:$0xf] %v330_v40  ;;  %v283_v43 = vpop.permute.xlu1 %282  ;;  %v281_v44 = vpop.permute.xlu0 %280  ;;  %542 = vmatprep.subr.msk.mxu0 %vm383_vm4, %v372_v41 }
  0xa3   : > { %v285_v45 = vsel %vm284_vm5, %v281_v44, %v283_v43  ;;  %v288_v46 = vsel %vm284_vm5, 0.0, %v281_v44  ;;  %543 = vmatpush1.msk.msra.mxu0 %vm383_vm4, %v371_v42  ;;  %v368_v61 = vld [vmem:[#allocation2 + $0x28] sm:$0xff] }
  0xa4   : > { %v289_v47 = vmul.f32 %v288_v46, %v230_v34  ;;  %v290_v48 = vmul.f32 %v285_v45, %v691_v17  ;;  %v367_v0 = vld [vmem:[#allocation2 + $0x48] sm:$0xff] }
  0xa5   : > { %v370_v49 = vld [vmem:[#allocation2 + $0x20] sm:$0xff] }
  0xa6   : > { %v293_v50 = vrot.slane %v289_v47, 4  ;;  %v294_v51 = vrot.slane %v290_v48, 4  ;;  %v259_v52 = vpop.permute.xlu1 %258  ;;  %v257_v53 = vpop.permute.xlu0 %256  ;;  %414 = vmatprep.subr.mxu0 %v370_v49 }
  0xa7   : > { %v261_v54 = vsel %vm260_vm6, %v257_v53, %v259_v52  ;;  %v264_v55 = vsel %vm260_vm6, 0.0, %v257_v53 }
  0xa8   : > { %297 = vst [vmem:[#allocation2 + $0x18] sm:$0xf0] %v293_v50  ;;  %298 = vst [vmem:[#allocation2 + $0x10] sm:$0xf0] %v294_v51  ;;  %v276_v56 = vmul.f32 %v269_v13, %v264_v55  ;;  %v277_v57 = vmul.f32 %v273_v14, %v261_v54  ;;  %v362_v13 = vld [vmem:[#allocation3] sm:$0xff] }
  0xa9   : > { %v369_v58 = vld [vmem:[#allocation2 + $0x8] sm:$0xff] }
  0xaa   : > { %278 = vst [vmem:[#allocation2 + $0x18] sm:$0xf] %v276_v56  ;;  %279 = vst [vmem:[#allocation2 + $0x10] sm:$0xf] %v277_v57  ;;  %v220_v59 = vpop.permute.xlu1 %219  ;;  %v218_v60 = vpop.permute.xlu0 %217  ;;  %415 = vmatpush1.msra.mxu0 %v369_v58 }
  0xab   : > { %v222_v62 = vsel %vm221_vm7, %v218_v60, %v220_v59  ;;  %v225_v63 = vsel %vm221_vm7, 0.0, %v218_v60  ;;  %416 = vmatprep.subr.mxu0 %v368_v61 }
  0xac   : > { %v237_v1 = vmul.f32 %v230_v34, %v225_v63  ;;  %v238_v2 = vmul.f32 %v691_v17, %v222_v62  ;;  %417 = vmatpush1.msra.mxu0 %v367_v0 }
  0xae   : > { %239 = vst [vmem:[#allocation2 + $0x30] sm:$0xf] %v237_v1  ;;  %240 = vst [vmem:[#allocation2] sm:$0xf] %v238_v2  ;;  %v244_v3 = vpop.permute.xlu1 %243  ;;  %v242_v4 = vpop.permute.xlu0 %241 }
  0xaf   : > { %v246_v5 = vsel %vm245_vm8, %v242_v4, %v244_v3  ;;  %v248_v6 = vsel %vm245_vm8, 0.0, %v242_v4 }
  0xb0   : > { %v250_v7 = vrot.slane %v248_v6, 4  ;;  %v251_v8 = vrot.slane %v246_v5, 4 }
  0xb1   : > { %v366_v9 = vld [vmem:[#allocation2 + $0x10] sm:$0xff]  ;;  %v365_v10 = vld [vmem:[#allocation2 + $0x18] sm:$0xff] }
  0xb2   : > { %254 = vst [vmem:[#allocation2 + $0x30] sm:$0xf0] %v250_v7  ;;  %255 = vst [vmem:[#allocation2] sm:$0xf0] %v251_v8  ;;  %418 = vmatprep.subr.mxu0 %v366_v9 }
  0xb3   : > { %419 = vmatpush1.msra.mxu0 %v365_v10 }
  0xb9   : > { %v364_v11 = vld [vmem:[#allocation2] sm:$0xff]  ;;  %v363_v12 = vld [vmem:[#allocation2 + $0x30] sm:$0xff] }
  0xba   : > { %420 = vmatprep.subr.mxu0 %v364_v11 }
  0xbb   : > { %421 = vmatpush1.msra.mxu0 %v363_v12  ;;  %v377_v14 = vpop.permute.xlu0 %376 }
  0xbc   : > { %544 = vmatmul.mubr.msk.f32.vlgmr.msra.gmra.mxu0 %vm379_vm9, %v362_v13 }
 0x17c   : > { %v456_v15 = vpop.f32.mrf.mxu0 }
 0x17d   : > { %v457_v16 = vadd.f32 %v456_v15, %v377_v14 }
 0x17e   : > { %v458_v17 = vpop.f32.mrf.mxu0 }
 0x17f   : > { %461 = vst [vmem:[%s210_s20] sm:$0xff] %v457_v16  ;;  %v459_v18 = vadd.f32 %v458_v17, %v377_v14 }
 0x181   : > { %462 = vst [vmem:[%s210_s20 + $0x8] sm:$0xff] %v459_v18 }
 0x182 PF: > { %s15_s15 = sadd.s32 1, %s616_s15  }
 0x183   : > { %p12_p1 = scmp.ge.s32.totalorder %s15_s15, 4  }
 0x185   :  { %14 = sbr.rel (!%p12_p1) target bundleno = 1 (0x1), region = 72 }
 0x18a   :  { %484 = vsyncpa [#allocation4], 1 }
 0x18b   :  { %486 = vsyncpa [#allocation4 + $0x1], 1 }

// kernel: rrdbnet_forward.13
= control target key start
LH: loop header
LB: loop body
LE: loop exit
PB: predicated region body
PF: predicated region fallthrough
CT: control target
= control target key end

     0   :  { %17 = vsyncpa [#allocation4], 0  ;;  %s3165_s0 = inlined_call_operand.vmem [shape: f32[2,8,256], index: 0, kind: input, shape index: {}]   ;;  %s3166_s1 = inlined_call_operand.vmem [shape: f32[2,256], index: 1, kind: input, shape index: {}]   ;;  %s3167_s2 = inlined_call_operand.hbm [shape: f32[8,72], index: 2, kind: input, shape index: {}]   ;;  %s3168_s3 = inlined_call_operand.hbm [shape: f32[8,144], index: 3, kind: input, shape index: {}]   ;;  %s3169_s4 = inlined_call_operand.hbm [shape: f32[8,216], index: 4, kind: input, shape index: {}]   ;;  %s3170_s5 = inlined_call_operand.hbm [shape: f32[8,288], index: 5, kind: input, shape index: {}]   ;;  %s3171_s6 = inlined_call_operand.hbm [shape: f32[8,360], index: 6, kind: input, shape index: {}]   ;;  %s3172_s7 = inlined_call_operand.vmem [shape: f32[8,1], index: 7, kind: input, shape index: {}]   ;;  %s3173_s8 = inlined_call_operand.vmem [shape: f32[8,1], index: 8, kind: input, shape index: {}]   ;;  %s3174_s9 = inlined_call_operand.vmem [shape: f32[8,1], index: 9, kind: input, shape index: {}]   ;;  %s3175_s10 = inlined_call_operand.vmem [shape: f32[8,1], index: 10, kind: input, shape index: {}]   ;;  %s3176_s11 = inlined_call_operand.vmem [shape: f32[8,1], index: 11, kind: input, shape index: {}]   ;;  %s3177_s12 = inlined_call_operand.vmem [shape: f32[2,8,256], index: 12, kind: output, shape index: {}]  }
   0x1   :  { %18 = vsyncpa [#allocation6], 0 }
   0x2   :  { %19 = vsyncpa [#allocation9], 0  ;;  %s2331_s21 = smov 0  }
   0x3 LB: > { %s2251_s22 = smov [#allocation5]   ;;  %s2337_s24 = sadd.s32 4294967295, %s2249_s21   ;;  %s2249_s21 = sphi %s2331_s21, %s25_s21  }
   0x4   : > { %s340_s23 = sshll.u32 %s2251_s22, 4  ;;  %p1956_p0 = scmp.ge.s32.totalorder %s2249_s21, 1  ;;  %s341_s23 = int_to_ptr.vmem [resolvable:$true] %s340_s23 }
   0x5   : > { %p313_p1 = scmp.lt.s32.totalorder %s2249_s21, 3  ;;  %p3178_p2 = scmp.eq.s32.totalorder %s2337_s24, 0 }
   0x6   : > { %s2252_s26 = smov [#allocation8]   ;;  %s2253_s28 = smov [#allocation3]  }
   0x7   : > { %p2342_p3 = pnand %p1956_p0, %p313_p1  ;;  %s362_s27 = sshll.u32 %s2252_s26, 4  ;;  %s363_s27 = int_to_ptr.vmem [resolvable:$true] %s362_s27 }
   0x8   : > { %s329_s29 = sshll.u32 %s2253_s28, 4  ;;  %s2254_s13 = smov [#allocation7]   ;;  %s2354_s29 = int_to_ptr.vmem [resolvable:$true] %s329_s29 }
   0x9   : > { %s3182_s25 = scalar_select %p2342_p3, 1, 0 }
   0xa   : > { %p2048_p4 = pneg %p2342_p3  ;;  %s351_s14 = sshll.u32 %s2254_s13, 4  ;;  %s2356_s14 = int_to_ptr.vmem [resolvable:$true] %s351_s14 }
   0xb   : > { %s2112_s16 = scalar_lea.vmem %s341_s23, 256  ;;  %p2120_p10 = scmp.lt.s32.totalorder %s341_s23, %s341_s23 }
   0xc   : > { %p2350_p5 = pnand %p3178_p2, %p2048_p4  ;;  %p2113_p7 = scmp.ne.s32.totalorder %s341_s23, %s2112_s16 }
   0xd   : > { %p2121_p11 = scmp.lt.s32.totalorder %s2112_s16, %s2112_s16 }
   0xe   : > { %p2360_p6 = pneg %p2350_p5 }
   0xf   : > { %p2122_p12 = por %p2121_p11, %p2120_p10 }
  0x10   : > { %p2115_p8 = pnand %p2113_p7, %p2360_p6 }
  0x12   : > { %p2116_p9 = pneg %p2115_p8 }
  0x14   : > { %p2123_p13 = pnand %p2122_p12, %p2116_p9 }
  0x16   : > { %2126 = shalt.err (!%p2123_p13)
}
  0x17   : > { %2054 = dma.hbm_to_vmem [thread:$0]  (!%p2350_p5), %s3168_s3, 256, %s341_s23, [#allocation6]  }
  0x18   : > { %s2138_s19 = scalar_lea.vmem %s363_s27, 384  ;;  %p2146_p2 = scmp.lt.s32.totalorder %s363_s27, %s363_s27 }
  0x19   : > { %p2139_p0 = scmp.ne.s32.totalorder %s363_s27, %s2138_s19  ;;  %p2147_p7 = scmp.lt.s32.totalorder %s2138_s19, %s2138_s19 }
  0x1b   : > { %p2141_p1 = pnand %p2139_p0, %p2360_p6  ;;  %p2148_p8 = por %p2147_p7, %p2146_p2 }
  0x1d   : > { %p2142_p4 = pneg %p2141_p1 }
  0x1f   : > { %p2149_p3 = pnand %p2148_p8, %p2142_p4 }
  0x21   : > { %2152 = shalt.err (!%p2149_p3)
}
  0x22   : > { %2060 = dma.hbm_to_vmem [thread:$0]  (!%p2350_p5), %s3170_s5, 384, %s363_s27, [#allocation9]  }
  0x23   : > { %s2164_s23 = scalar_lea.vmem %s2354_s29, 128  ;;  %p2172_p12 = scmp.lt.s32.totalorder %s2354_s29, %s2354_s29 }
  0x24   : > { %p2165_p9 = scmp.ne.s32.totalorder %s2354_s29, %s2164_s23  ;;  %p2173_p2 = scmp.lt.s32.totalorder %s2164_s23, %s2164_s23 }
  0x26   : > { %p2167_p10 = pnand %p2165_p9, %p2360_p6  ;;  %p2174_p13 = por %p2173_p2, %p2172_p12 }
  0x28   : > { %p2168_p11 = pneg %p2167_p10 }
  0x2a   : > { %p2175_p3 = pnand %p2174_p13, %p2168_p11 }
  0x2c   : > { %2178 = shalt.err (!%p2175_p3)
}
  0x2d   : > { %2051 = dma.hbm_to_vmem [thread:$0]  (!%p2350_p5), %s3167_s2, 128, %s2354_s29, [#allocation4]  }
  0x2e   : > { %s2190_s27 = scalar_lea.vmem %s2356_s14, 256  ;;  %p2198_p7 = scmp.lt.s32.totalorder %s2356_s14, %s2356_s14 }
  0x2f   : > { %p2191_p0 = scmp.ne.s32.totalorder %s2356_s14, %s2190_s27  ;;  %p2199_p8 = scmp.lt.s32.totalorder %s2190_s27, %s2190_s27 }
  0x31   : > { %p2193_p1 = pnand %p2191_p0, %p2360_p6  ;;  %p2200_p9 = por %p2199_p8, %p2198_p7 }
  0x33   : > { %p2194_p4 = pneg %p2193_p1 }
  0x35   : > { %p2201_p10 = pnand %p2200_p9, %p2194_p4 }
  0x37   : > { %2204 = shalt.err (!%p2201_p10)
}
  0x38   : > { %2057 = dma.hbm_to_vmem [thread:$0]  (!%p2350_p5), %s3169_s4, 256, %s2356_s14, [#allocation6]  }
  0x39   : > { %s2255_s29 = smov [#allocation10]  }
  0x3a   : > { %s373_s17 = sshll.u32 %s2255_s29, 4  ;;  %s374_s17 = int_to_ptr.vmem [resolvable:$true] %s373_s17 }
  0x3b   : > { %s2216_s18 = scalar_lea.vmem %s374_s17, 384  ;;  %p2224_p13 = scmp.lt.s32.totalorder %s374_s17, %s374_s17 }
  0x3c   : > { %p2217_p11 = scmp.ne.s32.totalorder %s374_s17, %s2216_s18  ;;  %p2225_p3 = scmp.lt.s32.totalorder %s2216_s18, %s2216_s18 }
  0x3e   : > { %p2219_p12 = pnand %p2217_p11, %p2360_p6  ;;  %p2226_p0 = por %p2225_p3, %p2224_p13 }
  0x40   : > { %p2220_p2 = pneg %p2219_p12 }
  0x42   : > { %p2227_p1 = pnand %p2226_p0, %p2220_p2 }
  0x44   : > { %2230 = shalt.err (!%p2227_p1)
}
  0x45   : > { %2063 = dma.hbm_to_vmem [thread:$0]  (!%p2350_p5), %s3171_s6, 384, %s374_s17, [#allocation9]  }
  0x46   : > { %p3185_p4 = scmp.ne.s32.totalorder %s3182_s25, 0 }
  0x47   : > { %p3186_p7 = scmp.eq.s32.totalorder (!%p3185_p4), %s2337_s24, 0 }
  0x48   : > { %409 = sbr.rel (%p3185_p4) target bundleno = 1871 (0x74f), region = 68 }
  0x4d   : > { %2236 = dma.done.wait (%p3186_p7), [#allocation4], 128   ;;  %p3187_p6 = pmov %p3186_p7 }
  0x4f   : > { %2238 = vsyncadd (%p3187_p6), [#allocation4], 4294967168  ;;  %p3188_p8 = pmov %p3187_p6 }
  0x50   : > { %p3189_p9 = pmov %p3187_p6 }
  0x51   : > { %2240 = dma.done.wait (%p3188_p8), [#allocation6], 512  }
  0x52   : > { %2242 = vsyncadd (%p3189_p9), [#allocation6], 4294966784  ;;  %p3190_p10 = pmov %p3187_p6 }
  0x53   : > { %p3191_p5 = pmov %p3187_p6 }
  0x54   : > { %2244 = dma.done.wait (%p3190_p10), [#allocation9], 768  }
  0x55   : > { %2246 = vsyncadd (%p3191_p5), [#allocation9], 4294966528  ;;  %p467_p11 = scmp.lt.s32.totalorder %s2337_s24, 1  ;;  %s2256_s22 = smov 113   ;;  %v3180_v2 = vmov 0.0   ;;  %v2263_v3 = vmov 0   ;;  %v494_v5 = vlaneseq }
  0x56   : > { %s2257_s23 = smov 111   ;;  %s2258_s26 = smov 112   ;;  %701 = vmatprep.mubr.f32.mxu0 %v3180_v2  ;;  %2097 = vset.pattern.permute.xlu0 %v2263_v3  ;;  %v627_v4 = vld [vmem:[%s3172_s7] sm:$0xff]  ;;  %vm599_vm0 = vcmask 908288   ;;  %vm575_vm1 = vcmask 924672   ;;  %vm588_vm2 = vcmask 916480  }
  0x57   : > { %s3196_s24 = smov (!%p467_p11, %s2337_s24), 1  ;;  %s2259_s28 = smov 127   ;;  %2098 = vset.pattern.permute.xlu1 %v2263_v3  ;;  %v495_v6 = vshrl.u32 %v494_v5, 7  ;;  %v1973_v8 = vld [vmem:[%s3166_s1 + $0x1] ss:$2 sm:$0x3] }
  0x58   : > { %s1981_s25 = sshll.u32 %s3196_s24, 4  ;;  %s2260_s27 = smov 1   ;;  %v477_v14 = vld [vmem:[%s3166_s1] ss:$2 sm:$0x3]  ;;  %vm562_vm3 = vcmask 1039360  }
  0x59   : > { %s2433_s15 = scalar_lea.vmem %s3165_s0, %s1981_s25  ;;  %s2262_s13 = smov 15   ;;  %v500_v7 = vsub.s32 1, %v495_v6  ;;  %v496_v10 = vsub.s32 0, %v495_v6  ;;  %vm547_vm4 = vcmask 7168   ;;  %vm523_vm5 = vcmask 121856   ;;  %v608_v58 = vld [vmem:[#allocation3] sm:$0xff] }
  0x5a   : > { %v2436_v0 = vld [vmem:[%s2433_s15 + $0x8] sm:$0xff]  ;;  %v2443_v1 = vld [vmem:[%s2433_s15] sm:$0xff]  ;;  %s2264_s16 = smov 17   ;;  %s2265_s29 = smov 16   ;;  %vm488_vm6 = vcmask 138240   ;;  %vm512_vm7 = vcmask 130048  }
  0x5b   : > { %573 = vrot.lane.b32.xlu1 %v2436_v0, %s2256_s22  ;;  %597 = vrot.lane.b32.xlu0 %v2436_v0, %s2257_s23  ;;  %v2480_v9 = vrot.slane %v1973_v8, %v500_v7  ;;  %v2489_v16 = vrot.slane %v1973_v8, %v496_v10  ;;  %v2492_v19 = vrot.slane %v477_v14, %v500_v7  ;;  %vm2557_vm8 = vmneg %vm512_vm7  ;;  %vm633_vm9 = vcmask 588800   ;;  %v848_v7 = vld [vmem:[%s3173_s8] sm:$0xff]  ;;  %v811_v8 = vld [vmem:[#allocation5 + $0x8] sm:$0xff] }
  0x5c   : > { %v2496_v22 = vrot.slane %v477_v14, %v496_v10  ;;  %1975 = vmatprep.mubr.msk.f32.mxu1 %vm512_vm7, %v811_v8  ;;  %vm1092_vm14 = vcmask 719872  }
  0x5f   : > { %571 = vrot.lane.b32.xlu1 %v2443_v1, %s2256_s22  ;;  %595 = vrot.lane.b32.xlu0 %v2443_v1, %s2257_s23 }
  0x63   : > { %586 = vrot.lane.b32.xlu1 %v2436_v0, %s2258_s26  ;;  %584 = vrot.lane.b32.xlu0 %v2443_v1, %s2258_s26 }
  0x67   : > { %558 = vrot.lane.b32.xlu1 %v2443_v1, %s2259_s28  ;;  %560 = vrot.lane.b32.xlu0 %v2436_v0, %s2259_s28 }
  0x6b   : > { %545 = vrot.lane.b32.xlu1 %v2436_v0, %s2260_s27  ;;  %543 = vrot.lane.b32.xlu0 %v2443_v1, %s2260_s27 }
  0x6f   : > { %521 = vrot.lane.b32.xlu1 %v2436_v0, %s2262_s13  ;;  %519 = vrot.lane.b32.xlu0 %v2443_v1, %s2262_s13 }
  0x73   : > { %486 = vrot.lane.b32.xlu1 %v2436_v0, %s2264_s16  ;;  %484 = vrot.lane.b32.xlu0 %v2443_v1, %s2264_s16 }
  0x77   : > { %510 = vrot.lane.b32.xlu1 %v2436_v0, %s2265_s29  ;;  %508 = vrot.lane.b32.xlu0 %v2443_v1, %s2265_s29 }
  0x7b   : > { %630 = vperm.xlu0 %2097, %v627_v4  }
  0xcd   : > { %v574_v11 = vpop.permute.xlu1 %573  ;;  %v598_v12 = vpop.permute.xlu0 %597 }
  0xce   : > { %v603_v13 = vsel %vm599_vm0, %v598_v12, 0.0  ;;  %v579_v21 = vsel %vm575_vm1, %v574_v11, 0.0 }
  0xcf   : > { %v2487_v15 = vmul.f32 %v603_v13, %v2480_v9  ;;  %v2506_v27 = vmul.f32 %v579_v21, %v2492_v19 }
  0xd1   : > { %v572_v17 = vpop.permute.xlu1 %571  ;;  %v596_v18 = vpop.permute.xlu0 %595  ;;  %651 = vmatprep.subr.mxu0 %v2487_v15 }
  0xd2   : > { %v600_v20 = vsel %vm599_vm0, %v596_v18, %v598_v12  ;;  %v576_v24 = vsel %vm575_vm1, %v572_v17, %v574_v11 }
  0xd3   : > { %v2499_v23 = vmul.f32 %v600_v20, %v2489_v16  ;;  %v2515_v29 = vmul.f32 %v576_v24, %v2496_v22 }
  0xd5   : > { %v2502_v25 = vpop.permute.xlu1 %586  ;;  %v585_v26 = vpop.permute.xlu0 %584  ;;  %652 = vmatpush1.msra.mxu0 %v2499_v23 }
  0xd6   : > { %v2510_v28 = vsel %vm588_vm2, %v585_v26, %v2502_v25  ;;  %1983 = vmatprep.subr.msk.mxu0 %vm588_vm2, %v2502_v25 }
  0xd7   : > { %654 = vmatpush1.msra.mxu0 %v2510_v28 }
  0xd8   : > { %655 = vmatprep.subr.mxu0 %v2506_v27 }
  0xd9   : > { %v559_v30 = vpop.permute.xlu1 %558  ;;  %v561_v31 = vpop.permute.xlu0 %560  ;;  %656 = vmatpush1.msra.mxu0 %v2515_v29 }
  0xda   : > { %v563_v32 = vsel %vm562_vm3, %v559_v30, %v561_v31  ;;  %v566_v33 = vsel %vm562_vm3, %v561_v31, 0.0 }
  0xdb   : > { %v2523_v34 = vmul.f32 %v563_v32, %v2489_v16  ;;  %v2526_v35 = vmul.f32 %v566_v33, %v2480_v9 }
  0xdd   : > { %v546_v36 = vpop.permute.xlu1 %545  ;;  %v544_v37 = vpop.permute.xlu0 %543  ;;  %657 = vmatprep.subr.mxu0 %v2526_v35 }
  0xde   : > { %v548_v38 = vsel %vm547_vm4, %v544_v37, %v546_v36  ;;  %v551_v39 = vsel %vm547_vm4, 0.0, %v544_v37  ;;  %658 = vmatpush1.msra.mxu0 %v2523_v34 }
  0xdf   : > { %v2533_v40 = vmul.f32 %v551_v39, %v2496_v22  ;;  %v2536_v41 = vmul.f32 %v548_v38, %v2492_v19  ;;  %659 = vmatprep.subr.mxu0 %v2436_v0 }
  0xe0   : > { %660 = vmatpush1.msra.mxu0 %v2443_v1 }
  0xe1   : > { %v522_v42 = vpop.permute.xlu1 %521  ;;  %v520_v43 = vpop.permute.xlu0 %519  ;;  %661 = vmatprep.subr.mxu0 %v2536_v41 }
  0xe2   : > { %v524_v44 = vsel %vm523_vm5, %v520_v43, %v522_v42  ;;  %v527_v45 = vsel %vm523_vm5, 0.0, %v520_v43  ;;  %662 = vmatpush1.msra.mxu0 %v2533_v40 }
  0xe3   : > { %v2545_v46 = vmul.f32 %v2489_v16, %v527_v45  ;;  %v2548_v47 = vmul.f32 %v2480_v9, %v524_v44 }
  0xe5   : > { %v487_v48 = vpop.permute.xlu1 %486  ;;  %v485_v49 = vpop.permute.xlu0 %484  ;;  %663 = vmatprep.subr.mxu0 %v2548_v47 }
  0xe6   : > { %664 = vmatpush1.msra.mxu0 %v2545_v46  ;;  %v489_v50 = vsel %vm488_vm6, %v485_v49, %v487_v48  ;;  %v492_v51 = vsel %vm488_vm6, 0.0, %v485_v49 }
  0xe7   : > { %v2566_v56 = vmul.f32 %v2492_v19, %v489_v50  ;;  %v2570_v57 = vmul.f32 %v2496_v22, %v492_v51 }
  0xe9   : > { %v511_v52 = vpop.permute.xlu1 %510  ;;  %v2554_v53 = vpop.permute.xlu0 %508 }
  0xea   : > { %v2563_v55 = vsel %vm512_vm7, %v2554_v53, %v511_v52 }
  0xeb   : > { %665 = vmatprep.subr.mxu0 %v2563_v55 }
  0xec   : > { %1985 = vmatpush1.msk.msra.mxu0 %vm2557_vm8, %v2554_v53 }
  0xed   : > { %667 = vmatprep.subr.mxu0 %v2566_v56 }
  0xee   : > { %668 = vmatpush1.msra.mxu0 %v2570_v57 }
  0xef   : > { %1974 = vmatmul.mubr.msk.f32.vlgmr.msra.gmra.mxu0 %vm633_vm9, %v608_v58 }
  0xf6   : > { %v631_v59 = vpop.permute.xlu0 %630 }
 0x1af   : > { %v703_v60 = vpop.f32.mrf.mxu0 }
 0x1b0   : > { %v704_v61 = vadd.f32 %v703_v60, %v631_v59 }
 0x1b1   : > { %v705_v62 = vpop.f32.mrf.mxu0 }
 0x1b2   : > { %vm708_vm10 = vcmp.gt.f32.partialorder %v704_v61, 0.0  ;;  %v710_v63 = vmul.f32 0.2, %v704_v61  ;;  %v706_v3 = vadd.f32 %v705_v62, %v631_v59 }
 0x1b4   : > { %v2577_v4 = vsel %vm708_vm10, %v704_v61, %v710_v63  ;;  %v711_v5 = vmul.f32 0.2, %v706_v3  ;;  %vm709_vm11 = vcmp.gt.f32.partialorder %v706_v3, 0.0  ;;  %vm1350_vm10 = vcmask 261120  }
 0x1b5   : > { %750 = vrot.lane.b32.xlu0 %v2577_v4, %s2260_s27  ;;  %776 = vrot.lane.b32.xlu1 %v2577_v4, %s2256_s22 }
 0x1b6   : > { %v2583_v6 = vsel %vm709_vm11, %v706_v3, %v711_v5 }
 0x1b9   : > { %766 = vrot.lane.b32.xlu0 %v2583_v6, %s2259_s28  ;;  %764 = vrot.lane.b32.xlu1 %v2577_v4, %s2259_s28 }
 0x1bd   : > { %738 = vrot.lane.b32.xlu0 %v2577_v4, %s2262_s13  ;;  %778 = vrot.lane.b32.xlu1 %v2583_v6, %s2256_s22 }
 0x1c1   : > { %716 = vrot.lane.b32.xlu0 %v2577_v4, %s2264_s16  ;;  %752 = vrot.lane.b32.xlu1 %v2583_v6, %s2260_s27 }
 0x1c5   : > { %728 = vrot.lane.b32.xlu0 %v2577_v4, %s2265_s29  ;;  %740 = vrot.lane.b32.xlu1 %v2583_v6, %s2262_s13 }
 0x1c9   : > { %800 = vrot.lane.b32.xlu0 %v2583_v6, %s2257_s23  ;;  %718 = vrot.lane.b32.xlu1 %v2583_v6, %s2264_s16 }
 0x1cd   : > { %788 = vrot.lane.b32.xlu0 %v2577_v4, %s2258_s26  ;;  %730 = vrot.lane.b32.xlu1 %v2583_v6, %s2265_s29 }
 0x1d1   : > { %851 = vperm.xlu0 %2097, %v848_v7   ;;  %798 = vrot.lane.b32.xlu1 %v2577_v4, %s2257_s23 }
 0x1d5   : > { %790 = vrot.lane.b32.xlu1 %v2583_v6, %s2258_s26 }
 0x227   : > { %v751_v10 = vpop.permute.xlu0 %750  ;;  %v777_v11 = vpop.permute.xlu1 %776 }
 0x228   : > { %v757_v37 = vsel %vm547_vm4, 0.0, %v751_v10 }
 0x229   : > { %v2650_v43 = vmul.f32 %v757_v37, %v2496_v22 }
 0x22b   : > { %v765_v12 = vpop.permute.xlu1 %764  ;;  %v767_v13 = vpop.permute.xlu0 %766 }
 0x22c   : > { %v771_v17 = vsel %vm562_vm3, %v767_v13, 0.0  ;;  %v768_v21 = vsel %vm562_vm3, %v765_v12, %v767_v13  ;;  %v810_v13 = vld [vmem:[#allocation5] sm:$0xff] }
 0x22d   : > { %v2628_v30 = vmul.f32 %v771_v17, %v2480_v9  ;;  %v2633_v33 = vmul.f32 %v768_v21, %v2489_v16 }
 0x22f   : > { %v779_v14 = vpop.permute.xlu1 %778  ;;  %v739_v31 = vpop.permute.xlu0 %738 }
 0x230   : > { %v780_v18 = vsel %vm575_vm1, %v777_v11, %v779_v14  ;;  %v783_v20 = vsel %vm575_vm1, %v779_v14, 0.0  ;;  %v745_v38 = vsel %vm523_vm5, 0.0, %v739_v31 }
 0x231   : > { %v2622_v24 = vmul.f32 %v780_v18, %v2496_v22  ;;  %v2625_v26 = vmul.f32 %v783_v20, %v2492_v19  ;;  %v2661_v49 = vmul.f32 %v745_v38, %v2489_v16 }
 0x233   : > { %857 = vmatprep.subr.mxu1 %v2625_v26  ;;  %1096 = vmatprep.subr.mxu0 %v2625_v26  ;;  %v753_v32 = vpop.permute.xlu1 %752  ;;  %v717_v45 = vpop.permute.xlu0 %716 }
 0x234   : > { %v754_v36 = vsel %vm547_vm4, %v751_v10, %v753_v32  ;;  %858 = vmatpush1.msra.mxu1 %v2622_v24  ;;  %1097 = vmatpush1.msra.mxu0 %v2622_v24  ;;  %v723_v52 = vsel %vm488_vm6, 0.0, %v717_v45 }
 0x235   : > { %859 = vmatprep.subr.mxu1 %v2628_v30  ;;  %1098 = vmatprep.subr.mxu0 %v2628_v30  ;;  %v2645_v39 = vmul.f32 %v754_v36, %v2492_v19  ;;  %v2683_v62 = vmul.f32 %v723_v52, %v2496_v22 }
 0x236   : > { %860 = vmatpush1.msra.mxu1 %v2633_v33  ;;  %1099 = vmatpush1.msra.mxu0 %v2633_v33 }
 0x237   : > { %861 = vmatprep.subr.mxu1 %v2583_v6  ;;  %1100 = vmatprep.subr.mxu0 %v2583_v6  ;;  %v741_v42 = vpop.permute.xlu1 %740  ;;  %v2671_v58 = vpop.permute.xlu0 %728 }
 0x238   : > { %v742_v44 = vsel %vm523_vm5, %v739_v31, %v741_v42  ;;  %862 = vmatpush1.msra.mxu1 %v2577_v4  ;;  %1101 = vmatpush1.msra.mxu0 %v2577_v4  ;;  %v1031_v42 = vld [vmem:[#allocation7 + $0x8] sm:$0xff] }
 0x239   : > { %v2656_v48 = vmul.f32 %v742_v44, %v2480_v9  ;;  %863 = vmatprep.subr.mxu1 %v2645_v39  ;;  %1102 = vmatprep.subr.mxu0 %v2645_v39  ;;  %v1086_v44 = vld [vmem:[%s3174_s9] sm:$0xff] }
 0x23a   : > { %864 = vmatpush1.msra.mxu1 %v2650_v43  ;;  %1103 = vmatpush1.msra.mxu0 %v2650_v43 }
 0x23b   : > { %865 = vmatprep.subr.mxu1 %v2656_v48  ;;  %1104 = vmatprep.subr.mxu0 %v2656_v48  ;;  %v719_v50 = vpop.permute.xlu1 %718  ;;  %v801_v63 = vpop.permute.xlu0 %800 }
 0x23c   : > { %866 = vmatpush1.msra.mxu1 %v2661_v49  ;;  %1105 = vmatpush1.msra.mxu0 %v2661_v49  ;;  %v720_v51 = vsel %vm488_vm6, %v717_v45, %v719_v50  ;;  %v805_v5 = vsel %vm599_vm0, %v801_v63, 0.0 }
 0x23d   : > { %v2678_v61 = vmul.f32 %v720_v51, %v2492_v19  ;;  %v2736_v8 = vmul.f32 %v805_v5, %v2480_v9  ;;  %1976 = vmatprep.mubr.msk.f32.mxu0 %vm1092_vm14, %v1031_v42 }
 0x23f   : > { %v731_v59 = vpop.permute.xlu1 %730  ;;  %v789_v12 = vpop.permute.xlu0 %788 }
 0x240   : > { %v2675_v60 = vsel %vm512_vm7, %v2671_v58, %v731_v59 }
 0x241   : > { %867 = vmatprep.subr.mxu1 %v2675_v60  ;;  %1106 = vmatprep.subr.mxu0 %v2675_v60 }
 0x242   : > { %1987 = vmatpush1.msk.msra.mxu1 %vm2557_vm8, %v2671_v58  ;;  %1993 = vmatpush1.msk.msra.mxu0 %vm2557_vm8, %v2671_v58 }
 0x243   : > { %869 = vmatprep.subr.mxu1 %v2678_v61  ;;  %1108 = vmatprep.subr.mxu0 %v2678_v61  ;;  %v799_v3 = vpop.permute.xlu1 %798 }
 0x244   : > { %870 = vmatpush1.msra.mxu1 %v2683_v62  ;;  %1109 = vmatpush1.msra.mxu0 %v2683_v62  ;;  %v802_v7 = vsel %vm599_vm0, %v799_v3, %v801_v63 }
 0x245   : > { %871 = vmatprep.subr.mxu1 %v2487_v15  ;;  %1110 = vmatprep.subr.mxu0 %v2487_v15  ;;  %v2741_v10 = vmul.f32 %v802_v7, %v2489_v16 }
 0x246   : > { %872 = vmatpush1.msra.mxu1 %v2499_v23  ;;  %1111 = vmatpush1.msra.mxu0 %v2499_v23 }
 0x247   : > { %1988 = vmatprep.subr.msk.mxu1 %vm588_vm2, %v2502_v25  ;;  %1994 = vmatprep.subr.msk.mxu0 %vm588_vm2, %v2502_v25  ;;  %v2743_v11 = vpop.permute.xlu1 %790 }
 0x248   : > { %874 = vmatpush1.msra.mxu1 %v2510_v28  ;;  %1113 = vmatpush1.msra.mxu0 %v2510_v28  ;;  %v2753_v14 = vsel %vm588_vm2, %v789_v12, %v2743_v11 }
 0x249   : > { %875 = vmatprep.subr.mxu1 %v2506_v27  ;;  %1114 = vmatprep.subr.mxu0 %v2506_v27 }
 0x24a   : > { %876 = vmatpush1.msra.mxu1 %v2515_v29  ;;  %1115 = vmatpush1.msra.mxu0 %v2515_v29 }
 0x24b   : > { %877 = vmatprep.subr.mxu1 %v2526_v35  ;;  %1116 = vmatprep.subr.mxu0 %v2526_v35 }
 0x24c   : > { %878 = vmatpush1.msra.mxu1 %v2523_v34  ;;  %1117 = vmatpush1.msra.mxu0 %v2523_v34  ;;  %v852_v17 = vpop.permute.xlu0 %851 }
 0x24d   : > { %879 = vmatprep.subr.mxu1 %v2436_v0  ;;  %1118 = vmatprep.subr.mxu0 %v2436_v0 }
 0x24e   : > { %880 = vmatpush1.msra.mxu1 %v2443_v1  ;;  %1119 = vmatpush1.msra.mxu0 %v2443_v1 }
 0x24f   : > { %881 = vmatprep.subr.mxu1 %v2536_v41  ;;  %1120 = vmatprep.subr.mxu0 %v2536_v41 }
 0x250   : > { %882 = vmatpush1.msra.mxu1 %v2533_v40  ;;  %1121 = vmatpush1.msra.mxu0 %v2533_v40 }
 0x251   : > { %883 = vmatprep.subr.mxu1 %v2548_v47  ;;  %1122 = vmatprep.subr.mxu0 %v2548_v47 }
 0x252   : > { %884 = vmatpush1.msra.mxu1 %v2545_v46  ;;  %1123 = vmatpush1.msra.mxu0 %v2545_v46 }
 0x253   : > { %885 = vmatprep.subr.mxu1 %v2563_v55  ;;  %1124 = vmatprep.subr.mxu0 %v2563_v55 }
 0x254   : > { %1990 = vmatpush1.msk.msra.mxu1 %vm2557_vm8, %v2554_v53  ;;  %1996 = vmatpush1.msk.msra.mxu0 %vm2557_vm8, %v2554_v53 }
 0x255   : > { %887 = vmatprep.subr.mxu1 %v2566_v56  ;;  %1126 = vmatprep.subr.mxu0 %v2566_v56 }
 0x256   : > { %888 = vmatpush1.msra.mxu1 %v2570_v57  ;;  %1127 = vmatpush1.msra.mxu0 %v2570_v57 }
 0x257   : > { %917 = vmatprep.subr.mxu1 %v2736_v8 }
 0x258   : > { %918 = vmatpush2.msra.mxu1 %v2741_v10 }
 0x259   : > { %1991 = vmatprep.subr.msk.mxu1 %vm588_vm2, %v2743_v11 }
 0x25a   : > { %920 = vmatpush2.msra.mxu1 %v2753_v14 }
 0x25b   : > { %922 = vmatmul.mubr.f32.vlgmr.msra.gmra.mxu1 %v810_v13  ;;  %1354 = vmatprep.subr.mxu1 %v2625_v26 }
 0x25c   : > { %1355 = vmatpush1.msra.mxu1 %v2622_v24 }
 0x25d   : > { %1356 = vmatprep.subr.mxu1 %v2628_v30 }
 0x25e   : > { %1357 = vmatpush1.msra.mxu1 %v2633_v33 }
 0x25f   : > { %1358 = vmatprep.subr.mxu1 %v2583_v6 }
 0x260   : > { %1359 = vmatpush1.msra.mxu1 %v2577_v4 }
 0x261   : > { %1360 = vmatprep.subr.mxu1 %v2645_v39 }
 0x262   : > { %1361 = vmatpush1.msra.mxu1 %v2650_v43 }
 0x263   : > { %1362 = vmatprep.subr.mxu1 %v2656_v48 }
 0x264   : > { %1363 = vmatpush1.msra.mxu1 %v2661_v49 }
 0x265   : > { %1364 = vmatprep.subr.mxu1 %v2675_v60 }
 0x266   : > { %2002 = vmatpush1.msk.msra.mxu1 %vm2557_vm8, %v2671_v58 }
 0x267   : > { %1366 = vmatprep.subr.mxu1 %v2678_v61 }
 0x268   : > { %1367 = vmatpush1.msra.mxu1 %v2683_v62 }
 0x269   : > { %1368 = vmatprep.subr.mxu1 %v2487_v15 }
 0x26a   : > { %1369 = vmatpush1.msra.mxu1 %v2499_v23 }
 0x26b   : > { %2003 = vmatprep.subr.msk.mxu1 %vm588_vm2, %v2502_v25 }
 0x26c   : > { %1371 = vmatpush1.msra.mxu1 %v2510_v28 }
 0x26d   : > { %1372 = vmatprep.subr.mxu1 %v2506_v27 }
 0x26e   : > { %1373 = vmatpush1.msra.mxu1 %v2515_v29 }
 0x26f   : > { %1374 = vmatprep.subr.mxu1 %v2526_v35 }
 0x270   : > { %1375 = vmatpush1.msra.mxu1 %v2523_v34 }
 0x271   : > { %1376 = vmatprep.subr.mxu1 %v2436_v0 }
 0x272   : > { %1377 = vmatpush1.msra.mxu1 %v2443_v1 }
 0x273   : > { %1378 = vmatprep.subr.mxu1 %v2536_v41 }
 0x274   : > { %1379 = vmatpush1.msra.mxu1 %v2533_v40 }
 0x275   : > { %1380 = vmatprep.subr.mxu1 %v2548_v47 }
 0x276   : > { %1381 = vmatpush1.msra.mxu1 %v2545_v46 }
 0x277   : > { %1382 = vmatprep.subr.mxu1 %v2563_v55 }
 0x278   : > { %2005 = vmatpush1.msk.msra.mxu1 %vm2557_vm8, %v2554_v53 }
 0x279   : > { %1384 = vmatprep.subr.mxu1 %v2566_v56 }
 0x27a   : > { %1385 = vmatpush1.msra.mxu1 %v2570_v57 }
 0x31b   : > { %v923_v18 = vpop.f32.mrf.mxu1 }
 0x31c   : > { %v924_v20 = vadd.f32 %v923_v18, %v852_v17 }
 0x31d   : > { %v925_v21 = vpop.f32.mrf.mxu1 }
 0x31e   : > { %vm928_vm12 = vcmp.gt.f32.partialorder %v924_v20, 0.0  ;;  %v930_v31 = vmul.f32 0.2, %v924_v20  ;;  %v926_v36 = vadd.f32 %v925_v21, %v852_v17 }
 0x320   : > { %v2793_v32 = vsel %vm928_vm12, %v924_v20, %v930_v31  ;;  %v931_v37 = vmul.f32 0.2, %v926_v36  ;;  %vm929_vm13 = vcmp.gt.f32.partialorder %v926_v36, 0.0 }
 0x321   : > { %1008 = vrot.lane.b32.xlu1 %v2793_v32, %s2258_s26  ;;  %1018 = vrot.lane.b32.xlu0 %v2793_v32, %s2257_s23 }
 0x322   : > { %v2803_v38 = vsel %vm929_vm13, %v926_v36, %v931_v37 }
 0x325   : > { %970 = vrot.lane.b32.xlu1 %v2793_v32, %s2260_s27  ;;  %996 = vrot.lane.b32.xlu0 %v2793_v32, %s2256_s22 }
 0x329   : > { %1020 = vrot.lane.b32.xlu1 %v2803_v38, %s2257_s23  ;;  %984 = vrot.lane.b32.xlu0 %v2793_v32, %s2259_s28 }
 0x32d   : > { %998 = vrot.lane.b32.xlu1 %v2803_v38, %s2256_s22  ;;  %1010 = vrot.lane.b32.xlu0 %v2803_v38, %s2258_s26 }
 0x331   : > { %986 = vrot.lane.b32.xlu1 %v2803_v38, %s2259_s28  ;;  %972 = vrot.lane.b32.xlu0 %v2803_v38, %s2260_s27 }
 0x335   : > { %958 = vrot.lane.b32.xlu1 %v2793_v32, %s2262_s13  ;;  %960 = vrot.lane.b32.xlu0 %v2803_v38, %s2262_s13 }
 0x339   : > { %936 = vrot.lane.b32.xlu1 %v2793_v32, %s2264_s16  ;;  %938 = vrot.lane.b32.xlu0 %v2803_v38, %s2264_s16 }
 0x33d   : > { %948 = vrot.lane.b32.xlu1 %v2793_v32, %s2265_s29  ;;  %950 = vrot.lane.b32.xlu0 %v2803_v38, %s2265_s29 }
 0x341   : > { %1089 = vperm.xlu1 %2098, %v1086_v44  }
 0x393   : > { %v1009_v45 = vpop.permute.xlu1 %1008  ;;  %v1019_v50 = vpop.permute.xlu0 %1018 }
 0x397   : > { %v971_v51 = vpop.permute.xlu1 %970  ;;  %v997_v52 = vpop.permute.xlu0 %996 }
 0x39b   : > { %v1021_v59 = vpop.permute.xlu1 %1020  ;;  %v985_v63 = vpop.permute.xlu0 %984 }
 0x39c   : > { %v1022_v3 = vsel %vm599_vm0, %v1019_v50, %v1021_v59  ;;  %v1025_v5 = vsel %vm599_vm0, %v1021_v59, 0.0 }
 0x39d   : > { %v2835_v7 = vmul.f32 %v1022_v3, %v2489_v16  ;;  %v2838_v12 = vmul.f32 %v1025_v5, %v2480_v9  ;;  %v977_v3 = vsel %vm547_vm4, 0.0, %v971_v51 }
 0x39f   : > { %1138 = vmatprep.subr.mxu0 %v2838_v12  ;;  %v999_v13 = vpop.permute.xlu1 %998  ;;  %v2841_v17 = vpop.permute.xlu0 %1010 }
 0x3a0   : > { %v1000_v18 = vsel %vm575_vm1, %v997_v52, %v999_v13  ;;  %v1003_v20 = vsel %vm575_vm1, %v999_v13, 0.0  ;;  %1139 = vmatpush2.msra.mxu0 %v2835_v7  ;;  %v2848_v21 = vsel %vm588_vm2, %v1009_v45, %v2841_v17 }
 0x3a1   : > { %v2851_v31 = vmul.f32 %v1000_v18, %v2496_v22  ;;  %v2854_v36 = vmul.f32 %v1003_v20, %v2492_v19  ;;  %1997 = vmatprep.subr.msk.mxu0 %vm588_vm2, %v2841_v17 }
 0x3a2   : > { %1141 = vmatpush2.msra.mxu0 %v2848_v21 }
 0x3a3   : > { %v987_v37 = vpop.permute.xlu1 %986  ;;  %1142 = vmatprep.subr.mxu0 %v2854_v36  ;;  %v973_v42 = vpop.permute.xlu0 %972 }
 0x3a4   : > { %v988_v44 = vsel %vm562_vm3, %v985_v63, %v987_v37  ;;  %v991_v45 = vsel %vm562_vm3, %v987_v37, 0.0  ;;  %1143 = vmatpush2.msra.mxu0 %v2851_v31  ;;  %v974_v59 = vsel %vm547_vm4, %v971_v51, %v973_v42  ;;  %v2880_v37 = vmul.f32 %v977_v3, %v2496_v22 }
 0x3a5   : > { %v2864_v50 = vmul.f32 %v988_v44, %v2489_v16  ;;  %v2867_v52 = vmul.f32 %v991_v45, %v2480_v9  ;;  %v2875_v18 = vmul.f32 %v974_v59, %v2492_v19 }
 0x3a7   : > { %v959_v5 = vpop.permute.xlu1 %958  ;;  %1144 = vmatprep.subr.mxu0 %v2867_v52  ;;  %v961_v13 = vpop.permute.xlu0 %960 }
 0x3a8   : > { %v962_v63 = vsel %vm523_vm5, %v959_v5, %v961_v13  ;;  %1145 = vmatpush2.msra.mxu0 %v2864_v50  ;;  %v965_v20 = vsel %vm523_vm5, 0.0, %v959_v5 }
 0x3a9   : > { %1146 = vmatprep.subr.mxu0 %v2803_v38  ;;  %v2884_v51 = vmul.f32 %v962_v63, %v2480_v9  ;;  %v2888_v45 = vmul.f32 %v965_v20, %v2489_v16 }
 0x3aa   : > { %1147 = vmatpush2.msra.mxu0 %v2793_v32 }
 0x3ab   : > { %v937_v42 = vpop.permute.xlu1 %936  ;;  %1148 = vmatprep.subr.mxu0 %v2875_v18  ;;  %v939_v44 = vpop.permute.xlu0 %938 }
 0x3ac   : > { %1149 = vmatpush2.msra.mxu0 %v2880_v37  ;;  %v940_v59 = vsel %vm488_vm6, %v937_v42, %v939_v44  ;;  %v943_v3 = vsel %vm488_vm6, 0.0, %v937_v42  ;;  %v1030_v42 = vld [vmem:[#allocation7] sm:$0xff] }
 0x3ad   : > { %1150 = vmatprep.subr.mxu0 %v2884_v51  ;;  %v2902_v20 = vmul.f32 %v940_v59, %v2492_v19  ;;  %v2906_v2 = vmul.f32 %v943_v3, %v2496_v22 }
 0x3ae   : > { %1151 = vmatpush2.msra.mxu0 %v2888_v45 }
 0x3af   : > { %v2895_v5 = vpop.permute.xlu1 %948  ;;  %v951_v13 = vpop.permute.xlu0 %950 }
 0x3b0   : > { %v2899_v63 = vsel %vm512_vm7, %v2895_v5, %v951_v13 }
 0x3b1   : > { %1152 = vmatprep.subr.mxu0 %v2899_v63 }
 0x3b2   : > { %1999 = vmatpush2.msk.msra.mxu0 %vm2557_vm8, %v2895_v5 }
 0x3b3   : > { %1154 = vmatprep.subr.mxu0 %v2902_v20 }
 0x3b4   : > { %1155 = vmatpush2.msra.mxu0 %v2906_v2 }
 0x3b5   : > { %1156 = vmatprep.subr.mxu0 %v2736_v8 }
 0x3b6   : > { %1157 = vmatpush2.msra.mxu0 %v2741_v10 }
 0x3b7   : > { %2000 = vmatprep.subr.msk.mxu0 %vm588_vm2, %v2743_v11 }
 0x3b8   : > { %1159 = vmatpush2.msra.mxu0 %v2753_v14 }
 0x3b9   : > { %1161 = vmatmul.mubr.f32.vlgmr.msra.gmra.mxu0 %v1030_v42  ;;  %1701 = vmatprep.subr.mxu0 %v2625_v26 }
 0x3ba   : > { %1702 = vmatpush1.msra.mxu0 %v2622_v24 }
 0x3bb   : > { %1703 = vmatprep.subr.mxu0 %v2628_v30 }
 0x3bc   : > { %1704 = vmatpush1.msra.mxu0 %v2633_v33 }
 0x3bd   : > { %1705 = vmatprep.subr.mxu0 %v2583_v6 }
 0x3be   : > { %1706 = vmatpush1.msra.mxu0 %v2577_v4 }
 0x3bf   : > { %1707 = vmatprep.subr.mxu0 %v2645_v39 }
 0x3c0   : > { %1708 = vmatpush1.msra.mxu0 %v2650_v43 }
 0x3c1   : > { %1709 = vmatprep.subr.mxu0 %v2656_v48 }
 0x3c2   : > { %1710 = vmatpush1.msra.mxu0 %v2661_v49 }
 0x3c3   : > { %1711 = vmatprep.subr.mxu0 %v2675_v60 }
 0x3c4   : > { %2014 = vmatpush1.msk.msra.mxu0 %vm2557_vm8, %v2671_v58 }
 0x3c5   : > { %1713 = vmatprep.subr.mxu0 %v2678_v61 }
 0x3c6   : > { %1714 = vmatpush1.msra.mxu0 %v2683_v62 }
 0x3c7   : > { %1715 = vmatprep.subr.mxu0 %v2487_v15 }
 0x3c8   : > { %1716 = vmatpush1.msra.mxu0 %v2499_v23 }
 0x3c9   : > { %2015 = vmatprep.subr.msk.mxu0 %vm588_vm2, %v2502_v25 }
 0x3ca   : > { %1718 = vmatpush1.msra.mxu0 %v2510_v28 }
 0x3cb   : > { %1719 = vmatprep.subr.mxu0 %v2506_v27 }
 0x3cc   : > { %1720 = vmatpush1.msra.mxu0 %v2515_v29 }
 0x3cd   : > { %1721 = vmatprep.subr.mxu0 %v2526_v35  ;;  %v1270_v35 = vld [vmem:[#allocation8 + $0x8] sm:$0xff] }
 0x3ce   : > { %1722 = vmatpush1.msra.mxu0 %v2523_v34  ;;  %1418 = vmatprep.mubr.f32.mxu1 %v1270_v35 }
 0x3cf   : > { %1723 = vmatprep.subr.mxu0 %v2436_v0  ;;  %v1090_v0 = vpop.permute.xlu1 %1089 }
 0x3d0   : > { %1724 = vmatpush1.msra.mxu0 %v2443_v1 }
 0x3d1   : > { %1725 = vmatprep.subr.mxu0 %v2536_v41  ;;  %v1599_v41 = vld [vmem:[#allocation10 + $0x8] sm:$0xff] }
 0x3d2   : > { %1726 = vmatpush1.msra.mxu0 %v2533_v40  ;;  %v1344_v40 = vld [vmem:[%s3175_s10] sm:$0xff]  ;;  %1765 = vmatprep.mubr.f32.mxu0 %v1599_v41 }
 0x3d3   : > { %1727 = vmatprep.subr.mxu0 %v2548_v47 }
 0x3d4   : > { %1728 = vmatpush1.msra.mxu0 %v2545_v46 }
 0x3d5   : > { %1729 = vmatprep.subr.mxu0 %v2563_v55 }
 0x3d6   : > { %2017 = vmatpush1.msk.msra.mxu0 %vm2557_vm8, %v2554_v53 }
 0x3d7   : > { %1731 = vmatprep.subr.mxu0 %v2566_v56 }
 0x3d8   : > { %1732 = vmatpush1.msra.mxu0 %v2570_v57 }
 0x479   : > { %v1162_v1 = vpop.f32.mrf.mxu0 }
 0x47a   : > { %v1163_v15 = vadd.f32 %v1162_v1, %v1090_v0 }
 0x47b   : > { %v1164_v23 = vpop.f32.mrf.mxu0 }
 0x47c   : > { %vm1167_vm15 = vcmp.gt.f32.partialorder %v1163_v15, 0.0  ;;  %v1169_v25 = vmul.f32 0.2, %v1163_v15  ;;  %v1165_v27 = vadd.f32 %v1164_v23, %v1090_v0 }
 0x47e   : > { %v1171_v28 = vsel %vm1167_vm15, %v1163_v15, %v1169_v25  ;;  %vm1168_vm9 = vcmp.gt.f32.partialorder %v1165_v27, 0.0  ;;  %v1170_v29 = vmul.f32 0.2, %v1165_v27 }
 0x47f   : > { %1209 = vrot.lane.b32.xlu0 %v1171_v28, %s2260_s27 }
 0x480   : > { %v1172_v34 = vsel %vm1168_vm9, %v1165_v27, %v1170_v29 }
 0x481   : > { %1211 = vrot.lane.b32.xlu1 %v1172_v34, %s2260_s27  ;;  %1386 = vmatprep.subr.mxu1 %v1172_v34 }
 0x482   : > { %1733 = vmatprep.subr.mxu0 %v1172_v34  ;;  %1387 = vmatpush2.msra.mxu1 %v1171_v28 }
 0x483   : > { %1734 = vmatpush2.msra.mxu0 %v1171_v28  ;;  %1197 = vrot.lane.b32.xlu0 %v1171_v28, %s2262_s13 }
 0x485   : > { %1199 = vrot.lane.b32.xlu1 %v1172_v34, %s2262_s13 }
 0x487   : > { %1175 = vrot.lane.b32.xlu0 %v1171_v28, %s2264_s16 }
 0x489   : > { %1177 = vrot.lane.b32.xlu1 %v1172_v34, %s2264_s16 }
 0x48b   : > { %1187 = vrot.lane.b32.xlu0 %v1171_v28, %s2265_s29 }
 0x48d   : > { %1189 = vrot.lane.b32.xlu1 %v1172_v34, %s2265_s29 }
 0x48f   : > { %1247 = vrot.lane.b32.xlu0 %v1171_v28, %s2258_s26 }
 0x491   : > { %1257 = vrot.lane.b32.xlu1 %v1171_v28, %s2257_s23 }
 0x493   : > { %1259 = vrot.lane.b32.xlu0 %v1172_v34, %s2257_s23 }
 0x495   : > { %1235 = vrot.lane.b32.xlu1 %v1171_v28, %s2256_s22 }
 0x497   : > { %1237 = vrot.lane.b32.xlu0 %v1172_v34, %s2256_s22 }
 0x499   : > { %1249 = vrot.lane.b32.xlu1 %v1172_v34, %s2258_s26 }
 0x49b   : > { %1225 = vrot.lane.b32.xlu0 %v1172_v34, %s2259_s28 }
 0x49d   : > { %1223 = vrot.lane.b32.xlu1 %v1171_v28, %s2259_s28 }
 0x49f   : > { %1347 = vperm.xlu0 %2097, %v1344_v40  }
 0x4f1   : > { %v1210_v46 = vpop.permute.xlu0 %1209 }
 0x4f2   : > { %v1216_v47 = vsel %vm547_vm4, 0.0, %v1210_v46 }
 0x4f3   : > { %v1212_v53 = vpop.permute.xlu1 %1211  ;;  %v1217_v4 = vmul.f32 %v1216_v47, %v2496_v22 }
 0x4f4   : > { %v1213_v55 = vsel %vm547_vm4, %v1210_v46, %v1212_v53  ;;  %v1691_v46 = vld [vmem:[%s3176_s11] sm:$0xff] }
 0x4f5   : > { %v1218_v56 = vmul.f32 %v1213_v55, %v2492_v19  ;;  %v1198_v57 = vpop.permute.xlu0 %1197 }
 0x4f6   : > { %v1204_v6 = vsel %vm523_vm5, 0.0, %v1198_v57 }
 0x4f7   : > { %v1200_v24 = vpop.permute.xlu1 %1199  ;;  %1388 = vmatprep.subr.mxu1 %v1218_v56  ;;  %1735 = vmatprep.subr.mxu0 %v1218_v56  ;;  %v1205_v39 = vmul.f32 %v1204_v6, %v2489_v16 }
 0x4f8   : > { %v1201_v26 = vsel %vm523_vm5, %v1198_v57, %v1200_v24  ;;  %1389 = vmatpush2.msra.mxu1 %v1217_v4  ;;  %1736 = vmatpush2.msra.mxu0 %v1217_v4 }
 0x4f9   : > { %v1206_v30 = vmul.f32 %v1201_v26, %v2480_v9  ;;  %v1176_v33 = vpop.permute.xlu0 %1175 }
 0x4fa   : > { %v1182_v49 = vsel %vm488_vm6, 0.0, %v1176_v33 }
 0x4fb   : > { %v1178_v43 = vpop.permute.xlu1 %1177  ;;  %1390 = vmatprep.subr.mxu1 %v1206_v30  ;;  %1737 = vmatprep.subr.mxu0 %v1206_v30  ;;  %v1183_v44 = vmul.f32 %v1182_v49, %v2496_v22 }
 0x4fc   : > { %1391 = vmatpush2.msra.mxu1 %v1205_v39  ;;  %1738 = vmatpush2.msra.mxu0 %v1205_v39  ;;  %v1179_v48 = vsel %vm488_vm6, %v1176_v33, %v1178_v43 }
 0x4fd   : > { %v1188_v58 = vpop.permute.xlu0 %1187  ;;  %v1184_v62 = vmul.f32 %v1179_v48, %v2492_v19 }
 0x4ff   : > { %v1190_v60 = vpop.permute.xlu1 %1189 }
 0x500   : > { %v1191_v61 = vsel %vm512_vm7, %v1188_v58, %v1190_v60 }
 0x501   : > { %1392 = vmatprep.subr.mxu1 %v1191_v61  ;;  %1739 = vmatprep.subr.mxu0 %v1191_v61  ;;  %v2995_v59 = vpop.permute.xlu0 %1247 }
 0x502   : > { %2007 = vmatpush2.msk.msra.mxu1 %vm2557_vm8, %v1188_v58  ;;  %2019 = vmatpush2.msk.msra.mxu0 %vm2557_vm8, %v1188_v58 }
 0x503   : > { %1394 = vmatprep.subr.mxu1 %v1184_v62  ;;  %1741 = vmatprep.subr.mxu0 %v1184_v62  ;;  %v1258_v3 = vpop.permute.xlu1 %1257 }
 0x504   : > { %1395 = vmatpush2.msra.mxu1 %v1183_v44  ;;  %1742 = vmatpush2.msra.mxu0 %v1183_v44 }
 0x505   : > { %1396 = vmatprep.subr.mxu1 %v2838_v12  ;;  %1743 = vmatprep.subr.mxu0 %v2838_v12 }
 0x506   : > { %1397 = vmatpush2.msra.mxu1 %v2835_v7  ;;  %1744 = vmatpush2.msra.mxu0 %v2835_v7  ;;  %v1260_v7 = vpop.permute.xlu0 %1259 }
 0x507   : > { %2008 = vmatprep.subr.msk.mxu1 %vm588_vm2, %v2841_v17  ;;  %2020 = vmatprep.subr.msk.mxu0 %vm588_vm2, %v2841_v17  ;;  %v1236_v12 = vpop.permute.xlu1 %1235  ;;  %v1264_v17 = vsel %vm599_vm0, %v1260_v7, 0.0 }
 0x508   : > { %1399 = vmatpush2.msra.mxu1 %v2848_v21  ;;  %1746 = vmatpush2.msra.mxu0 %v2848_v21  ;;  %v1261_v21 = vsel %vm599_vm0, %v1258_v3, %v1260_v7 }
 0x509   : > { %1400 = vmatprep.subr.mxu1 %v2854_v36  ;;  %1747 = vmatprep.subr.mxu0 %v2854_v36  ;;  %v3044_v36 = vmul.f32 %v1264_v17, %v2480_v9 }
 0x50a   : > { %1401 = vmatpush2.msra.mxu1 %v2851_v31  ;;  %1748 = vmatpush2.msra.mxu0 %v2851_v31  ;;  %v1269_v31 = vld [vmem:[#allocation8] sm:$0xff] }
 0x50b   : > { %1402 = vmatprep.subr.mxu1 %v2867_v52  ;;  %1749 = vmatprep.subr.mxu0 %v2867_v52 }
 0x50c   : > { %1403 = vmatpush2.msra.mxu1 %v2864_v50  ;;  %1750 = vmatpush2.msra.mxu0 %v2864_v50 }
 0x50d   : > { %1404 = vmatprep.subr.mxu1 %v2803_v38  ;;  %1751 = vmatprep.subr.mxu0 %v2803_v38  ;;  %v1238_v38 = vpop.permute.xlu0 %1237 }
 0x50e   : > { %1405 = vmatpush2.msra.mxu1 %v2793_v32  ;;  %1752 = vmatpush2.msra.mxu0 %v2793_v32  ;;  %v3025_v32 = vpop.permute.xlu1 %1249 }
 0x50f   : > { %1406 = vmatprep.subr.mxu1 %v2875_v18  ;;  %1753 = vmatprep.subr.mxu0 %v2875_v18  ;;  %v1239_v18 = vsel %vm575_vm1, %v1236_v12, %v1238_v38 }
 0x510   : > { %1407 = vmatpush2.msra.mxu1 %v2880_v37  ;;  %1754 = vmatpush2.msra.mxu0 %v2880_v37 }
 0x511   : > { %1408 = vmatprep.subr.mxu1 %v2884_v51  ;;  %1755 = vmatprep.subr.mxu0 %v2884_v51  ;;  %v1226_v50 = vpop.permute.xlu0 %1225 }
 0x512   : > { %1409 = vmatpush2.msra.mxu1 %v2888_v45  ;;  %1756 = vmatpush2.msra.mxu0 %v2888_v45  ;;  %v1224_v52 = vpop.permute.xlu1 %1223  ;;  %v1230_v37 = vsel %vm562_vm3, %v1226_v50, 0.0 }
 0x513   : > { %1410 = vmatprep.subr.mxu1 %v2899_v63  ;;  %1757 = vmatprep.subr.mxu0 %v2899_v63  ;;  %v1227_v45 = vsel %vm562_vm3, %v1224_v52, %v1226_v50  ;;  %v3077_v13 = vmul.f32 %v1230_v37, %v2480_v9 }
 0x514   : > { %2010 = vmatpush2.msk.msra.mxu1 %vm2557_vm8, %v2895_v5  ;;  %2022 = vmatpush2.msk.msra.mxu0 %vm2557_vm8, %v2895_v5  ;;  %v3073_v5 = vmul.f32 %v1239_v18, %v2496_v22  ;;  %v3081_v63 = vmul.f32 %v1227_v45, %v2489_v16 }
 0x515   : > { %1412 = vmatprep.subr.mxu1 %v2902_v20  ;;  %1759 = vmatprep.subr.mxu0 %v2902_v20  ;;  %v1271_v20 = vld [vmem:[#allocation8 + $0x10] sm:$0xff] }
 0x516   : > { %1413 = vmatpush2.msra.mxu1 %v2906_v2  ;;  %1760 = vmatpush2.msra.mxu0 %v2906_v2  ;;  %v3051_v2 = vmul.f32 %v1261_v21, %v2489_v16 }
 0x517   : > { %1414 = vmatprep.subr.mxu1 %v2736_v8  ;;  %1761 = vmatprep.subr.mxu0 %v2736_v8  ;;  %v1242_v8 = vsel %vm575_vm1, %v1238_v38, 0.0 }
 0x518   : > { %1415 = vmatpush2.msra.mxu1 %v2741_v10  ;;  %1762 = vmatpush2.msra.mxu0 %v2741_v10  ;;  %v1598_v10 = vld [vmem:[#allocation10] sm:$0xff]  ;;  %v3062_v51 = vmul.f32 %v1242_v8, %v2492_v19 }
 0x519   : > { %2011 = vmatprep.subr.msk.mxu1 %vm588_vm2, %v2743_v11  ;;  %2023 = vmatprep.subr.msk.mxu0 %vm588_vm2, %v2743_v11  ;;  %v3194_v11 = vmov 0.0  }
 0x51a   : > { %1417 = vmatpush2.msra.mxu1 %v2753_v14  ;;  %1764 = vmatpush2.msra.mxu0 %v2753_v14  ;;  %v3070_v14 = vsel %vm588_vm2, %v2995_v59, %v3025_v32  ;;  %v1348_v0 = vpop.permute.xlu0 %1347 }
 0x51b   : > { %1419 = vmatmul.mubr.f32.vlgmr.msra.gmra.mxu1 %v1269_v31  ;;  %1449 = vmatprep.subr.mxu1 %v3044_v36 }
 0x51c   : > { %1450 = vmatpush1.msra.mxu1 %v3051_v2  ;;  %1489 = vmatprep.mubr.f32.mxu1 %v3194_v11 }
 0x51d   : > { %2012 = vmatprep.subr.msk.mxu1 %vm588_vm2, %v3025_v32  ;;  %1766 = vmatmul.mubr.f32.vlgmr.msra.gmra.mxu0 %v1598_v10 }
 0x51e   : > { %1452 = vmatpush1.msra.mxu1 %v3070_v14 }
 0x51f   : > { %1453 = vmatprep.subr.mxu1 %v3062_v51 }
 0x520   : > { %1454 = vmatpush1.msra.mxu1 %v3073_v5 }
 0x521   : > { %1455 = vmatprep.subr.mxu1 %v3077_v13 }
 0x522   : > { %1456 = vmatpush1.msra.mxu1 %v3081_v63 }
 0x523   : > { %1977 = vmatmul.mubr.msk.f32.vlgmr.msra.gmra.mxu1 %vm1350_vm10, %v1271_v20 }
 0x524   : > { %1836 = vmatprep.mubr.f32.mxu1 %v3194_v11 }
 0x5db   : > { %v1420_v42 = vpop.f32.mrf.mxu1 }
 0x5dc   : > { %v1421_v15 = vadd.f32 %v1420_v42, %v1348_v0 }
 0x5dd   : > { %v1422_v1 = vpop.f32.mrf.mxu1 }
 0x5de   : > { %v1423_v28 = vadd.f32 %v1422_v1, %v1348_v0 }
 0x5e3   : > { %v1491_v23 = vpop.f32.mrf.mxu1 }
 0x5e4   : > { %v1492_v25 = vadd.f32 %v1491_v23, %v1421_v15 }
 0x5e5   : > { %v1493_v27 = vpop.f32.mrf.mxu1 }
 0x5e6   : > { %vm1496_vm11 = vcmp.gt.f32.partialorder %v1492_v25, 0.0  ;;  %v1498_v29 = vmul.f32 0.2, %v1492_v25  ;;  %v1494_v35 = vadd.f32 %v1493_v27, %v1423_v28  ;;  %v2100_v27 = vld [vmem:[%s2433_s15 + $0x8] sm:$0xff] }
 0x5e8   : > { %v3087_v34 = vsel %vm1496_vm11, %v1492_v25, %v1498_v29  ;;  %v1499_v40 = vmul.f32 0.2, %v1494_v35  ;;  %vm1497_vm12 = vcmp.gt.f32.partialorder %v1494_v35, 0.0 }
 0x5e9   : > { %1576 = vrot.lane.b32.xlu1 %v3087_v34, %s2258_s26  ;;  %1586 = vrot.lane.b32.xlu0 %v3087_v34, %s2257_s23 }
 0x5ea   : > { %v1501_v41 = vsel %vm1497_vm12, %v1494_v35, %v1499_v40 }
 0x5ed   : > { %1538 = vrot.lane.b32.xlu1 %v3087_v34, %s2260_s27  ;;  %1564 = vrot.lane.b32.xlu0 %v3087_v34, %s2256_s22 }
 0x5f1   : > { %1588 = vrot.lane.b32.xlu1 %v1501_v41, %s2257_s23  ;;  %1552 = vrot.lane.b32.xlu0 %v3087_v34, %s2259_s28 }
 0x5f5   : > { %1566 = vrot.lane.b32.xlu1 %v1501_v41, %s2256_s22  ;;  %1578 = vrot.lane.b32.xlu0 %v1501_v41, %s2258_s26 }
 0x5f9   : > { %1554 = vrot.lane.b32.xlu1 %v1501_v41, %s2259_s28  ;;  %1540 = vrot.lane.b32.xlu0 %v1501_v41, %s2260_s27  ;;  %s476_s27 = scalar_lea.vmem %s3177_s12, %s1981_s25 }
 0x5fd   : > { %1526 = vrot.lane.b32.xlu1 %v3087_v34, %s2262_s13  ;;  %1528 = vrot.lane.b32.xlu0 %v1501_v41, %s2262_s13 }
 0x601   : > { %1504 = vrot.lane.b32.xlu1 %v3087_v34, %s2264_s16  ;;  %1506 = vrot.lane.b32.xlu0 %v1501_v41, %s2264_s16 }
 0x605   : > { %1516 = vrot.lane.b32.xlu1 %v3087_v34, %s2265_s29  ;;  %1518 = vrot.lane.b32.xlu0 %v1501_v41, %s2265_s29 }
 0x609   : > { %1694 = vperm.xlu1 %2098, %v1691_v46  }
 0x65b   : > { %v1577_v47 = vpop.permute.xlu1 %1576  ;;  %v1587_v53 = vpop.permute.xlu0 %1586 }
 0x65f   : > { %v1539_v55 = vpop.permute.xlu1 %1538  ;;  %v1565_v56 = vpop.permute.xlu0 %1564 }
 0x660   : > { %v1545_v38 = vsel %vm547_vm4, 0.0, %v1539_v55 }
 0x661   : > { %v1546_v52 = vmul.f32 %v1545_v38, %v2496_v22 }
 0x663   : > { %v1589_v57 = vpop.permute.xlu1 %1588  ;;  %v1553_v4 = vpop.permute.xlu0 %1552 }
 0x664   : > { %v1590_v6 = vsel %vm599_vm0, %v1587_v53, %v1589_v57  ;;  %v1593_v24 = vsel %vm599_vm0, %v1589_v57, 0.0  ;;  %vm1697_vm0 = vcmask 850944  }
 0x665   : > { %v1594_v26 = vmul.f32 %v1590_v6, %v2489_v16  ;;  %v1595_v30 = vmul.f32 %v1593_v24, %v2480_v9 }
 0x667   : > { %1778 = vmatprep.subr.mxu1 %v1595_v30  ;;  %v1567_v33 = vpop.permute.xlu1 %1566  ;;  %v1579_v39 = vpop.permute.xlu0 %1578 }
 0x668   : > { %v1568_v43 = vsel %vm575_vm1, %v1565_v56, %v1567_v33  ;;  %v1571_v48 = vsel %vm575_vm1, %v1567_v33, 0.0  ;;  %v1580_v49 = vsel %vm588_vm2, %v1577_v47, %v1579_v39  ;;  %1779 = vmatpush1.msra.mxu1 %v1594_v26 }
 0x669   : > { %v1572_v58 = vmul.f32 %v1568_v43, %v2496_v22  ;;  %v1573_v60 = vmul.f32 %v1571_v48, %v2492_v19  ;;  %2024 = vmatprep.subr.msk.mxu1 %vm588_vm2, %v1579_v39 }
 0x66a   : > { %1781 = vmatpush1.msra.mxu1 %v1580_v49 }
 0x66b   : > { %v1555_v61 = vpop.permute.xlu1 %1554  ;;  %1782 = vmatprep.subr.mxu1 %v1573_v60  ;;  %v1541_v62 = vpop.permute.xlu0 %1540 }
 0x66c   : > { %v1556_v44 = vsel %vm562_vm3, %v1553_v4, %v1555_v61  ;;  %v1559_v59 = vsel %vm562_vm3, %v1555_v61, 0.0  ;;  %1783 = vmatpush1.msra.mxu1 %v1572_v58  ;;  %v1542_v12 = vsel %vm547_vm4, %v1539_v55, %v1541_v62 }
 0x66d   : > { %v1560_v3 = vmul.f32 %v1556_v44, %v2489_v16  ;;  %v1561_v7 = vmul.f32 %v1559_v59, %v2480_v9  ;;  %v1547_v50 = vmul.f32 %v1542_v12, %v2492_v19 }
 0x66f   : > { %v1527_v17 = vpop.permute.xlu1 %1526  ;;  %1784 = vmatprep.subr.mxu1 %v1561_v7  ;;  %v1529_v21 = vpop.permute.xlu0 %1528 }
 0x670   : > { %v1530_v31 = vsel %vm523_vm5, %v1527_v17, %v1529_v21  ;;  %1785 = vmatpush1.msra.mxu1 %v1560_v3  ;;  %v1533_v8 = vsel %vm523_vm5, 0.0, %v1527_v17 }
 0x671   : > { %1786 = vmatprep.subr.mxu1 %v1501_v41  ;;  %v1535_v10 = vmul.f32 %v1530_v31, %v2480_v9  ;;  %v1534_v11 = vmul.f32 %v1533_v8, %v2489_v16  ;;  %v1600_v16 = vld [vmem:[#allocation10 + $0x10] sm:$0xff] }
 0x672   : > { %1787 = vmatpush1.msra.mxu1 %v3087_v34 }
 0x673   : > { %v1505_v18 = vpop.permute.xlu1 %1504  ;;  %1788 = vmatprep.subr.mxu1 %v1547_v50  ;;  %v1507_v37 = vpop.permute.xlu0 %1506 }
 0x674   : > { %1789 = vmatpush1.msra.mxu1 %v1546_v52  ;;  %v1508_v45 = vsel %vm488_vm6, %v1505_v18, %v1507_v37  ;;  %v1511_v20 = vsel %vm488_vm6, 0.0, %v1505_v18 }
 0x675   : > { %1790 = vmatprep.subr.mxu1 %v1535_v10  ;;  %v1513_v15 = vmul.f32 %v1508_v45, %v2492_v19  ;;  %v1512_v9 = vmul.f32 %v1511_v20, %v2496_v22  ;;  %v1767_v19 = vpop.f32.mrf.mxu0 }
 0x676   : > { %1791 = vmatpush1.msra.mxu1 %v1534_v11 }
 0x677   : > { %v1517_v42 = vpop.permute.xlu1 %1516  ;;  %v1519_v0 = vpop.permute.xlu0 %1518 }
 0x678   : > { %v1520_v1 = vsel %vm512_vm7, %v1517_v42, %v1519_v0  ;;  %v1769_v54 = vpop.f32.mrf.mxu0 }
 0x679   : > { %1792 = vmatprep.subr.mxu1 %v1520_v1 }
 0x67a   : > { %2026 = vmatpush1.msk.msra.mxu1 %vm2557_vm8, %v1517_v42 }
 0x67b   : > { %1794 = vmatprep.subr.mxu1 %v1513_v15 }
 0x67c   : > { %1795 = vmatpush1.msra.mxu1 %v1512_v9 }
 0x67d   : > { %1796 = vmatprep.subr.mxu1 %v3044_v36 }
 0x67e   : > { %1797 = vmatpush1.msra.mxu1 %v3051_v2 }
 0x67f   : > { %2027 = vmatprep.subr.msk.mxu1 %vm588_vm2, %v3025_v32 }
 0x680   : > { %1799 = vmatpush1.msra.mxu1 %v3070_v14 }
 0x681   : > { %1800 = vmatprep.subr.mxu1 %v3062_v51 }
 0x682   : > { %1801 = vmatpush1.msra.mxu1 %v3073_v5 }
 0x683   : > { %1802 = vmatprep.subr.mxu1 %v3077_v13  ;;  %v2099_v13 = vld [vmem:[%s2433_s15] sm:$0xff] }
 0x684   : > { %1803 = vmatpush1.msra.mxu1 %v3081_v63  ;;  %v1695_v22 = vpop.permute.xlu1 %1694 }
 0x685   : > { %1978 = vmatmul.mubr.msk.f32.vlgmr.msra.gmra.mxu1 %vm1697_vm0, %v1600_v16  ;;  %v1768_v32 = vadd.f32 %v1767_v19, %v1695_v22  ;;  %v1770_v2 = vadd.f32 %v1769_v54, %v1695_v22 }
 0x745   : > { %v1838_v36 = vpop.f32.mrf.mxu1 }
 0x746   : > { %v1839_v14 = vadd.f32 %v1838_v36, %v1768_v32 }
 0x747   : > { %v1840_v51 = vpop.f32.mrf.mxu1 }
 0x748   : > { %v1843_v23 = vmul.f32 0.2, %v1839_v14  ;;  %v1841_v5 = vadd.f32 %v1840_v51, %v1770_v2 }
 0x74a   : > { %v1845_v25 = vadd.f32 %v2099_v13, %v1843_v23  ;;  %v1844_v63 = vmul.f32 0.2, %v1841_v5 }
 0x74c   : > { %1847 = vst [vmem:[%s476_s27] sm:$0xff] %v1845_v25  ;;  %v1846_v28 = vadd.f32 %v2100_v27, %v1844_v63 }
 0x74e   : > { %1848 = vst [vmem:[%s476_s27 + $0x8] sm:$0xff] %v1846_v28 }
 0x74f PF: > { %s25_s21 = sadd.s32 1, %s2249_s21  }
 0x750   : > { %p22_p12 = scmp.ge.s32.totalorder %s25_s21, 4  }
 0x752   :  { %24 = sbr.rel (!%p22_p12) target bundleno = 3 (0x3), region = 120 }
 0x757   :  { %1870 = vsyncpa [#allocation4], 1 }
 0x758   :  { %1872 = vsyncpa [#allocation4 + $0x1], 1 }
 0x759   :  { %1873 = vsyncpa [#allocation6], 1 }
 0x75a   :  { %1874 = vsyncpa [#allocation9], 1 }

// kernel: rrdbnet_forward.15
= control target key start
LH: loop header
LB: loop body
LE: loop exit
PB: predicated region body
PF: predicated region fallthrough
CT: control target
= control target key end

     0   :  { %18 = vsyncpa [#allocation4], 0  ;;  %s3239_s0 = inlined_call_operand.vmem [shape: f32[2,8,256], index: 0, kind: input, shape index: {}]   ;;  %s3240_s1 = inlined_call_operand.vmem [shape: f32[2,256], index: 1, kind: input, shape index: {}]   ;;  %s3241_s2 = inlined_call_operand.hbm [shape: f32[8,72], index: 2, kind: input, shape index: {}]   ;;  %s3242_s3 = inlined_call_operand.hbm [shape: f32[8,144], index: 3, kind: input, shape index: {}]   ;;  %s3243_s4 = inlined_call_operand.hbm [shape: f32[8,216], index: 4, kind: input, shape index: {}]   ;;  %s3244_s5 = inlined_call_operand.hbm [shape: f32[8,288], index: 5, kind: input, shape index: {}]   ;;  %s3245_s6 = inlined_call_operand.hbm [shape: f32[8,360], index: 6, kind: input, shape index: {}]   ;;  %s3246_s7 = inlined_call_operand.vmem [shape: f32[8,1], index: 7, kind: input, shape index: {}]   ;;  %s3247_s8 = inlined_call_operand.vmem [shape: f32[8,1], index: 8, kind: input, shape index: {}]   ;;  %s3248_s9 = inlined_call_operand.vmem [shape: f32[8,1], index: 9, kind: input, shape index: {}]   ;;  %s3249_s10 = inlined_call_operand.vmem [shape: f32[8,1], index: 10, kind: input, shape index: {}]   ;;  %s3250_s11 = inlined_call_operand.vmem [shape: f32[8,1], index: 11, kind: input, shape index: {}]   ;;  %s3251_s12 = inlined_call_operand.vmem [shape: f32[2,8,256], index: 12, kind: input, shape index: {}]   ;;  %s3252_s13 = inlined_call_operand.vmem [shape: f32[2,8,256], index: 13, kind: output, shape index: {}]  }
   0x1   :  { %19 = vsyncpa [#allocation6], 0 }
   0x2   :  { %20 = vsyncpa [#allocation9], 0  ;;  %s2404_s25 = smov 0  }
   0x3 LB: > { %s2319_s26 = smov [#allocation5]   ;;  %s2410_s28 = sadd.s32 4294967295, %s2317_s25   ;;  %s2317_s25 = sphi %s2404_s25, %s26_s25  }
   0x4   : > { %s367_s27 = sshll.u32 %s2319_s26, 4  ;;  %p2021_p0 = scmp.ge.s32.totalorder %s2317_s25, 1  ;;  %s368_s27 = int_to_ptr.vmem [resolvable:$true] %s367_s27 }
   0x5   : > { %p340_p1 = scmp.lt.s32.totalorder %s2317_s25, 3  ;;  %p3253_p2 = scmp.eq.s32.totalorder %s2410_s28, 0 }
   0x6   : > { %s2320_s30 = smov [#allocation8]   ;;  %s2321_s15 = smov [#allocation3]  }
   0x7   : > { %p2415_p3 = pnand %p2021_p0, %p340_p1  ;;  %s389_s14 = sshll.u32 %s2320_s30, 4  ;;  %s390_s14 = int_to_ptr.vmem [resolvable:$true] %s389_s14 }
   0x8   : > { %s356_s16 = sshll.u32 %s2321_s15, 4  ;;  %s2322_s18 = smov [#allocation7]   ;;  %s2427_s16 = int_to_ptr.vmem [resolvable:$true] %s356_s16 }
   0x9   : > { %s3257_s29 = scalar_select %p2415_p3, 1, 0 }
   0xa   : > { %p2116_p4 = pneg %p2415_p3  ;;  %s378_s19 = sshll.u32 %s2322_s18, 4  ;;  %s2429_s19 = int_to_ptr.vmem [resolvable:$true] %s378_s19 }
   0xb   : > { %s2180_s21 = scalar_lea.vmem %s368_s27, 256  ;;  %p2188_p10 = scmp.lt.s32.totalorder %s368_s27, %s368_s27 }
   0xc   : > { %p2423_p5 = pnand %p3253_p2, %p2116_p4  ;;  %p2181_p7 = scmp.ne.s32.totalorder %s368_s27, %s2180_s21 }
   0xd   : > { %p2189_p11 = scmp.lt.s32.totalorder %s2180_s21, %s2180_s21 }
   0xe   : > { %p2433_p6 = pneg %p2423_p5 }
   0xf   : > { %p2190_p12 = por %p2189_p11, %p2188_p10 }
  0x10   : > { %p2183_p8 = pnand %p2181_p7, %p2433_p6 }
  0x12   : > { %p2184_p9 = pneg %p2183_p8 }
  0x14   : > { %p2191_p13 = pnand %p2190_p12, %p2184_p9 }
  0x16   : > { %2194 = shalt.err (!%p2191_p13)
}
  0x17   : > { %2122 = dma.hbm_to_vmem [thread:$0]  (!%p2423_p5), %s3242_s3, 256, %s368_s27, [#allocation6]  }
  0x18   : > { %s2206_s24 = scalar_lea.vmem %s390_s14, 384  ;;  %p2214_p2 = scmp.lt.s32.totalorder %s390_s14, %s390_s14 }
  0x19   : > { %p2207_p0 = scmp.ne.s32.totalorder %s390_s14, %s2206_s24  ;;  %p2215_p7 = scmp.lt.s32.totalorder %s2206_s24, %s2206_s24 }
  0x1b   : > { %p2209_p1 = pnand %p2207_p0, %p2433_p6  ;;  %p2216_p8 = por %p2215_p7, %p2214_p2 }
  0x1d   : > { %p2210_p4 = pneg %p2209_p1 }
  0x1f   : > { %p2217_p3 = pnand %p2216_p8, %p2210_p4 }
  0x21   : > { %2220 = shalt.err (!%p2217_p3)
}
  0x22   : > { %2128 = dma.hbm_to_vmem [thread:$0]  (!%p2423_p5), %s3244_s5, 384, %s390_s14, [#allocation9]  }
  0x23   : > { %s2232_s27 = scalar_lea.vmem %s2427_s16, 128  ;;  %p2240_p12 = scmp.lt.s32.totalorder %s2427_s16, %s2427_s16 }
  0x24   : > { %p2233_p9 = scmp.ne.s32.totalorder %s2427_s16, %s2232_s27  ;;  %p2241_p2 = scmp.lt.s32.totalorder %s2232_s27, %s2232_s27 }
  0x26   : > { %p2235_p10 = pnand %p2233_p9, %p2433_p6  ;;  %p2242_p13 = por %p2241_p2, %p2240_p12 }
  0x28   : > { %p2236_p11 = pneg %p2235_p10 }
  0x2a   : > { %p2243_p3 = pnand %p2242_p13, %p2236_p11 }
  0x2c   : > { %2246 = shalt.err (!%p2243_p3)
}
  0x2d   : > { %2119 = dma.hbm_to_vmem [thread:$0]  (!%p2423_p5), %s3241_s2, 128, %s2427_s16, [#allocation4]  }
  0x2e   : > { %s2258_s14 = scalar_lea.vmem %s2429_s19, 256  ;;  %p2266_p7 = scmp.lt.s32.totalorder %s2429_s19, %s2429_s19 }
  0x2f   : > { %p2259_p0 = scmp.ne.s32.totalorder %s2429_s19, %s2258_s14  ;;  %p2267_p8 = scmp.lt.s32.totalorder %s2258_s14, %s2258_s14 }
  0x31   : > { %p2261_p1 = pnand %p2259_p0, %p2433_p6  ;;  %p2268_p9 = por %p2267_p8, %p2266_p7 }
  0x33   : > { %p2262_p4 = pneg %p2261_p1 }
  0x35   : > { %p2269_p10 = pnand %p2268_p9, %p2262_p4 }
  0x37   : > { %2272 = shalt.err (!%p2269_p10)
}
  0x38   : > { %2125 = dma.hbm_to_vmem [thread:$0]  (!%p2423_p5), %s3243_s4, 256, %s2429_s19, [#allocation6]  }
  0x39   : > { %s2323_s16 = smov [#allocation10]  }
  0x3a   : > { %s400_s23 = sshll.u32 %s2323_s16, 4  ;;  %s401_s23 = int_to_ptr.vmem [resolvable:$true] %s400_s23 }
  0x3b   : > { %s2284_s24 = scalar_lea.vmem %s401_s23, 384  ;;  %p2292_p13 = scmp.lt.s32.totalorder %s401_s23, %s401_s23 }
  0x3c   : > { %p2285_p11 = scmp.ne.s32.totalorder %s401_s23, %s2284_s24  ;;  %p2293_p3 = scmp.lt.s32.totalorder %s2284_s24, %s2284_s24 }
  0x3e   : > { %p2287_p12 = pnand %p2285_p11, %p2433_p6  ;;  %p2294_p0 = por %p2293_p3, %p2292_p13 }
  0x40   : > { %p2288_p2 = pneg %p2287_p12 }
  0x42   : > { %p2295_p1 = pnand %p2294_p0, %p2288_p2 }
  0x44   : > { %2298 = shalt.err (!%p2295_p1)
}
  0x45   : > { %2131 = dma.hbm_to_vmem [thread:$0]  (!%p2423_p5), %s3245_s6, 384, %s401_s23, [#allocation9]  }
  0x46   : > { %p3260_p4 = scmp.ne.s32.totalorder %s3257_s29, 0 }
  0x47   : > { %p3261_p7 = scmp.eq.s32.totalorder (!%p3260_p4), %s2410_s28, 0 }
  0x48   : > { %444 = sbr.rel (%p3260_p4) target bundleno = 1873 (0x751), region = 72 }
  0x4d   : > { %2304 = dma.done.wait (%p3261_p7), [#allocation4], 128   ;;  %p3262_p6 = pmov %p3261_p7 }
  0x4f   : > { %2306 = vsyncadd (%p3262_p6), [#allocation4], 4294967168  ;;  %p3263_p8 = pmov %p3262_p6 }
  0x50   : > { %p3264_p9 = pmov %p3262_p6 }
  0x51   : > { %2308 = dma.done.wait (%p3263_p8), [#allocation6], 512  }
  0x52   : > { %2310 = vsyncadd (%p3264_p9), [#allocation6], 4294966784  ;;  %p3265_p10 = pmov %p3262_p6 }
  0x53   : > { %p3266_p5 = pmov %p3262_p6 }
  0x54   : > { %2312 = dma.done.wait (%p3265_p10), [#allocation9], 768  }
  0x55   : > { %2314 = vsyncadd (%p3266_p5), [#allocation9], 4294966528  ;;  %p509_p11 = scmp.lt.s32.totalorder %s2410_s28, 1  ;;  %s2324_s27 = smov 113   ;;  %v3255_v2 = vmov 0.0   ;;  %v2331_v3 = vmov 0   ;;  %v541_v5 = vlaneseq }
  0x56   : > { %s2325_s15 = smov 111   ;;  %s2327_s18 = smov 127   ;;  %748 = vmatprep.mubr.f32.mxu0 %v3255_v2  ;;  %2165 = vset.pattern.permute.xlu0 %v2331_v3  ;;  %v674_v4 = vld [vmem:[%s3246_s7] sm:$0xff]  ;;  %vm646_vm0 = vcmask 908288   ;;  %vm622_vm1 = vcmask 924672   ;;  %vm635_vm2 = vcmask 916480  }
  0x57   : > { %s3271_s28 = smov (!%p509_p11, %s2410_s28), 1  ;;  %s2328_s14 = smov 1   ;;  %2166 = vset.pattern.permute.xlu1 %v2331_v3  ;;  %v542_v6 = vshrl.u32 %v541_v5, 7  ;;  %v2040_v8 = vld [vmem:[%s3240_s1 + $0x1] ss:$2 sm:$0x3] }
  0x58   : > { %s2498_s29 = sshll.u32 %s3271_s28, 4  ;;  %s2326_s28 = smov 112   ;;  %v524_v14 = vld [vmem:[%s3240_s1] ss:$2 sm:$0x3]  ;;  %vm609_vm3 = vcmask 1039360  }
  0x59   : > { %s2504_s20 = scalar_lea.vmem %s3239_s0, %s2498_s29  ;;  %s2330_s21 = smov 15   ;;  %v547_v7 = vsub.s32 1, %v542_v6  ;;  %v543_v10 = vsub.s32 0, %v542_v6  ;;  %vm594_vm4 = vcmask 7168   ;;  %vm570_vm5 = vcmask 121856   ;;  %v655_v58 = vld [vmem:[#allocation3] sm:$0xff] }
  0x5a   : > { %v2507_v0 = vld [vmem:[%s2504_s20 + $0x8] sm:$0xff]  ;;  %v2514_v1 = vld [vmem:[%s2504_s20] sm:$0xff]  ;;  %s2332_s22 = smov 17   ;;  %s2333_s16 = smov 16   ;;  %vm535_vm6 = vcmask 138240   ;;  %vm559_vm7 = vcmask 130048  }
  0x5b   : > { %620 = vrot.lane.b32.xlu1 %v2507_v0, %s2324_s27  ;;  %644 = vrot.lane.b32.xlu0 %v2507_v0, %s2325_s15  ;;  %v2551_v9 = vrot.slane %v2040_v8, %v547_v7  ;;  %v2560_v16 = vrot.slane %v2040_v8, %v543_v10  ;;  %v2563_v19 = vrot.slane %v524_v14, %v547_v7  ;;  %vm2628_vm8 = vmneg %vm559_vm7  ;;  %vm680_vm9 = vcmask 588800   ;;  %v895_v7 = vld [vmem:[%s3247_s8] sm:$0xff]  ;;  %v858_v8 = vld [vmem:[#allocation5 + $0x8] sm:$0xff] }
  0x5c   : > { %v2567_v22 = vrot.slane %v524_v14, %v543_v10  ;;  %2042 = vmatprep.mubr.msk.f32.mxu1 %vm559_vm7, %v858_v8  ;;  %vm1139_vm14 = vcmask 719872  }
  0x5f   : > { %618 = vrot.lane.b32.xlu1 %v2514_v1, %s2324_s27  ;;  %642 = vrot.lane.b32.xlu0 %v2514_v1, %s2325_s15 }
  0x63   : > { %633 = vrot.lane.b32.xlu1 %v2507_v0, %s2326_s28  ;;  %631 = vrot.lane.b32.xlu0 %v2514_v1, %s2326_s28 }
  0x67   : > { %605 = vrot.lane.b32.xlu1 %v2514_v1, %s2327_s18  ;;  %607 = vrot.lane.b32.xlu0 %v2507_v0, %s2327_s18 }
  0x6b   : > { %592 = vrot.lane.b32.xlu1 %v2507_v0, %s2328_s14  ;;  %590 = vrot.lane.b32.xlu0 %v2514_v1, %s2328_s14 }
  0x6f   : > { %568 = vrot.lane.b32.xlu1 %v2507_v0, %s2330_s21  ;;  %566 = vrot.lane.b32.xlu0 %v2514_v1, %s2330_s21 }
  0x73   : > { %533 = vrot.lane.b32.xlu1 %v2507_v0, %s2332_s22  ;;  %531 = vrot.lane.b32.xlu0 %v2514_v1, %s2332_s22 }
  0x77   : > { %557 = vrot.lane.b32.xlu1 %v2507_v0, %s2333_s16  ;;  %555 = vrot.lane.b32.xlu0 %v2514_v1, %s2333_s16 }
  0x7b   : > { %677 = vperm.xlu0 %2165, %v674_v4  }
  0xcd   : > { %v621_v11 = vpop.permute.xlu1 %620  ;;  %v645_v12 = vpop.permute.xlu0 %644 }
  0xce   : > { %v650_v13 = vsel %vm646_vm0, %v645_v12, 0.0  ;;  %v626_v21 = vsel %vm622_vm1, %v621_v11, 0.0 }
  0xcf   : > { %v2558_v15 = vmul.f32 %v650_v13, %v2551_v9  ;;  %v2577_v27 = vmul.f32 %v626_v21, %v2563_v19 }
  0xd1   : > { %v619_v17 = vpop.permute.xlu1 %618  ;;  %v643_v18 = vpop.permute.xlu0 %642  ;;  %698 = vmatprep.subr.mxu0 %v2558_v15 }
  0xd2   : > { %v647_v20 = vsel %vm646_vm0, %v643_v18, %v645_v12  ;;  %v623_v24 = vsel %vm622_vm1, %v619_v17, %v621_v11 }
  0xd3   : > { %v2570_v23 = vmul.f32 %v647_v20, %v2560_v16  ;;  %v2586_v29 = vmul.f32 %v623_v24, %v2567_v22 }
  0xd5   : > { %v2573_v25 = vpop.permute.xlu1 %633  ;;  %v632_v26 = vpop.permute.xlu0 %631  ;;  %699 = vmatpush1.msra.mxu0 %v2570_v23 }
  0xd6   : > { %v2581_v28 = vsel %vm635_vm2, %v632_v26, %v2573_v25  ;;  %2051 = vmatprep.subr.msk.mxu0 %vm635_vm2, %v2573_v25 }
  0xd7   : > { %701 = vmatpush1.msra.mxu0 %v2581_v28 }
  0xd8   : > { %702 = vmatprep.subr.mxu0 %v2577_v27 }
  0xd9   : > { %v606_v30 = vpop.permute.xlu1 %605  ;;  %v608_v31 = vpop.permute.xlu0 %607  ;;  %703 = vmatpush1.msra.mxu0 %v2586_v29 }
  0xda   : > { %v610_v32 = vsel %vm609_vm3, %v606_v30, %v608_v31  ;;  %v613_v33 = vsel %vm609_vm3, %v608_v31, 0.0 }
  0xdb   : > { %v2594_v34 = vmul.f32 %v610_v32, %v2560_v16  ;;  %v2597_v35 = vmul.f32 %v613_v33, %v2551_v9 }
  0xdd   : > { %v593_v36 = vpop.permute.xlu1 %592  ;;  %v591_v37 = vpop.permute.xlu0 %590  ;;  %704 = vmatprep.subr.mxu0 %v2597_v35 }
  0xde   : > { %v595_v38 = vsel %vm594_vm4, %v591_v37, %v593_v36  ;;  %v598_v39 = vsel %vm594_vm4, 0.0, %v591_v37  ;;  %705 = vmatpush1.msra.mxu0 %v2594_v34 }
  0xdf   : > { %v2604_v40 = vmul.f32 %v598_v39, %v2567_v22  ;;  %v2607_v41 = vmul.f32 %v595_v38, %v2563_v19  ;;  %706 = vmatprep.subr.mxu0 %v2507_v0 }
  0xe0   : > { %707 = vmatpush1.msra.mxu0 %v2514_v1 }
  0xe1   : > { %v569_v42 = vpop.permute.xlu1 %568  ;;  %v567_v43 = vpop.permute.xlu0 %566  ;;  %708 = vmatprep.subr.mxu0 %v2607_v41 }
  0xe2   : > { %v571_v44 = vsel %vm570_vm5, %v567_v43, %v569_v42  ;;  %v574_v45 = vsel %vm570_vm5, 0.0, %v567_v43  ;;  %709 = vmatpush1.msra.mxu0 %v2604_v40 }
  0xe3   : > { %v2616_v46 = vmul.f32 %v2560_v16, %v574_v45  ;;  %v2619_v47 = vmul.f32 %v2551_v9, %v571_v44 }
  0xe5   : > { %v534_v48 = vpop.permute.xlu1 %533  ;;  %v532_v49 = vpop.permute.xlu0 %531  ;;  %710 = vmatprep.subr.mxu0 %v2619_v47 }
  0xe6   : > { %711 = vmatpush1.msra.mxu0 %v2616_v46  ;;  %v536_v50 = vsel %vm535_vm6, %v532_v49, %v534_v48  ;;  %v539_v51 = vsel %vm535_vm6, 0.0, %v532_v49 }
  0xe7   : > { %v2637_v56 = vmul.f32 %v2563_v19, %v536_v50  ;;  %v2641_v57 = vmul.f32 %v2567_v22, %v539_v51 }
  0xe9   : > { %v558_v52 = vpop.permute.xlu1 %557  ;;  %v2625_v53 = vpop.permute.xlu0 %555 }
  0xea   : > { %v2634_v55 = vsel %vm559_vm7, %v2625_v53, %v558_v52 }
  0xeb   : > { %712 = vmatprep.subr.mxu0 %v2634_v55 }
  0xec   : > { %2053 = vmatpush1.msk.msra.mxu0 %vm2628_vm8, %v2625_v53 }
  0xed   : > { %714 = vmatprep.subr.mxu0 %v2637_v56 }
  0xee   : > { %715 = vmatpush1.msra.mxu0 %v2641_v57 }
  0xef   : > { %2041 = vmatmul.mubr.msk.f32.vlgmr.msra.gmra.mxu0 %vm680_vm9, %v655_v58 }
  0xf6   : > { %v678_v59 = vpop.permute.xlu0 %677 }
 0x1af   : > { %v750_v60 = vpop.f32.mrf.mxu0 }
 0x1b0   : > { %v751_v61 = vadd.f32 %v750_v60, %v678_v59 }
 0x1b1   : > { %v752_v62 = vpop.f32.mrf.mxu0 }
 0x1b2   : > { %vm755_vm10 = vcmp.gt.f32.partialorder %v751_v61, 0.0  ;;  %v757_v63 = vmul.f32 0.2, %v751_v61  ;;  %v753_v3 = vadd.f32 %v752_v62, %v678_v59 }
 0x1b4   : > { %v2648_v4 = vsel %vm755_vm10, %v751_v61, %v757_v63  ;;  %v758_v5 = vmul.f32 0.2, %v753_v3  ;;  %vm756_vm11 = vcmp.gt.f32.partialorder %v753_v3, 0.0  ;;  %vm1397_vm10 = vcmask 261120  }
 0x1b5   : > { %797 = vrot.lane.b32.xlu0 %v2648_v4, %s2328_s14  ;;  %823 = vrot.lane.b32.xlu1 %v2648_v4, %s2324_s27 }
 0x1b6   : > { %v2654_v6 = vsel %vm756_vm11, %v753_v3, %v758_v5 }
 0x1b9   : > { %813 = vrot.lane.b32.xlu0 %v2654_v6, %s2327_s18  ;;  %811 = vrot.lane.b32.xlu1 %v2648_v4, %s2327_s18 }
 0x1bd   : > { %785 = vrot.lane.b32.xlu0 %v2648_v4, %s2330_s21  ;;  %825 = vrot.lane.b32.xlu1 %v2654_v6, %s2324_s27 }
 0x1c1   : > { %763 = vrot.lane.b32.xlu0 %v2648_v4, %s2332_s22  ;;  %799 = vrot.lane.b32.xlu1 %v2654_v6, %s2328_s14 }
 0x1c5   : > { %775 = vrot.lane.b32.xlu0 %v2648_v4, %s2333_s16  ;;  %787 = vrot.lane.b32.xlu1 %v2654_v6, %s2330_s21 }
 0x1c9   : > { %847 = vrot.lane.b32.xlu0 %v2654_v6, %s2325_s15  ;;  %765 = vrot.lane.b32.xlu1 %v2654_v6, %s2332_s22 }
 0x1cd   : > { %835 = vrot.lane.b32.xlu0 %v2648_v4, %s2326_s28  ;;  %777 = vrot.lane.b32.xlu1 %v2654_v6, %s2333_s16 }
 0x1d1   : > { %898 = vperm.xlu0 %2165, %v895_v7   ;;  %845 = vrot.lane.b32.xlu1 %v2648_v4, %s2325_s15 }
 0x1d5   : > { %837 = vrot.lane.b32.xlu1 %v2654_v6, %s2326_s28 }
 0x227   : > { %v798_v10 = vpop.permute.xlu0 %797  ;;  %v824_v11 = vpop.permute.xlu1 %823 }
 0x228   : > { %v804_v37 = vsel %vm594_vm4, 0.0, %v798_v10 }
 0x229   : > { %v2721_v43 = vmul.f32 %v804_v37, %v2567_v22 }
 0x22b   : > { %v812_v12 = vpop.permute.xlu1 %811  ;;  %v814_v13 = vpop.permute.xlu0 %813 }
 0x22c   : > { %v818_v17 = vsel %vm609_vm3, %v814_v13, 0.0  ;;  %v815_v21 = vsel %vm609_vm3, %v812_v12, %v814_v13  ;;  %v857_v13 = vld [vmem:[#allocation5] sm:$0xff] }
 0x22d   : > { %v2699_v30 = vmul.f32 %v818_v17, %v2551_v9  ;;  %v2704_v33 = vmul.f32 %v815_v21, %v2560_v16 }
 0x22f   : > { %v826_v14 = vpop.permute.xlu1 %825  ;;  %v786_v31 = vpop.permute.xlu0 %785 }
 0x230   : > { %v827_v18 = vsel %vm622_vm1, %v824_v11, %v826_v14  ;;  %v830_v20 = vsel %vm622_vm1, %v826_v14, 0.0  ;;  %v792_v38 = vsel %vm570_vm5, 0.0, %v786_v31 }
 0x231   : > { %v2693_v24 = vmul.f32 %v827_v18, %v2567_v22  ;;  %v2696_v26 = vmul.f32 %v830_v20, %v2563_v19  ;;  %v2732_v49 = vmul.f32 %v792_v38, %v2560_v16 }
 0x233   : > { %904 = vmatprep.subr.mxu1 %v2696_v26  ;;  %1143 = vmatprep.subr.mxu0 %v2696_v26  ;;  %v800_v32 = vpop.permute.xlu1 %799  ;;  %v764_v45 = vpop.permute.xlu0 %763 }
 0x234   : > { %v801_v36 = vsel %vm594_vm4, %v798_v10, %v800_v32  ;;  %905 = vmatpush1.msra.mxu1 %v2693_v24  ;;  %1144 = vmatpush1.msra.mxu0 %v2693_v24  ;;  %v770_v52 = vsel %vm535_vm6, 0.0, %v764_v45 }
 0x235   : > { %906 = vmatprep.subr.mxu1 %v2699_v30  ;;  %1145 = vmatprep.subr.mxu0 %v2699_v30  ;;  %v2716_v39 = vmul.f32 %v801_v36, %v2563_v19  ;;  %v2754_v62 = vmul.f32 %v770_v52, %v2567_v22 }
 0x236   : > { %907 = vmatpush1.msra.mxu1 %v2704_v33  ;;  %1146 = vmatpush1.msra.mxu0 %v2704_v33 }
 0x237   : > { %908 = vmatprep.subr.mxu1 %v2654_v6  ;;  %1147 = vmatprep.subr.mxu0 %v2654_v6  ;;  %v788_v42 = vpop.permute.xlu1 %787  ;;  %v2742_v58 = vpop.permute.xlu0 %775 }
 0x238   : > { %v789_v44 = vsel %vm570_vm5, %v786_v31, %v788_v42  ;;  %909 = vmatpush1.msra.mxu1 %v2648_v4  ;;  %1148 = vmatpush1.msra.mxu0 %v2648_v4  ;;  %v1078_v42 = vld [vmem:[#allocation7 + $0x8] sm:$0xff] }
 0x239   : > { %v2727_v48 = vmul.f32 %v789_v44, %v2551_v9  ;;  %910 = vmatprep.subr.mxu1 %v2716_v39  ;;  %1149 = vmatprep.subr.mxu0 %v2716_v39  ;;  %v1133_v44 = vld [vmem:[%s3248_s9] sm:$0xff] }
 0x23a   : > { %911 = vmatpush1.msra.mxu1 %v2721_v43  ;;  %1150 = vmatpush1.msra.mxu0 %v2721_v43 }
 0x23b   : > { %912 = vmatprep.subr.mxu1 %v2727_v48  ;;  %1151 = vmatprep.subr.mxu0 %v2727_v48  ;;  %v766_v50 = vpop.permute.xlu1 %765  ;;  %v848_v63 = vpop.permute.xlu0 %847 }
 0x23c   : > { %913 = vmatpush1.msra.mxu1 %v2732_v49  ;;  %1152 = vmatpush1.msra.mxu0 %v2732_v49  ;;  %v767_v51 = vsel %vm535_vm6, %v764_v45, %v766_v50  ;;  %v852_v5 = vsel %vm646_vm0, %v848_v63, 0.0 }
 0x23d   : > { %v2749_v61 = vmul.f32 %v767_v51, %v2563_v19  ;;  %v2807_v8 = vmul.f32 %v852_v5, %v2551_v9  ;;  %2043 = vmatprep.mubr.msk.f32.mxu0 %vm1139_vm14, %v1078_v42 }
 0x23f   : > { %v778_v59 = vpop.permute.xlu1 %777  ;;  %v836_v12 = vpop.permute.xlu0 %835 }
 0x240   : > { %v2746_v60 = vsel %vm559_vm7, %v2742_v58, %v778_v59 }
 0x241   : > { %914 = vmatprep.subr.mxu1 %v2746_v60  ;;  %1153 = vmatprep.subr.mxu0 %v2746_v60 }
 0x242   : > { %2055 = vmatpush1.msk.msra.mxu1 %vm2628_vm8, %v2742_v58  ;;  %2061 = vmatpush1.msk.msra.mxu0 %vm2628_vm8, %v2742_v58 }
 0x243   : > { %916 = vmatprep.subr.mxu1 %v2749_v61  ;;  %1155 = vmatprep.subr.mxu0 %v2749_v61  ;;  %v846_v3 = vpop.permute.xlu1 %845 }
 0x244   : > { %917 = vmatpush1.msra.mxu1 %v2754_v62  ;;  %1156 = vmatpush1.msra.mxu0 %v2754_v62  ;;  %v849_v7 = vsel %vm646_vm0, %v846_v3, %v848_v63 }
 0x245   : > { %918 = vmatprep.subr.mxu1 %v2558_v15  ;;  %1157 = vmatprep.subr.mxu0 %v2558_v15  ;;  %v2812_v10 = vmul.f32 %v849_v7, %v2560_v16 }
 0x246   : > { %919 = vmatpush1.msra.mxu1 %v2570_v23  ;;  %1158 = vmatpush1.msra.mxu0 %v2570_v23 }
 0x247   : > { %2056 = vmatprep.subr.msk.mxu1 %vm635_vm2, %v2573_v25  ;;  %2062 = vmatprep.subr.msk.mxu0 %vm635_vm2, %v2573_v25  ;;  %v2814_v11 = vpop.permute.xlu1 %837 }
 0x248   : > { %921 = vmatpush1.msra.mxu1 %v2581_v28  ;;  %1160 = vmatpush1.msra.mxu0 %v2581_v28  ;;  %v2824_v14 = vsel %vm635_vm2, %v836_v12, %v2814_v11 }
 0x249   : > { %922 = vmatprep.subr.mxu1 %v2577_v27  ;;  %1161 = vmatprep.subr.mxu0 %v2577_v27 }
 0x24a   : > { %923 = vmatpush1.msra.mxu1 %v2586_v29  ;;  %1162 = vmatpush1.msra.mxu0 %v2586_v29 }
 0x24b   : > { %924 = vmatprep.subr.mxu1 %v2597_v35  ;;  %1163 = vmatprep.subr.mxu0 %v2597_v35 }
 0x24c   : > { %925 = vmatpush1.msra.mxu1 %v2594_v34  ;;  %1164 = vmatpush1.msra.mxu0 %v2594_v34  ;;  %v899_v17 = vpop.permute.xlu0 %898 }
 0x24d   : > { %926 = vmatprep.subr.mxu1 %v2507_v0  ;;  %1165 = vmatprep.subr.mxu0 %v2507_v0 }
 0x24e   : > { %927 = vmatpush1.msra.mxu1 %v2514_v1  ;;  %1166 = vmatpush1.msra.mxu0 %v2514_v1 }
 0x24f   : > { %928 = vmatprep.subr.mxu1 %v2607_v41  ;;  %1167 = vmatprep.subr.mxu0 %v2607_v41 }
 0x250   : > { %929 = vmatpush1.msra.mxu1 %v2604_v40  ;;  %1168 = vmatpush1.msra.mxu0 %v2604_v40 }
 0x251   : > { %930 = vmatprep.subr.mxu1 %v2619_v47  ;;  %1169 = vmatprep.subr.mxu0 %v2619_v47 }
 0x252   : > { %931 = vmatpush1.msra.mxu1 %v2616_v46  ;;  %1170 = vmatpush1.msra.mxu0 %v2616_v46 }
 0x253   : > { %932 = vmatprep.subr.mxu1 %v2634_v55  ;;  %1171 = vmatprep.subr.mxu0 %v2634_v55 }
 0x254   : > { %2058 = vmatpush1.msk.msra.mxu1 %vm2628_vm8, %v2625_v53  ;;  %2064 = vmatpush1.msk.msra.mxu0 %vm2628_vm8, %v2625_v53 }
 0x255   : > { %934 = vmatprep.subr.mxu1 %v2637_v56  ;;  %1173 = vmatprep.subr.mxu0 %v2637_v56 }
 0x256   : > { %935 = vmatpush1.msra.mxu1 %v2641_v57  ;;  %1174 = vmatpush1.msra.mxu0 %v2641_v57 }
 0x257   : > { %964 = vmatprep.subr.mxu1 %v2807_v8 }
 0x258   : > { %965 = vmatpush2.msra.mxu1 %v2812_v10 }
 0x259   : > { %2059 = vmatprep.subr.msk.mxu1 %vm635_vm2, %v2814_v11 }
 0x25a   : > { %967 = vmatpush2.msra.mxu1 %v2824_v14 }
 0x25b   : > { %969 = vmatmul.mubr.f32.vlgmr.msra.gmra.mxu1 %v857_v13  ;;  %1401 = vmatprep.subr.mxu1 %v2696_v26 }
 0x25c   : > { %1402 = vmatpush1.msra.mxu1 %v2693_v24 }
 0x25d   : > { %1403 = vmatprep.subr.mxu1 %v2699_v30 }
 0x25e   : > { %1404 = vmatpush1.msra.mxu1 %v2704_v33 }
 0x25f   : > { %1405 = vmatprep.subr.mxu1 %v2654_v6 }
 0x260   : > { %1406 = vmatpush1.msra.mxu1 %v2648_v4 }
 0x261   : > { %1407 = vmatprep.subr.mxu1 %v2716_v39 }
 0x262   : > { %1408 = vmatpush1.msra.mxu1 %v2721_v43 }
 0x263   : > { %1409 = vmatprep.subr.mxu1 %v2727_v48 }
 0x264   : > { %1410 = vmatpush1.msra.mxu1 %v2732_v49 }
 0x265   : > { %1411 = vmatprep.subr.mxu1 %v2746_v60 }
 0x266   : > { %2070 = vmatpush1.msk.msra.mxu1 %vm2628_vm8, %v2742_v58 }
 0x267   : > { %1413 = vmatprep.subr.mxu1 %v2749_v61 }
 0x268   : > { %1414 = vmatpush1.msra.mxu1 %v2754_v62 }
 0x269   : > { %1415 = vmatprep.subr.mxu1 %v2558_v15 }
 0x26a   : > { %1416 = vmatpush1.msra.mxu1 %v2570_v23 }
 0x26b   : > { %2071 = vmatprep.subr.msk.mxu1 %vm635_vm2, %v2573_v25 }
 0x26c   : > { %1418 = vmatpush1.msra.mxu1 %v2581_v28 }
 0x26d   : > { %1419 = vmatprep.subr.mxu1 %v2577_v27 }
 0x26e   : > { %1420 = vmatpush1.msra.mxu1 %v2586_v29 }
 0x26f   : > { %1421 = vmatprep.subr.mxu1 %v2597_v35 }
 0x270   : > { %1422 = vmatpush1.msra.mxu1 %v2594_v34 }
 0x271   : > { %1423 = vmatprep.subr.mxu1 %v2507_v0 }
 0x272   : > { %1424 = vmatpush1.msra.mxu1 %v2514_v1 }
 0x273   : > { %1425 = vmatprep.subr.mxu1 %v2607_v41 }
 0x274   : > { %1426 = vmatpush1.msra.mxu1 %v2604_v40 }
 0x275   : > { %1427 = vmatprep.subr.mxu1 %v2619_v47 }
 0x276   : > { %1428 = vmatpush1.msra.mxu1 %v2616_v46 }
 0x277   : > { %1429 = vmatprep.subr.mxu1 %v2634_v55 }
 0x278   : > { %2073 = vmatpush1.msk.msra.mxu1 %vm2628_vm8, %v2625_v53 }
 0x279   : > { %1431 = vmatprep.subr.mxu1 %v2637_v56 }
 0x27a   : > { %1432 = vmatpush1.msra.mxu1 %v2641_v57 }
 0x31b   : > { %v970_v18 = vpop.f32.mrf.mxu1 }
 0x31c   : > { %v971_v20 = vadd.f32 %v970_v18, %v899_v17 }
 0x31d   : > { %v972_v21 = vpop.f32.mrf.mxu1 }
 0x31e   : > { %vm975_vm12 = vcmp.gt.f32.partialorder %v971_v20, 0.0  ;;  %v977_v31 = vmul.f32 0.2, %v971_v20  ;;  %v973_v36 = vadd.f32 %v972_v21, %v899_v17 }
 0x320   : > { %v2864_v32 = vsel %vm975_vm12, %v971_v20, %v977_v31  ;;  %v978_v37 = vmul.f32 0.2, %v973_v36  ;;  %vm976_vm13 = vcmp.gt.f32.partialorder %v973_v36, 0.0 }
 0x321   : > { %1055 = vrot.lane.b32.xlu1 %v2864_v32, %s2326_s28  ;;  %1065 = vrot.lane.b32.xlu0 %v2864_v32, %s2325_s15 }
 0x322   : > { %v2874_v38 = vsel %vm976_vm13, %v973_v36, %v978_v37 }
 0x325   : > { %1017 = vrot.lane.b32.xlu1 %v2864_v32, %s2328_s14  ;;  %1043 = vrot.lane.b32.xlu0 %v2864_v32, %s2324_s27 }
 0x329   : > { %1067 = vrot.lane.b32.xlu1 %v2874_v38, %s2325_s15  ;;  %1031 = vrot.lane.b32.xlu0 %v2864_v32, %s2327_s18 }
 0x32d   : > { %1045 = vrot.lane.b32.xlu1 %v2874_v38, %s2324_s27  ;;  %1057 = vrot.lane.b32.xlu0 %v2874_v38, %s2326_s28 }
 0x331   : > { %1033 = vrot.lane.b32.xlu1 %v2874_v38, %s2327_s18  ;;  %1019 = vrot.lane.b32.xlu0 %v2874_v38, %s2328_s14 }
 0x335   : > { %1005 = vrot.lane.b32.xlu1 %v2864_v32, %s2330_s21  ;;  %1007 = vrot.lane.b32.xlu0 %v2874_v38, %s2330_s21 }
 0x339   : > { %983 = vrot.lane.b32.xlu1 %v2864_v32, %s2332_s22  ;;  %985 = vrot.lane.b32.xlu0 %v2874_v38, %s2332_s22 }
 0x33d   : > { %995 = vrot.lane.b32.xlu1 %v2864_v32, %s2333_s16  ;;  %997 = vrot.lane.b32.xlu0 %v2874_v38, %s2333_s16 }
 0x341   : > { %1136 = vperm.xlu1 %2166, %v1133_v44  }
 0x393   : > { %v1056_v45 = vpop.permute.xlu1 %1055  ;;  %v1066_v50 = vpop.permute.xlu0 %1065 }
 0x397   : > { %v1018_v51 = vpop.permute.xlu1 %1017  ;;  %v1044_v52 = vpop.permute.xlu0 %1043 }
 0x39b   : > { %v1068_v59 = vpop.permute.xlu1 %1067  ;;  %v1032_v63 = vpop.permute.xlu0 %1031 }
 0x39c   : > { %v1069_v3 = vsel %vm646_vm0, %v1066_v50, %v1068_v59  ;;  %v1072_v5 = vsel %vm646_vm0, %v1068_v59, 0.0 }
 0x39d   : > { %v2906_v7 = vmul.f32 %v1069_v3, %v2560_v16  ;;  %v2909_v12 = vmul.f32 %v1072_v5, %v2551_v9  ;;  %v1024_v3 = vsel %vm594_vm4, 0.0, %v1018_v51 }
 0x39f   : > { %1185 = vmatprep.subr.mxu0 %v2909_v12  ;;  %v1046_v13 = vpop.permute.xlu1 %1045  ;;  %v2912_v17 = vpop.permute.xlu0 %1057 }
 0x3a0   : > { %v1047_v18 = vsel %vm622_vm1, %v1044_v52, %v1046_v13  ;;  %v1050_v20 = vsel %vm622_vm1, %v1046_v13, 0.0  ;;  %1186 = vmatpush2.msra.mxu0 %v2906_v7  ;;  %v2919_v21 = vsel %vm635_vm2, %v1056_v45, %v2912_v17 }
 0x3a1   : > { %v2922_v31 = vmul.f32 %v1047_v18, %v2567_v22  ;;  %v2925_v36 = vmul.f32 %v1050_v20, %v2563_v19  ;;  %2065 = vmatprep.subr.msk.mxu0 %vm635_vm2, %v2912_v17 }
 0x3a2   : > { %1188 = vmatpush2.msra.mxu0 %v2919_v21 }
 0x3a3   : > { %v1034_v37 = vpop.permute.xlu1 %1033  ;;  %1189 = vmatprep.subr.mxu0 %v2925_v36  ;;  %v1020_v42 = vpop.permute.xlu0 %1019 }
 0x3a4   : > { %v1035_v44 = vsel %vm609_vm3, %v1032_v63, %v1034_v37  ;;  %v1038_v45 = vsel %vm609_vm3, %v1034_v37, 0.0  ;;  %1190 = vmatpush2.msra.mxu0 %v2922_v31  ;;  %v1021_v59 = vsel %vm594_vm4, %v1018_v51, %v1020_v42  ;;  %v2951_v37 = vmul.f32 %v1024_v3, %v2567_v22 }
 0x3a5   : > { %v2935_v50 = vmul.f32 %v1035_v44, %v2560_v16  ;;  %v2938_v52 = vmul.f32 %v1038_v45, %v2551_v9  ;;  %v2946_v18 = vmul.f32 %v1021_v59, %v2563_v19 }
 0x3a7   : > { %v1006_v5 = vpop.permute.xlu1 %1005  ;;  %1191 = vmatprep.subr.mxu0 %v2938_v52  ;;  %v1008_v13 = vpop.permute.xlu0 %1007 }
 0x3a8   : > { %v1009_v63 = vsel %vm570_vm5, %v1006_v5, %v1008_v13  ;;  %1192 = vmatpush2.msra.mxu0 %v2935_v50  ;;  %v1012_v20 = vsel %vm570_vm5, 0.0, %v1006_v5 }
 0x3a9   : > { %1193 = vmatprep.subr.mxu0 %v2874_v38  ;;  %v2955_v51 = vmul.f32 %v1009_v63, %v2551_v9  ;;  %v2959_v45 = vmul.f32 %v1012_v20, %v2560_v16 }
 0x3aa   : > { %1194 = vmatpush2.msra.mxu0 %v2864_v32 }
 0x3ab   : > { %v984_v42 = vpop.permute.xlu1 %983  ;;  %1195 = vmatprep.subr.mxu0 %v2946_v18  ;;  %v986_v44 = vpop.permute.xlu0 %985 }
 0x3ac   : > { %1196 = vmatpush2.msra.mxu0 %v2951_v37  ;;  %v987_v59 = vsel %vm535_vm6, %v984_v42, %v986_v44  ;;  %v990_v3 = vsel %vm535_vm6, 0.0, %v984_v42  ;;  %v1077_v42 = vld [vmem:[#allocation7] sm:$0xff] }
 0x3ad   : > { %1197 = vmatprep.subr.mxu0 %v2955_v51  ;;  %v2973_v20 = vmul.f32 %v987_v59, %v2563_v19  ;;  %v2977_v2 = vmul.f32 %v990_v3, %v2567_v22 }
 0x3ae   : > { %1198 = vmatpush2.msra.mxu0 %v2959_v45 }
 0x3af   : > { %v2966_v5 = vpop.permute.xlu1 %995  ;;  %v998_v13 = vpop.permute.xlu0 %997 }
 0x3b0   : > { %v2970_v63 = vsel %vm559_vm7, %v2966_v5, %v998_v13 }
 0x3b1   : > { %1199 = vmatprep.subr.mxu0 %v2970_v63 }
 0x3b2   : > { %2067 = vmatpush2.msk.msra.mxu0 %vm2628_vm8, %v2966_v5 }
 0x3b3   : > { %1201 = vmatprep.subr.mxu0 %v2973_v20 }
 0x3b4   : > { %1202 = vmatpush2.msra.mxu0 %v2977_v2 }
 0x3b5   : > { %1203 = vmatprep.subr.mxu0 %v2807_v8 }
 0x3b6   : > { %1204 = vmatpush2.msra.mxu0 %v2812_v10 }
 0x3b7   : > { %2068 = vmatprep.subr.msk.mxu0 %vm635_vm2, %v2814_v11 }
 0x3b8   : > { %1206 = vmatpush2.msra.mxu0 %v2824_v14 }
 0x3b9   : > { %1208 = vmatmul.mubr.f32.vlgmr.msra.gmra.mxu0 %v1077_v42  ;;  %1748 = vmatprep.subr.mxu0 %v2696_v26 }
 0x3ba   : > { %1749 = vmatpush1.msra.mxu0 %v2693_v24 }
 0x3bb   : > { %1750 = vmatprep.subr.mxu0 %v2699_v30 }
 0x3bc   : > { %1751 = vmatpush1.msra.mxu0 %v2704_v33 }
 0x3bd   : > { %1752 = vmatprep.subr.mxu0 %v2654_v6 }
 0x3be   : > { %1753 = vmatpush1.msra.mxu0 %v2648_v4 }
 0x3bf   : > { %1754 = vmatprep.subr.mxu0 %v2716_v39 }
 0x3c0   : > { %1755 = vmatpush1.msra.mxu0 %v2721_v43 }
 0x3c1   : > { %1756 = vmatprep.subr.mxu0 %v2727_v48 }
 0x3c2   : > { %1757 = vmatpush1.msra.mxu0 %v2732_v49 }
 0x3c3   : > { %1758 = vmatprep.subr.mxu0 %v2746_v60 }
 0x3c4   : > { %2082 = vmatpush1.msk.msra.mxu0 %vm2628_vm8, %v2742_v58 }
 0x3c5   : > { %1760 = vmatprep.subr.mxu0 %v2749_v61 }
 0x3c6   : > { %1761 = vmatpush1.msra.mxu0 %v2754_v62 }
 0x3c7   : > { %1762 = vmatprep.subr.mxu0 %v2558_v15 }
 0x3c8   : > { %1763 = vmatpush1.msra.mxu0 %v2570_v23 }
 0x3c9   : > { %2083 = vmatprep.subr.msk.mxu0 %vm635_vm2, %v2573_v25 }
 0x3ca   : > { %1765 = vmatpush1.msra.mxu0 %v2581_v28 }
 0x3cb   : > { %1766 = vmatprep.subr.mxu0 %v2577_v27 }
 0x3cc   : > { %1767 = vmatpush1.msra.mxu0 %v2586_v29 }
 0x3cd   : > { %1768 = vmatprep.subr.mxu0 %v2597_v35  ;;  %v1317_v35 = vld [vmem:[#allocation8 + $0x8] sm:$0xff] }
 0x3ce   : > { %1769 = vmatpush1.msra.mxu0 %v2594_v34  ;;  %1465 = vmatprep.mubr.f32.mxu1 %v1317_v35 }
 0x3cf   : > { %1770 = vmatprep.subr.mxu0 %v2507_v0  ;;  %v1137_v0 = vpop.permute.xlu1 %1136 }
 0x3d0   : > { %1771 = vmatpush1.msra.mxu0 %v2514_v1 }
 0x3d1   : > { %1772 = vmatprep.subr.mxu0 %v2607_v41  ;;  %v1646_v41 = vld [vmem:[#allocation10 + $0x8] sm:$0xff] }
 0x3d2   : > { %1773 = vmatpush1.msra.mxu0 %v2604_v40  ;;  %v1391_v40 = vld [vmem:[%s3249_s10] sm:$0xff]  ;;  %1812 = vmatprep.mubr.f32.mxu0 %v1646_v41 }
 0x3d3   : > { %1774 = vmatprep.subr.mxu0 %v2619_v47 }
 0x3d4   : > { %1775 = vmatpush1.msra.mxu0 %v2616_v46 }
 0x3d5   : > { %1776 = vmatprep.subr.mxu0 %v2634_v55 }
 0x3d6   : > { %2085 = vmatpush1.msk.msra.mxu0 %vm2628_vm8, %v2625_v53 }
 0x3d7   : > { %1778 = vmatprep.subr.mxu0 %v2637_v56 }
 0x3d8   : > { %1779 = vmatpush1.msra.mxu0 %v2641_v57 }
 0x479   : > { %v1209_v1 = vpop.f32.mrf.mxu0 }
 0x47a   : > { %v1210_v15 = vadd.f32 %v1209_v1, %v1137_v0 }
 0x47b   : > { %v1211_v23 = vpop.f32.mrf.mxu0 }
 0x47c   : > { %vm1214_vm15 = vcmp.gt.f32.partialorder %v1210_v15, 0.0  ;;  %v1216_v25 = vmul.f32 0.2, %v1210_v15  ;;  %v1212_v27 = vadd.f32 %v1211_v23, %v1137_v0 }
 0x47e   : > { %v1218_v28 = vsel %vm1214_vm15, %v1210_v15, %v1216_v25  ;;  %vm1215_vm9 = vcmp.gt.f32.partialorder %v1212_v27, 0.0  ;;  %v1217_v29 = vmul.f32 0.2, %v1212_v27 }
 0x47f   : > { %1256 = vrot.lane.b32.xlu0 %v1218_v28, %s2328_s14 }
 0x480   : > { %v1219_v34 = vsel %vm1215_vm9, %v1212_v27, %v1217_v29 }
 0x481   : > { %1258 = vrot.lane.b32.xlu1 %v1219_v34, %s2328_s14  ;;  %1433 = vmatprep.subr.mxu1 %v1219_v34 }
 0x482   : > { %1780 = vmatprep.subr.mxu0 %v1219_v34  ;;  %1434 = vmatpush2.msra.mxu1 %v1218_v28 }
 0x483   : > { %1781 = vmatpush2.msra.mxu0 %v1218_v28  ;;  %1244 = vrot.lane.b32.xlu0 %v1218_v28, %s2330_s21 }
 0x485   : > { %1246 = vrot.lane.b32.xlu1 %v1219_v34, %s2330_s21 }
 0x487   : > { %1222 = vrot.lane.b32.xlu0 %v1218_v28, %s2332_s22 }
 0x489   : > { %1224 = vrot.lane.b32.xlu1 %v1219_v34, %s2332_s22 }
 0x48b   : > { %1234 = vrot.lane.b32.xlu0 %v1218_v28, %s2333_s16 }
 0x48d   : > { %1236 = vrot.lane.b32.xlu1 %v1219_v34, %s2333_s16 }
 0x48f   : > { %1294 = vrot.lane.b32.xlu0 %v1218_v28, %s2326_s28 }
 0x491   : > { %1304 = vrot.lane.b32.xlu1 %v1218_v28, %s2325_s15 }
 0x493   : > { %1306 = vrot.lane.b32.xlu0 %v1219_v34, %s2325_s15 }
 0x495   : > { %1282 = vrot.lane.b32.xlu1 %v1218_v28, %s2324_s27 }
 0x497   : > { %1284 = vrot.lane.b32.xlu0 %v1219_v34, %s2324_s27 }
 0x499   : > { %1296 = vrot.lane.b32.xlu1 %v1219_v34, %s2326_s28 }
 0x49b   : > { %1272 = vrot.lane.b32.xlu0 %v1219_v34, %s2327_s18 }
 0x49d   : > { %1270 = vrot.lane.b32.xlu1 %v1218_v28, %s2327_s18 }
 0x49f   : > { %1394 = vperm.xlu0 %2165, %v1391_v40  }
 0x4f1   : > { %v1257_v46 = vpop.permute.xlu0 %1256 }
 0x4f2   : > { %v1263_v47 = vsel %vm594_vm4, 0.0, %v1257_v46 }
 0x4f3   : > { %v1259_v53 = vpop.permute.xlu1 %1258  ;;  %v1264_v4 = vmul.f32 %v1263_v47, %v2567_v22 }
 0x4f4   : > { %v1260_v55 = vsel %vm594_vm4, %v1257_v46, %v1259_v53  ;;  %v1738_v46 = vld [vmem:[%s3250_s11] sm:$0xff] }
 0x4f5   : > { %v1265_v56 = vmul.f32 %v1260_v55, %v2563_v19  ;;  %v1245_v57 = vpop.permute.xlu0 %1244 }
 0x4f6   : > { %v1251_v6 = vsel %vm570_vm5, 0.0, %v1245_v57 }
 0x4f7   : > { %v1247_v24 = vpop.permute.xlu1 %1246  ;;  %1435 = vmatprep.subr.mxu1 %v1265_v56  ;;  %1782 = vmatprep.subr.mxu0 %v1265_v56  ;;  %v1252_v39 = vmul.f32 %v1251_v6, %v2560_v16 }
 0x4f8   : > { %v1248_v26 = vsel %vm570_vm5, %v1245_v57, %v1247_v24  ;;  %1436 = vmatpush2.msra.mxu1 %v1264_v4  ;;  %1783 = vmatpush2.msra.mxu0 %v1264_v4 }
 0x4f9   : > { %v1253_v30 = vmul.f32 %v1248_v26, %v2551_v9  ;;  %v1223_v33 = vpop.permute.xlu0 %1222 }
 0x4fa   : > { %v1229_v49 = vsel %vm535_vm6, 0.0, %v1223_v33 }
 0x4fb   : > { %v1225_v43 = vpop.permute.xlu1 %1224  ;;  %1437 = vmatprep.subr.mxu1 %v1253_v30  ;;  %1784 = vmatprep.subr.mxu0 %v1253_v30  ;;  %v1230_v44 = vmul.f32 %v1229_v49, %v2567_v22 }
 0x4fc   : > { %1438 = vmatpush2.msra.mxu1 %v1252_v39  ;;  %1785 = vmatpush2.msra.mxu0 %v1252_v39  ;;  %v1226_v48 = vsel %vm535_vm6, %v1223_v33, %v1225_v43 }
 0x4fd   : > { %v1235_v58 = vpop.permute.xlu0 %1234  ;;  %v1231_v62 = vmul.f32 %v1226_v48, %v2563_v19 }
 0x4ff   : > { %v1237_v60 = vpop.permute.xlu1 %1236 }
 0x500   : > { %v1238_v61 = vsel %vm559_vm7, %v1235_v58, %v1237_v60 }
 0x501   : > { %1439 = vmatprep.subr.mxu1 %v1238_v61  ;;  %1786 = vmatprep.subr.mxu0 %v1238_v61  ;;  %v3066_v59 = vpop.permute.xlu0 %1294 }
 0x502   : > { %2075 = vmatpush2.msk.msra.mxu1 %vm2628_vm8, %v1235_v58  ;;  %2087 = vmatpush2.msk.msra.mxu0 %vm2628_vm8, %v1235_v58 }
 0x503   : > { %1441 = vmatprep.subr.mxu1 %v1231_v62  ;;  %1788 = vmatprep.subr.mxu0 %v1231_v62  ;;  %v1305_v3 = vpop.permute.xlu1 %1304 }
 0x504   : > { %1442 = vmatpush2.msra.mxu1 %v1230_v44  ;;  %1789 = vmatpush2.msra.mxu0 %v1230_v44 }
 0x505   : > { %1443 = vmatprep.subr.mxu1 %v2909_v12  ;;  %1790 = vmatprep.subr.mxu0 %v2909_v12 }
 0x506   : > { %1444 = vmatpush2.msra.mxu1 %v2906_v7  ;;  %1791 = vmatpush2.msra.mxu0 %v2906_v7  ;;  %v1307_v7 = vpop.permute.xlu0 %1306 }
 0x507   : > { %2076 = vmatprep.subr.msk.mxu1 %vm635_vm2, %v2912_v17  ;;  %2088 = vmatprep.subr.msk.mxu0 %vm635_vm2, %v2912_v17  ;;  %v1283_v12 = vpop.permute.xlu1 %1282  ;;  %v1311_v17 = vsel %vm646_vm0, %v1307_v7, 0.0 }
 0x508   : > { %1446 = vmatpush2.msra.mxu1 %v2919_v21  ;;  %1793 = vmatpush2.msra.mxu0 %v2919_v21  ;;  %v1308_v21 = vsel %vm646_vm0, %v1305_v3, %v1307_v7 }
 0x509   : > { %1447 = vmatprep.subr.mxu1 %v2925_v36  ;;  %1794 = vmatprep.subr.mxu0 %v2925_v36  ;;  %v3115_v36 = vmul.f32 %v1311_v17, %v2551_v9 }
 0x50a   : > { %1448 = vmatpush2.msra.mxu1 %v2922_v31  ;;  %1795 = vmatpush2.msra.mxu0 %v2922_v31  ;;  %v1316_v31 = vld [vmem:[#allocation8] sm:$0xff] }
 0x50b   : > { %1449 = vmatprep.subr.mxu1 %v2938_v52  ;;  %1796 = vmatprep.subr.mxu0 %v2938_v52 }
 0x50c   : > { %1450 = vmatpush2.msra.mxu1 %v2935_v50  ;;  %1797 = vmatpush2.msra.mxu0 %v2935_v50 }
 0x50d   : > { %1451 = vmatprep.subr.mxu1 %v2874_v38  ;;  %1798 = vmatprep.subr.mxu0 %v2874_v38  ;;  %v1285_v38 = vpop.permute.xlu0 %1284 }
 0x50e   : > { %1452 = vmatpush2.msra.mxu1 %v2864_v32  ;;  %1799 = vmatpush2.msra.mxu0 %v2864_v32  ;;  %v3096_v32 = vpop.permute.xlu1 %1296 }
 0x50f   : > { %1453 = vmatprep.subr.mxu1 %v2946_v18  ;;  %1800 = vmatprep.subr.mxu0 %v2946_v18  ;;  %v1286_v18 = vsel %vm622_vm1, %v1283_v12, %v1285_v38 }
 0x510   : > { %1454 = vmatpush2.msra.mxu1 %v2951_v37  ;;  %1801 = vmatpush2.msra.mxu0 %v2951_v37 }
 0x511   : > { %1455 = vmatprep.subr.mxu1 %v2955_v51  ;;  %1802 = vmatprep.subr.mxu0 %v2955_v51  ;;  %v1273_v50 = vpop.permute.xlu0 %1272 }
 0x512   : > { %1456 = vmatpush2.msra.mxu1 %v2959_v45  ;;  %1803 = vmatpush2.msra.mxu0 %v2959_v45  ;;  %v1271_v52 = vpop.permute.xlu1 %1270  ;;  %v1277_v37 = vsel %vm609_vm3, %v1273_v50, 0.0 }
 0x513   : > { %1457 = vmatprep.subr.mxu1 %v2970_v63  ;;  %1804 = vmatprep.subr.mxu0 %v2970_v63  ;;  %v1274_v45 = vsel %vm609_vm3, %v1271_v52, %v1273_v50  ;;  %v3148_v13 = vmul.f32 %v1277_v37, %v2551_v9 }
 0x514   : > { %2078 = vmatpush2.msk.msra.mxu1 %vm2628_vm8, %v2966_v5  ;;  %2090 = vmatpush2.msk.msra.mxu0 %vm2628_vm8, %v2966_v5  ;;  %v3144_v5 = vmul.f32 %v1286_v18, %v2567_v22  ;;  %v3152_v63 = vmul.f32 %v1274_v45, %v2560_v16 }
 0x515   : > { %1459 = vmatprep.subr.mxu1 %v2973_v20  ;;  %1806 = vmatprep.subr.mxu0 %v2973_v20  ;;  %v1318_v20 = vld [vmem:[#allocation8 + $0x10] sm:$0xff] }
 0x516   : > { %1460 = vmatpush2.msra.mxu1 %v2977_v2  ;;  %1807 = vmatpush2.msra.mxu0 %v2977_v2  ;;  %v3122_v2 = vmul.f32 %v1308_v21, %v2560_v16 }
 0x517   : > { %1461 = vmatprep.subr.mxu1 %v2807_v8  ;;  %1808 = vmatprep.subr.mxu0 %v2807_v8  ;;  %v1289_v8 = vsel %vm622_vm1, %v1285_v38, 0.0 }
 0x518   : > { %1462 = vmatpush2.msra.mxu1 %v2812_v10  ;;  %1809 = vmatpush2.msra.mxu0 %v2812_v10  ;;  %v1645_v10 = vld [vmem:[#allocation10] sm:$0xff]  ;;  %v3133_v51 = vmul.f32 %v1289_v8, %v2563_v19 }
 0x519   : > { %2079 = vmatprep.subr.msk.mxu1 %vm635_vm2, %v2814_v11  ;;  %2091 = vmatprep.subr.msk.mxu0 %vm635_vm2, %v2814_v11  ;;  %v3269_v11 = vmov 0.0  }
 0x51a   : > { %1464 = vmatpush2.msra.mxu1 %v2824_v14  ;;  %1811 = vmatpush2.msra.mxu0 %v2824_v14  ;;  %v3141_v14 = vsel %vm635_vm2, %v3066_v59, %v3096_v32  ;;  %v1395_v0 = vpop.permute.xlu0 %1394 }
 0x51b   : > { %1466 = vmatmul.mubr.f32.vlgmr.msra.gmra.mxu1 %v1316_v31  ;;  %1496 = vmatprep.subr.mxu1 %v3115_v36 }
 0x51c   : > { %1497 = vmatpush1.msra.mxu1 %v3122_v2  ;;  %1536 = vmatprep.mubr.f32.mxu1 %v3269_v11 }
 0x51d   : > { %2080 = vmatprep.subr.msk.mxu1 %vm635_vm2, %v3096_v32  ;;  %1813 = vmatmul.mubr.f32.vlgmr.msra.gmra.mxu0 %v1645_v10 }
 0x51e   : > { %1499 = vmatpush1.msra.mxu1 %v3141_v14 }
 0x51f   : > { %1500 = vmatprep.subr.mxu1 %v3133_v51 }
 0x520   : > { %1501 = vmatpush1.msra.mxu1 %v3144_v5 }
 0x521   : > { %1502 = vmatprep.subr.mxu1 %v3148_v13 }
 0x522   : > { %1503 = vmatpush1.msra.mxu1 %v3152_v63 }
 0x523   : > { %2044 = vmatmul.mubr.msk.f32.vlgmr.msra.gmra.mxu1 %vm1397_vm10, %v1318_v20 }
 0x524   : > { %1883 = vmatprep.mubr.f32.mxu1 %v3269_v11 }
 0x5db   : > { %v1467_v42 = vpop.f32.mrf.mxu1 }
 0x5dc   : > { %v1468_v15 = vadd.f32 %v1467_v42, %v1395_v0 }
 0x5dd   : > { %v1469_v1 = vpop.f32.mrf.mxu1 }
 0x5de   : > { %v1470_v28 = vadd.f32 %v1469_v1, %v1395_v0 }
 0x5e3   : > { %v1538_v23 = vpop.f32.mrf.mxu1 }
 0x5e4   : > { %v1539_v25 = vadd.f32 %v1538_v23, %v1468_v15 }
 0x5e5   : > { %v1540_v27 = vpop.f32.mrf.mxu1 }
 0x5e6   : > { %vm1543_vm11 = vcmp.gt.f32.partialorder %v1539_v25, 0.0  ;;  %v1545_v29 = vmul.f32 0.2, %v1539_v25  ;;  %v1541_v35 = vadd.f32 %v1540_v27, %v1470_v28  ;;  %v2168_v27 = vld [vmem:[%s2504_s20 + $0x8] sm:$0xff] }
 0x5e8   : > { %v3158_v34 = vsel %vm1543_vm11, %v1539_v25, %v1545_v29  ;;  %v1546_v40 = vmul.f32 0.2, %v1541_v35  ;;  %vm1544_vm12 = vcmp.gt.f32.partialorder %v1541_v35, 0.0 }
 0x5e9   : > { %1623 = vrot.lane.b32.xlu1 %v3158_v34, %s2326_s28  ;;  %1633 = vrot.lane.b32.xlu0 %v3158_v34, %s2325_s15 }
 0x5ea   : > { %v1548_v41 = vsel %vm1544_vm12, %v1541_v35, %v1546_v40 }
 0x5ed   : > { %1585 = vrot.lane.b32.xlu1 %v3158_v34, %s2328_s14  ;;  %1611 = vrot.lane.b32.xlu0 %v3158_v34, %s2324_s27 }
 0x5f1   : > { %1635 = vrot.lane.b32.xlu1 %v1548_v41, %s2325_s15  ;;  %1599 = vrot.lane.b32.xlu0 %v3158_v34, %s2327_s18 }
 0x5f5   : > { %1613 = vrot.lane.b32.xlu1 %v1548_v41, %s2324_s27  ;;  %1625 = vrot.lane.b32.xlu0 %v1548_v41, %s2326_s28 }
 0x5f9   : > { %1601 = vrot.lane.b32.xlu1 %v1548_v41, %s2327_s18  ;;  %1587 = vrot.lane.b32.xlu0 %v1548_v41, %s2328_s14  ;;  %s518_s14 = scalar_lea.vmem %s3251_s12, %s2498_s29 }
 0x5fa   : > { %v1896_v28 = vld [vmem:[%s518_s14] sm:$0xff]  ;;  %v1897_v35 = vld [vmem:[%s518_s14 + $0x8] sm:$0xff] }
 0x5fd   : > { %1573 = vrot.lane.b32.xlu1 %v3158_v34, %s2330_s21  ;;  %1575 = vrot.lane.b32.xlu0 %v1548_v41, %s2330_s21 }
 0x601   : > { %1551 = vrot.lane.b32.xlu1 %v3158_v34, %s2332_s22  ;;  %1553 = vrot.lane.b32.xlu0 %v1548_v41, %s2332_s22 }
 0x605   : > { %1563 = vrot.lane.b32.xlu1 %v3158_v34, %s2333_s16  ;;  %1565 = vrot.lane.b32.xlu0 %v1548_v41, %s2333_s16  ;;  %s523_s16 = scalar_lea.vmem %s3252_s13, %s2498_s29 }
 0x609   : > { %1741 = vperm.xlu1 %2166, %v1738_v46  }
 0x65b   : > { %v1624_v47 = vpop.permute.xlu1 %1623  ;;  %v1634_v53 = vpop.permute.xlu0 %1633 }
 0x65f   : > { %v1586_v55 = vpop.permute.xlu1 %1585  ;;  %v1612_v56 = vpop.permute.xlu0 %1611 }
 0x660   : > { %v1592_v38 = vsel %vm594_vm4, 0.0, %v1586_v55 }
 0x661   : > { %v1593_v52 = vmul.f32 %v1592_v38, %v2567_v22 }
 0x663   : > { %v1636_v57 = vpop.permute.xlu1 %1635  ;;  %v1600_v4 = vpop.permute.xlu0 %1599 }
 0x664   : > { %v1637_v6 = vsel %vm646_vm0, %v1634_v53, %v1636_v57  ;;  %v1640_v24 = vsel %vm646_vm0, %v1636_v57, 0.0  ;;  %vm1744_vm0 = vcmask 850944  }
 0x665   : > { %v1641_v26 = vmul.f32 %v1637_v6, %v2560_v16  ;;  %v1642_v30 = vmul.f32 %v1640_v24, %v2551_v9 }
 0x667   : > { %1825 = vmatprep.subr.mxu1 %v1642_v30  ;;  %v1614_v33 = vpop.permute.xlu1 %1613  ;;  %v1626_v39 = vpop.permute.xlu0 %1625 }
 0x668   : > { %v1615_v43 = vsel %vm622_vm1, %v1612_v56, %v1614_v33  ;;  %v1618_v48 = vsel %vm622_vm1, %v1614_v33, 0.0  ;;  %v1627_v49 = vsel %vm635_vm2, %v1624_v47, %v1626_v39  ;;  %1826 = vmatpush1.msra.mxu1 %v1641_v26 }
 0x669   : > { %v1619_v58 = vmul.f32 %v1615_v43, %v2567_v22  ;;  %v1620_v60 = vmul.f32 %v1618_v48, %v2563_v19  ;;  %2092 = vmatprep.subr.msk.mxu1 %vm635_vm2, %v1626_v39 }
 0x66a   : > { %1828 = vmatpush1.msra.mxu1 %v1627_v49 }
 0x66b   : > { %v1602_v61 = vpop.permute.xlu1 %1601  ;;  %1829 = vmatprep.subr.mxu1 %v1620_v60  ;;  %v1588_v62 = vpop.permute.xlu0 %1587 }
 0x66c   : > { %v1603_v44 = vsel %vm609_vm3, %v1600_v4, %v1602_v61  ;;  %v1606_v59 = vsel %vm609_vm3, %v1602_v61, 0.0  ;;  %1830 = vmatpush1.msra.mxu1 %v1619_v58  ;;  %v1589_v12 = vsel %vm594_vm4, %v1586_v55, %v1588_v62 }
 0x66d   : > { %v1607_v3 = vmul.f32 %v1603_v44, %v2560_v16  ;;  %v1608_v7 = vmul.f32 %v1606_v59, %v2551_v9  ;;  %v1594_v50 = vmul.f32 %v1589_v12, %v2563_v19 }
 0x66f   : > { %v1574_v17 = vpop.permute.xlu1 %1573  ;;  %1831 = vmatprep.subr.mxu1 %v1608_v7  ;;  %v1576_v21 = vpop.permute.xlu0 %1575 }
 0x670   : > { %v1577_v31 = vsel %vm570_vm5, %v1574_v17, %v1576_v21  ;;  %1832 = vmatpush1.msra.mxu1 %v1607_v3  ;;  %v1580_v8 = vsel %vm570_vm5, 0.0, %v1574_v17 }
 0x671   : > { %1833 = vmatprep.subr.mxu1 %v1548_v41  ;;  %v1582_v10 = vmul.f32 %v1577_v31, %v2551_v9  ;;  %v1581_v11 = vmul.f32 %v1580_v8, %v2560_v16  ;;  %v1647_v16 = vld [vmem:[#allocation10 + $0x10] sm:$0xff] }
 0x672   : > { %1834 = vmatpush1.msra.mxu1 %v3158_v34 }
 0x673   : > { %v1552_v18 = vpop.permute.xlu1 %1551  ;;  %1835 = vmatprep.subr.mxu1 %v1594_v50  ;;  %v1554_v37 = vpop.permute.xlu0 %1553 }
 0x674   : > { %1836 = vmatpush1.msra.mxu1 %v1593_v52  ;;  %v1555_v45 = vsel %vm535_vm6, %v1552_v18, %v1554_v37  ;;  %v1558_v20 = vsel %vm535_vm6, 0.0, %v1552_v18 }
 0x675   : > { %1837 = vmatprep.subr.mxu1 %v1582_v10  ;;  %v1560_v15 = vmul.f32 %v1555_v45, %v2563_v19  ;;  %v1559_v9 = vmul.f32 %v1558_v20, %v2567_v22  ;;  %v1814_v19 = vpop.f32.mrf.mxu0 }
 0x676   : > { %1838 = vmatpush1.msra.mxu1 %v1581_v11 }
 0x677   : > { %v1564_v42 = vpop.permute.xlu1 %1563  ;;  %v1566_v0 = vpop.permute.xlu0 %1565 }
 0x678   : > { %v1567_v1 = vsel %vm559_vm7, %v1564_v42, %v1566_v0  ;;  %v1816_v54 = vpop.f32.mrf.mxu0 }
 0x679   : > { %1839 = vmatprep.subr.mxu1 %v1567_v1 }
 0x67a   : > { %2094 = vmatpush1.msk.msra.mxu1 %vm2628_vm8, %v1564_v42 }
 0x67b   : > { %1841 = vmatprep.subr.mxu1 %v1560_v15 }
 0x67c   : > { %1842 = vmatpush1.msra.mxu1 %v1559_v9 }
 0x67d   : > { %1843 = vmatprep.subr.mxu1 %v3115_v36 }
 0x67e   : > { %1844 = vmatpush1.msra.mxu1 %v3122_v2 }
 0x67f   : > { %2095 = vmatprep.subr.msk.mxu1 %vm635_vm2, %v3096_v32 }
 0x680   : > { %1846 = vmatpush1.msra.mxu1 %v3141_v14  ;;  %v2167_v14 = vld [vmem:[%s2504_s20] sm:$0xff] }
 0x681   : > { %1847 = vmatprep.subr.mxu1 %v3133_v51 }
 0x682   : > { %1848 = vmatpush1.msra.mxu1 %v3144_v5  ;;  %v1892_v5 = vmul.f32 0.2, %v2167_v14 }
 0x683   : > { %1849 = vmatprep.subr.mxu1 %v3148_v13 }
 0x684   : > { %1850 = vmatpush1.msra.mxu1 %v3152_v63  ;;  %v1742_v22 = vpop.permute.xlu1 %1741  ;;  %v1893_v63 = vmul.f32 0.2, %v2168_v27 }
 0x685   : > { %2045 = vmatmul.mubr.msk.f32.vlgmr.msra.gmra.mxu1 %vm1744_vm0, %v1647_v16  ;;  %v1815_v32 = vadd.f32 %v1814_v19, %v1742_v22  ;;  %v1817_v2 = vadd.f32 %v1816_v54, %v1742_v22 }
 0x745   : > { %v1885_v36 = vpop.f32.mrf.mxu1 }
 0x746   : > { %v1886_v51 = vadd.f32 %v1885_v36, %v1815_v32 }
 0x747   : > { %v1887_v23 = vpop.f32.mrf.mxu1 }
 0x748   : > { %v1890_v13 = vmul.f32 0.04, %v1886_v51  ;;  %v1888_v25 = vadd.f32 %v1887_v23, %v1817_v2 }
 0x74a   : > { %v1894_v29 = vadd.f32 %v1892_v5, %v1890_v13  ;;  %v1891_v34 = vmul.f32 0.04, %v1888_v25 }
 0x74c   : > { %v1898_v40 = vadd.f32 %v1896_v28, %v1894_v29  ;;  %v1895_v41 = vadd.f32 %v1893_v63, %v1891_v34 }
 0x74e   : > { %1900 = vst [vmem:[%s523_s16] sm:$0xff] %v1898_v40  ;;  %v1899_v46 = vadd.f32 %v1897_v35, %v1895_v41 }
 0x750   : > { %1901 = vst [vmem:[%s523_s16 + $0x8] sm:$0xff] %v1899_v46 }
 0x751 PF: > { %s26_s25 = sadd.s32 1, %s2317_s25  }
 0x752   : > { %p23_p12 = scmp.ge.s32.totalorder %s26_s25, 4  }
 0x754   :  { %25 = sbr.rel (!%p23_p12) target bundleno = 3 (0x3), region = 127 }
 0x759   :  { %1923 = vsyncpa [#allocation4], 1 }
 0x75a   :  { %1925 = vsyncpa [#allocation4 + $0x1], 1 }
 0x75b   :  { %1926 = vsyncpa [#allocation6], 1 }
 0x75c   :  { %1927 = vsyncpa [#allocation9], 1 }

// kernel: rrdbnet_forward.20
= control target key start
LH: loop header
LB: loop body
LE: loop exit
PB: predicated region body
PF: predicated region fallthrough
CT: control target
= control target key end

     0   :  { %s1220_s15 = smov 0   ;;  %s1660_s0 = inlined_call_operand.vmem [shape: f32[2,8,1024], index: 0, kind: input, shape index: {}]   ;;  %s1661_s1 = inlined_call_operand.vmem [shape: f32[2,1024], index: 1, kind: input, shape index: {}]   ;;  %s1662_s2 = inlined_call_operand.vmem [shape: f32[8,72], index: 2, kind: input, shape index: {}]   ;;  %s1663_s3 = inlined_call_operand.vmem [shape: f32[8,1], index: 3, kind: input, shape index: {}]   ;;  %s1664_s4 = inlined_call_operand.vmem [shape: f32[2,8,1024], index: 4, kind: output, shape index: {}]  }
   0x1 LB: > { %s1137_s16 = sadd.s32 4294967295, %s1183_s15   ;;  %p1141_p0 = scmp.ge.s32.totalorder %s1183_s15, 1  ;;  %s1183_s15 = sphi %s1220_s15, %s14_s15  }
   0x2   : > { %p162_p1 = scmp.lt.s32.totalorder %s1183_s15, 3 }
   0x4   : > { %p163_p2 = pnand %p1141_p0, %p162_p1 }
   0x5   : > { %p188_p3 = scmp.lt.s32.totalorder (!%p163_p2), %s1137_s16, 1  ;;  %s1185_s21 = smov (!%p163_p2), 95  }
   0x6   : > { %166 = sbr.rel (%p163_p2) target bundleno = 460 (0x1cc), region = 36  ;;  %s1186_s22 = smov (!%p163_p2), 97  }
   0x7   : > { %s1187_s23 = smov (!%p163_p2), 96   ;;  %s1188_s24 = smov (!%p163_p2), 127  }
   0x8   : > { %s1189_s25 = smov (!%p163_p2), 1   ;;  %s1190_s26 = smov (!%p163_p2), 31  }
   0x9   : > { %s1191_s27 = smov (!%p163_p2), 33   ;;  %s1193_s30 = smov (!%p163_p2), 32  }
   0xb   : > { %s1666_s16 = smov (!%p188_p3, %s1137_s16), 1  ;;  %v251_v5 = vlaneseq  ;;  %v1320_v9 = vld [vmem:[%s1661_s1 + $0x1] ss:$2 sm:$0xff]  ;;  %v1192_v14 = vmov 0.0   ;;  %v1355_v17 = vld [vmem:[%s1661_s1] ss:$2 sm:$0xff] }
   0xc   : > { %s1153_s17 = sshll.u32 %s1666_s16, 6  ;;  %830 = vmatprep.mubr.f32.mxu0 %v1192_v14  ;;  %901 = vmatprep.mubr.f32.mxu1 %v1192_v14  ;;  %vm650_vm0 = vcmask 777216   ;;  %v1194_v31 = vmov 0   ;;  %v756_v45 = vld [vmem:[%s1663_s3] sm:$0xff]  ;;  %vm609_vm1 = vcmask 785408   ;;  %vm560_vm2 = vcmask 793600  }
   0xd   : > { %s1236_s20 = scalar_lea.vmem %s1660_s0, %s1153_s17  ;;  %v1309_v6 = vshrl.u32 %v251_v5, 7  ;;  %1176 = vset.pattern.permute.xlu0 %v1194_v31  ;;  %vm511_vm3 = vcmask 1039360   ;;  %vm454_vm4 = vcmask 7168   ;;  %vm364_vm5 = vcmask 252928   ;;  %s1647_s13 = scalar_lea.vmem %s1664_s4, %s1153_s17 }
   0xe   : > { %v1239_v0 = vld [vmem:[%s1236_s20 + $0x18] sm:$0xff]  ;;  %v1242_v1 = vld [vmem:[%s1236_s20 + $0x8] sm:$0xff]  ;;  %v1249_v2 = vld [vmem:[%s1236_s20 + $0x20] sm:$0xff]  ;;  %vm233_vm6 = vcmask 269312   ;;  %vm323_vm7 = vcmask 261120   ;;  %vm762_vm9 = vcmask 588800  }
   0xf   : > { %640 = vrot.lane.b32.xlu1 %v1239_v0, %s1185_s21  ;;  %636 = vrot.lane.b32.xlu0 %v1242_v1, %s1185_s21  ;;  %v1252_v3 = vld [vmem:[%s1236_s20 + $0x10] sm:$0xff]  ;;  %v1259_v4 = vld [vmem:[%s1236_s20] sm:$0xff]  ;;  %v269_v7 = vsub.s32 4, %v1309_v6  ;;  %v273_v8 = vsub.s32 5, %v1309_v6  ;;  %v277_v12 = vsub.s32 6, %v1309_v6  ;;  %v281_v13 = vsub.s32 7, %v1309_v6  ;;  %vm1155_vm8 = vmneg %vm323_vm7 }
  0x10   : > { %v1365_v19 = vld [vmem:[%s1236_s20 + $0x30] sm:$0xff]  ;;  %v1368_v20 = vld [vmem:[%s1236_s20 + $0x28] sm:$0xff]  ;;  %v1375_v21 = vld [vmem:[%s1236_s20 + $0x38] sm:$0xff]  ;;  %v265_v22 = vsub.s32 3, %v1309_v6  ;;  %v257_v23 = vsub.s32 1, %v1309_v6  ;;  %v261_v24 = vsub.s32 2, %v1309_v6 }
  0x11   : > { %v1325_v10 = vrot.slane %v1320_v9, %v269_v7  ;;  %v1330_v11 = vrot.slane %v1320_v9, %v273_v8  ;;  %v1341_v15 = vrot.slane %v1320_v9, %v277_v12  ;;  %v1346_v16 = vrot.slane %v1320_v9, %v281_v13 }
  0x12   : > { %v1358_v18 = vrot.slane %v1355_v17, %v277_v12  ;;  %v253_v27 = vsub.s32 0, %v1309_v6  ;;  %v1426_v28 = vrot.slane %v1320_v9, %v265_v22  ;;  %v1429_v29 = vrot.slane %v1320_v9, %v257_v23 }
  0x13   : > { %642 = vrot.lane.b32.xlu1 %v1249_v2, %s1185_s21  ;;  %638 = vrot.lane.b32.xlu0 %v1252_v3, %s1185_s21  ;;  %v1432_v30 = vrot.slane %v1320_v9, %v261_v24  ;;  %v1463_v53 = vrot.slane %v1355_v17, %v265_v22  ;;  %v1466_v54 = vrot.slane %v1355_v17, %v261_v24 }
  0x14   : > { %v1441_v37 = vrot.slane %v1320_v9, %v253_v27  ;;  %v1474_v59 = vrot.slane %v1355_v17, %v257_v23  ;;  %v1481_v63 = vrot.slane %v1355_v17, %v253_v27 }
  0x17   : > { %546 = vrot.lane.b32.xlu1 %v1242_v1, %s1186_s22  ;;  %634 = vrot.lane.b32.xlu0 %v1259_v4, %s1185_s21 }
  0x1b   : > { %550 = vrot.lane.b32.xlu1 %v1239_v0, %s1186_s22  ;;  %548 = vrot.lane.b32.xlu0 %v1252_v3, %s1186_s22 }
  0x1f   : > { %595 = vrot.lane.b32.xlu1 %v1242_v1, %s1187_s23  ;;  %552 = vrot.lane.b32.xlu0 %v1249_v2, %s1186_s22 }
  0x23   : > { %599 = vrot.lane.b32.xlu1 %v1239_v0, %s1187_s23  ;;  %597 = vrot.lane.b32.xlu0 %v1252_v3, %s1187_s23 }
  0x27   : > { %544 = vrot.lane.b32.xlu1 %v1259_v4, %s1186_s22  ;;  %601 = vrot.lane.b32.xlu0 %v1249_v2, %s1187_s23 }
  0x2b   : > { %497 = vrot.lane.b32.xlu1 %v1242_v1, %s1188_s24  ;;  %593 = vrot.lane.b32.xlu0 %v1259_v4, %s1187_s23 }
  0x2f   : > { %501 = vrot.lane.b32.xlu1 %v1239_v0, %s1188_s24  ;;  %499 = vrot.lane.b32.xlu0 %v1252_v3, %s1188_s24 }
  0x33   : > { %495 = vrot.lane.b32.xlu1 %v1259_v4, %s1188_s24  ;;  %503 = vrot.lane.b32.xlu0 %v1249_v2, %s1188_s24 }
  0x37   : > { %440 = vrot.lane.b32.xlu1 %v1242_v1, %s1189_s25  ;;  %438 = vrot.lane.b32.xlu0 %v1259_v4, %s1189_s25 }
  0x3b   : > { %444 = vrot.lane.b32.xlu1 %v1239_v0, %s1189_s25  ;;  %442 = vrot.lane.b32.xlu0 %v1252_v3, %s1189_s25 }
  0x3f   : > { %350 = vrot.lane.b32.xlu1 %v1242_v1, %s1190_s26  ;;  %348 = vrot.lane.b32.xlu0 %v1259_v4, %s1190_s26 }
  0x43   : > { %354 = vrot.lane.b32.xlu1 %v1239_v0, %s1190_s26  ;;  %352 = vrot.lane.b32.xlu0 %v1252_v3, %s1190_s26 }
  0x47   : > { %219 = vrot.lane.b32.xlu1 %v1242_v1, %s1191_s27  ;;  %217 = vrot.lane.b32.xlu0 %v1259_v4, %s1191_s27 }
  0x4b   : > { %223 = vrot.lane.b32.xlu1 %v1239_v0, %s1191_s27  ;;  %221 = vrot.lane.b32.xlu0 %v1252_v3, %s1191_s27 }
  0x4f   : > { %309 = vrot.lane.b32.xlu1 %v1242_v1, %s1193_s30  ;;  %307 = vrot.lane.b32.xlu0 %v1259_v4, %s1193_s30 }
  0x53   : > { %313 = vrot.lane.b32.xlu1 %v1239_v0, %s1193_s30  ;;  %311 = vrot.lane.b32.xlu0 %v1252_v3, %s1193_s30 }
  0x57   : > { %646 = vrot.lane.b32.xlu1 %v1365_v19, %s1185_s21  ;;  %644 = vrot.lane.b32.xlu0 %v1368_v20, %s1185_s21 }
  0x5b   : > { %554 = vrot.lane.b32.xlu1 %v1368_v20, %s1186_s22  ;;  %648 = vrot.lane.b32.xlu0 %v1375_v21, %s1185_s21 }
  0x5f   : > { %558 = vrot.lane.b32.xlu1 %v1375_v21, %s1186_s22  ;;  %556 = vrot.lane.b32.xlu0 %v1365_v19, %s1186_s22 }
  0x63   : > { %605 = vrot.lane.b32.xlu1 %v1365_v19, %s1187_s23  ;;  %603 = vrot.lane.b32.xlu0 %v1368_v20, %s1187_s23 }
  0x67   : > { %505 = vrot.lane.b32.xlu1 %v1368_v20, %s1188_s24  ;;  %607 = vrot.lane.b32.xlu0 %v1375_v21, %s1187_s23 }
  0x6b   : > { %509 = vrot.lane.b32.xlu1 %v1375_v21, %s1188_s24  ;;  %507 = vrot.lane.b32.xlu0 %v1365_v19, %s1188_s24 }
  0x6f   : > { %448 = vrot.lane.b32.xlu1 %v1368_v20, %s1189_s25  ;;  %446 = vrot.lane.b32.xlu0 %v1249_v2, %s1189_s25 }
  0x73   : > { %452 = vrot.lane.b32.xlu1 %v1375_v21, %s1189_s25  ;;  %450 = vrot.lane.b32.xlu0 %v1365_v19, %s1189_s25 }
  0x77   : > { %358 = vrot.lane.b32.xlu1 %v1368_v20, %s1190_s26  ;;  %356 = vrot.lane.b32.xlu0 %v1249_v2, %s1190_s26 }
  0x7b   : > { %362 = vrot.lane.b32.xlu1 %v1375_v21, %s1190_s26  ;;  %360 = vrot.lane.b32.xlu0 %v1365_v19, %s1190_s26 }
  0x7f   : > { %227 = vrot.lane.b32.xlu1 %v1368_v20, %s1191_s27  ;;  %225 = vrot.lane.b32.xlu0 %v1249_v2, %s1191_s27 }
  0x81   : > { %v641_v25 = vpop.permute.xlu1 %640  ;;  %v637_v26 = vpop.permute.xlu0 %636 }
  0x83   : > { %231 = vrot.lane.b32.xlu1 %v1375_v21, %s1191_s27  ;;  %229 = vrot.lane.b32.xlu0 %v1365_v19, %s1191_s27 }
  0x85   : > { %v1434_v32 = vpop.permute.xlu1 %642  ;;  %v639_v33 = vpop.permute.xlu0 %638 }
  0x86   : > { %v653_v34 = vsel %vm650_vm0, %v639_v33, %v641_v25  ;;  %v654_v35 = vsel %vm650_vm0, %v641_v25, %v1434_v32  ;;  %v652_v36 = vsel %vm650_vm0, %v637_v26, %v639_v33 }
  0x87   : > { %317 = vrot.lane.b32.xlu1 %v1368_v20, %s1193_s30  ;;  %315 = vrot.lane.b32.xlu0 %v1249_v2, %s1193_s30  ;;  %v670_v38 = vmul.f32 %v654_v35, %v1426_v28  ;;  %v668_v39 = vmul.f32 %v652_v36, %v1429_v29  ;;  %v669_v40 = vmul.f32 %v653_v34, %v1432_v30 }
  0x89   : > { %851 = vmatprep.subr.mxu1 %v670_v38  ;;  %v547_v41 = vpop.permute.xlu1 %546  ;;  %780 = vmatprep.subr.mxu0 %v668_v39  ;;  %v635_v42 = vpop.permute.xlu0 %634 }
  0x8a   : > { %v651_v43 = vsel %vm650_vm0, %v635_v42, %v637_v26  ;;  %852 = vmatpush1.msra.mxu1 %v669_v40 }
  0x8b   : > { %321 = vrot.lane.b32.xlu1 %v1375_v21, %s1193_s30  ;;  %319 = vrot.lane.b32.xlu0 %v1365_v19, %s1193_s30  ;;  %v667_v44 = vmul.f32 %v651_v43, %v1441_v37 }
  0x8d   : > { %v551_v46 = vpop.permute.xlu1 %550  ;;  %781 = vmatpush1.msra.mxu0 %v667_v44  ;;  %v549_v47 = vpop.permute.xlu0 %548 }
  0x8e   : > { %v563_v56 = vsel %vm560_vm2, %v549_v47, %v551_v46  ;;  %v562_v61 = vsel %vm560_vm2, %v547_v41, %v549_v47 }
  0x8f   : > { %759 = vperm.xlu0 %1176, %v756_v45   ;;  %v579_v9 = vmul.f32 %v563_v56, %v1466_v54  ;;  %v578_v24 = vmul.f32 %v562_v61, %v1474_v59 }
  0x91   : > { %v596_v48 = vpop.permute.xlu1 %595  ;;  %v1459_v49 = vpop.permute.xlu0 %552 }
  0x92   : > { %v564_v55 = vsel %vm560_vm2, %v551_v46, %v1459_v49 }
  0x93   : > { %v580_v62 = vmul.f32 %v564_v55, %v1463_v53 }
  0x95   : > { %v600_v50 = vpop.permute.xlu1 %599  ;;  %v598_v51 = vpop.permute.xlu0 %597 }
  0x96   : > { %v611_v52 = vsel %vm609_vm1, %v596_v48, %v598_v51  ;;  %v612_v5 = vsel %vm609_vm1, %v598_v51, %v600_v50 }
  0x97   : > { %782 = vmatprep.subr.mxu0 %v611_v52 }
  0x99   : > { %v545_v57 = vpop.permute.xlu1 %544  ;;  %v1471_v58 = vpop.permute.xlu0 %601 }
  0x9a   : > { %v613_v60 = vsel %vm609_vm1, %v600_v50, %v1471_v58  ;;  %v561_v12 = vsel %vm560_vm2, %v545_v57, %v547_v41 }
  0x9b   : > { %853 = vmatprep.subr.mxu1 %v613_v60  ;;  %v577_v26 = vmul.f32 %v561_v12, %v1481_v63 }
  0x9c   : > { %854 = vmatpush1.msra.mxu1 %v612_v5 }
  0x9d   : > { %v498_v22 = vpop.permute.xlu1 %497  ;;  %855 = vmatprep.subr.mxu1 %v580_v62  ;;  %v594_v23 = vpop.permute.xlu0 %593 }
  0x9e   : > { %856 = vmatpush1.msra.mxu1 %v579_v9  ;;  %v610_v25 = vsel %vm609_vm1, %v594_v23, %v596_v48 }
  0x9f   : > { %783 = vmatpush1.msra.mxu0 %v610_v25 }
  0xa0   : > { %784 = vmatprep.subr.mxu0 %v578_v24 }
  0xa1   : > { %v502_v27 = vpop.permute.xlu1 %501  ;;  %785 = vmatpush1.msra.mxu0 %v577_v26  ;;  %v500_v31 = vpop.permute.xlu0 %499 }
  0xa2   : > { %v513_v33 = vsel %vm511_vm3, %v498_v22, %v500_v31  ;;  %v514_v35 = vsel %vm511_vm3, %v500_v31, %v502_v27 }
  0xa3   : > { %v529_v34 = vmul.f32 %v513_v33, %v1429_v29  ;;  %v530_v43 = vmul.f32 %v514_v35, %v1432_v30 }
  0xa5   : > { %v496_v36 = vpop.permute.xlu1 %495  ;;  %786 = vmatprep.subr.mxu0 %v529_v34  ;;  %v1492_v38 = vpop.permute.xlu0 %503 }
  0xa6   : > { %v512_v39 = vsel %vm511_vm3, %v496_v36, %v498_v22  ;;  %v515_v40 = vsel %vm511_vm3, %v502_v27, %v1492_v38 }
  0xa7   : > { %v528_v41 = vmul.f32 %v512_v39, %v1441_v37  ;;  %v531_v42 = vmul.f32 %v515_v40, %v1426_v28  ;;  %v1539_v39 = vld [vmem:[%s1662_s2] sm:$0xff] }
  0xa9   : > { %v441_v44 = vpop.permute.xlu1 %440  ;;  %787 = vmatpush1.msra.mxu0 %v528_v41  ;;  %857 = vmatprep.subr.mxu1 %v531_v42  ;;  %v439_v45 = vpop.permute.xlu0 %438 }
  0xaa   : > { %v455_v46 = vsel %vm454_vm4, %v439_v45, %v441_v44  ;;  %v470_v47 = vsel %vm454_vm4, 0.0, %v439_v45  ;;  %858 = vmatpush1.msra.mxu1 %v530_v43  ;;  %788 = vmatprep.subr.mxu0 %v1242_v1 }
  0xab   : > { %v471_v48 = vmul.f32 %v470_v47, %v1481_v63  ;;  %v472_v50 = vmul.f32 %v455_v46, %v1474_v59  ;;  %789 = vmatpush1.msra.mxu0 %v1259_v4  ;;  %859 = vmatprep.subr.mxu1 %v1239_v0 }
  0xac   : > { %860 = vmatpush1.msra.mxu1 %v1252_v3 }
  0xad   : > { %v1508_v51 = vpop.permute.xlu1 %444  ;;  %790 = vmatprep.subr.mxu0 %v472_v50  ;;  %v443_v52 = vpop.permute.xlu0 %442 }
  0xae   : > { %v456_v55 = vsel %vm454_vm4, %v441_v44, %v443_v52  ;;  %v457_v56 = vsel %vm454_vm4, %v443_v52, %v1508_v51  ;;  %791 = vmatpush1.msra.mxu0 %v471_v48 }
  0xaf   : > { %v473_v1 = vmul.f32 %v456_v55, %v1466_v54  ;;  %v474_v57 = vmul.f32 %v457_v56, %v1463_v53 }
  0xb1   : > { %v351_v4 = vpop.permute.xlu1 %350  ;;  %861 = vmatprep.subr.mxu1 %v474_v57  ;;  %v349_v0 = vpop.permute.xlu0 %348 }
  0xb2   : > { %v365_v3 = vsel %vm364_vm5, %v349_v0, %v351_v4  ;;  %v380_v60 = vsel %vm364_vm5, 0.0, %v349_v0  ;;  %862 = vmatpush1.msra.mxu1 %v473_v1 }
  0xb3   : > { %v422_v61 = vmul.f32 %v1441_v37, %v380_v60  ;;  %v423_v62 = vmul.f32 %v1429_v29, %v365_v3 }
  0xb5   : > { %v1519_v5 = vpop.permute.xlu1 %354  ;;  %792 = vmatprep.subr.mxu0 %v423_v62  ;;  %v353_v9 = vpop.permute.xlu0 %352 }
  0xb6   : > { %v366_v12 = vsel %vm364_vm5, %v351_v4, %v353_v9  ;;  %v367_v22 = vsel %vm364_vm5, %v353_v9, %v1519_v5  ;;  %793 = vmatpush1.msra.mxu0 %v422_v61 }
  0xb7   : > { %v424_v23 = vmul.f32 %v1432_v30, %v366_v12  ;;  %v425_v24 = vmul.f32 %v1426_v28, %v367_v22  ;;  %v1583_v12 = vrot.slane %v1355_v17, %v281_v13 }
  0xb9   : > { %v220_v25 = vpop.permute.xlu1 %219  ;;  %863 = vmatprep.subr.mxu1 %v425_v24  ;;  %v218_v26 = vpop.permute.xlu0 %217 }
  0xba   : > { %864 = vmatpush1.msra.mxu1 %v424_v23  ;;  %v234_v27 = vsel %vm233_vm6, %v218_v26, %v220_v25  ;;  %v249_v31 = vsel %vm233_vm6, 0.0, %v218_v26 }
  0xbb   : > { %v292_v28 = vmul.f32 %v1474_v59, %v234_v27  ;;  %v291_v35 = vmul.f32 %v1481_v63, %v249_v31 }
  0xbd   : > { %v1526_v29 = vpop.permute.xlu1 %223  ;;  %v222_v37 = vpop.permute.xlu0 %221 }
  0xbe   : > { %v236_v36 = vsel %vm233_vm6, %v222_v37, %v1526_v29  ;;  %v235_v40 = vsel %vm233_vm6, %v220_v25, %v222_v37 }
  0xbf   : > { %v294_v43 = vmul.f32 %v1463_v53, %v236_v36  ;;  %v293_v44 = vmul.f32 %v1466_v54, %v235_v40  ;;  %v1560_v54 = vrot.slane %v1355_v17, %v269_v7 }
  0xc1   : > { %v310_v33 = vpop.permute.xlu1 %309  ;;  %v308_v34 = vpop.permute.xlu0 %307 }
  0xc2   : > { %v324_v30 = vsel %vm323_vm7, %v308_v34, %v310_v33 }
  0xc3   : > { %794 = vmatprep.subr.mxu0 %v324_v30 }
  0xc4   : > { %1156 = vmatpush1.msk.msra.mxu0 %vm1155_vm8, %v308_v34 }
  0xc5   : > { %v1542_v41 = vpop.permute.xlu1 %313  ;;  %796 = vmatprep.subr.mxu0 %v292_v28  ;;  %v312_v42 = vpop.permute.xlu0 %311 }
  0xc6   : > { %797 = vmatpush1.msra.mxu0 %v291_v35  ;;  %v326_v59 = vsel %vm323_vm7, %v312_v42, %v1542_v41  ;;  %v325_v63 = vsel %vm323_vm7, %v310_v33, %v312_v42 }
  0xc7   : > { %865 = vmatprep.subr.mxu1 %v326_v59  ;;  %1147 = vmatmul.mubr.msk.f32.vlgmr.msra.gmra.mxu0 %vm762_vm9, %v1539_v39 }
  0xc8   : > { %866 = vmatpush1.msra.mxu1 %v325_v63  ;;  %972 = vmatprep.mubr.f32.mxu0 %v1192_v14 }
  0xc9   : > { %v647_v45 = vpop.permute.xlu1 %646  ;;  %867 = vmatprep.subr.mxu1 %v294_v43  ;;  %v645_v46 = vpop.permute.xlu0 %644 }
  0xca   : > { %v655_v47 = vsel %vm650_vm0, %v1434_v32, %v645_v46  ;;  %v656_v48 = vsel %vm650_vm0, %v645_v46, %v647_v45  ;;  %868 = vmatpush1.msra.mxu1 %v293_v44 }
  0xcb   : > { %v671_v53 = vmul.f32 %v655_v47, %v1325_v10  ;;  %v672_v50 = vmul.f32 %v656_v48, %v1330_v11  ;;  %1148 = vmatmul.mubr.msk.f32.vlgmr.msra.gmra.mxu1 %vm762_vm9, %v1539_v39 }
  0xcc   : > { %1043 = vmatprep.mubr.f32.mxu1 %v1192_v14 }
  0xcd   : > { %v555_v52 = vpop.permute.xlu1 %554  ;;  %922 = vmatprep.subr.mxu0 %v672_v50  ;;  %v649_v32 = vpop.permute.xlu0 %648 }
  0xce   : > { %v565_v55 = vsel %vm560_vm2, %v1459_v49, %v555_v52  ;;  %v657_v56 = vsel %vm650_vm0, %v647_v45, %v649_v32  ;;  %v666_v1 = vsel %vm650_vm0, %v649_v32, 0.0  ;;  %923 = vmatpush1.msra.mxu0 %v671_v53  ;;  %v1576_v49 = vrot.slane %v1355_v17, %v273_v8 }
  0xcf   : > { %v581_v57 = vmul.f32 %v565_v55, %v1560_v54  ;;  %v673_v7 = vmul.f32 %v657_v56, %v1341_v15  ;;  %v674_v4 = vmul.f32 %v666_v1, %v1346_v16 }
  0xd1   : > { %v559_v0 = vpop.permute.xlu1 %558  ;;  %993 = vmatprep.subr.mxu1 %v674_v4  ;;  %v557_v14 = vpop.permute.xlu0 %556 }
  0xd2   : > { %v567_v3 = vsel %vm560_vm2, %v557_v14, %v559_v0  ;;  %994 = vmatpush1.msra.mxu1 %v673_v7  ;;  %v566_v61 = vsel %vm560_vm2, %v555_v52, %v557_v14  ;;  %v576_v24 = vsel %vm560_vm2, %v559_v0, 0.0 }
  0xd3   : > { %v583_v60 = vmul.f32 %v567_v3, %v1358_v18  ;;  %v582_v8 = vmul.f32 %v566_v61, %v1576_v49  ;;  %v584_v37 = vmul.f32 %v576_v24, %v1583_v12 }
  0xd5   : > { %v606_v62 = vpop.permute.xlu1 %605  ;;  %v604_v9 = vpop.permute.xlu0 %603 }
  0xd6   : > { %v614_v22 = vsel %vm609_vm1, %v1471_v58, %v604_v9  ;;  %v615_v23 = vsel %vm609_vm1, %v604_v9, %v606_v62 }
  0xd7   : > { %924 = vmatprep.subr.mxu0 %v615_v23 }
  0xd8   : > { %925 = vmatpush1.msra.mxu0 %v614_v22 }
  0xd9   : > { %v506_v25 = vpop.permute.xlu1 %505  ;;  %926 = vmatprep.subr.mxu0 %v582_v8  ;;  %v608_v26 = vpop.permute.xlu0 %607 }
  0xda   : > { %v616_v6 = vsel %vm609_vm1, %v606_v62, %v608_v26  ;;  %927 = vmatpush1.msra.mxu0 %v581_v57  ;;  %1157 = vmatprep.subr.msk.mxu1 %vm609_vm1, %v608_v26  ;;  %v516_v13 = vsel %vm511_vm3, %v1492_v38, %v506_v25 }
  0xdb   : > { %996 = vmatpush1.msra.mxu1 %v616_v6  ;;  %v532_v35 = vmul.f32 %v516_v13, %v1325_v10 }
  0xdc   : > { %997 = vmatprep.subr.mxu1 %v584_v37 }
  0xdd   : > { %v510_v17 = vpop.permute.xlu1 %509  ;;  %998 = vmatpush1.msra.mxu1 %v583_v60  ;;  %v508_v58 = vpop.permute.xlu0 %507 }
  0xde   : > { %v527_v27 = vsel %vm511_vm3, %v510_v17, 0.0  ;;  %v517_v31 = vsel %vm511_vm3, %v506_v25, %v508_v58  ;;  %v518_v33 = vsel %vm511_vm3, %v508_v58, %v510_v17 }
  0xdf   : > { %v535_v34 = vmul.f32 %v527_v27, %v1346_v16  ;;  %v533_v30 = vmul.f32 %v517_v31, %v1330_v11  ;;  %v534_v28 = vmul.f32 %v518_v33, %v1341_v15 }
  0xe1   : > { %v449_v36 = vpop.permute.xlu1 %448  ;;  %928 = vmatprep.subr.mxu0 %v533_v30  ;;  %999 = vmatprep.subr.mxu1 %v535_v34  ;;  %v447_v38 = vpop.permute.xlu0 %446 }
  0xe2   : > { %v458_v40 = vsel %vm454_vm4, %v1508_v51, %v447_v38  ;;  %v459_v42 = vsel %vm454_vm4, %v447_v38, %v449_v36  ;;  %929 = vmatpush1.msra.mxu0 %v532_v35  ;;  %1000 = vmatpush1.msra.mxu1 %v534_v28 }
  0xe3   : > { %v475_v59 = vmul.f32 %v458_v40, %v1560_v54  ;;  %v476_v63 = vmul.f32 %v459_v42, %v1576_v49  ;;  %930 = vmatprep.subr.mxu0 %v1368_v20  ;;  %1001 = vmatprep.subr.mxu1 %v1375_v21 }
  0xe4   : > { %931 = vmatpush1.msra.mxu0 %v1249_v2  ;;  %1002 = vmatpush1.msra.mxu1 %v1365_v19 }
  0xe5   : > { %v453_v43 = vpop.permute.xlu1 %452  ;;  %932 = vmatprep.subr.mxu0 %v476_v63  ;;  %v451_v44 = vpop.permute.xlu0 %450 }
  0xe6   : > { %v460_v51 = vsel %vm454_vm4, %v449_v36, %v451_v44  ;;  %v461_v45 = vsel %vm454_vm4, %v451_v44, %v453_v43  ;;  %933 = vmatpush1.msra.mxu0 %v475_v59 }
  0xe7   : > { %v477_v46 = vmul.f32 %v460_v51, %v1358_v18  ;;  %v478_v47 = vmul.f32 %v461_v45, %v1583_v12 }
  0xe9   : > { %v359_v48 = vpop.permute.xlu1 %358  ;;  %1003 = vmatprep.subr.mxu1 %v478_v47  ;;  %v357_v20 = vpop.permute.xlu0 %356 }
  0xea   : > { %v368_v2 = vsel %vm364_vm5, %v1519_v5, %v357_v20  ;;  %v369_v19 = vsel %vm364_vm5, %v357_v20, %v359_v48  ;;  %1004 = vmatpush1.msra.mxu1 %v477_v46 }
  0xeb   : > { %v426_v21 = vmul.f32 %v1325_v10, %v368_v2  ;;  %v427_v53 = vmul.f32 %v1330_v11, %v369_v19 }
  0xed   : > { %v363_v50 = vpop.permute.xlu1 %362  ;;  %934 = vmatprep.subr.mxu0 %v427_v53  ;;  %v361_v52 = vpop.permute.xlu0 %360 }
  0xee   : > { %v370_v32 = vsel %vm364_vm5, %v359_v48, %v361_v52  ;;  %v371_v55 = vsel %vm364_vm5, %v361_v52, %v363_v50  ;;  %935 = vmatpush1.msra.mxu0 %v426_v21 }
  0xef   : > { %v428_v56 = vmul.f32 %v1341_v15, %v370_v32  ;;  %v429_v1 = vmul.f32 %v1346_v16, %v371_v55 }
  0xf1   : > { %v228_v5 = vpop.permute.xlu1 %227  ;;  %1005 = vmatprep.subr.mxu1 %v429_v1  ;;  %v226_v57 = vpop.permute.xlu0 %225 }
  0xf2   : > { %1006 = vmatpush1.msra.mxu1 %v428_v56  ;;  %v238_v11 = vsel %vm233_vm6, %v226_v57, %v228_v5  ;;  %v237_v4 = vsel %vm233_vm6, %v1526_v29, %v226_v57 }
  0xf3   : > { %v296_v16 = vmul.f32 %v1576_v49, %v238_v11  ;;  %v295_v60 = vmul.f32 %v1560_v54, %v237_v4 }
  0xf5   : > { %v232_v7 = vpop.permute.xlu1 %231  ;;  %v230_v10 = vpop.permute.xlu0 %229 }
  0xf6   : > { %v240_v61 = vsel %vm233_vm6, %v230_v10, %v232_v7  ;;  %v239_v62 = vsel %vm233_vm6, %v228_v5, %v230_v10 }
  0xf7   : > { %v298_v23 = vmul.f32 %v1583_v12, %v240_v61  ;;  %v297_v54 = vmul.f32 %v1358_v18, %v239_v62 }
  0xf9   : > { %v318_v0 = vpop.permute.xlu1 %317  ;;  %v316_v14 = vpop.permute.xlu0 %315 }
  0xfa   : > { %v327_v3 = vsel %vm323_vm7, %v1542_v41, %v316_v14  ;;  %v328_v15 = vsel %vm323_vm7, %v316_v14, %v318_v0 }
  0xfb   : > { %936 = vmatprep.subr.mxu0 %v328_v15 }
  0xfc   : > { %937 = vmatpush1.msra.mxu0 %v327_v3 }
  0xfd   : > { %v322_v9 = vpop.permute.xlu1 %321  ;;  %938 = vmatprep.subr.mxu0 %v296_v16  ;;  %v320_v29 = vpop.permute.xlu0 %319 }
  0xfe   : > { %v329_v22 = vsel %vm323_vm7, %v318_v0, %v320_v29  ;;  %939 = vmatpush1.msra.mxu0 %v295_v60  ;;  %v330_v41 = vsel %vm323_vm7, %v320_v29, %v322_v9 }
  0xff   : > { %1149 = vmatmul.mubr.msk.f32.vlgmr.msra.gmra.mxu0 %vm762_vm9, %v1539_v39  ;;  %1007 = vmatprep.subr.mxu1 %v330_v41 }
 0x100   : > { %1008 = vmatpush1.msra.mxu1 %v329_v22 }
 0x101   : > { %1009 = vmatprep.subr.mxu1 %v298_v23 }
 0x102   : > { %1010 = vmatpush1.msra.mxu1 %v297_v54 }
 0x103   : > { %1150 = vmatmul.mubr.msk.f32.vlgmr.msra.gmra.mxu1 %vm762_vm9, %v1539_v39 }
 0x10a   : > { %v760_v49 = vpop.permute.xlu0 %759 }
 0x187   : > { %v832_v24 = vpop.f32.mrf.mxu0 }
 0x188   : > { %v833_v8 = vadd.f32 %v832_v24, %v760_v49 }
 0x189   : > { %v834_v25 = vpop.f32.mrf.mxu0 }
 0x18a   : > { %v835_v12 = vadd.f32 %v834_v25, %v760_v49  ;;  %vm1050_vm10 = vcmp.gt.f32.partialorder %v833_v8, 0.0  ;;  %v1058_v18 = vmul.f32 0.2, %v833_v8 }
 0x18b   : > { %v903_v26 = vpop.f32.mrf.mxu1 }
 0x18c   : > { %v904_v37 = vadd.f32 %v903_v26, %v760_v49  ;;  %vm1051_vm11 = vcmp.gt.f32.partialorder %v835_v12, 0.0  ;;  %v1059_v39 = vmul.f32 0.2, %v835_v12  ;;  %v1066_v6 = vsel %vm1050_vm10, %v833_v8, %v1058_v18 }
 0x18d   : > { %v905_v13 = vpop.f32.mrf.mxu1  ;;  %1074 = vst [vmem:[%s1647_s13] sm:$0xff] %v1066_v6 }
 0x18e   : > { %v906_v17 = vadd.f32 %v905_v13, %v760_v49  ;;  %vm1052_vm12 = vcmp.gt.f32.partialorder %v904_v37, 0.0  ;;  %v1060_v58 = vmul.f32 0.2, %v904_v37  ;;  %v1067_v27 = vsel %vm1051_vm11, %v835_v12, %v1059_v39 }
 0x18f   : > { %1075 = vst [vmem:[%s1647_s13 + $0x8] sm:$0xff] %v1067_v27 }
 0x190   : > { %vm1053_vm13 = vcmp.gt.f32.partialorder %v906_v17, 0.0  ;;  %v1061_v31 = vmul.f32 0.2, %v906_v17  ;;  %v1068_v33 = vsel %vm1052_vm12, %v904_v37, %v1060_v58 }
 0x191   : > { %1076 = vst [vmem:[%s1647_s13 + $0x10] sm:$0xff] %v1068_v33 }
 0x192   : > { %v1069_v34 = vsel %vm1053_vm13, %v906_v17, %v1061_v31 }
 0x193   : > { %1077 = vst [vmem:[%s1647_s13 + $0x18] sm:$0xff] %v1069_v34 }
 0x1bf   : > { %v974_v30 = vpop.f32.mrf.mxu0 }
 0x1c0   : > { %v975_v28 = vadd.f32 %v974_v30, %v760_v49 }
 0x1c1   : > { %v976_v35 = vpop.f32.mrf.mxu0 }
 0x1c2   : > { %vm1054_vm14 = vcmp.gt.f32.partialorder %v975_v28, 0.0  ;;  %v1062_v36 = vmul.f32 0.2, %v975_v28  ;;  %v977_v38 = vadd.f32 %v976_v35, %v760_v49 }
 0x1c3   : > { %v1045_v40 = vpop.f32.mrf.mxu1 }
 0x1c4   : > { %v1070_v42 = vsel %vm1054_vm14, %v975_v28, %v1062_v36  ;;  %vm1055_vm15 = vcmp.gt.f32.partialorder %v977_v38, 0.0  ;;  %v1063_v59 = vmul.f32 0.2, %v977_v38  ;;  %v1046_v63 = vadd.f32 %v1045_v40, %v760_v49 }
 0x1c5   : > { %1078 = vst [vmem:[%s1647_s13 + $0x20] sm:$0xff] %v1070_v42  ;;  %v1047_v43 = vpop.f32.mrf.mxu1 }
 0x1c6   : > { %v1071_v44 = vsel %vm1055_vm15, %v977_v38, %v1063_v59  ;;  %vm1056_vm0 = vcmp.gt.f32.partialorder %v1046_v63, 0.0  ;;  %v1064_v51 = vmul.f32 0.2, %v1046_v63  ;;  %v1048_v45 = vadd.f32 %v1047_v43, %v760_v49 }
 0x1c7   : > { %1079 = vst [vmem:[%s1647_s13 + $0x28] sm:$0xff] %v1071_v44 }
 0x1c8   : > { %v1072_v46 = vsel %vm1056_vm0, %v1046_v63, %v1064_v51  ;;  %vm1057_vm1 = vcmp.gt.f32.partialorder %v1048_v45, 0.0  ;;  %v1065_v47 = vmul.f32 0.2, %v1048_v45 }
 0x1c9   : > { %1080 = vst [vmem:[%s1647_s13 + $0x30] sm:$0xff] %v1072_v46 }
 0x1ca   : > { %v1073_v48 = vsel %vm1057_vm1, %v1048_v45, %v1065_v47 }
 0x1cb   : > { %1081 = vst [vmem:[%s1647_s13 + $0x38] sm:$0xff] %v1073_v48 }
 0x1cc PF: > { %s14_s15 = sadd.s32 1, %s1183_s15  }
 0x1cd   : > { %p11_p4 = scmp.ge.s32.totalorder %s14_s15, 4  }
 0x1cf   :  { %13 = sbr.rel (!%p11_p4) target bundleno = 1 (0x1), region = 67 }

// kernel: rrdbnet_forward.21
= control target key start
LH: loop header
LB: loop body
LE: loop exit
PB: predicated region body
PF: predicated region fallthrough
CT: control target
= control target key end

     0   :  { %s3455_s15 = smov 0   ;;  %s5246_s0 = inlined_call_operand.vmem [shape: f32[2,8,4096], index: 0, kind: input, shape index: {}]   ;;  %s5247_s1 = inlined_call_operand.vmem [shape: f32[2,4096], index: 1, kind: input, shape index: {}]   ;;  %s5248_s2 = inlined_call_operand.vmem [shape: f32[8,72], index: 2, kind: input, shape index: {}]   ;;  %s5249_s3 = inlined_call_operand.vmem [shape: f32[8,1], index: 3, kind: input, shape index: {}]   ;;  %s5250_s4 = inlined_call_operand.vmem [shape: f32[2,8,4096], index: 4, kind: output, shape index: {}]  }
   0x1 LB: > { %s3354_s16 = sadd.s32 4294967295, %s3421_s15   ;;  %p3358_p0 = scmp.ge.s32.totalorder %s3421_s15, 1  ;;  %s3421_s15 = sphi %s3455_s15, %s14_s15  }
   0x2   : > { %p162_p1 = scmp.lt.s32.totalorder %s3421_s15, 3 }
   0x4   : > { %p163_p2 = pnand %p3358_p0, %p162_p1 }
   0x5   : > { %p188_p3 = scmp.lt.s32.totalorder (!%p163_p2), %s3354_s16, 1  ;;  %s3423_s21 = smov (!%p163_p2), 63  }
   0x6   : > { %166 = sbr.rel (%p163_p2) target bundleno = 662 (0x296), region = 36  ;;  %s3424_s22 = smov (!%p163_p2), 65  }
   0x7   : > { %s3425_s23 = smov (!%p163_p2), 64   ;;  %s3426_s24 = smov (!%p163_p2), 127  }
   0x8   : > { %s3428_s25 = smov (!%p163_p2), 1  }
   0xb   : > { %s5257_s16 = smov (!%p188_p3, %s3354_s16), 1  ;;  %v5251_v5 = vmov 0.0   ;;  %v410_v14 = vlaneseq  ;;  %v3638_v17 = vld [vmem:[%s5247_s1 + $0x1] ss:$2 sm:$0xff]  ;;  %vm859_vm0 = vcmask 515072   ;;  %vm698_vm1 = vcmask 523264  }
   0xc   : > { %s3388_s17 = sshll.u32 %s5257_s16, 8  ;;  %2099 = vmatprep.mubr.f32.mxu0 %v5251_v5  ;;  %2170 = vmatprep.mubr.f32.mxu1 %v5251_v5  ;;  %v3728_v49 = vld [vmem:[%s5247_s1] ss:$2 sm:$0xff]  ;;  %vm341_vm2 = vcmask 531456   ;;  %vm1441_vm3 = vcmask 1039360   ;;  %vm1216_vm4 = vcmask 7168   ;;  %vm3858_vm5 = vmneg %vm698_vm1 }
   0xd   : > { %s3471_s20 = scalar_lea.vmem %s5246_s0, %s3388_s17  ;;  %v3626_v15 = vshrl.u32 %v410_v14, 7  ;;  %vm2031_vm6 = vcmask 588800   ;;  %s5183_s27 = scalar_lea.vmem %s5250_s4, %s3388_s17 }
   0xe   : > { %v3474_v0 = vld [vmem:[%s3471_s20 + $0x18] sm:$0xff]  ;;  %v3477_v1 = vld [vmem:[%s3471_s20 + $0x8] sm:$0xff]  ;;  %v3484_v2 = vld [vmem:[%s3471_s20 + $0x20] sm:$0xff] }
   0xf   : > { %801 = vrot.lane.b32.xlu1 %v3474_v0, %s3423_s21  ;;  %797 = vrot.lane.b32.xlu0 %v3477_v1, %s3423_s21  ;;  %v3487_v3 = vld [vmem:[%s3471_s20 + $0x10] sm:$0xff]  ;;  %v3494_v4 = vld [vmem:[%s3471_s20] sm:$0xff]  ;;  %v3633_v16 = vsub.s32 3, %v3626_v15  ;;  %v3641_v18 = vsub.s32 1, %v3626_v15  ;;  %v3644_v19 = vsub.s32 2, %v3626_v15  ;;  %v3655_v23 = vsub.s32 0, %v3626_v15 }
  0x10   : > { %v3539_v6 = vld [vmem:[%s3471_s20 + $0x30] sm:$0xff]  ;;  %v3542_v7 = vld [vmem:[%s3471_s20 + $0x28] sm:$0xff]  ;;  %v3549_v8 = vld [vmem:[%s3471_s20 + $0x40] sm:$0xff] }
  0x11   : > { %v3552_v9 = vld [vmem:[%s3471_s20 + $0x38] sm:$0xff]  ;;  %v3591_v10 = vld [vmem:[%s3471_s20 + $0x50] sm:$0xff]  ;;  %v3594_v11 = vld [vmem:[%s3471_s20 + $0x48] sm:$0xff]  ;;  %v3652_v22 = vrot.slane %v3638_v17, %v3633_v16  ;;  %v3659_v24 = vrot.slane %v3638_v17, %v3641_v18  ;;  %v3663_v25 = vrot.slane %v3638_v17, %v3644_v19  ;;  %v3685_v32 = vrot.slane %v3638_v17, %v3655_v23 }
  0x12   : > { %v3601_v12 = vld [vmem:[%s3471_s20 + $0x60] sm:$0xff]  ;;  %v3604_v13 = vld [vmem:[%s3471_s20 + $0x58] sm:$0xff]  ;;  %v3704_v39 = vld [vmem:[%s3471_s20 + $0x70] sm:$0xff]  ;;  %v3748_v54 = vrot.slane %v3728_v49, %v3644_v19  ;;  %v3759_v57 = vrot.slane %v3728_v49, %v3633_v16  ;;  %v3767_v58 = vrot.slane %v3728_v49, %v3641_v18  ;;  %v3780_v62 = vrot.slane %v3728_v49, %v3655_v23 }
  0x13   : > { %803 = vrot.lane.b32.xlu1 %v3484_v2, %s3423_s21  ;;  %799 = vrot.lane.b32.xlu0 %v3487_v3, %s3423_s21  ;;  %v3707_v40 = vld [vmem:[%s3471_s20 + $0x68] sm:$0xff]  ;;  %v3714_v43 = vld [vmem:[%s3471_s20 + $0x80] sm:$0xff] }
  0x14   : > { %v3717_v44 = vld [vmem:[%s3471_s20 + $0x78] sm:$0xff] }
  0x17   : > { %279 = vrot.lane.b32.xlu1 %v3477_v1, %s3424_s22  ;;  %795 = vrot.lane.b32.xlu0 %v3494_v4, %s3423_s21 }
  0x1b   : > { %283 = vrot.lane.b32.xlu1 %v3474_v0, %s3424_s22  ;;  %281 = vrot.lane.b32.xlu0 %v3487_v3, %s3424_s22 }
  0x1f   : > { %636 = vrot.lane.b32.xlu1 %v3477_v1, %s3425_s23  ;;  %285 = vrot.lane.b32.xlu0 %v3484_v2, %s3424_s22 }
  0x23   : > { %640 = vrot.lane.b32.xlu1 %v3474_v0, %s3425_s23  ;;  %638 = vrot.lane.b32.xlu0 %v3487_v3, %s3425_s23 }
  0x27   : > { %277 = vrot.lane.b32.xlu1 %v3494_v4, %s3424_s22  ;;  %642 = vrot.lane.b32.xlu0 %v3484_v2, %s3425_s23 }
  0x2b   : > { %1379 = vrot.lane.b32.xlu1 %v3477_v1, %s3426_s24  ;;  %634 = vrot.lane.b32.xlu0 %v3494_v4, %s3425_s23 }
  0x2f   : > { %1383 = vrot.lane.b32.xlu1 %v3474_v0, %s3426_s24  ;;  %1381 = vrot.lane.b32.xlu0 %v3487_v3, %s3426_s24 }
  0x33   : > { %1377 = vrot.lane.b32.xlu1 %v3494_v4, %s3426_s24  ;;  %1385 = vrot.lane.b32.xlu0 %v3484_v2, %s3426_s24 }
  0x37   : > { %1154 = vrot.lane.b32.xlu1 %v3477_v1, %s3428_s25  ;;  %1152 = vrot.lane.b32.xlu0 %v3494_v4, %s3428_s25 }
  0x3b   : > { %1158 = vrot.lane.b32.xlu1 %v3474_v0, %s3428_s25  ;;  %1156 = vrot.lane.b32.xlu0 %v3487_v3, %s3428_s25 }
  0x3f   : > { %807 = vrot.lane.b32.xlu1 %v3539_v6, %s3423_s21  ;;  %805 = vrot.lane.b32.xlu0 %v3542_v7, %s3423_s21 }
  0x43   : > { %811 = vrot.lane.b32.xlu1 %v3549_v8, %s3423_s21  ;;  %809 = vrot.lane.b32.xlu0 %v3552_v9, %s3423_s21 }
  0x47   : > { %289 = vrot.lane.b32.xlu1 %v3539_v6, %s3424_s22  ;;  %287 = vrot.lane.b32.xlu0 %v3542_v7, %s3424_s22 }
  0x4b   : > { %293 = vrot.lane.b32.xlu1 %v3549_v8, %s3424_s22  ;;  %291 = vrot.lane.b32.xlu0 %v3552_v9, %s3424_s22 }
  0x4f   : > { %646 = vrot.lane.b32.xlu1 %v3539_v6, %s3425_s23  ;;  %644 = vrot.lane.b32.xlu0 %v3542_v7, %s3425_s23 }
  0x53   : > { %650 = vrot.lane.b32.xlu1 %v3549_v8, %s3425_s23  ;;  %648 = vrot.lane.b32.xlu0 %v3552_v9, %s3425_s23 }
  0x57   : > { %1389 = vrot.lane.b32.xlu1 %v3539_v6, %s3426_s24  ;;  %1387 = vrot.lane.b32.xlu0 %v3542_v7, %s3426_s24 }
  0x5b   : > { %1393 = vrot.lane.b32.xlu1 %v3549_v8, %s3426_s24  ;;  %1391 = vrot.lane.b32.xlu0 %v3552_v9, %s3426_s24 }
  0x5f   : > { %1162 = vrot.lane.b32.xlu1 %v3542_v7, %s3428_s25  ;;  %1160 = vrot.lane.b32.xlu0 %v3484_v2, %s3428_s25 }
  0x63   : > { %1166 = vrot.lane.b32.xlu1 %v3552_v9, %s3428_s25  ;;  %1164 = vrot.lane.b32.xlu0 %v3539_v6, %s3428_s25 }
  0x67   : > { %815 = vrot.lane.b32.xlu1 %v3591_v10, %s3423_s21  ;;  %813 = vrot.lane.b32.xlu0 %v3594_v11, %s3423_s21 }
  0x6b   : > { %819 = vrot.lane.b32.xlu1 %v3601_v12, %s3423_s21  ;;  %817 = vrot.lane.b32.xlu0 %v3604_v13, %s3423_s21 }
  0x6f   : > { %297 = vrot.lane.b32.xlu1 %v3591_v10, %s3424_s22  ;;  %295 = vrot.lane.b32.xlu0 %v3594_v11, %s3424_s22 }
  0x73   : > { %301 = vrot.lane.b32.xlu1 %v3601_v12, %s3424_s22  ;;  %299 = vrot.lane.b32.xlu0 %v3604_v13, %s3424_s22 }
  0x77   : > { %654 = vrot.lane.b32.xlu1 %v3591_v10, %s3425_s23  ;;  %652 = vrot.lane.b32.xlu0 %v3594_v11, %s3425_s23 }
  0x7b   : > { %658 = vrot.lane.b32.xlu1 %v3601_v12, %s3425_s23  ;;  %656 = vrot.lane.b32.xlu0 %v3604_v13, %s3425_s23 }
  0x7f   : > { %1397 = vrot.lane.b32.xlu1 %v3591_v10, %s3426_s24  ;;  %1395 = vrot.lane.b32.xlu0 %v3594_v11, %s3426_s24 }
  0x81   : > { %v802_v20 = vpop.permute.xlu1 %801  ;;  %v798_v21 = vpop.permute.xlu0 %797 }
  0x83   : > { %1401 = vrot.lane.b32.xlu1 %v3601_v12, %s3426_s24  ;;  %1399 = vrot.lane.b32.xlu0 %v3604_v13, %s3426_s24 }
  0x85   : > { %v3665_v26 = vpop.permute.xlu1 %803  ;;  %v800_v27 = vpop.permute.xlu0 %799 }
  0x86   : > { %v3669_v28 = vsel %vm859_vm0, %v802_v20, %v3665_v26  ;;  %v3672_v29 = vsel %vm859_vm0, %v798_v21, %v800_v27  ;;  %v3675_v30 = vsel %vm859_vm0, %v800_v27, %v802_v20 }
  0x87   : > { %1170 = vrot.lane.b32.xlu1 %v3594_v11, %s3428_s25  ;;  %1168 = vrot.lane.b32.xlu0 %v3549_v8, %s3428_s25  ;;  %v1675_v31 = vmul.f32 %v3652_v22, %v3669_v28  ;;  %v1673_v33 = vmul.f32 %v3659_v24, %v3672_v29  ;;  %v1674_v34 = vmul.f32 %v3663_v25, %v3675_v30 }
  0x89   : > { %2120 = vmatprep.subr.mxu1 %v1675_v31  ;;  %v280_v35 = vpop.permute.xlu1 %279  ;;  %v3691_v36 = vpop.permute.xlu0 %795  ;;  %2049 = vmatprep.subr.mxu0 %v1673_v33 }
  0x8a   : > { %2121 = vmatpush1.msra.mxu1 %v1674_v34  ;;  %v3695_v37 = vsel %vm859_vm0, %v3691_v36, %v798_v21 }
  0x8b   : > { %1174 = vrot.lane.b32.xlu1 %v3604_v13, %s3428_s25  ;;  %1172 = vrot.lane.b32.xlu0 %v3591_v10, %s3428_s25  ;;  %v1672_v38 = vmul.f32 %v3685_v32, %v3695_v37 }
  0x8d   : > { %v284_v41 = vpop.permute.xlu1 %283  ;;  %2050 = vmatpush1.msra.mxu0 %v1672_v38  ;;  %v282_v42 = vpop.permute.xlu0 %281 }
  0x8e   : > { %v3751_v55 = vsel %vm341_vm2, %v282_v42, %v284_v41  ;;  %v3770_v59 = vsel %vm341_vm2, %v280_v35, %v282_v42 }
  0x8f   : > { %823 = vrot.lane.b32.xlu1 %v3704_v39, %s3423_s21  ;;  %821 = vrot.lane.b32.xlu0 %v3707_v40, %s3423_s21  ;;  %v1574_v21 = vmul.f32 %v3748_v54, %v3751_v55  ;;  %v1573_v31 = vmul.f32 %v3767_v58, %v3770_v59 }
  0x91   : > { %v637_v45 = vpop.permute.xlu1 %636  ;;  %v3719_v46 = vpop.permute.xlu0 %285 }
  0x92   : > { %v3740_v51 = vsel %vm341_vm2, %v284_v41, %v3719_v46 }
  0x93   : > { %827 = vrot.lane.b32.xlu1 %v3714_v43, %s3423_s21  ;;  %825 = vrot.lane.b32.xlu0 %v3717_v44, %s3423_s21  ;;  %v1575_v61 = vmul.f32 %v3759_v57, %v3740_v51 }
  0x95   : > { %v641_v47 = vpop.permute.xlu1 %640  ;;  %v639_v48 = vpop.permute.xlu0 %638 }
  0x96   : > { %v3731_v50 = vsel %vm698_vm1, %v637_v45, %v639_v48  ;;  %v3774_v60 = vsel %vm698_vm1, %v639_v48, %v641_v47 }
  0x97   : > { %305 = vrot.lane.b32.xlu1 %v3704_v39, %s3424_s22  ;;  %303 = vrot.lane.b32.xlu0 %v3707_v40, %s3424_s22 }
  0x98   : > { %2051 = vmatprep.subr.mxu0 %v3731_v50 }
  0x99   : > { %v3742_v52 = vpop.permute.xlu1 %277  ;;  %v3744_v53 = vpop.permute.xlu0 %642 }
  0x9a   : > { %v3755_v56 = vsel %vm698_vm1, %v641_v47, %v3744_v53  ;;  %v3784_v63 = vsel %vm341_vm2, %v3742_v52, %v280_v35 }
  0x9b   : > { %309 = vrot.lane.b32.xlu1 %v3714_v43, %s3424_s22  ;;  %307 = vrot.lane.b32.xlu0 %v3717_v44, %s3424_s22  ;;  %v1572_v33 = vmul.f32 %v3780_v62, %v3784_v63 }
  0x9c   : > { %2122 = vmatprep.subr.mxu1 %v3755_v56 }
  0x9d   : > { %2123 = vmatpush1.msra.mxu1 %v3774_v60  ;;  %v1380_v14 = vpop.permute.xlu1 %1379  ;;  %v3787_v20 = vpop.permute.xlu0 %634 }
  0x9e   : > { %2124 = vmatprep.subr.mxu1 %v1575_v61  ;;  %v3793_v27 = vsel %vm698_vm1, %v3787_v20, %v637_v45 }
  0x9f   : > { %2125 = vmatpush1.msra.mxu1 %v1574_v21  ;;  %662 = vrot.lane.b32.xlu1 %v3704_v39, %s3425_s23 }
  0xa0   : > { %660 = vrot.lane.b32.xlu0 %v3707_v40, %s3425_s23  ;;  %2052 = vmatpush1.msra.mxu0 %v3793_v27 }
  0xa1   : > { %2053 = vmatprep.subr.mxu0 %v1573_v31  ;;  %v1384_v34 = vpop.permute.xlu1 %1383  ;;  %v1382_v35 = vpop.permute.xlu0 %1381 }
  0xa2   : > { %2054 = vmatpush1.msra.mxu0 %v1572_v33  ;;  %v1443_v38 = vsel %vm1441_vm3, %v1380_v14, %v1382_v35  ;;  %v1444_v42 = vsel %vm1441_vm3, %v1382_v35, %v1384_v34 }
  0xa3   : > { %666 = vrot.lane.b32.xlu1 %v3714_v43, %s3425_s23  ;;  %v1507_v41 = vmul.f32 %v1443_v38, %v3659_v24  ;;  %v1508_v33 = vmul.f32 %v1444_v42, %v3663_v25 }
  0xa4   : > { %664 = vrot.lane.b32.xlu0 %v3717_v44, %s3425_s23 }
  0xa5   : > { %v1378_v45 = vpop.permute.xlu1 %1377  ;;  %2055 = vmatprep.subr.mxu0 %v1507_v41  ;;  %v3811_v47 = vpop.permute.xlu0 %1385  ;;  %v923_v41 = vsel %vm859_vm0, 0.0, %v3691_v36  ;;  %v1089_v36 = vmul.f32 %v3659_v24, %v3695_v37 }
  0xa6   : > { %v1442_v48 = vsel %vm1441_vm3, %v1378_v45, %v1380_v14  ;;  %v1445_v61 = vsel %vm1441_vm3, %v1384_v34, %v3811_v47 }
  0xa7   : > { %v1506_v21 = vmul.f32 %v1442_v48, %v3685_v32  ;;  %1405 = vrot.lane.b32.xlu1 %v3704_v39, %s3426_s24  ;;  %v1509_v31 = vmul.f32 %v1445_v61, %v3652_v22  ;;  %v3834_v48 = vsub.s32 5, %v3626_v15 }
  0xa8   : > { %1403 = vrot.lane.b32.xlu0 %v3707_v40, %s3426_s24 }
  0xa9   : > { %v1155_v35 = vpop.permute.xlu1 %1154  ;;  %2056 = vmatpush1.msra.mxu0 %v1506_v21  ;;  %2126 = vmatprep.subr.mxu1 %v1509_v31  ;;  %v1153_v14 = vpop.permute.xlu0 %1152  ;;  %v3848_v21 = vsub.s32 7, %v3626_v15 }
  0xaa   : > { %v1217_v38 = vsel %vm1216_vm4, %v1153_v14, %v1155_v35  ;;  %v1280_v34 = vsel %vm1216_vm4, 0.0, %v1153_v14  ;;  %2127 = vmatpush1.msra.mxu1 %v1508_v33  ;;  %2057 = vmatprep.subr.mxu0 %v3477_v1  ;;  %v3840_v1 = vsub.s32 4, %v3626_v15  ;;  %v1088_v33 = vmul.f32 %v3685_v32, %v923_v41 }
  0xab   : > { %1409 = vrot.lane.b32.xlu1 %v3714_v43, %s3426_s24  ;;  %2058 = vmatpush1.msra.mxu0 %v3494_v4  ;;  %v1282_v42 = vmul.f32 %v1217_v38, %v3767_v58  ;;  %v1281_v45 = vmul.f32 %v1280_v34, %v3780_v62  ;;  %v405_v32 = vsel %vm341_vm2, 0.0, %v3742_v52  ;;  %v571_v41 = vmul.f32 %v3767_v58, %v3784_v63 }
  0xac   : > { %1407 = vrot.lane.b32.xlu0 %v3717_v44, %s3426_s24  ;;  %2128 = vmatprep.subr.mxu1 %v3474_v0  ;;  %v3873_v14 = vrot.slane %v3638_v17, %v3840_v1  ;;  %v3885_v52 = vsub.s32 6, %v3626_v15  ;;  %v1090_v58 = vmul.f32 %v3663_v25, %v3672_v29  ;;  %v570_v15 = vmul.f32 %v3780_v62, %v405_v32  ;;  %v3911_v25 = vld [vmem:[%s5248_s2] sm:$0xff]  ;;  %v3916_v62 = vld [vmem:[%s3471_s20 + $0x90] sm:$0xff] }
  0xad   : > { %v3844_v61 = vpop.permute.xlu1 %1158  ;;  %2059 = vmatprep.subr.mxu0 %v1282_v42  ;;  %v1157_v4 = vpop.permute.xlu0 %1156  ;;  %2129 = vmatpush1.msra.mxu1 %v3487_v3  ;;  %v3880_v42 = vrot.slane %v3638_v17, %v3848_v21 }
  0xae   : > { %v1218_v31 = vsel %vm1216_vm4, %v1155_v35, %v1157_v4  ;;  %v1219_v0 = vsel %vm1216_vm4, %v1157_v4, %v3844_v61  ;;  %2060 = vmatpush1.msra.mxu0 %v1281_v45  ;;  %v3865_v35 = vrot.slane %v3638_v17, %v3834_v48  ;;  %v3920_v63 = vrot.slane %v3638_v17, %v3885_v52  ;;  %v3931_v4 = vld [vmem:[%s3471_s20 + $0x88] sm:$0xff] }
  0xaf   : > { %1178 = vrot.lane.b32.xlu1 %v3707_v40, %s3428_s25  ;;  %2061 = vmatprep.subr.mxu0 %v1089_v36  ;;  %v1284_v24 = vmul.f32 %v1219_v0, %v3759_v57  ;;  %v1283_v37 = vmul.f32 %v1218_v31, %v3748_v54  ;;  %v573_v17 = vmul.f32 %v3759_v57, %v3751_v55  ;;  %v3949_v55 = vld [vmem:[%s3471_s20 + $0xa0] sm:$0xff]  ;;  %v3952_v57 = vld [vmem:[%s3471_s20 + $0x98] sm:$0xff] }
  0xb0   : > { %1176 = vrot.lane.b32.xlu0 %v3601_v12, %s3428_s25  ;;  %2062 = vmatpush1.msra.mxu0 %v1088_v33  ;;  %v1091_v12 = vmul.f32 %v3652_v22, %v3675_v30  ;;  %v572_v0 = vmul.f32 %v3748_v54, %v3770_v59 }
  0xb1   : > { %v808_v38 = vpop.permute.xlu1 %807  ;;  %2063 = vmatprep.subr.mxu0 %v3793_v27  ;;  %2130 = vmatprep.subr.mxu1 %v1284_v24  ;;  %v806_v34 = vpop.permute.xlu0 %805  ;;  %v3966_v24 = vrot.slane %v3728_v49, %v3834_v48 }
  0xb2   : > { %v3889_v45 = vsel %vm859_vm0, %v3665_v26, %v806_v34  ;;  %v3892_v27 = vsel %vm859_vm0, %v806_v34, %v808_v38  ;;  %3391 = vmatpush1.msk.msra.mxu0 %vm3858_vm5, %v3787_v20  ;;  %2131 = vmatpush1.msra.mxu1 %v1283_v37  ;;  %v3981_v34 = vrot.slane %v3728_v49, %v3840_v1 }
  0xb3   : > { %1182 = vrot.lane.b32.xlu1 %v3717_v44, %s3428_s25  ;;  %2065 = vmatprep.subr.mxu0 %v571_v41  ;;  %v1677_v22 = vmul.f32 %v3865_v35, %v3892_v27  ;;  %v1676_v26 = vmul.f32 %v3873_v14, %v3889_v45 }
  0xb4   : > { %1180 = vrot.lane.b32.xlu0 %v3704_v39, %s3428_s25  ;;  %2132 = vmatprep.subr.mxu1 %v1091_v12 }
  0xb5   : > { %2066 = vmatpush1.msra.mxu0 %v570_v15  ;;  %2133 = vmatpush1.msra.mxu1 %v1090_v58  ;;  %v3913_v29 = vpop.permute.xlu1 %811  ;;  %v810_v30 = vpop.permute.xlu0 %809  ;;  %v3995_v58 = vrot.slane %v3728_v49, %v3848_v21 }
  0xb6   : > { %2134 = vmatprep.subr.mxu1 %v3774_v60  ;;  %2191 = vmatprep.subr.mxu0 %v1677_v22  ;;  %v3924_v20 = vsel %vm859_vm0, %v808_v38, %v810_v30  ;;  %v3928_v36 = vsel %vm859_vm0, %v810_v30, %v3913_v29 }
  0xb7   : > { %3370 = vmatmul.mubr.msk.f32.vlgmr.msra.gmra.mxu0 %vm2031_vm6, %v3911_v25  ;;  %2135 = vmatpush1.msra.mxu1 %v3731_v50  ;;  %v1679_v60 = vmul.f32 %v3880_v42, %v3928_v36  ;;  %v1678_v31 = vmul.f32 %v3920_v63, %v3924_v20 }
  0xb8   : > { %2192 = vmatpush1.msra.mxu0 %v1676_v26  ;;  %831 = vrot.lane.b32.xlu1 %v3916_v62, %s3423_s21 }
  0xb9   : > { %829 = vrot.lane.b32.xlu0 %v3931_v4, %s3423_s21  ;;  %2136 = vmatprep.subr.mxu1 %v573_v17  ;;  %v290_v50 = vpop.permute.xlu1 %289  ;;  %v288_v33 = vpop.permute.xlu0 %287  ;;  %v4015_v17 = vrot.slane %v3728_v49, %v3885_v52 }
  0xba   : > { %2137 = vmatpush1.msra.mxu1 %v572_v0  ;;  %2241 = vmatprep.mubr.f32.mxu0 %v5251_v5  ;;  %v3969_v3 = vsel %vm341_vm2, %v288_v33, %v290_v50  ;;  %v3975_v37 = vsel %vm341_vm2, %v3719_v46, %v288_v33 }
  0xbb   : > { %2262 = vmatprep.subr.mxu1 %v1679_v60  ;;  %3371 = vmatmul.mubr.msk.f32.vlgmr.msra.gmra.mxu1 %vm2031_vm6, %v3911_v25  ;;  %v1577_v46 = vmul.f32 %v3966_v24, %v3969_v3  ;;  %v1576_v15 = vmul.f32 %v3981_v34, %v3975_v37 }
  0xbc   : > { %2263 = vmatpush1.msra.mxu1 %v1678_v31  ;;  %835 = vrot.lane.b32.xlu1 %v3949_v55, %s3423_s21 }
  0xbd   : > { %833 = vrot.lane.b32.xlu0 %v3952_v57, %s3423_s21  ;;  %v3961_v54 = vpop.permute.xlu1 %293  ;;  %v292_v59 = vpop.permute.xlu0 %291  ;;  %2312 = vmatprep.mubr.f32.mxu1 %v5251_v5 }
  0xbe   : > { %v4001_v22 = vsel %vm341_vm2, %v292_v59, %v3961_v54 }
  0xbf   : > { %v1579_v0 = vmul.f32 %v3995_v58, %v4001_v22 }
  0xc0   : > { %313 = vrot.lane.b32.xlu1 %v3916_v62, %s3424_s22 }
  0xc1   : > { %311 = vrot.lane.b32.xlu0 %v3931_v4, %s3424_s22  ;;  %v647_v32 = vpop.permute.xlu1 %646  ;;  %v645_v38 = vpop.permute.xlu0 %644 }
  0xc2   : > { %v3984_v41 = vsel %vm698_vm1, %v645_v38, %v647_v32  ;;  %v3988_v12 = vsel %vm698_vm1, %v3744_v53, %v645_v38  ;;  %v4007_v53 = vsel %vm341_vm2, %v290_v50, %v292_v59 }
  0xc3   : > { %2193 = vmatprep.subr.mxu0 %v3984_v41  ;;  %v1578_v50 = vmul.f32 %v4015_v17, %v4007_v53 }
  0xc4   : > { %317 = vrot.lane.b32.xlu1 %v3949_v55, %s3424_s22  ;;  %2194 = vmatpush1.msra.mxu0 %v3988_v12 }
  0xc5   : > { %315 = vrot.lane.b32.xlu0 %v3952_v57, %s3424_s22  ;;  %v4011_v26 = vpop.permute.xlu1 %650  ;;  %2195 = vmatprep.subr.mxu0 %v1577_v46  ;;  %v649_v30 = vpop.permute.xlu0 %648 }
  0xc6   : > { %2196 = vmatpush1.msra.mxu0 %v1576_v15  ;;  %v4019_v60 = vsel %vm698_vm1, %v649_v30, %v4011_v26  ;;  %v4022_v31 = vsel %vm698_vm1, %v647_v32, %v649_v30 }
  0xc7   : > { %2264 = vmatprep.subr.mxu1 %v4019_v60 }
  0xc8   : > { %670 = vrot.lane.b32.xlu1 %v3916_v62, %s3425_s23  ;;  %2265 = vmatpush1.msra.mxu1 %v4022_v31 }
  0xc9   : > { %668 = vrot.lane.b32.xlu0 %v3931_v4, %s3425_s23  ;;  %v1390_v49 = vpop.permute.xlu1 %1389  ;;  %2266 = vmatprep.subr.mxu1 %v1579_v0  ;;  %v1388_v33 = vpop.permute.xlu0 %1387 }
  0xca   : > { %v1446_v59 = vsel %vm1441_vm3, %v3811_v47, %v1388_v33  ;;  %v1447_v32 = vsel %vm1441_vm3, %v1388_v33, %v1390_v49  ;;  %2267 = vmatpush1.msra.mxu1 %v1578_v50 }
  0xcb   : > { %v1510_v38 = vmul.f32 %v1446_v59, %v3873_v14  ;;  %v1511_v46 = vmul.f32 %v1447_v32, %v3865_v35 }
  0xcc   : > { %674 = vrot.lane.b32.xlu1 %v3949_v55, %s3425_s23 }
  0xcd   : > { %672 = vrot.lane.b32.xlu0 %v3952_v57, %s3425_s23  ;;  %v4043_v15 = vpop.permute.xlu1 %1393  ;;  %2197 = vmatprep.subr.mxu0 %v1511_v46  ;;  %v1392_v30 = vpop.permute.xlu0 %1391 }
  0xce   : > { %v1448_v0 = vsel %vm1441_vm3, %v1390_v49, %v1392_v30  ;;  %v1449_v47 = vsel %vm1441_vm3, %v1392_v30, %v4043_v15  ;;  %2198 = vmatpush1.msra.mxu0 %v1510_v38  ;;  %v1093_v30 = vmul.f32 %v3865_v35, %v3889_v45 }
  0xcf   : > { %v1512_v50 = vmul.f32 %v1448_v0, %v3920_v63  ;;  %v1513_v33 = vmul.f32 %v1449_v47, %v3880_v42  ;;  %2199 = vmatprep.subr.mxu0 %v3542_v7  ;;  %v1092_v0 = vmul.f32 %v3873_v14, %v3669_v28 }
  0xd0   : > { %1413 = vrot.lane.b32.xlu1 %v3916_v62, %s3426_s24  ;;  %2200 = vmatpush1.msra.mxu0 %v3484_v2 }
  0xd1   : > { %1411 = vrot.lane.b32.xlu0 %v3931_v4, %s3426_s24  ;;  %v1163_v59 = vpop.permute.xlu1 %1162  ;;  %2268 = vmatprep.subr.mxu1 %v1513_v33  ;;  %v1161_v49 = vpop.permute.xlu0 %1160 }
  0xd2   : > { %v1220_v32 = vsel %vm1216_vm4, %v3844_v61, %v1161_v49  ;;  %v1221_v38 = vsel %vm1216_vm4, %v1161_v49, %v1163_v59  ;;  %2269 = vmatpush1.msra.mxu1 %v1512_v50 }
  0xd3   : > { %v1285_v46 = vmul.f32 %v1220_v32, %v3981_v34  ;;  %v1286_v7 = vmul.f32 %v1221_v38, %v3966_v24  ;;  %2270 = vmatprep.subr.mxu1 %v3552_v9  ;;  %v4076_v9 = vld [vmem:[%s5247_s1 + $0x11] ss:$2 sm:$0xff] }
  0xd4   : > { %1417 = vrot.lane.b32.xlu1 %v3949_v55, %s3426_s24  ;;  %2271 = vmatpush1.msra.mxu1 %v3539_v6  ;;  %v4085_v35 = vrot.slane %v4076_v9, %v3641_v18  ;;  %v4091_v28 = vrot.slane %v4076_v9, %v3655_v23  ;;  %v4141_v38 = vrot.slane %v4076_v9, %v3644_v19 }
  0xd5   : > { %1415 = vrot.lane.b32.xlu0 %v3952_v57, %s3426_s24  ;;  %v4067_v2 = vpop.permute.xlu1 %1166  ;;  %2201 = vmatprep.subr.mxu0 %v1286_v7  ;;  %v1165_v61 = vpop.permute.xlu0 %1164 }
  0xd6   : > { %v1222_v6 = vsel %vm1216_vm4, %v1163_v59, %v1165_v61  ;;  %v1223_v47 = vsel %vm1216_vm4, %v1165_v61, %v4067_v2  ;;  %2202 = vmatpush1.msra.mxu0 %v1285_v46  ;;  %v575_v59 = vmul.f32 %v3966_v24, %v3975_v37  ;;  %v577_v46 = vmul.f32 %v3995_v58, %v4007_v53 }
  0xd7   : > { %v1287_v50 = vmul.f32 %v1222_v6, %v4015_v17  ;;  %2203 = vmatprep.subr.mxu0 %v1093_v30  ;;  %v1288_v33 = vmul.f32 %v1223_v47, %v3995_v58  ;;  %v576_v61 = vmul.f32 %v4015_v17, %v3969_v3  ;;  %v4164_v58 = vld [vmem:[%s3471_s20 + $0xb8] sm:$0xff] }
  0xd8   : > { %1186 = vrot.lane.b32.xlu1 %v3931_v4, %s3428_s25  ;;  %2204 = vmatpush1.msra.mxu0 %v1092_v0  ;;  %v4160_v0 = vld [vmem:[%s3471_s20 + $0xc0] sm:$0xff]  ;;  %v4175_v17 = vld [vmem:[%s5247_s1 + $0x10] ss:$2 sm:$0xff] }
  0xd9   : > { %1184 = vrot.lane.b32.xlu0 %v3714_v43, %s3428_s25  ;;  %v816_v14 = vpop.permute.xlu1 %815  ;;  %2205 = vmatprep.subr.mxu0 %v3988_v12  ;;  %v814_v45 = vpop.permute.xlu0 %813  ;;  %v1095_v43 = vmul.f32 %v3880_v42, %v3924_v20  ;;  %v574_v12 = vmul.f32 %v3981_v34, %v3740_v51  ;;  %v4120_v51 = vrot.slane %v4076_v9, %v3633_v16  ;;  %v4134_v20 = vld [vmem:[%s3471_s20 + $0xb0] sm:$0xff]  ;;  %v4137_v34 = vld [vmem:[%s3471_s20 + $0xa8] sm:$0xff] }
  0xda   : > { %2272 = vmatprep.subr.mxu1 %v1288_v33  ;;  %v4100_v49 = vsel %vm859_vm0, %v3913_v29, %v814_v45  ;;  %v4103_v32 = vsel %vm859_vm0, %v814_v45, %v816_v14  ;;  %2206 = vmatpush1.msra.mxu0 %v3755_v56  ;;  %v1094_v29 = vmul.f32 %v3920_v63, %v3892_v27 }
  0xdb   : > { %2273 = vmatpush1.msra.mxu1 %v1287_v50  ;;  %2207 = vmatprep.subr.mxu0 %v575_v59  ;;  %v1681_v24 = vmul.f32 %v4085_v35, %v4103_v32  ;;  %v1680_v37 = vmul.f32 %v4091_v28, %v4100_v49  ;;  %v4182_v6 = vrot.slane %v4175_v17, %v3641_v18 }
  0xdc   : > { %1190 = vrot.lane.b32.xlu1 %v3952_v57, %s3428_s25  ;;  %2274 = vmatprep.subr.mxu1 %v1095_v43  ;;  %v4195_v45 = vrot.slane %v4175_v17, %v3655_v23 }
  0xdd   : > { %1188 = vrot.lane.b32.xlu0 %v3916_v62, %s3428_s25  ;;  %2208 = vmatpush1.msra.mxu0 %v574_v12  ;;  %v4124_v56 = vpop.permute.xlu1 %819  ;;  %v818_v42 = vpop.permute.xlu0 %817  ;;  %v4211_v12 = vrot.slane %v4175_v17, %v3633_v16 }
  0xde   : > { %2275 = vmatpush1.msra.mxu1 %v1094_v29  ;;  %2333 = vmatprep.subr.mxu0 %v1681_v24  ;;  %v4127_v27 = vsel %vm859_vm0, %v816_v14, %v818_v42  ;;  %v4131_v63 = vsel %vm859_vm0, %v818_v42, %v4124_v56 }
  0xdf   : > { %2276 = vmatprep.subr.mxu1 %v4022_v31  ;;  %3372 = vmatmul.mubr.msk.f32.vlgmr.msra.gmra.mxu0 %vm2031_vm6, %v3911_v25  ;;  %v1683_v7 = vmul.f32 %v4120_v51, %v4131_v63  ;;  %v1682_v30 = vmul.f32 %v4141_v38, %v4127_v27 }
  0xe0   : > { %2277 = vmatpush1.msra.mxu1 %v3984_v41  ;;  %2334 = vmatpush1.msra.mxu0 %v1680_v37 }
  0xe1   : > { %839 = vrot.lane.b32.xlu1 %v4134_v20, %s3423_s21  ;;  %837 = vrot.lane.b32.xlu0 %v4137_v34, %s3423_s21  ;;  %v298_v41 = vpop.permute.xlu1 %297  ;;  %v296_v31 = vpop.permute.xlu0 %295 }
  0xe2   : > { %2278 = vmatprep.subr.mxu1 %v577_v46  ;;  %2383 = vmatprep.mubr.f32.mxu0 %v5251_v5  ;;  %v4185_v47 = vsel %vm341_vm2, %v296_v31, %v298_v41  ;;  %v4189_v50 = vsel %vm341_vm2, %v3961_v54, %v296_v31  ;;  %v4229_v46 = vrot.slane %v4175_v17, %v3644_v19 }
  0xe3   : > { %2279 = vmatpush1.msra.mxu1 %v576_v61  ;;  %v1581_v54 = vmul.f32 %v4182_v6, %v4185_v47  ;;  %v1580_v24 = vmul.f32 %v4195_v45, %v4189_v50 }
  0xe4   : > { %2404 = vmatprep.subr.mxu1 %v1683_v7  ;;  %3373 = vmatmul.mubr.msk.f32.vlgmr.msra.gmra.mxu1 %vm2031_vm6, %v3911_v25 }
  0xe5   : > { %2405 = vmatpush1.msra.mxu1 %v1682_v30  ;;  %843 = vrot.lane.b32.xlu1 %v4160_v0, %s3423_s21  ;;  %v4170_v3 = vpop.permute.xlu1 %301  ;;  %v300_v53 = vpop.permute.xlu0 %299 }
  0xe6   : > { %841 = vrot.lane.b32.xlu0 %v4164_v58, %s3423_s21  ;;  %2454 = vmatprep.mubr.f32.mxu1 %v5251_v5  ;;  %v4217_v29 = vsel %vm341_vm2, %v300_v53, %v4170_v3 }
  0xe7   : > { %v1583_v30 = vmul.f32 %v4211_v12, %v4217_v29 }
  0xe9   : > { %321 = vrot.lane.b32.xlu1 %v4134_v20, %s3424_s22  ;;  %v655_v33 = vpop.permute.xlu1 %654  ;;  %v653_v14 = vpop.permute.xlu0 %652 }
  0xea   : > { %319 = vrot.lane.b32.xlu0 %v4137_v34, %s3424_s22  ;;  %v4200_v59 = vsel %vm698_vm1, %v653_v14, %v655_v33  ;;  %v4204_v43 = vsel %vm698_vm1, %v4011_v26, %v653_v14  ;;  %v4221_v26 = vsel %vm341_vm2, %v298_v41, %v300_v53 }
  0xeb   : > { %2335 = vmatprep.subr.mxu0 %v4200_v59  ;;  %v1582_v41 = vmul.f32 %v4229_v46, %v4221_v26 }
  0xec   : > { %2336 = vmatpush1.msra.mxu0 %v4204_v43 }
  0xed   : > { %325 = vrot.lane.b32.xlu1 %v4160_v0, %s3424_s22  ;;  %v4225_v37 = vpop.permute.xlu1 %658  ;;  %2337 = vmatprep.subr.mxu0 %v1581_v54  ;;  %v657_v42 = vpop.permute.xlu0 %656 }
  0xee   : > { %323 = vrot.lane.b32.xlu0 %v4164_v58, %s3424_s22  ;;  %2338 = vmatpush1.msra.mxu0 %v1580_v24  ;;  %v4235_v7 = vsel %vm698_vm1, %v657_v42, %v4225_v37  ;;  %v4238_v61 = vsel %vm698_vm1, %v655_v33, %v657_v42 }
  0xef   : > { %2406 = vmatprep.subr.mxu1 %v4235_v7 }
  0xf0   : > { %2407 = vmatpush1.msra.mxu1 %v4238_v61 }
  0xf1   : > { %678 = vrot.lane.b32.xlu1 %v4134_v20, %s3425_s23  ;;  %v1398_v31 = vpop.permute.xlu1 %1397  ;;  %2408 = vmatprep.subr.mxu1 %v1583_v30  ;;  %v1396_v53 = vpop.permute.xlu0 %1395 }
  0xf2   : > { %676 = vrot.lane.b32.xlu0 %v4137_v34, %s3425_s23  ;;  %v1450_v33 = vsel %vm1441_vm3, %v4043_v15, %v1396_v53  ;;  %v1451_v14 = vsel %vm1441_vm3, %v1396_v53, %v1398_v31  ;;  %2409 = vmatpush1.msra.mxu1 %v1582_v41 }
  0xf3   : > { %v1514_v54 = vmul.f32 %v1450_v33, %v4091_v28  ;;  %v1515_v24 = vmul.f32 %v1451_v14, %v4085_v35 }
  0xf5   : > { %682 = vrot.lane.b32.xlu1 %v4160_v0, %s3425_s23  ;;  %v4257_v42 = vpop.permute.xlu1 %1401  ;;  %2339 = vmatprep.subr.mxu0 %v1515_v24  ;;  %v1400_v30 = vpop.permute.xlu0 %1399 }
  0xf6   : > { %680 = vrot.lane.b32.xlu0 %v4164_v58, %s3425_s23  ;;  %v1452_v5 = vsel %vm1441_vm3, %v1398_v31, %v1400_v30  ;;  %v1453_v15 = vsel %vm1441_vm3, %v1400_v30, %v4257_v42  ;;  %2340 = vmatpush1.msra.mxu0 %v1514_v54  ;;  %v1096_v30 = vmul.f32 %v4091_v28, %v3928_v36 }
  0xf7   : > { %v1516_v41 = vmul.f32 %v1452_v5, %v4141_v38  ;;  %v1517_v53 = vmul.f32 %v1453_v15, %v4120_v51  ;;  %2341 = vmatprep.subr.mxu0 %v3594_v11 }
  0xf8   : > { %2342 = vmatpush1.msra.mxu0 %v3549_v8 }
  0xf9   : > { %1421 = vrot.lane.b32.xlu1 %v4134_v20, %s3426_s24  ;;  %v1171_v33 = vpop.permute.xlu1 %1170  ;;  %2410 = vmatprep.subr.mxu1 %v1517_v53  ;;  %v1169_v14 = vpop.permute.xlu0 %1168 }
  0xfa   : > { %1419 = vrot.lane.b32.xlu0 %v4137_v34, %s3426_s24  ;;  %v1224_v31 = vsel %vm1216_vm4, %v4067_v2, %v1169_v14  ;;  %v1225_v5 = vsel %vm1216_vm4, %v1169_v14, %v1171_v33  ;;  %2411 = vmatpush1.msra.mxu1 %v1516_v41  ;;  %v1097_v2 = vmul.f32 %v4085_v35, %v4100_v49 }
  0xfb   : > { %v1289_v54 = vmul.f32 %v1224_v31, %v4195_v45  ;;  %v1290_v11 = vmul.f32 %v1225_v5, %v4182_v6  ;;  %2412 = vmatprep.subr.mxu1 %v3604_v13  ;;  %v4295_v41 = vrot.slane %v4076_v9, %v3834_v48  ;;  %v4314_v14 = vrot.slane %v4076_v9, %v3840_v1 }
  0xfc   : > { %2413 = vmatpush1.msra.mxu1 %v3591_v10  ;;  %v4352_v31 = vrot.slane %v4076_v9, %v3885_v52 }
  0xfd   : > { %1425 = vrot.lane.b32.xlu1 %v4160_v0, %s3426_s24  ;;  %v4281_v8 = vpop.permute.xlu1 %1174  ;;  %2343 = vmatprep.subr.mxu0 %v1290_v11  ;;  %v1173_v24 = vpop.permute.xlu0 %1172 }
  0xfe   : > { %1423 = vrot.lane.b32.xlu0 %v4164_v58, %s3426_s24  ;;  %v1226_v13 = vsel %vm1216_vm4, %v1171_v33, %v1173_v24  ;;  %v1227_v10 = vsel %vm1216_vm4, %v1173_v24, %v4281_v8  ;;  %2344 = vmatpush1.msra.mxu0 %v1289_v54  ;;  %v579_v33 = vmul.f32 %v4182_v6, %v4189_v50 }
  0xff   : > { %2345 = vmatprep.subr.mxu0 %v1097_v2  ;;  %v1292_v15 = vmul.f32 %v1227_v10, %v4211_v12  ;;  %v1291_v35 = vmul.f32 %v1226_v13, %v4229_v46  ;;  %v1098_v6 = vmul.f32 %v4141_v38, %v4103_v32  ;;  %v4345_v38 = vld [vmem:[%s3471_s20 + $0xd0] sm:$0xff]  ;;  %v581_v54 = vmul.f32 %v4211_v12, %v4221_v26  ;;  %v4374_v2 = vld [vmem:[%s3471_s20 + $0xd8] sm:$0xff] }
 0x100   : > { %2346 = vmatpush1.msra.mxu0 %v1096_v30  ;;  %v5255_v12 = vmov 0.0  }
 0x101   : > { %1194 = vrot.lane.b32.xlu1 %v4137_v34, %s3428_s25  ;;  %v824_v36 = vpop.permute.xlu1 %823  ;;  %2347 = vmatprep.subr.mxu0 %v4204_v43  ;;  %v822_v28 = vpop.permute.xlu0 %821 }
 0x102   : > { %1192 = vrot.lane.b32.xlu0 %v3949_v55, %s3428_s25  ;;  %2414 = vmatprep.subr.mxu1 %v1292_v15  ;;  %v4305_v49 = vsel %vm859_vm0, %v4124_v56, %v822_v28  ;;  %v4308_v53 = vsel %vm859_vm0, %v822_v28, %v824_v36  ;;  %v1099_v55 = vmul.f32 %v4120_v51, %v4127_v27 }
 0x103   : > { %v1685_v43 = vmul.f32 %v4295_v41, %v4308_v53  ;;  %2348 = vmatpush1.msra.mxu0 %v4019_v60  ;;  %v578_v56 = vmul.f32 %v4195_v45, %v4001_v22  ;;  %2415 = vmatpush1.msra.mxu1 %v1291_v35  ;;  %v1684_v50 = vmul.f32 %v4314_v14, %v4305_v49  ;;  %v4348_v45 = vld [vmem:[%s3471_s20 + $0xc8] sm:$0xff] }
 0x104   : > { %2349 = vmatprep.subr.mxu0 %v579_v33  ;;  %2416 = vmatprep.subr.mxu1 %v1099_v55  ;;  %v4333_v51 = vrot.slane %v4076_v9, %v3848_v21  ;;  %v580_v9 = vmul.f32 %v4229_v46, %v4185_v47  ;;  %v4387_v46 = vrot.slane %v4175_v17, %v3834_v48 }
 0x105   : > { %1198 = vrot.lane.b32.xlu1 %v4164_v58, %s3428_s25  ;;  %v4329_v60 = vpop.permute.xlu1 %827  ;;  %v826_v22 = vpop.permute.xlu0 %825  ;;  %2350 = vmatpush1.msra.mxu0 %v578_v56  ;;  %v4401_v35 = vrot.slane %v4175_v17, %v3840_v1  ;;  %v4416_v33 = vrot.slane %v4175_v17, %v3848_v21 }
 0x106   : > { %1196 = vrot.lane.b32.xlu0 %v4134_v20, %s3428_s25  ;;  %v4339_v32 = vsel %vm859_vm0, %v826_v22, %v4329_v60  ;;  %2417 = vmatpush1.msra.mxu1 %v1098_v6  ;;  %v4342_v27 = vsel %vm859_vm0, %v824_v36, %v826_v22  ;;  %v4435_v22 = vrot.slane %v4175_v17, %v3885_v52 }
 0x107   : > { %2475 = vmatprep.subr.mxu0 %v1685_v43  ;;  %2418 = vmatprep.subr.mxu1 %v4238_v61  ;;  %v1687_v5 = vmul.f32 %v4333_v51, %v4339_v32  ;;  %v1686_v61 = vmul.f32 %v4352_v31, %v4342_v27  ;;  %v3429_v43 = vmov 0  }
 0x108   : > { %3374 = vmatmul.mubr.msk.f32.vlgmr.msra.gmra.mxu0 %vm2031_vm6, %v3911_v25  ;;  %2419 = vmatpush1.msra.mxu1 %v4200_v59  ;;  %v4371_v59 = vld [vmem:[%s3471_s20 + $0xe0] sm:$0xff] }
 0x109   : > { %2476 = vmatpush1.msra.mxu0 %v1684_v50  ;;  %v306_v11 = vpop.permute.xlu1 %305  ;;  %v304_v24 = vpop.permute.xlu0 %303  ;;  %847 = vrot.lane.b32.xlu1 %v4345_v38, %s3423_s21 }
 0x10a   : > { %845 = vrot.lane.b32.xlu0 %v4348_v45, %s3423_s21  ;;  %2420 = vmatprep.subr.mxu1 %v581_v54  ;;  %v4391_v30 = vsel %vm341_vm2, %v304_v24, %v306_v11  ;;  %v4395_v10 = vsel %vm341_vm2, %v4170_v3, %v304_v24 }
 0x10b   : > { %2421 = vmatpush1.msra.mxu1 %v580_v9  ;;  %2525 = vmatprep.mubr.f32.mxu0 %v5255_v12  ;;  %v1585_v3 = vmul.f32 %v4387_v46, %v4391_v30  ;;  %v1584_v55 = vmul.f32 %v4401_v35, %v4395_v10 }
 0x10c   : > { %2546 = vmatprep.subr.mxu1 %v1687_v5  ;;  %3375 = vmatmul.mubr.msk.f32.vlgmr.msra.gmra.mxu1 %vm2031_vm6, %v3911_v25 }
 0x10d   : > { %v4379_v47 = vpop.permute.xlu1 %309  ;;  %v308_v26 = vpop.permute.xlu0 %307  ;;  %2547 = vmatpush1.msra.mxu1 %v1686_v61  ;;  %851 = vrot.lane.b32.xlu1 %v4371_v59, %s3423_s21 }
 0x10e   : > { %849 = vrot.lane.b32.xlu0 %v4374_v2, %s3423_s21  ;;  %2596 = vmatprep.mubr.f32.mxu1 %v5255_v12  ;;  %v4429_v6 = vsel %vm341_vm2, %v306_v11, %v308_v26 }
 0x10f   : > { %3408 = vset.pattern.permute.xlu0 %v3429_v43  ;;  %v1586_v17 = vmul.f32 %v4435_v22, %v4429_v6 }
 0x111   : > { %v663_v13 = vpop.permute.xlu1 %662  ;;  %329 = vrot.lane.b32.xlu1 %v4345_v38, %s3424_s22 }
 0x112   : > { %v661_v15 = vpop.permute.xlu0 %660  ;;  %327 = vrot.lane.b32.xlu0 %v4348_v45, %s3424_s22 }
 0x113   : > { %v4407_v36 = vsel %vm698_vm1, %v4225_v37, %v661_v15  ;;  %v4410_v28 = vsel %vm698_vm1, %v661_v15, %v663_v13  ;;  %v4423_v37 = vsel %vm341_vm2, %v308_v26, %v4379_v47 }
 0x114   : > { %2477 = vmatprep.subr.mxu0 %v4410_v28  ;;  %v1587_v11 = vmul.f32 %v4416_v33, %v4423_v37 }
 0x115   : > { %2478 = vmatpush1.msra.mxu0 %v4407_v36  ;;  %v4426_v56 = vpop.permute.xlu1 %666  ;;  %333 = vrot.lane.b32.xlu1 %v4371_v59, %s3424_s22 }
 0x116   : > { %2479 = vmatprep.subr.mxu0 %v1585_v3  ;;  %v665_v50 = vpop.permute.xlu0 %664  ;;  %331 = vrot.lane.b32.xlu0 %v4374_v2, %s3424_s22 }
 0x117   : > { %v4440_v5 = vsel %vm698_vm1, %v663_v13, %v665_v50  ;;  %2480 = vmatpush1.msra.mxu0 %v1584_v55  ;;  %v4444_v54 = vsel %vm698_vm1, %v665_v50, %v4426_v56 }
 0x118   : > { %2548 = vmatprep.subr.mxu1 %v4444_v54 }
 0x119   : > { %2549 = vmatpush1.msra.mxu1 %v4440_v5  ;;  %v1406_v24 = vpop.permute.xlu1 %1405  ;;  %686 = vrot.lane.b32.xlu1 %v4345_v38, %s3425_s23 }
 0x11a   : > { %2550 = vmatprep.subr.mxu1 %v1587_v11  ;;  %v1404_v9 = vpop.permute.xlu0 %1403  ;;  %684 = vrot.lane.b32.xlu0 %v4348_v45, %s3425_s23 }
 0x11b   : > { %v1454_v61 = vsel %vm1441_vm3, %v4257_v42, %v1404_v9  ;;  %v1455_v26 = vsel %vm1441_vm3, %v1404_v9, %v1406_v24  ;;  %2551 = vmatpush1.msra.mxu1 %v1586_v17  ;;  %v3409_v9 = vld [vmem:[%s3471_s20 + $0x60] sm:$0xff] }
 0x11c   : > { %v1518_v13 = vmul.f32 %v1454_v61, %v4314_v14  ;;  %v1519_v15 = vmul.f32 %v1455_v26, %v4295_v41 }
 0x11d   : > { %v4461_v3 = vpop.permute.xlu1 %1409  ;;  %690 = vrot.lane.b32.xlu1 %v4371_v59, %s3425_s23 }
 0x11e   : > { %2481 = vmatprep.subr.mxu0 %v1519_v15  ;;  %v1408_v43 = vpop.permute.xlu0 %1407  ;;  %688 = vrot.lane.b32.xlu0 %v4374_v2, %s3425_s23 }
 0x11f   : > { %v1456_v42 = vsel %vm1441_vm3, %v1406_v24, %v1408_v43  ;;  %v1457_v55 = vsel %vm1441_vm3, %v1408_v43, %v4461_v3  ;;  %2482 = vmatpush1.msra.mxu0 %v1518_v13  ;;  %v1101_v43 = vmul.f32 %v4295_v41, %v4305_v49 }
 0x120   : > { %v1520_v50 = vmul.f32 %v1456_v42, %v4352_v31  ;;  %v1521_v11 = vmul.f32 %v1457_v55, %v4333_v51  ;;  %2483 = vmatprep.subr.mxu0 %v3707_v40  ;;  %v1100_v42 = vmul.f32 %v4314_v14, %v4131_v63 }
 0x121   : > { %v1179_v17 = vpop.permute.xlu1 %1178  ;;  %2484 = vmatpush1.msra.mxu0 %v3409_v9  ;;  %1429 = vrot.lane.b32.xlu1 %v4345_v38, %s3426_s24 }
 0x122   : > { %2552 = vmatprep.subr.mxu1 %v1521_v11  ;;  %v1177_v61 = vpop.permute.xlu0 %1176  ;;  %1427 = vrot.lane.b32.xlu0 %v4348_v45, %s3426_s24 }
 0x123   : > { %v1228_v24 = vsel %vm1216_vm4, %v4281_v8, %v1177_v61  ;;  %v1229_v26 = vsel %vm1216_vm4, %v1177_v61, %v1179_v17  ;;  %2553 = vmatpush1.msra.mxu1 %v1520_v50  ;;  %v583_v50 = vmul.f32 %v4387_v46, %v4395_v10 }
 0x124   : > { %v1293_v13 = vmul.f32 %v1228_v24, %v4401_v35  ;;  %v1294_v40 = vmul.f32 %v1229_v26, %v4387_v46  ;;  %2554 = vmatprep.subr.mxu1 %v3717_v44  ;;  %v582_v46 = vmul.f32 %v4401_v35, %v4217_v29  ;;  %v4556_v35 = vld [vmem:[%s3471_s20 + $0xf0] sm:$0xff]  ;;  %v4564_v24 = vld [vmem:[%s3471_s20 + $0xe8] sm:$0xff]  ;;  %v585_v26 = vmul.f32 %v4416_v33, %v4429_v6  ;;  %v4582_v6 = vld [vmem:[%s3471_s20 + $0xf8] sm:$0xff] }
 0x125   : > { %v4484_v15 = vpop.permute.xlu1 %1182  ;;  %2555 = vmatpush1.msra.mxu1 %v3704_v39  ;;  %1433 = vrot.lane.b32.xlu1 %v4371_v59, %s3426_s24  ;;  %v4501_v39 = vld [vmem:[%s5247_s1 + $0x21] ss:$2 sm:$0xff] }
 0x126   : > { %2485 = vmatprep.subr.mxu0 %v1294_v40  ;;  %v1181_v8 = vpop.permute.xlu0 %1180  ;;  %1431 = vrot.lane.b32.xlu0 %v4374_v2, %s3426_s24  ;;  %v4507_v63 = vrot.slane %v4501_v39, %v3641_v18  ;;  %v4542_v29 = vrot.slane %v4501_v39, %v3633_v16 }
 0x127   : > { %v1230_v44 = vsel %vm1216_vm4, %v1179_v17, %v1181_v8  ;;  %v1231_v55 = vsel %vm1216_vm4, %v1181_v8, %v4484_v15  ;;  %2486 = vmatpush1.msra.mxu0 %v1293_v13  ;;  %v1103_v17 = vmul.f32 %v4333_v51, %v4342_v27 }
 0x128   : > { %v1295_v41 = vmul.f32 %v1230_v44, %v4435_v22  ;;  %v1296_v49 = vmul.f32 %v1231_v55, %v4416_v33  ;;  %2487 = vmatprep.subr.mxu0 %v1101_v43  ;;  %v584_v43 = vmul.f32 %v4435_v22, %v4391_v30  ;;  %v4593_v22 = vld [vmem:[%s5247_s1 + $0x20] ss:$2 sm:$0xff] }
 0x129   : > { %2488 = vmatpush1.msra.mxu0 %v1100_v42  ;;  %1202 = vrot.lane.b32.xlu1 %v4348_v45, %s3428_s25 }
 0x12a   : > { %v832_v14 = vpop.permute.xlu1 %831  ;;  %2489 = vmatprep.subr.mxu0 %v4407_v36  ;;  %1200 = vrot.lane.b32.xlu0 %v4160_v0, %s3428_s25  ;;  %v4530_v0 = vrot.slane %v4501_v39, %v3655_v23  ;;  %v4560_v36 = vrot.slane %v4501_v39, %v3644_v19 }
 0x12b   : > { %2556 = vmatprep.subr.mxu1 %v1296_v49  ;;  %v830_v11 = vpop.permute.xlu0 %829  ;;  %2490 = vmatpush1.msra.mxu0 %v4235_v7 }
 0x12c   : > { %v4520_v9 = vsel %vm859_vm0, %v4329_v60, %v830_v11  ;;  %v4523_v61 = vsel %vm859_vm0, %v830_v11, %v832_v14  ;;  %2557 = vmatpush1.msra.mxu1 %v1295_v41  ;;  %2491 = vmatprep.subr.mxu0 %v583_v50  ;;  %v1102_v60 = vmul.f32 %v4352_v31, %v4308_v53 }
 0x12d   : > { %v1689_v51 = vmul.f32 %v4507_v63, %v4523_v61  ;;  %1206 = vrot.lane.b32.xlu1 %v4374_v2, %s3428_s25  ;;  %2558 = vmatprep.subr.mxu1 %v1103_v17  ;;  %v1688_v27 = vmul.f32 %v4530_v0, %v4520_v9  ;;  %v4614_v41 = vrot.slane %v4593_v22, %v3655_v23 }
 0x12e   : > { %v4538_v7 = vpop.permute.xlu1 %835  ;;  %1204 = vrot.lane.b32.xlu0 %v4345_v38, %s3428_s25  ;;  %2492 = vmatpush1.msra.mxu0 %v582_v46  ;;  %v4629_v50 = vrot.slane %v4593_v22, %v3633_v16 }
 0x12f   : > { %v834_v10 = vpop.permute.xlu0 %833  ;;  %2559 = vmatpush1.msra.mxu1 %v1102_v60  ;;  %2617 = vmatprep.subr.mxu0 %v1689_v51  ;;  %v4648_v60 = vrot.slane %v4593_v22, %v3644_v19 }
 0x130   : > { %v4549_v53 = vsel %vm859_vm0, %v832_v14, %v834_v10  ;;  %v4553_v31 = vsel %vm859_vm0, %v834_v10, %v4538_v7  ;;  %2560 = vmatprep.subr.mxu1 %v4440_v5  ;;  %3376 = vmatmul.mubr.msk.f32.vlgmr.msra.gmra.mxu0 %vm2031_vm6, %v3911_v25 }
 0x131   : > { %v1691_v13 = vmul.f32 %v4542_v29, %v4553_v31  ;;  %2561 = vmatpush1.msra.mxu1 %v4410_v28  ;;  %v1690_v5 = vmul.f32 %v4560_v36, %v4549_v53  ;;  %2618 = vmatpush1.msra.mxu0 %v1688_v27 }
 0x132   : > { %v314_v40 = vpop.permute.xlu1 %313  ;;  %855 = vrot.lane.b32.xlu1 %v4556_v35, %s3423_s21  ;;  %853 = vrot.lane.b32.xlu0 %v4564_v24, %s3423_s21 }
 0x133   : > { %v312_v33 = vpop.permute.xlu0 %311  ;;  %2562 = vmatprep.subr.mxu1 %v585_v26  ;;  %2667 = vmatprep.mubr.f32.mxu0 %v5255_v12 }
 0x134   : > { %2563 = vmatpush1.msra.mxu1 %v584_v43  ;;  %v4604_v8 = vsel %vm341_vm2, %v312_v33, %v314_v40  ;;  %v4608_v44 = vsel %vm341_vm2, %v4379_v47, %v312_v33 }
 0x135   : > { %2688 = vmatprep.subr.mxu1 %v1691_v13  ;;  %3377 = vmatmul.mubr.msk.f32.vlgmr.msra.gmra.mxu1 %vm2031_vm6, %v3911_v25  ;;  %v4600_v25 = vrot.slane %v4593_v22, %v3641_v18  ;;  %v1588_v11 = vmul.f32 %v4614_v41, %v4608_v44 }
 0x136   : > { %v4586_v30 = vpop.permute.xlu1 %317  ;;  %2689 = vmatpush1.msra.mxu1 %v1690_v5  ;;  %335 = vrot.lane.b32.xlu1 %v4564_v24, %s3424_s22 }
 0x137   : > { %v316_v28 = vpop.permute.xlu0 %315  ;;  %857 = vrot.lane.b32.xlu0 %v4582_v6, %s3423_s21  ;;  %2738 = vmatprep.mubr.f32.mxu1 %v5255_v12  ;;  %v1589_v47 = vmul.f32 %v4600_v25, %v4604_v8 }
 0x138   : > { %v4636_v17 = vsel %vm341_vm2, %v316_v28, %v4586_v30  ;;  %v4642_v46 = vsel %vm341_vm2, %v314_v40, %v316_v28 }
 0x139   : > { %v1591_v26 = vmul.f32 %v4629_v50, %v4636_v17  ;;  %v1590_v13 = vmul.f32 %v4648_v60, %v4642_v46 }
 0x13a   : > { %v671_v42 = vpop.permute.xlu1 %670  ;;  %339 = vrot.lane.b32.xlu1 %v4582_v6, %s3424_s22 }
 0x13b   : > { %v669_v55 = vpop.permute.xlu0 %668  ;;  %337 = vrot.lane.b32.xlu0 %v4556_v35, %s3424_s22 }
 0x13c   : > { %v4620_v49 = vsel %vm698_vm1, %v4426_v56, %v669_v55  ;;  %v4623_v14 = vsel %vm698_vm1, %v669_v55, %v671_v42 }
 0x13d   : > { %2619 = vmatprep.subr.mxu0 %v4623_v14 }
 0x13e   : > { %2620 = vmatpush1.msra.mxu0 %v4620_v49  ;;  %v4639_v56 = vpop.permute.xlu1 %674  ;;  %694 = vrot.lane.b32.xlu1 %v4556_v35, %s3425_s23 }
 0x13f   : > { %2621 = vmatprep.subr.mxu0 %v1589_v47  ;;  %v673_v51 = vpop.permute.xlu0 %672  ;;  %692 = vrot.lane.b32.xlu0 %v4564_v24, %s3425_s23 }
 0x140   : > { %v4653_v27 = vsel %vm698_vm1, %v671_v42, %v673_v51  ;;  %2622 = vmatpush1.msra.mxu0 %v1588_v11  ;;  %v4657_v10 = vsel %vm698_vm1, %v673_v51, %v4639_v56 }
 0x141   : > { %2690 = vmatprep.subr.mxu1 %v4657_v10 }
 0x142   : > { %2691 = vmatpush1.msra.mxu1 %v4653_v27  ;;  %v1414_v40 = vpop.permute.xlu1 %1413  ;;  %1435 = vrot.lane.b32.xlu1 %v4564_v24, %s3426_s24 }
 0x143   : > { %2692 = vmatprep.subr.mxu1 %v1591_v26  ;;  %v1412_v43 = vpop.permute.xlu0 %1411  ;;  %696 = vrot.lane.b32.xlu0 %v4582_v6, %s3425_s23 }
 0x144   : > { %v1458_v5 = vsel %vm1441_vm3, %v4461_v3, %v1412_v43  ;;  %v1459_v33 = vsel %vm1441_vm3, %v1412_v43, %v1414_v40  ;;  %2693 = vmatpush1.msra.mxu1 %v1590_v13  ;;  %v3410_v43 = vld [vmem:[%s3471_s20 + $0x80] sm:$0xff] }
 0x145   : > { %v1522_v28 = vmul.f32 %v1458_v5, %v4530_v0  ;;  %v1523_v42 = vmul.f32 %v1459_v33, %v4507_v63 }
 0x146   : > { %v4674_v55 = vpop.permute.xlu1 %1417  ;;  %1439 = vrot.lane.b32.xlu1 %v4582_v6, %s3426_s24 }
 0x147   : > { %2623 = vmatprep.subr.mxu0 %v1523_v42  ;;  %v1416_v47 = vpop.permute.xlu0 %1415  ;;  %1437 = vrot.lane.b32.xlu0 %v4556_v35, %s3426_s24 }
 0x148   : > { %v1460_v3 = vsel %vm1441_vm3, %v1414_v40, %v1416_v47  ;;  %v1461_v11 = vsel %vm1441_vm3, %v1416_v47, %v4674_v55  ;;  %2624 = vmatpush1.msra.mxu0 %v1522_v28  ;;  %v1105_v47 = vmul.f32 %v4507_v63, %v4520_v9  ;;  %v4715_v9 = vrot.slane %v4501_v39, %v3834_v48 }
 0x149   : > { %v1524_v51 = vmul.f32 %v1460_v3, %v4560_v36  ;;  %v1525_v26 = vmul.f32 %v1461_v11, %v4542_v29  ;;  %2625 = vmatprep.subr.mxu0 %v3931_v4  ;;  %v587_v11 = vmul.f32 %v4600_v25, %v4608_v44 }
 0x14a   : > { %v1187_v13 = vpop.permute.xlu1 %1186  ;;  %2626 = vmatpush1.msra.mxu0 %v3410_v43  ;;  %1210 = vrot.lane.b32.xlu1 %v4564_v24, %s3428_s25 }
 0x14b   : > { %2694 = vmatprep.subr.mxu1 %v1525_v26  ;;  %v1185_v5 = vpop.permute.xlu0 %1184  ;;  %1208 = vrot.lane.b32.xlu0 %v4371_v59, %s3428_s25 }
 0x14c   : > { %v1232_v40 = vsel %vm1216_vm4, %v4484_v15, %v1185_v5  ;;  %v1233_v33 = vsel %vm1216_vm4, %v1185_v5, %v1187_v13  ;;  %2695 = vmatpush1.msra.mxu1 %v1524_v51  ;;  %v1104_v15 = vmul.f32 %v4530_v0, %v4339_v32  ;;  %v586_v32 = vmul.f32 %v4614_v41, %v4423_v37 }
 0x14d   : > { %v1297_v28 = vmul.f32 %v1232_v40, %v4614_v41  ;;  %v1298_v4 = vmul.f32 %v1233_v33, %v4600_v25  ;;  %2696 = vmatprep.subr.mxu1 %v3952_v57  ;;  %v4721_v0 = vrot.slane %v4501_v39, %v3840_v1  ;;  %v1106_v25 = vmul.f32 %v4560_v36, %v4523_v61  ;;  %v4758_v36 = vld [vmem:[%s5248_s2] sm:$0xff] }
 0x14e   : > { %v4697_v42 = vpop.permute.xlu1 %1190  ;;  %2697 = vmatpush1.msra.mxu1 %v3916_v62  ;;  %1214 = vrot.lane.b32.xlu1 %v4582_v6, %s3428_s25  ;;  %v4752_v61 = vrot.slane %v4501_v39, %v3885_v52  ;;  %v4787_v33 = vrot.slane %v4593_v22, %v3834_v48 }
 0x14f   : > { %2627 = vmatprep.subr.mxu0 %v1298_v4  ;;  %v1189_v59 = vpop.permute.xlu0 %1188  ;;  %1212 = vrot.lane.b32.xlu0 %v4556_v35, %s3428_s25 }
 0x150   : > { %v1234_v57 = vsel %vm1216_vm4, %v1187_v13, %v1189_v59  ;;  %v1235_v3 = vsel %vm1216_vm4, %v1189_v59, %v4697_v42  ;;  %2628 = vmatpush1.msra.mxu0 %v1297_v28  ;;  %v1107_v13 = vmul.f32 %v4542_v29, %v4549_v53 }
 0x151   : > { %v1299_v62 = vmul.f32 %v1234_v57, %v4648_v60  ;;  %v1300_v63 = vmul.f32 %v1235_v3, %v4629_v50  ;;  %2629 = vmatprep.subr.mxu0 %v1105_v47 }
 0x152   : > { %2630 = vmatpush1.msra.mxu0 %v1104_v15  ;;  %v4798_v15 = vrot.slane %v4593_v22, %v3840_v1 }
 0x153   : > { %v840_v51 = vpop.permute.xlu1 %839  ;;  %2631 = vmatprep.subr.mxu0 %v4620_v49  ;;  %2698 = vmatprep.subr.mxu1 %v1300_v63  ;;  %v838_v26 = vpop.permute.xlu0 %837  ;;  %v588_v49 = vmul.f32 %v4648_v60, %v4604_v8  ;;  %v2025_v8 = vld [vmem:[%s5249_s3] sm:$0xff]  ;;  %v4811_v63 = vrot.slane %v4593_v22, %v3848_v21 }
 0x154   : > { %v4730_v43 = vsel %vm859_vm0, %v4538_v7, %v838_v26  ;;  %v4733_v37 = vsel %vm859_vm0, %v838_v26, %v840_v51  ;;  %2632 = vmatpush1.msra.mxu0 %v4444_v54  ;;  %2699 = vmatpush1.msra.mxu1 %v1299_v62  ;;  %v4744_v7 = vrot.slane %v4501_v39, %v3848_v21 }
 0x155   : > { %v1692_v44 = vmul.f32 %v4721_v0, %v4730_v43  ;;  %v1693_v41 = vmul.f32 %v4715_v9, %v4733_v37  ;;  %2633 = vmatprep.subr.mxu0 %v587_v11  ;;  %2700 = vmatprep.subr.mxu1 %v1107_v13  ;;  %v589_v54 = vmul.f32 %v4629_v50, %v4642_v46 }
 0x156   : > { %2634 = vmatpush1.msra.mxu0 %v586_v32  ;;  %2701 = vmatpush1.msra.mxu1 %v1106_v25  ;;  %v4828_v26 = vrot.slane %v4593_v22, %v3885_v52 }
 0x157   : > { %v4746_v29 = vpop.permute.xlu1 %843  ;;  %2759 = vmatprep.subr.mxu0 %v1693_v41  ;;  %2702 = vmatprep.subr.mxu1 %v4653_v27 }
 0x158   : > { %v842_v53 = vpop.permute.xlu0 %841  ;;  %3378 = vmatmul.mubr.msk.f32.vlgmr.msra.gmra.mxu0 %vm2031_vm6, %v4758_v36  ;;  %2703 = vmatpush1.msra.mxu1 %v4623_v14 }
 0x159   : > { %v4765_v50 = vsel %vm859_vm0, %v840_v51, %v842_v53  ;;  %v4769_v39 = vsel %vm859_vm0, %v842_v53, %v4746_v29  ;;  %2760 = vmatpush1.msra.mxu0 %v1692_v44  ;;  %2704 = vmatprep.subr.mxu1 %v589_v54 }
 0x15a   : > { %v1694_v46 = vmul.f32 %v4752_v61, %v4765_v50  ;;  %v1695_v27 = vmul.f32 %v4744_v7, %v4769_v39  ;;  %2705 = vmatpush1.msra.mxu1 %v588_v49  ;;  %2809 = vmatprep.mubr.f32.mxu0 %v5255_v12 }
 0x15b   : > { %v322_v5 = vpop.permute.xlu1 %321  ;;  %3379 = vmatmul.mubr.msk.f32.vlgmr.msra.gmra.mxu1 %vm2031_vm6, %v4758_v36  ;;  %2028 = vperm.xlu0 %3408, %v2025_v8  }
 0x15c   : > { %2830 = vmatprep.subr.mxu1 %v1695_v27  ;;  %v320_v60 = vpop.permute.xlu0 %319  ;;  %2880 = vmatprep.mubr.f32.mxu1 %v5255_v12 }
 0x15d   : > { %2831 = vmatpush1.msra.mxu1 %v1694_v46  ;;  %v4790_v28 = vsel %vm341_vm2, %v320_v60, %v322_v5  ;;  %v4794_v47 = vsel %vm341_vm2, %v4586_v30, %v320_v60 }
 0x15e   : > { %v1593_v62 = vmul.f32 %v4787_v33, %v4790_v28  ;;  %v1592_v30 = vmul.f32 %v4798_v15, %v4794_v47 }
 0x15f   : > { %v4783_v14 = vpop.permute.xlu1 %325 }
 0x160   : > { %v324_v40 = vpop.permute.xlu0 %323 }
 0x161   : > { %v4818_v32 = vsel %vm341_vm2, %v324_v40, %v4783_v14  ;;  %v4824_v11 = vsel %vm341_vm2, %v322_v5, %v324_v40 }
 0x162   : > { %v1595_v44 = vmul.f32 %v4811_v63, %v4818_v32  ;;  %v1594_v41 = vmul.f32 %v4828_v26, %v4824_v11 }
 0x163   : > { %v679_v4 = vpop.permute.xlu1 %678 }
 0x164   : > { %v677_v59 = vpop.permute.xlu0 %676 }
 0x165   : > { %v4802_v57 = vsel %vm698_vm1, %v4639_v56, %v677_v59  ;;  %v4805_v3 = vsel %vm698_vm1, %v677_v59, %v679_v4 }
 0x166   : > { %2761 = vmatprep.subr.mxu0 %v4805_v3 }
 0x167   : > { %2762 = vmatpush1.msra.mxu0 %v4802_v57  ;;  %v4821_v56 = vpop.permute.xlu1 %682 }
 0x168   : > { %2763 = vmatprep.subr.mxu0 %v1593_v62  ;;  %v681_v51 = vpop.permute.xlu0 %680  ;;  %v3412_v62 = vld [vmem:[%s3471_s20 + $0xa0] sm:$0xff] }
 0x169   : > { %v4831_v13 = vsel %vm698_vm1, %v679_v4, %v681_v51  ;;  %2764 = vmatpush1.msra.mxu0 %v1592_v30  ;;  %v4835_v25 = vsel %vm698_vm1, %v681_v51, %v4821_v56 }
 0x16a   : > { %2832 = vmatprep.subr.mxu1 %v4835_v25 }
 0x16b   : > { %2833 = vmatpush1.msra.mxu1 %v4831_v13  ;;  %v1422_v22 = vpop.permute.xlu1 %1421 }
 0x16c   : > { %2834 = vmatprep.subr.mxu1 %v1595_v44  ;;  %v1420_v54 = vpop.permute.xlu0 %1419 }
 0x16d   : > { %v1462_v53 = vsel %vm1441_vm3, %v4674_v55, %v1420_v54  ;;  %v1463_v49 = vsel %vm1441_vm3, %v1420_v54, %v1422_v22  ;;  %2835 = vmatpush1.msra.mxu1 %v1594_v41 }
 0x16e   : > { %v1526_v46 = vmul.f32 %v1462_v53, %v4721_v0  ;;  %v1527_v27 = vmul.f32 %v1463_v49, %v4715_v9  ;;  %v4873_v49 = vld [vmem:[%s5247_s1 + $0x31] ss:$2 sm:$0xff] }
 0x16f   : > { %v4848_v5 = vpop.permute.xlu1 %1425 }
 0x170   : > { %2765 = vmatprep.subr.mxu0 %v1527_v27  ;;  %v1424_v8 = vpop.permute.xlu0 %1423  ;;  %v591_v27 = vmul.f32 %v4787_v33, %v4794_v47 }
 0x171   : > { %v1464_v60 = vsel %vm1441_vm3, %v1422_v22, %v1424_v8  ;;  %v1465_v40 = vsel %vm1441_vm3, %v1424_v8, %v4848_v5  ;;  %2766 = vmatpush1.msra.mxu0 %v1526_v46 }
 0x172   : > { %v1528_v4 = vmul.f32 %v1464_v60, %v4752_v61  ;;  %v1529_v55 = vmul.f32 %v1465_v40, %v4744_v7  ;;  %2767 = vmatprep.subr.mxu0 %v4137_v34  ;;  %v1109_v34 = vmul.f32 %v4715_v9, %v4730_v43  ;;  %v4882_v43 = vrot.slane %v4873_v49, %v3641_v18 }
 0x173   : > { %v1195_v59 = vpop.permute.xlu1 %1194  ;;  %2768 = vmatpush1.msra.mxu0 %v3412_v62  ;;  %v1111_v40 = vmul.f32 %v4744_v7, %v4765_v50  ;;  %v4911_v7 = vrot.slane %v4873_v49, %v3633_v16  ;;  %v592_v50 = vmul.f32 %v4828_v26, %v4790_v28 }
 0x174   : > { %2836 = vmatprep.subr.mxu1 %v1529_v55  ;;  %v1193_v30 = vpop.permute.xlu0 %1192 }
 0x175   : > { %v1236_v51 = vsel %vm1216_vm4, %v4697_v42, %v1193_v30  ;;  %v1237_v44 = vsel %vm1216_vm4, %v1193_v30, %v1195_v59  ;;  %2837 = vmatpush1.msra.mxu1 %v1528_v4  ;;  %v1108_v42 = vmul.f32 %v4721_v0, %v4553_v31  ;;  %v590_v31 = vmul.f32 %v4798_v15, %v4636_v17 }
 0x176   : > { %v1301_v41 = vmul.f32 %v1236_v51, %v4798_v15  ;;  %v1302_v22 = vmul.f32 %v1237_v44, %v4787_v33  ;;  %2838 = vmatprep.subr.mxu1 %v4164_v58  ;;  %v4888_v0 = vrot.slane %v4873_v49, %v3655_v23  ;;  %v1110_v33 = vmul.f32 %v4752_v61, %v4733_v37 }
 0x177   : > { %v4863_v54 = vpop.permute.xlu1 %1198  ;;  %2839 = vmatpush1.msra.mxu1 %v4134_v20  ;;  %v4919_v37 = vrot.slane %v4873_v49, %v3644_v19 }
 0x178   : > { %2769 = vmatprep.subr.mxu0 %v1302_v22  ;;  %v1197_v53 = vpop.permute.xlu0 %1196 }
 0x179   : > { %v1238_v46 = vsel %vm1216_vm4, %v1195_v59, %v1197_v53  ;;  %v1239_v58 = vsel %vm1216_vm4, %v1197_v53, %v4863_v54  ;;  %2770 = vmatpush1.msra.mxu0 %v1301_v41  ;;  %v4947_v59 = vld [vmem:[%s5247_s1 + $0x30] ss:$2 sm:$0xff] }
 0x17a   : > { %v1303_v20 = vmul.f32 %v1238_v46, %v4828_v26  ;;  %v1304_v9 = vmul.f32 %v1239_v58, %v4811_v63  ;;  %2771 = vmatprep.subr.mxu0 %v1109_v34  ;;  %v4951_v62 = vrot.slane %v4947_v59, %v3641_v18  ;;  %v4962_v22 = vrot.slane %v4947_v59, %v3655_v23 }
 0x17b   : > { %2772 = vmatpush1.msra.mxu0 %v1108_v42  ;;  %v848_v8 = vpop.permute.xlu1 %847  ;;  %v4975_v42 = vrot.slane %v4947_v59, %v3633_v16  ;;  %v4992_v16 = vrot.slane %v4947_v59, %v3644_v19 }
 0x17c   : > { %2773 = vmatprep.subr.mxu0 %v4802_v57  ;;  %2840 = vmatprep.subr.mxu1 %v1304_v9  ;;  %v846_v60 = vpop.permute.xlu0 %845 }
 0x17d   : > { %v4897_v4 = vsel %vm859_vm0, %v4746_v29, %v846_v60  ;;  %v4900_v17 = vsel %vm859_vm0, %v846_v60, %v848_v8  ;;  %2774 = vmatpush1.msra.mxu0 %v4657_v10  ;;  %2841 = vmatpush1.msra.mxu1 %v1303_v20  ;;  %v593_v10 = vmul.f32 %v4811_v63, %v4824_v11 }
 0x17e   : > { %v1696_v47 = vmul.f32 %v4888_v0, %v4897_v4  ;;  %v1697_v15 = vmul.f32 %v4882_v43, %v4900_v17  ;;  %2775 = vmatprep.subr.mxu0 %v591_v27  ;;  %2842 = vmatprep.subr.mxu1 %v1111_v40 }
 0x17f   : > { %2776 = vmatpush1.msra.mxu0 %v590_v31  ;;  %2843 = vmatpush1.msra.mxu1 %v1110_v33  ;;  %v4913_v29 = vpop.permute.xlu1 %851 }
 0x180   : > { %2901 = vmatprep.subr.mxu0 %v1697_v15  ;;  %2844 = vmatprep.subr.mxu1 %v4831_v13  ;;  %v850_v61 = vpop.permute.xlu0 %849 }
 0x181   : > { %3380 = vmatmul.mubr.msk.f32.vlgmr.msra.gmra.mxu0 %vm2031_vm6, %v4758_v36  ;;  %v4927_v57 = vsel %vm859_vm0, %v848_v8, %v850_v61  ;;  %v4931_v55 = vsel %vm859_vm0, %v850_v61, %v4913_v29  ;;  %2845 = vmatpush1.msra.mxu1 %v4805_v3 }
 0x182   : > { %2902 = vmatpush1.msra.mxu0 %v1696_v47  ;;  %v1698_v63 = vmul.f32 %v4919_v37, %v4927_v57  ;;  %v1699_v11 = vmul.f32 %v4911_v7, %v4931_v55  ;;  %2846 = vmatprep.subr.mxu1 %v593_v10 }
 0x183   : > { %2847 = vmatpush1.msra.mxu1 %v592_v50  ;;  %v330_v13 = vpop.permute.xlu1 %329  ;;  %2951 = vmatprep.mubr.f32.mxu0 %v5255_v12 }
 0x184   : > { %2972 = vmatprep.subr.mxu1 %v1699_v11  ;;  %v328_v28 = vpop.permute.xlu0 %327  ;;  %3381 = vmatmul.mubr.msk.f32.vlgmr.msra.gmra.mxu1 %vm2031_vm6, %v4758_v36 }
 0x185   : > { %2973 = vmatpush1.msra.mxu1 %v1698_v63  ;;  %3022 = vmatprep.mubr.f32.mxu1 %v5255_v12  ;;  %v4954_v30 = vsel %vm341_vm2, %v328_v28, %v330_v13  ;;  %v4958_v44 = vsel %vm341_vm2, %v4783_v14, %v328_v28 }
 0x186   : > { %v1597_v53 = vmul.f32 %v4951_v62, %v4954_v30  ;;  %v1596_v23 = vmul.f32 %v4962_v22, %v4958_v44 }
 0x187   : > { %v4942_v3 = vpop.permute.xlu1 %333 }
 0x188   : > { %v332_v26 = vpop.permute.xlu0 %331 }
 0x189   : > { %v4982_v14 = vsel %vm341_vm2, %v332_v26, %v4942_v3  ;;  %v4988_v46 = vsel %vm341_vm2, %v330_v13, %v332_v26  ;;  %v3413_v13 = vld [vmem:[%s3471_s20 + $0xc0] sm:$0xff] }
 0x18a   : > { %v1599_v31 = vmul.f32 %v4975_v42, %v4982_v14  ;;  %v1598_v27 = vmul.f32 %v4992_v16, %v4988_v46 }
 0x18b   : > { %v687_v51 = vpop.permute.xlu1 %686 }
 0x18c   : > { %v685_v41 = vpop.permute.xlu0 %684 }
 0x18d   : > { %v4966_v34 = vsel %vm698_vm1, %v4821_v56, %v685_v41  ;;  %v4969_v18 = vsel %vm698_vm1, %v685_v41, %v687_v51 }
 0x18e   : > { %2903 = vmatprep.subr.mxu0 %v4969_v18 }
 0x18f   : > { %2904 = vmatpush1.msra.mxu0 %v4966_v34  ;;  %v4985_v56 = vpop.permute.xlu1 %690 }
 0x190   : > { %2905 = vmatprep.subr.mxu0 %v1597_v53  ;;  %v689_v58 = vpop.permute.xlu0 %688 }
 0x191   : > { %v4995_v20 = vsel %vm698_vm1, %v687_v51, %v689_v58  ;;  %2906 = vmatpush1.msra.mxu0 %v1596_v23  ;;  %v4999_v9 = vsel %vm698_vm1, %v689_v58, %v4985_v56 }
 0x192   : > { %2974 = vmatprep.subr.mxu1 %v4999_v9 }
 0x193   : > { %2975 = vmatpush1.msra.mxu1 %v4995_v20  ;;  %v1430_v19 = vpop.permute.xlu1 %1429 }
 0x194   : > { %2976 = vmatprep.subr.mxu1 %v1599_v31  ;;  %v1428_v8 = vpop.permute.xlu0 %1427 }
 0x195   : > { %v1466_v60 = vsel %vm1441_vm3, %v4848_v5, %v1428_v8  ;;  %v1467_v40 = vsel %vm1441_vm3, %v1428_v8, %v1430_v19  ;;  %2977 = vmatpush1.msra.mxu1 %v1598_v27  ;;  %v5052_v8 = vrot.slane %v4873_v49, %v3840_v1 }
 0x196   : > { %v1530_v33 = vmul.f32 %v1466_v60, %v4888_v0  ;;  %v1531_v47 = vmul.f32 %v1467_v40, %v4882_v43 }
 0x197   : > { %v5012_v15 = vpop.permute.xlu1 %1433 }
 0x198   : > { %2907 = vmatprep.subr.mxu0 %v1531_v47  ;;  %v1432_v10 = vpop.permute.xlu0 %1431 }
 0x199   : > { %v1468_v61 = vsel %vm1441_vm3, %v1430_v19, %v1432_v10  ;;  %v1469_v50 = vsel %vm1441_vm3, %v1432_v10, %v5012_v15  ;;  %2908 = vmatpush1.msra.mxu0 %v1530_v33 }
 0x19a   : > { %v1532_v63 = vmul.f32 %v1468_v61, %v4919_v37  ;;  %v1533_v5 = vmul.f32 %v1469_v50, %v4911_v7  ;;  %2909 = vmatprep.subr.mxu0 %v4348_v45  ;;  %v1113_v45 = vmul.f32 %v4882_v43, %v4897_v4  ;;  %v1115_v43 = vmul.f32 %v4911_v7, %v4927_v57 }
 0x19b   : > { %v1203_v11 = vpop.permute.xlu1 %1202  ;;  %2910 = vmatpush1.msra.mxu0 %v3413_v13  ;;  %v594_v4 = vmul.f32 %v4962_v22, %v4818_v32  ;;  %v1114_v7 = vmul.f32 %v4919_v37, %v4900_v17  ;;  %v5078_v37 = vrot.slane %v4873_v49, %v3885_v52  ;;  %v5104_v61 = vrot.slane %v4947_v59, %v3840_v1 }
 0x19c   : > { %2978 = vmatprep.subr.mxu1 %v1533_v5  ;;  %v1201_v28 = vpop.permute.xlu0 %1200  ;;  %v5108_v50 = vrot.slane %v4947_v59, %v3848_v21 }
 0x19d   : > { %v1240_v26 = vsel %vm1216_vm4, %v4863_v54, %v1201_v28  ;;  %v1241_v51 = vsel %vm1216_vm4, %v1201_v28, %v1203_v11  ;;  %2979 = vmatpush1.msra.mxu1 %v1532_v63  ;;  %v1112_v54 = vmul.f32 %v4888_v0, %v4769_v39  ;;  %v595_v39 = vmul.f32 %v4951_v62, %v4958_v44 }
 0x19e   : > { %v1305_v41 = vmul.f32 %v1240_v26, %v4962_v22  ;;  %v1306_v53 = vmul.f32 %v1241_v51, %v4951_v62  ;;  %2980 = vmatprep.subr.mxu1 %v4374_v2 }
 0x19f   : > { %v5027_v23 = vpop.permute.xlu1 %1206  ;;  %2981 = vmatpush1.msra.mxu1 %v4345_v38  ;;  %v5041_v38 = vrot.slane %v4873_v49, %v3834_v48 }
 0x1a0   : > { %2911 = vmatprep.subr.mxu0 %v1306_v53  ;;  %v1205_v58 = vpop.permute.xlu0 %1204 }
 0x1a1   : > { %v1242_v31 = vsel %vm1216_vm4, %v1203_v11, %v1205_v58  ;;  %v1243_v27 = vsel %vm1216_vm4, %v1205_v58, %v5027_v23  ;;  %2912 = vmatpush1.msra.mxu0 %v1305_v41 }
 0x1a2   : > { %v1307_v2 = vmul.f32 %v1242_v31, %v4992_v16  ;;  %v1308_v19 = vmul.f32 %v1243_v27, %v4975_v42  ;;  %2913 = vmatprep.subr.mxu0 %v1113_v45 }
 0x1a3   : > { %2914 = vmatpush1.msra.mxu0 %v1112_v54 }
 0x1a4   : > { %v856_v0 = vpop.permute.xlu1 %855  ;;  %2915 = vmatprep.subr.mxu0 %v4966_v34  ;;  %2982 = vmatprep.subr.mxu1 %v1308_v19  ;;  %v854_v60 = vpop.permute.xlu0 %853  ;;  %v596_v34 = vmul.f32 %v4992_v16, %v4954_v30 }
 0x1a5   : > { %2916 = vmatpush1.msra.mxu0 %v4835_v25  ;;  %2983 = vmatpush1.msra.mxu1 %v1307_v2  ;;  %v5059_v57 = vsel %vm859_vm0, %v4913_v29, %v854_v60  ;;  %v5062_v62 = vsel %vm859_vm0, %v854_v60, %v856_v0  ;;  %v5070_v25 = vrot.slane %v4873_v49, %v3848_v21 }
 0x1a6   : > { %2917 = vmatprep.subr.mxu0 %v595_v39  ;;  %2984 = vmatprep.subr.mxu1 %v1115_v43  ;;  %v1700_v32 = vmul.f32 %v5052_v8, %v5059_v57  ;;  %v1701_v44 = vmul.f32 %v5041_v38, %v5062_v62  ;;  %v597_v29 = vmul.f32 %v4975_v42, %v4988_v46 }
 0x1a7   : > { %2918 = vmatpush1.msra.mxu0 %v594_v4  ;;  %2985 = vmatpush1.msra.mxu1 %v1114_v7  ;;  %v3414_v4 = vld [vmem:[%s3471_s20 + $0xe0] sm:$0xff]  ;;  %v1117_v7 = vmul.f32 %v5041_v38, %v5059_v57 }
 0x1a8   : > { %v336_v17 = vpop.permute.xlu1 %335  ;;  %3382 = vmatmul.mubr.msk.f32.vlgmr.msra.gmra.mxu0 %vm2031_vm6, %v4758_v36  ;;  %2986 = vmatprep.subr.mxu1 %v4995_v20  ;;  %v529_v20 = vrot.slane %v4947_v59, %v3834_v48 }
 0x1a9   : > { %3043 = vmatprep.subr.mxu0 %v1701_v44  ;;  %v858_v22 = vpop.permute.xlu0 %857  ;;  %2987 = vmatpush1.msra.mxu1 %v4969_v18  ;;  %v370_v47 = vsel %vm341_vm2, %v4942_v3, %v336_v17  ;;  %v5118_v3 = vrot.slane %v4947_v59, %v3885_v52 }
 0x1aa   : > { %v5084_v40 = vsel %vm859_vm0, %v856_v0, %v858_v22  ;;  %v1671_v33 = vsel %vm859_vm0, %v858_v22, 0.0  ;;  %3044 = vmatpush1.msra.mxu0 %v1700_v32  ;;  %2988 = vmatprep.subr.mxu1 %v597_v29  ;;  %v1600_v1 = vmul.f32 %v5104_v61, %v370_v47  ;;  %v1116_v32 = vmul.f32 %v5052_v8, %v4931_v55 }
 0x1ab   : > { %v1702_v42 = vmul.f32 %v5078_v37, %v5084_v40  ;;  %v1703_v49 = vmul.f32 %v1671_v33, %v5070_v25  ;;  %3093 = vmatprep.mubr.f32.mxu0 %v5255_v12  ;;  %2989 = vmatpush1.msra.mxu1 %v596_v34  ;;  %v598_v55 = vmul.f32 %v5104_v61, %v4982_v14  ;;  %v2101_v14 = vpop.f32.mrf.mxu0 }
 0x1ac   : > { %v340_v46 = vpop.permute.xlu1 %339  ;;  %3383 = vmatmul.mubr.msk.f32.vlgmr.msra.gmra.mxu1 %vm2031_vm6, %v4758_v36 }
 0x1ad   : > { %3114 = vmatprep.subr.mxu1 %v1703_v49  ;;  %v338_v30 = vpop.permute.xlu0 %337  ;;  %3164 = vmatprep.mubr.f32.mxu1 %v5255_v12  ;;  %v1571_v48 = vsel %vm341_vm2, %v340_v46, 0.0 }
 0x1ae   : > { %3115 = vmatpush1.msra.mxu1 %v1702_v42  ;;  %v5096_v18 = vsel %vm341_vm2, %v336_v17, %v338_v30  ;;  %v372_v21 = vsel %vm341_vm2, %v338_v30, %v340_v46  ;;  %v1603_v13 = vmul.f32 %v1571_v48, %v5108_v50  ;;  %v599_v17 = vmul.f32 %v529_v20, %v370_v47 }
 0x1af   : > { %v1601_v5 = vmul.f32 %v529_v20, %v5096_v18  ;;  %v1602_v52 = vmul.f32 %v5118_v3, %v372_v21  ;;  %v601_v57 = vmul.f32 %v5108_v50, %v372_v21 }
 0x1b0   : > { %v695_v16 = vpop.permute.xlu1 %694 }
 0x1b1   : > { %v693_v10 = vpop.permute.xlu0 %692 }
 0x1b2   : > { %v727_v12 = vsel %vm698_vm1, %v4985_v56, %v693_v10  ;;  %v5113_v63 = vsel %vm698_vm1, %v693_v10, %v695_v16 }
 0x1b3   : > { %3045 = vmatprep.subr.mxu0 %v5113_v63 }
 0x1b4   : > { %3046 = vmatpush1.msra.mxu0 %v727_v12  ;;  %v1436_v11 = vpop.permute.xlu1 %1435 }
 0x1b5   : > { %3047 = vmatprep.subr.mxu0 %v1601_v5  ;;  %v697_v56 = vpop.permute.xlu0 %696  ;;  %v1470_v26 = vsel %vm1441_vm3, %v5012_v15, %v1436_v11 }
 0x1b6   : > { %v729_v28 = vsel %vm698_vm1, %v695_v16, %v697_v56  ;;  %3048 = vmatpush1.msra.mxu0 %v1600_v1  ;;  %3392 = vmatprep.subr.msk.mxu1 %vm698_vm1, %v697_v56  ;;  %v1534_v27 = vmul.f32 %v1470_v26, %v5052_v8  ;;  %v1118_v8 = vmul.f32 %v5078_v37, %v5062_v62  ;;  %v2103_v62 = vpop.f32.mrf.mxu0 }
 0x1b7   : > { %3117 = vmatpush1.msra.mxu1 %v729_v28 }
 0x1b8   : > { %3118 = vmatprep.subr.mxu1 %v1603_v13  ;;  %v1440_v59 = vpop.permute.xlu1 %1439 }
 0x1b9   : > { %v1505_v51 = vsel %vm1441_vm3, %v1440_v59, 0.0  ;;  %3119 = vmatpush1.msra.mxu1 %v1602_v52  ;;  %v1438_v41 = vpop.permute.xlu0 %1437 }
 0x1ba   : > { %v1537_v53 = vmul.f32 %v1505_v51, %v5070_v25  ;;  %v1471_v45 = vsel %vm1441_vm3, %v1436_v11, %v1438_v41  ;;  %v1472_v58 = vsel %vm1441_vm3, %v1438_v41, %v1440_v59 }
 0x1bb   : > { %v1535_v54 = vmul.f32 %v1471_v45, %v5041_v38  ;;  %v1536_v31 = vmul.f32 %v1472_v58, %v5078_v37  ;;  %v1119_v38 = vmul.f32 %v5070_v25, %v5084_v40  ;;  %v600_v25 = vmul.f32 %v5118_v3, %v5096_v18  ;;  %v2243_v37 = vpop.f32.mrf.mxu0 }
 0x1bc   : > { %v1211_v2 = vpop.permute.xlu1 %1210  ;;  %3120 = vmatprep.subr.mxu1 %v1537_v53 }
 0x1bd   : > { %3049 = vmatprep.subr.mxu0 %v1535_v54  ;;  %v1209_v15 = vpop.permute.xlu0 %1208  ;;  %3121 = vmatpush1.msra.mxu1 %v1536_v31  ;;  %v2245_v34 = vpop.f32.mrf.mxu0 }
 0x1be   : > { %v1244_v19 = vsel %vm1216_vm4, %v5027_v23, %v1209_v15  ;;  %v1245_v43 = vsel %vm1216_vm4, %v1209_v15, %v1211_v2  ;;  %3050 = vmatpush1.msra.mxu0 %v1534_v27  ;;  %3122 = vmatprep.subr.mxu1 %v4582_v6 }
 0x1bf   : > { %v1309_v39 = vmul.f32 %v1244_v19, %v5104_v61  ;;  %v1310_v0 = vmul.f32 %v1245_v43, %v529_v20  ;;  %3051 = vmatprep.subr.mxu0 %v4564_v24  ;;  %3123 = vmatpush1.msra.mxu1 %v4556_v35 }
 0x1c0   : > { %3052 = vmatpush1.msra.mxu0 %v3414_v4  ;;  %v1215_v60 = vpop.permute.xlu1 %1214 }
 0x1c1   : > { %3053 = vmatprep.subr.mxu0 %v1310_v0  ;;  %v1213_v23 = vpop.permute.xlu0 %1212 }
 0x1c2   : > { %v1246_v6 = vsel %vm1216_vm4, %v1211_v2, %v1213_v23  ;;  %v1247_v44 = vsel %vm1216_vm4, %v1213_v23, %v1215_v60  ;;  %3054 = vmatpush1.msra.mxu0 %v1309_v39 }
 0x1c3   : > { %v1311_v24 = vmul.f32 %v1246_v6, %v5118_v3  ;;  %v1312_v35 = vmul.f32 %v1247_v44, %v5108_v50  ;;  %3055 = vmatprep.subr.mxu0 %v1117_v7 }
 0x1c4   : > { %3056 = vmatpush1.msra.mxu0 %v1116_v32 }
 0x1c5   : > { %3057 = vmatprep.subr.mxu0 %v727_v12  ;;  %3124 = vmatprep.subr.mxu1 %v1312_v35 }
 0x1c6   : > { %3058 = vmatpush1.msra.mxu0 %v4999_v9  ;;  %3125 = vmatpush1.msra.mxu1 %v1311_v24  ;;  %v2172_v9 = vpop.f32.mrf.mxu1 }
 0x1c7   : > { %3059 = vmatprep.subr.mxu0 %v599_v17  ;;  %3126 = vmatprep.subr.mxu1 %v1119_v38 }
 0x1c8   : > { %3060 = vmatpush1.msra.mxu0 %v598_v55  ;;  %3127 = vmatpush1.msra.mxu1 %v1118_v8  ;;  %v2174_v29 = vpop.f32.mrf.mxu1  ;;  %v2385_v47 = vpop.f32.mrf.mxu0 }
 0x1c9   : > { %3384 = vmatmul.mubr.msk.f32.vlgmr.msra.gmra.mxu0 %vm2031_vm6, %v4758_v36  ;;  %3128 = vmatprep.subr.mxu1 %v729_v28 }
 0x1ca   : > { %3129 = vmatpush1.msra.mxu1 %v5113_v63  ;;  %v2314_v22 = vpop.f32.mrf.mxu1  ;;  %v2387_v56 = vpop.f32.mrf.mxu0 }
 0x1cb   : > { %3130 = vmatprep.subr.mxu1 %v601_v57 }
 0x1cc   : > { %3131 = vmatpush1.msra.mxu1 %v600_v25  ;;  %v2316_v40 = vpop.f32.mrf.mxu1 }
 0x1cd   : > { %3385 = vmatmul.mubr.msk.f32.vlgmr.msra.gmra.mxu1 %vm2031_vm6, %v4758_v36 }
 0x1ce   : > { %v2456_v10 = vpop.f32.mrf.mxu1 }
 0x1d0   : > { %v2458_v59 = vpop.f32.mrf.mxu1 }
 0x1d6   : > { %v5168_v33 = vpop.permute.xlu0 %2028 }
 0x1d7   : > { %v2102_v42 = vadd.f32 %v2101_v14, %v5168_v33  ;;  %v2104_v49 = vadd.f32 %v2103_v62, %v5168_v33  ;;  %v2173_v46 = vadd.f32 %v2172_v9, %v5168_v33  ;;  %v2175_v30 = vadd.f32 %v2174_v29, %v5168_v33 }
 0x1d8   : > { %v2244_v36 = vadd.f32 %v2243_v37, %v5168_v33  ;;  %v2315_v18 = vadd.f32 %v2314_v22, %v5168_v33  ;;  %v2246_v16 = vadd.f32 %v2245_v34, %v5168_v33  ;;  %v2317_v20 = vadd.f32 %v2316_v40, %v5168_v33 }
 0x1d9   : > { %vm3171_vm7 = vcmp.gt.f32.partialorder %v2102_v42, 0.0  ;;  %vm3172_vm8 = vcmp.gt.f32.partialorder %v2104_v49, 0.0  ;;  %vm3173_vm9 = vcmp.gt.f32.partialorder %v2173_v46, 0.0  ;;  %vm3174_vm10 = vcmp.gt.f32.partialorder %v2175_v30, 0.0 }
 0x1da   : > { %v3203_v61 = vmul.f32 0.2, %v2102_v42  ;;  %v3204_v50 = vmul.f32 0.2, %v2104_v49  ;;  %v3205_v12 = vmul.f32 0.2, %v2173_v46  ;;  %v2386_v63 = vadd.f32 %v2385_v47, %v5168_v33 }
 0x1db   : > { %v3206_v48 = vmul.f32 0.2, %v2175_v30  ;;  %vm3175_vm11 = vcmp.gt.f32.partialorder %v2244_v36, 0.0  ;;  %v3207_v3 = vmul.f32 0.2, %v2244_v36  ;;  %vm3177_vm12 = vcmp.gt.f32.partialorder %v2315_v18, 0.0 }
 0x1dc   : > { %v3235_v5 = vsel %vm3171_vm7, %v2102_v42, %v3203_v61  ;;  %v3236_v1 = vsel %vm3172_vm8, %v2104_v49, %v3204_v50  ;;  %v3237_v21 = vsel %vm3173_vm9, %v2173_v46, %v3205_v12  ;;  %v3209_v11 = vmul.f32 0.2, %v2315_v18 }
 0x1dd   : > { %v3238_v13 = vsel %vm3174_vm10, %v2175_v30, %v3206_v48  ;;  %3267 = vst [vmem:[%s5183_s27] sm:$0xff] %v3235_v5  ;;  %3268 = vst [vmem:[%s5183_s27 + $0x8] sm:$0xff] %v3236_v1  ;;  %v3239_v28 = vsel %vm3175_vm11, %v2244_v36, %v3207_v3  ;;  %vm3176_vm13 = vcmp.gt.f32.partialorder %v2246_v16, 0.0  ;;  %v3208_v52 = vmul.f32 0.2, %v2246_v16 }
 0x1de   : > { %3269 = vst [vmem:[%s5183_s27 + $0x10] sm:$0xff] %v3237_v21  ;;  %3270 = vst [vmem:[%s5183_s27 + $0x18] sm:$0xff] %v3238_v13  ;;  %v3241_v26 = vsel %vm3177_vm12, %v2315_v18, %v3209_v11  ;;  %vm3178_vm14 = vcmp.gt.f32.partialorder %v2317_v20, 0.0  ;;  %v3210_v51 = vmul.f32 0.2, %v2317_v20  ;;  %vm3179_vm15 = vcmp.gt.f32.partialorder %v2386_v63, 0.0 }
 0x1df   : > { %3271 = vst [vmem:[%s5183_s27 + $0x20] sm:$0xff] %v3239_v28  ;;  %3273 = vst [vmem:[%s5183_s27 + $0x30] sm:$0xff] %v3241_v26  ;;  %v3240_v41 = vsel %vm3176_vm13, %v2246_v16, %v3208_v52  ;;  %v3211_v53 = vmul.f32 0.2, %v2386_v63  ;;  %v2457_v45 = vadd.f32 %v2456_v10, %v5168_v33  ;;  %v2388_v58 = vadd.f32 %v2387_v56, %v5168_v33 }
 0x1e0   : > { %3272 = vst [vmem:[%s5183_s27 + $0x28] sm:$0xff] %v3240_v41  ;;  %v3242_v54 = vsel %vm3178_vm14, %v2317_v20, %v3210_v51  ;;  %v2459_v31 = vadd.f32 %v2458_v59, %v5168_v33 }
 0x1e1   : > { %3274 = vst [vmem:[%s5183_s27 + $0x38] sm:$0xff] %v3242_v54  ;;  %v3243_v27 = vsel %vm3179_vm15, %v2386_v63, %v3211_v53  ;;  %vm3181_vm0 = vcmp.gt.f32.partialorder %v2457_v45, 0.0  ;;  %v3213_v2 = vmul.f32 0.2, %v2457_v45  ;;  %vm3180_vm1 = vcmp.gt.f32.partialorder %v2388_v58, 0.0 }
 0x1e2   : > { %3275 = vst [vmem:[%s5183_s27 + $0x40] sm:$0xff] %v3243_v27  ;;  %v3212_v15 = vmul.f32 0.2, %v2388_v58  ;;  %vm3182_vm2 = vcmp.gt.f32.partialorder %v2459_v31, 0.0  ;;  %v3214_v19 = vmul.f32 0.2, %v2459_v31 }
 0x1e3   : > { %v3245_v43 = vsel %vm3181_vm0, %v2457_v45, %v3213_v2 }
 0x1e4   : > { %3277 = vst [vmem:[%s5183_s27 + $0x50] sm:$0xff] %v3245_v43  ;;  %v3244_v39 = vsel %vm3180_vm1, %v2388_v58, %v3212_v15  ;;  %v3246_v0 = vsel %vm3182_vm2, %v2459_v31, %v3214_v19 }
 0x1e5   : > { %3276 = vst [vmem:[%s5183_s27 + $0x48] sm:$0xff] %v3244_v39  ;;  %3278 = vst [vmem:[%s5183_s27 + $0x58] sm:$0xff] %v3246_v0 }
 0x1f0   : > { %v2527_v4 = vpop.f32.mrf.mxu0 }
 0x1f1   : > { %v2528_v60 = vadd.f32 %v2527_v4, %v5168_v33 }
 0x1f2   : > { %v2529_v7 = vpop.f32.mrf.mxu0 }
 0x1f3   : > { %vm3183_vm3 = vcmp.gt.f32.partialorder %v2528_v60, 0.0  ;;  %v3215_v23 = vmul.f32 0.2, %v2528_v60  ;;  %v2530_v32 = vadd.f32 %v2529_v7, %v5168_v33 }
 0x1f5   : > { %v2598_v6 = vpop.f32.mrf.mxu1  ;;  %v3247_v44 = vsel %vm3183_vm3, %v2528_v60, %v3215_v23  ;;  %vm3184_vm4 = vcmp.gt.f32.partialorder %v2530_v32, 0.0  ;;  %v3216_v35 = vmul.f32 0.2, %v2530_v32 }
 0x1f6   : > { %v2599_v24 = vadd.f32 %v2598_v6, %v5168_v33  ;;  %3279 = vst [vmem:[%s5183_s27 + $0x60] sm:$0xff] %v3247_v44 }
 0x1f7   : > { %v2600_v17 = vpop.f32.mrf.mxu1  ;;  %v3248_v55 = vsel %vm3184_vm4, %v2530_v32, %v3216_v35 }
 0x1f8   : > { %vm3185_vm5 = vcmp.gt.f32.partialorder %v2599_v24, 0.0  ;;  %v3217_v38 = vmul.f32 0.2, %v2599_v24  ;;  %v2601_v8 = vadd.f32 %v2600_v17, %v5168_v33  ;;  %3280 = vst [vmem:[%s5183_s27 + $0x68] sm:$0xff] %v3248_v55 }
 0x1fa   : > { %v3249_v57 = vsel %vm3185_vm5, %v2599_v24, %v3217_v38  ;;  %vm3186_vm6 = vcmp.gt.f32.partialorder %v2601_v8, 0.0  ;;  %v3218_v25 = vmul.f32 0.2, %v2601_v8 }
 0x1fb   : > { %3281 = vst [vmem:[%s5183_s27 + $0x70] sm:$0xff] %v3249_v57 }
 0x1fc   : > { %v3250_v14 = vsel %vm3186_vm6, %v2601_v8, %v3218_v25 }
 0x1fd   : > { %3282 = vst [vmem:[%s5183_s27 + $0x78] sm:$0xff] %v3250_v14 }
 0x218   : > { %v2669_v9 = vpop.f32.mrf.mxu0 }
 0x219   : > { %v2670_v62 = vadd.f32 %v2669_v9, %v5168_v33 }
 0x21a   : > { %v2671_v29 = vpop.f32.mrf.mxu0 }
 0x21b   : > { %vm3187_vm7 = vcmp.gt.f32.partialorder %v2670_v62, 0.0  ;;  %v3219_v37 = vmul.f32 0.2, %v2670_v62  ;;  %v2672_v22 = vadd.f32 %v2671_v29, %v5168_v33  ;;  %v2740_v34 = vpop.f32.mrf.mxu1 }
 0x21c   : > { %v2741_v42 = vadd.f32 %v2740_v34, %v5168_v33 }
 0x21d   : > { %v3251_v40 = vsel %vm3187_vm7, %v2670_v62, %v3219_v37  ;;  %vm3188_vm8 = vcmp.gt.f32.partialorder %v2672_v22, 0.0  ;;  %v3220_v49 = vmul.f32 0.2, %v2672_v22  ;;  %v2742_v46 = vpop.f32.mrf.mxu1 }
 0x21e   : > { %3283 = vst [vmem:[%s5183_s27 + $0x80] sm:$0xff] %v3251_v40  ;;  %vm3189_vm9 = vcmp.gt.f32.partialorder %v2741_v42, 0.0  ;;  %v3221_v30 = vmul.f32 0.2, %v2741_v42  ;;  %v2743_v18 = vadd.f32 %v2742_v46, %v5168_v33 }
 0x21f   : > { %v3252_v36 = vsel %vm3188_vm8, %v2672_v22, %v3220_v49 }
 0x220   : > { %3284 = vst [vmem:[%s5183_s27 + $0x88] sm:$0xff] %v3252_v36  ;;  %v3253_v16 = vsel %vm3189_vm9, %v2741_v42, %v3221_v30  ;;  %vm3190_vm10 = vcmp.gt.f32.partialorder %v2743_v18, 0.0  ;;  %v3222_v20 = vmul.f32 0.2, %v2743_v18 }
 0x221   : > { %3285 = vst [vmem:[%s5183_s27 + $0x90] sm:$0xff] %v3253_v16 }
 0x222   : > { %v3254_v47 = vsel %vm3190_vm10, %v2743_v18, %v3222_v20 }
 0x223   : > { %3286 = vst [vmem:[%s5183_s27 + $0x98] sm:$0xff] %v3254_v47 }
 0x241   : > { %v2811_v10 = vpop.f32.mrf.mxu0 }
 0x242   : > { %v2812_v61 = vadd.f32 %v2811_v10, %v5168_v33 }
 0x243   : > { %v2813_v50 = vpop.f32.mrf.mxu0 }
 0x244   : > { %vm3191_vm11 = vcmp.gt.f32.partialorder %v2812_v61, 0.0  ;;  %v3223_v12 = vmul.f32 0.2, %v2812_v61  ;;  %v2814_v63 = vadd.f32 %v2813_v50, %v5168_v33  ;;  %v2882_v48 = vpop.f32.mrf.mxu1 }
 0x245   : > { %v2883_v5 = vadd.f32 %v2882_v48, %v5168_v33 }
 0x246   : > { %v3255_v3 = vsel %vm3191_vm11, %v2812_v61, %v3223_v12  ;;  %vm3192_vm12 = vcmp.gt.f32.partialorder %v2814_v63, 0.0  ;;  %v3224_v1 = vmul.f32 0.2, %v2814_v63  ;;  %v2884_v21 = vpop.f32.mrf.mxu1 }
 0x247   : > { %3287 = vst [vmem:[%s5183_s27 + $0xa0] sm:$0xff] %v3255_v3  ;;  %vm3193_vm13 = vcmp.gt.f32.partialorder %v2883_v5, 0.0  ;;  %v3225_v11 = vmul.f32 0.2, %v2883_v5  ;;  %v2885_v13 = vadd.f32 %v2884_v21, %v5168_v33 }
 0x248   : > { %v3256_v56 = vsel %vm3192_vm12, %v2814_v63, %v3224_v1 }
 0x249   : > { %3288 = vst [vmem:[%s5183_s27 + $0xa8] sm:$0xff] %v3256_v56  ;;  %v3257_v28 = vsel %vm3193_vm13, %v2883_v5, %v3225_v11  ;;  %vm3194_vm14 = vcmp.gt.f32.partialorder %v2885_v13, 0.0  ;;  %v3226_v52 = vmul.f32 0.2, %v2885_v13 }
 0x24a   : > { %3289 = vst [vmem:[%s5183_s27 + $0xb0] sm:$0xff] %v3257_v28 }
 0x24b   : > { %v3258_v59 = vsel %vm3194_vm14, %v2885_v13, %v3226_v52 }
 0x24c   : > { %3290 = vst [vmem:[%s5183_s27 + $0xb8] sm:$0xff] %v3258_v59 }
 0x268   : > { %v2953_v26 = vpop.f32.mrf.mxu0 }
 0x269   : > { %v2954_v51 = vadd.f32 %v2953_v26, %v5168_v33 }
 0x26a   : > { %v2955_v41 = vpop.f32.mrf.mxu0 }
 0x26b   : > { %vm3195_vm15 = vcmp.gt.f32.partialorder %v2954_v51, 0.0  ;;  %v3227_v53 = vmul.f32 0.2, %v2954_v51  ;;  %v2956_v45 = vadd.f32 %v2955_v41, %v5168_v33 }
 0x26c   : > { %v3024_v54 = vpop.f32.mrf.mxu1 }
 0x26d   : > { %v3259_v58 = vsel %vm3195_vm15, %v2954_v51, %v3227_v53  ;;  %vm3196_vm0 = vcmp.gt.f32.partialorder %v2956_v45, 0.0  ;;  %v3228_v31 = vmul.f32 0.2, %v2956_v45  ;;  %v3025_v27 = vadd.f32 %v3024_v54, %v5168_v33 }
 0x26e   : > { %3291 = vst [vmem:[%s5183_s27 + $0xc0] sm:$0xff] %v3259_v58  ;;  %v3026_v15 = vpop.f32.mrf.mxu1 }
 0x26f   : > { %v3260_v2 = vsel %vm3196_vm0, %v2956_v45, %v3228_v31  ;;  %vm3197_vm1 = vcmp.gt.f32.partialorder %v3025_v27, 0.0  ;;  %v3229_v19 = vmul.f32 0.2, %v3025_v27  ;;  %v3027_v43 = vadd.f32 %v3026_v15, %v5168_v33 }
 0x270   : > { %3292 = vst [vmem:[%s5183_s27 + $0xc8] sm:$0xff] %v3260_v2 }
 0x271   : > { %v3261_v39 = vsel %vm3197_vm1, %v3025_v27, %v3229_v19  ;;  %vm3198_vm2 = vcmp.gt.f32.partialorder %v3027_v43, 0.0  ;;  %v3230_v0 = vmul.f32 0.2, %v3027_v43 }
 0x272   : > { %3293 = vst [vmem:[%s5183_s27 + $0xd0] sm:$0xff] %v3261_v39 }
 0x273   : > { %v3262_v4 = vsel %vm3198_vm2, %v3027_v43, %v3230_v0 }
 0x274   : > { %3294 = vst [vmem:[%s5183_s27 + $0xd8] sm:$0xff] %v3262_v4 }
 0x289   : > { %v3095_v60 = vpop.f32.mrf.mxu0 }
 0x28a   : > { %v3096_v7 = vadd.f32 %v3095_v60, %v5168_v33 }
 0x28b   : > { %v3097_v23 = vpop.f32.mrf.mxu0 }
 0x28c   : > { %vm3199_vm3 = vcmp.gt.f32.partialorder %v3096_v7, 0.0  ;;  %v3231_v32 = vmul.f32 0.2, %v3096_v7  ;;  %v3098_v6 = vadd.f32 %v3097_v23, %v5168_v33 }
 0x28d   : > { %v3166_v44 = vpop.f32.mrf.mxu1 }
 0x28e   : > { %v3263_v24 = vsel %vm3199_vm3, %v3096_v7, %v3231_v32  ;;  %vm3200_vm4 = vcmp.gt.f32.partialorder %v3098_v6, 0.0  ;;  %v3232_v35 = vmul.f32 0.2, %v3098_v6  ;;  %v3167_v17 = vadd.f32 %v3166_v44, %v5168_v33 }
 0x28f   : > { %3295 = vst [vmem:[%s5183_s27 + $0xe0] sm:$0xff] %v3263_v24  ;;  %v3168_v38 = vpop.f32.mrf.mxu1 }
 0x290   : > { %v3264_v55 = vsel %vm3200_vm4, %v3098_v6, %v3232_v35  ;;  %vm3201_vm5 = vcmp.gt.f32.partialorder %v3167_v17, 0.0  ;;  %v3233_v8 = vmul.f32 0.2, %v3167_v17  ;;  %v3169_v57 = vadd.f32 %v3168_v38, %v5168_v33 }
 0x291   : > { %3296 = vst [vmem:[%s5183_s27 + $0xe8] sm:$0xff] %v3264_v55 }
 0x292   : > { %v3265_v25 = vsel %vm3201_vm5, %v3167_v17, %v3233_v8  ;;  %vm3202_vm6 = vcmp.gt.f32.partialorder %v3169_v57, 0.0  ;;  %v3234_v14 = vmul.f32 0.2, %v3169_v57 }
 0x293   : > { %3297 = vst [vmem:[%s5183_s27 + $0xf0] sm:$0xff] %v3265_v25 }
 0x294   : > { %v3266_v9 = vsel %vm3202_vm6, %v3169_v57, %v3234_v14 }
 0x295   : > { %3298 = vst [vmem:[%s5183_s27 + $0xf8] sm:$0xff] %v3266_v9 }
 0x296 PF: > { %s14_s15 = sadd.s32 1, %s3421_s15  }
 0x297   : > { %p11_p4 = scmp.ge.s32.totalorder %s14_s15, 4  }
 0x299   :  { %13 = sbr.rel (!%p11_p4) target bundleno = 1 (0x1), region = 73 }

// kernel: rrdbnet_forward.23
= control target key start
LH: loop header
LB: loop body
LE: loop exit
PB: predicated region body
PF: predicated region fallthrough
CT: control target
= control target key end

     0   :  { %s3407_s15 = smov 0   ;;  %s5181_s0 = inlined_call_operand.vmem [shape: f32[2,8,4096], index: 0, kind: input, shape index: {}]   ;;  %s5182_s1 = inlined_call_operand.vmem [shape: f32[2,4096], index: 1, kind: input, shape index: {}]   ;;  %s5183_s2 = inlined_call_operand.vmem [shape: f32[4,72], index: 2, kind: input, shape index: {}]   ;;  %s5184_s3 = inlined_call_operand.vmem [shape: f32[4,1], index: 3, kind: input, shape index: {}]   ;;  %s5185_s4 = inlined_call_operand.vmem [shape: f32[2,4,4096], index: 4, kind: output, shape index: {}]  }
   0x1 LB: > { %s3306_s16 = sadd.s32 4294967295, %s3373_s15   ;;  %p3310_p0 = scmp.ge.s32.totalorder %s3373_s15, 1  ;;  %s3373_s15 = sphi %s3407_s15, %s14_s15  }
   0x2   : > { %p162_p1 = scmp.lt.s32.totalorder %s3373_s15, 3 }
   0x4   : > { %p163_p2 = pnand %p3310_p0, %p162_p1 }
   0x5   : > { %p188_p3 = scmp.lt.s32.totalorder (!%p163_p2), %s3306_s16, 1  ;;  %s3375_s21 = smov (!%p163_p2), 63  }
   0x6   : > { %166 = sbr.rel (%p163_p2) target bundleno = 661 (0x295), region = 36  ;;  %s3376_s22 = smov (!%p163_p2), 65  }
   0x7   : > { %s3377_s23 = smov (!%p163_p2), 64   ;;  %s3378_s24 = smov (!%p163_p2), 127  }
   0x8   : > { %s3380_s25 = smov (!%p163_p2), 1  }
   0xb   : > { %s5192_s16 = smov (!%p188_p3, %s3306_s16), 1  ;;  %v5186_v5 = vmov 0.0   ;;  %v410_v14 = vlaneseq  ;;  %v3588_v17 = vld [vmem:[%s5182_s1 + $0x1] ss:$2 sm:$0xff]  ;;  %vm859_vm0 = vcmask 515072   ;;  %vm698_vm1 = vcmask 523264  }
   0xc   : > { %s3340_s17 = sshll.u32 %s5192_s16, 8  ;;  %2099 = vmatprep.mubr.f32.mxu0 %v5186_v5  ;;  %2170 = vmatprep.mubr.f32.mxu1 %v5186_v5  ;;  %v3678_v49 = vld [vmem:[%s5182_s1] ss:$2 sm:$0xff]  ;;  %vm341_vm2 = vcmask 531456   ;;  %vm1441_vm3 = vcmask 1039360   ;;  %vm1216_vm4 = vcmask 7168   ;;  %vm3808_vm5 = vmneg %vm698_vm1 }
   0xd   : > { %s3421_s20 = scalar_lea.vmem %s5181_s0, %s3340_s17  ;;  %v3576_v15 = vshrl.u32 %v410_v14, 7  ;;  %vm2031_vm6 = vcmask 588800  }
   0xe   : > { %v3424_v0 = vld [vmem:[%s3421_s20 + $0x18] sm:$0xff]  ;;  %v3427_v1 = vld [vmem:[%s3421_s20 + $0x8] sm:$0xff]  ;;  %v3434_v2 = vld [vmem:[%s3421_s20 + $0x20] sm:$0xff] }
   0xf   : > { %801 = vrot.lane.b32.xlu1 %v3424_v0, %s3375_s21  ;;  %797 = vrot.lane.b32.xlu0 %v3427_v1, %s3375_s21  ;;  %v3437_v3 = vld [vmem:[%s3421_s20 + $0x10] sm:$0xff]  ;;  %v3444_v4 = vld [vmem:[%s3421_s20] sm:$0xff]  ;;  %v3583_v16 = vsub.s32 3, %v3576_v15  ;;  %v3591_v18 = vsub.s32 1, %v3576_v15  ;;  %v3594_v19 = vsub.s32 2, %v3576_v15  ;;  %v3605_v23 = vsub.s32 0, %v3576_v15 }
  0x10   : > { %v3489_v6 = vld [vmem:[%s3421_s20 + $0x30] sm:$0xff]  ;;  %v3492_v7 = vld [vmem:[%s3421_s20 + $0x28] sm:$0xff]  ;;  %v3499_v8 = vld [vmem:[%s3421_s20 + $0x40] sm:$0xff] }
  0x11   : > { %v3502_v9 = vld [vmem:[%s3421_s20 + $0x38] sm:$0xff]  ;;  %v3541_v10 = vld [vmem:[%s3421_s20 + $0x50] sm:$0xff]  ;;  %v3544_v11 = vld [vmem:[%s3421_s20 + $0x48] sm:$0xff]  ;;  %v3602_v22 = vrot.slane %v3588_v17, %v3583_v16  ;;  %v3609_v24 = vrot.slane %v3588_v17, %v3591_v18  ;;  %v3613_v25 = vrot.slane %v3588_v17, %v3594_v19  ;;  %v3635_v32 = vrot.slane %v3588_v17, %v3605_v23 }
  0x12   : > { %v3551_v12 = vld [vmem:[%s3421_s20 + $0x60] sm:$0xff]  ;;  %v3554_v13 = vld [vmem:[%s3421_s20 + $0x58] sm:$0xff]  ;;  %v3654_v39 = vld [vmem:[%s3421_s20 + $0x70] sm:$0xff]  ;;  %v3698_v54 = vrot.slane %v3678_v49, %v3594_v19  ;;  %v3709_v57 = vrot.slane %v3678_v49, %v3583_v16  ;;  %v3717_v58 = vrot.slane %v3678_v49, %v3591_v18  ;;  %v3730_v62 = vrot.slane %v3678_v49, %v3605_v23 }
  0x13   : > { %803 = vrot.lane.b32.xlu1 %v3434_v2, %s3375_s21  ;;  %799 = vrot.lane.b32.xlu0 %v3437_v3, %s3375_s21  ;;  %v3657_v40 = vld [vmem:[%s3421_s20 + $0x68] sm:$0xff]  ;;  %v3664_v43 = vld [vmem:[%s3421_s20 + $0x80] sm:$0xff] }
  0x14   : > { %v3667_v44 = vld [vmem:[%s3421_s20 + $0x78] sm:$0xff] }
  0x17   : > { %279 = vrot.lane.b32.xlu1 %v3427_v1, %s3376_s22  ;;  %795 = vrot.lane.b32.xlu0 %v3444_v4, %s3375_s21 }
  0x1b   : > { %283 = vrot.lane.b32.xlu1 %v3424_v0, %s3376_s22  ;;  %281 = vrot.lane.b32.xlu0 %v3437_v3, %s3376_s22 }
  0x1f   : > { %636 = vrot.lane.b32.xlu1 %v3427_v1, %s3377_s23  ;;  %285 = vrot.lane.b32.xlu0 %v3434_v2, %s3376_s22 }
  0x23   : > { %640 = vrot.lane.b32.xlu1 %v3424_v0, %s3377_s23  ;;  %638 = vrot.lane.b32.xlu0 %v3437_v3, %s3377_s23 }
  0x27   : > { %277 = vrot.lane.b32.xlu1 %v3444_v4, %s3376_s22  ;;  %642 = vrot.lane.b32.xlu0 %v3434_v2, %s3377_s23 }
  0x2b   : > { %1379 = vrot.lane.b32.xlu1 %v3427_v1, %s3378_s24  ;;  %634 = vrot.lane.b32.xlu0 %v3444_v4, %s3377_s23 }
  0x2f   : > { %1383 = vrot.lane.b32.xlu1 %v3424_v0, %s3378_s24  ;;  %1381 = vrot.lane.b32.xlu0 %v3437_v3, %s3378_s24 }
  0x33   : > { %1377 = vrot.lane.b32.xlu1 %v3444_v4, %s3378_s24  ;;  %1385 = vrot.lane.b32.xlu0 %v3434_v2, %s3378_s24 }
  0x37   : > { %1154 = vrot.lane.b32.xlu1 %v3427_v1, %s3380_s25  ;;  %1152 = vrot.lane.b32.xlu0 %v3444_v4, %s3380_s25 }
  0x3b   : > { %1158 = vrot.lane.b32.xlu1 %v3424_v0, %s3380_s25  ;;  %1156 = vrot.lane.b32.xlu0 %v3437_v3, %s3380_s25 }
  0x3f   : > { %807 = vrot.lane.b32.xlu1 %v3489_v6, %s3375_s21  ;;  %805 = vrot.lane.b32.xlu0 %v3492_v7, %s3375_s21 }
  0x43   : > { %811 = vrot.lane.b32.xlu1 %v3499_v8, %s3375_s21  ;;  %809 = vrot.lane.b32.xlu0 %v3502_v9, %s3375_s21 }
  0x47   : > { %289 = vrot.lane.b32.xlu1 %v3489_v6, %s3376_s22  ;;  %287 = vrot.lane.b32.xlu0 %v3492_v7, %s3376_s22 }
  0x4b   : > { %293 = vrot.lane.b32.xlu1 %v3499_v8, %s3376_s22  ;;  %291 = vrot.lane.b32.xlu0 %v3502_v9, %s3376_s22 }
  0x4f   : > { %646 = vrot.lane.b32.xlu1 %v3489_v6, %s3377_s23  ;;  %644 = vrot.lane.b32.xlu0 %v3492_v7, %s3377_s23 }
  0x53   : > { %650 = vrot.lane.b32.xlu1 %v3499_v8, %s3377_s23  ;;  %648 = vrot.lane.b32.xlu0 %v3502_v9, %s3377_s23 }
  0x57   : > { %1389 = vrot.lane.b32.xlu1 %v3489_v6, %s3378_s24  ;;  %1387 = vrot.lane.b32.xlu0 %v3492_v7, %s3378_s24 }
  0x5b   : > { %1393 = vrot.lane.b32.xlu1 %v3499_v8, %s3378_s24  ;;  %1391 = vrot.lane.b32.xlu0 %v3502_v9, %s3378_s24 }
  0x5f   : > { %1162 = vrot.lane.b32.xlu1 %v3492_v7, %s3380_s25  ;;  %1160 = vrot.lane.b32.xlu0 %v3434_v2, %s3380_s25 }
  0x63   : > { %1166 = vrot.lane.b32.xlu1 %v3502_v9, %s3380_s25  ;;  %1164 = vrot.lane.b32.xlu0 %v3489_v6, %s3380_s25 }
  0x67   : > { %815 = vrot.lane.b32.xlu1 %v3541_v10, %s3375_s21  ;;  %813 = vrot.lane.b32.xlu0 %v3544_v11, %s3375_s21 }
  0x6b   : > { %819 = vrot.lane.b32.xlu1 %v3551_v12, %s3375_s21  ;;  %817 = vrot.lane.b32.xlu0 %v3554_v13, %s3375_s21 }
  0x6f   : > { %297 = vrot.lane.b32.xlu1 %v3541_v10, %s3376_s22  ;;  %295 = vrot.lane.b32.xlu0 %v3544_v11, %s3376_s22 }
  0x73   : > { %301 = vrot.lane.b32.xlu1 %v3551_v12, %s3376_s22  ;;  %299 = vrot.lane.b32.xlu0 %v3554_v13, %s3376_s22 }
  0x77   : > { %654 = vrot.lane.b32.xlu1 %v3541_v10, %s3377_s23  ;;  %652 = vrot.lane.b32.xlu0 %v3544_v11, %s3377_s23 }
  0x7b   : > { %658 = vrot.lane.b32.xlu1 %v3551_v12, %s3377_s23  ;;  %656 = vrot.lane.b32.xlu0 %v3554_v13, %s3377_s23 }
  0x7f   : > { %1397 = vrot.lane.b32.xlu1 %v3541_v10, %s3378_s24  ;;  %1395 = vrot.lane.b32.xlu0 %v3544_v11, %s3378_s24 }
  0x81   : > { %v802_v20 = vpop.permute.xlu1 %801  ;;  %v798_v21 = vpop.permute.xlu0 %797 }
  0x83   : > { %1401 = vrot.lane.b32.xlu1 %v3551_v12, %s3378_s24  ;;  %1399 = vrot.lane.b32.xlu0 %v3554_v13, %s3378_s24 }
  0x85   : > { %v3615_v26 = vpop.permute.xlu1 %803  ;;  %v800_v27 = vpop.permute.xlu0 %799 }
  0x86   : > { %v3619_v28 = vsel %vm859_vm0, %v802_v20, %v3615_v26  ;;  %v3622_v29 = vsel %vm859_vm0, %v798_v21, %v800_v27  ;;  %v3625_v30 = vsel %vm859_vm0, %v800_v27, %v802_v20 }
  0x87   : > { %1170 = vrot.lane.b32.xlu1 %v3544_v11, %s3380_s25  ;;  %1168 = vrot.lane.b32.xlu0 %v3499_v8, %s3380_s25  ;;  %v1675_v31 = vmul.f32 %v3602_v22, %v3619_v28  ;;  %v1673_v33 = vmul.f32 %v3609_v24, %v3622_v29  ;;  %v1674_v34 = vmul.f32 %v3613_v25, %v3625_v30 }
  0x89   : > { %2120 = vmatprep.subr.mxu1 %v1675_v31  ;;  %v280_v35 = vpop.permute.xlu1 %279  ;;  %v3641_v36 = vpop.permute.xlu0 %795  ;;  %2049 = vmatprep.subr.mxu0 %v1673_v33 }
  0x8a   : > { %2121 = vmatpush1.msra.mxu1 %v1674_v34  ;;  %v3645_v37 = vsel %vm859_vm0, %v3641_v36, %v798_v21 }
  0x8b   : > { %1174 = vrot.lane.b32.xlu1 %v3554_v13, %s3380_s25  ;;  %1172 = vrot.lane.b32.xlu0 %v3541_v10, %s3380_s25  ;;  %v1672_v38 = vmul.f32 %v3635_v32, %v3645_v37 }
  0x8d   : > { %v284_v41 = vpop.permute.xlu1 %283  ;;  %2050 = vmatpush1.msra.mxu0 %v1672_v38  ;;  %v282_v42 = vpop.permute.xlu0 %281 }
  0x8e   : > { %v3701_v55 = vsel %vm341_vm2, %v282_v42, %v284_v41  ;;  %v3720_v59 = vsel %vm341_vm2, %v280_v35, %v282_v42 }
  0x8f   : > { %823 = vrot.lane.b32.xlu1 %v3654_v39, %s3375_s21  ;;  %821 = vrot.lane.b32.xlu0 %v3657_v40, %s3375_s21  ;;  %v1574_v21 = vmul.f32 %v3698_v54, %v3701_v55  ;;  %v1573_v31 = vmul.f32 %v3717_v58, %v3720_v59 }
  0x91   : > { %v637_v45 = vpop.permute.xlu1 %636  ;;  %v3669_v46 = vpop.permute.xlu0 %285 }
  0x92   : > { %v3690_v51 = vsel %vm341_vm2, %v284_v41, %v3669_v46 }
  0x93   : > { %827 = vrot.lane.b32.xlu1 %v3664_v43, %s3375_s21  ;;  %825 = vrot.lane.b32.xlu0 %v3667_v44, %s3375_s21  ;;  %v1575_v61 = vmul.f32 %v3709_v57, %v3690_v51 }
  0x95   : > { %v641_v47 = vpop.permute.xlu1 %640  ;;  %v639_v48 = vpop.permute.xlu0 %638 }
  0x96   : > { %v3681_v50 = vsel %vm698_vm1, %v637_v45, %v639_v48  ;;  %v3724_v60 = vsel %vm698_vm1, %v639_v48, %v641_v47 }
  0x97   : > { %305 = vrot.lane.b32.xlu1 %v3654_v39, %s3376_s22  ;;  %303 = vrot.lane.b32.xlu0 %v3657_v40, %s3376_s22 }
  0x98   : > { %2051 = vmatprep.subr.mxu0 %v3681_v50 }
  0x99   : > { %v3692_v52 = vpop.permute.xlu1 %277  ;;  %v3694_v53 = vpop.permute.xlu0 %642 }
  0x9a   : > { %v3705_v56 = vsel %vm698_vm1, %v641_v47, %v3694_v53  ;;  %v3734_v63 = vsel %vm341_vm2, %v3692_v52, %v280_v35 }
  0x9b   : > { %309 = vrot.lane.b32.xlu1 %v3664_v43, %s3376_s22  ;;  %307 = vrot.lane.b32.xlu0 %v3667_v44, %s3376_s22  ;;  %v1572_v33 = vmul.f32 %v3730_v62, %v3734_v63 }
  0x9c   : > { %2122 = vmatprep.subr.mxu1 %v3705_v56 }
  0x9d   : > { %2123 = vmatpush1.msra.mxu1 %v3724_v60  ;;  %v1380_v14 = vpop.permute.xlu1 %1379  ;;  %v3737_v20 = vpop.permute.xlu0 %634 }
  0x9e   : > { %2124 = vmatprep.subr.mxu1 %v1575_v61  ;;  %v3743_v27 = vsel %vm698_vm1, %v3737_v20, %v637_v45 }
  0x9f   : > { %2125 = vmatpush1.msra.mxu1 %v1574_v21  ;;  %662 = vrot.lane.b32.xlu1 %v3654_v39, %s3377_s23 }
  0xa0   : > { %660 = vrot.lane.b32.xlu0 %v3657_v40, %s3377_s23  ;;  %2052 = vmatpush1.msra.mxu0 %v3743_v27 }
  0xa1   : > { %2053 = vmatprep.subr.mxu0 %v1573_v31  ;;  %v1384_v34 = vpop.permute.xlu1 %1383  ;;  %v1382_v35 = vpop.permute.xlu0 %1381 }
  0xa2   : > { %2054 = vmatpush1.msra.mxu0 %v1572_v33  ;;  %v1443_v38 = vsel %vm1441_vm3, %v1380_v14, %v1382_v35  ;;  %v1444_v42 = vsel %vm1441_vm3, %v1382_v35, %v1384_v34 }
  0xa3   : > { %666 = vrot.lane.b32.xlu1 %v3664_v43, %s3377_s23  ;;  %v1507_v41 = vmul.f32 %v1443_v38, %v3609_v24  ;;  %v1508_v33 = vmul.f32 %v1444_v42, %v3613_v25 }
  0xa4   : > { %664 = vrot.lane.b32.xlu0 %v3667_v44, %s3377_s23 }
  0xa5   : > { %v1378_v45 = vpop.permute.xlu1 %1377  ;;  %2055 = vmatprep.subr.mxu0 %v1507_v41  ;;  %v3761_v47 = vpop.permute.xlu0 %1385  ;;  %v923_v41 = vsel %vm859_vm0, 0.0, %v3641_v36  ;;  %v1089_v36 = vmul.f32 %v3609_v24, %v3645_v37 }
  0xa6   : > { %v1442_v48 = vsel %vm1441_vm3, %v1378_v45, %v1380_v14  ;;  %v1445_v61 = vsel %vm1441_vm3, %v1384_v34, %v3761_v47 }
  0xa7   : > { %v1506_v21 = vmul.f32 %v1442_v48, %v3635_v32  ;;  %1405 = vrot.lane.b32.xlu1 %v3654_v39, %s3378_s24  ;;  %v1509_v31 = vmul.f32 %v1445_v61, %v3602_v22  ;;  %v3784_v48 = vsub.s32 5, %v3576_v15 }
  0xa8   : > { %1403 = vrot.lane.b32.xlu0 %v3657_v40, %s3378_s24 }
  0xa9   : > { %v1155_v35 = vpop.permute.xlu1 %1154  ;;  %2056 = vmatpush1.msra.mxu0 %v1506_v21  ;;  %2126 = vmatprep.subr.mxu1 %v1509_v31  ;;  %v1153_v14 = vpop.permute.xlu0 %1152  ;;  %v3798_v21 = vsub.s32 7, %v3576_v15 }
  0xaa   : > { %v1217_v38 = vsel %vm1216_vm4, %v1153_v14, %v1155_v35  ;;  %v1280_v34 = vsel %vm1216_vm4, 0.0, %v1153_v14  ;;  %2127 = vmatpush1.msra.mxu1 %v1508_v33  ;;  %2057 = vmatprep.subr.mxu0 %v3427_v1  ;;  %v3790_v1 = vsub.s32 4, %v3576_v15  ;;  %v1088_v33 = vmul.f32 %v3635_v32, %v923_v41 }
  0xab   : > { %1409 = vrot.lane.b32.xlu1 %v3664_v43, %s3378_s24  ;;  %2058 = vmatpush1.msra.mxu0 %v3444_v4  ;;  %v1282_v42 = vmul.f32 %v1217_v38, %v3717_v58  ;;  %v1281_v45 = vmul.f32 %v1280_v34, %v3730_v62  ;;  %v405_v32 = vsel %vm341_vm2, 0.0, %v3692_v52  ;;  %v571_v41 = vmul.f32 %v3717_v58, %v3734_v63 }
  0xac   : > { %1407 = vrot.lane.b32.xlu0 %v3667_v44, %s3378_s24  ;;  %2128 = vmatprep.subr.mxu1 %v3424_v0  ;;  %v3823_v14 = vrot.slane %v3588_v17, %v3790_v1  ;;  %v3835_v52 = vsub.s32 6, %v3576_v15  ;;  %v1090_v58 = vmul.f32 %v3613_v25, %v3622_v29  ;;  %v570_v15 = vmul.f32 %v3730_v62, %v405_v32  ;;  %v3861_v25 = vld [vmem:[%s5183_s2] sm:$0xf]  ;;  %v3866_v62 = vld [vmem:[%s3421_s20 + $0x90] sm:$0xff] }
  0xad   : > { %v3794_v61 = vpop.permute.xlu1 %1158  ;;  %2059 = vmatprep.subr.mxu0 %v1282_v42  ;;  %v1157_v4 = vpop.permute.xlu0 %1156  ;;  %2129 = vmatpush1.msra.mxu1 %v3437_v3  ;;  %v3830_v42 = vrot.slane %v3588_v17, %v3798_v21 }
  0xae   : > { %v1218_v31 = vsel %vm1216_vm4, %v1155_v35, %v1157_v4  ;;  %v1219_v0 = vsel %vm1216_vm4, %v1157_v4, %v3794_v61  ;;  %2060 = vmatpush1.msra.mxu0 %v1281_v45  ;;  %v3815_v35 = vrot.slane %v3588_v17, %v3784_v48  ;;  %v3870_v63 = vrot.slane %v3588_v17, %v3835_v52  ;;  %v3881_v4 = vld [vmem:[%s3421_s20 + $0x88] sm:$0xff] }
  0xaf   : > { %1178 = vrot.lane.b32.xlu1 %v3657_v40, %s3380_s25  ;;  %2061 = vmatprep.subr.mxu0 %v1089_v36  ;;  %v1284_v24 = vmul.f32 %v1219_v0, %v3709_v57  ;;  %v1283_v37 = vmul.f32 %v1218_v31, %v3698_v54  ;;  %v573_v17 = vmul.f32 %v3709_v57, %v3701_v55  ;;  %v3899_v55 = vld [vmem:[%s3421_s20 + $0xa0] sm:$0xff]  ;;  %v3902_v57 = vld [vmem:[%s3421_s20 + $0x98] sm:$0xff] }
  0xb0   : > { %1176 = vrot.lane.b32.xlu0 %v3551_v12, %s3380_s25  ;;  %2062 = vmatpush1.msra.mxu0 %v1088_v33  ;;  %v1091_v12 = vmul.f32 %v3602_v22, %v3625_v30  ;;  %v572_v0 = vmul.f32 %v3698_v54, %v3720_v59 }
  0xb1   : > { %v808_v38 = vpop.permute.xlu1 %807  ;;  %2063 = vmatprep.subr.mxu0 %v3743_v27  ;;  %2130 = vmatprep.subr.mxu1 %v1284_v24  ;;  %v806_v34 = vpop.permute.xlu0 %805  ;;  %v3916_v24 = vrot.slane %v3678_v49, %v3784_v48 }
  0xb2   : > { %v3839_v45 = vsel %vm859_vm0, %v3615_v26, %v806_v34  ;;  %v3842_v27 = vsel %vm859_vm0, %v806_v34, %v808_v38  ;;  %3343 = vmatpush1.msk.msra.mxu0 %vm3808_vm5, %v3737_v20  ;;  %2131 = vmatpush1.msra.mxu1 %v1283_v37  ;;  %v3931_v34 = vrot.slane %v3678_v49, %v3790_v1 }
  0xb3   : > { %1182 = vrot.lane.b32.xlu1 %v3667_v44, %s3380_s25  ;;  %2065 = vmatprep.subr.mxu0 %v571_v41  ;;  %v1677_v22 = vmul.f32 %v3815_v35, %v3842_v27  ;;  %v1676_v26 = vmul.f32 %v3823_v14, %v3839_v45 }
  0xb4   : > { %1180 = vrot.lane.b32.xlu0 %v3654_v39, %s3380_s25  ;;  %2132 = vmatprep.subr.mxu1 %v1091_v12 }
  0xb5   : > { %2066 = vmatpush1.msra.mxu0 %v570_v15  ;;  %2133 = vmatpush1.msra.mxu1 %v1090_v58  ;;  %v3863_v29 = vpop.permute.xlu1 %811  ;;  %v810_v30 = vpop.permute.xlu0 %809  ;;  %v3945_v58 = vrot.slane %v3678_v49, %v3798_v21 }
  0xb6   : > { %2134 = vmatprep.subr.mxu1 %v3724_v60  ;;  %2191 = vmatprep.subr.mxu0 %v1677_v22  ;;  %v3874_v20 = vsel %vm859_vm0, %v808_v38, %v810_v30  ;;  %v3878_v36 = vsel %vm859_vm0, %v810_v30, %v3863_v29 }
  0xb7   : > { %3322 = vmatmul.mubr.msk.f32.vlgmr.msra.gmra.mxu0 %vm2031_vm6, %v3861_v25  ;;  %2135 = vmatpush1.msra.mxu1 %v3681_v50  ;;  %v1679_v60 = vmul.f32 %v3830_v42, %v3878_v36  ;;  %v1678_v31 = vmul.f32 %v3870_v63, %v3874_v20 }
  0xb8   : > { %2192 = vmatpush1.msra.mxu0 %v1676_v26  ;;  %831 = vrot.lane.b32.xlu1 %v3866_v62, %s3375_s21 }
  0xb9   : > { %829 = vrot.lane.b32.xlu0 %v3881_v4, %s3375_s21  ;;  %2136 = vmatprep.subr.mxu1 %v573_v17  ;;  %v290_v50 = vpop.permute.xlu1 %289  ;;  %v288_v33 = vpop.permute.xlu0 %287  ;;  %v3965_v17 = vrot.slane %v3678_v49, %v3835_v52 }
  0xba   : > { %2137 = vmatpush1.msra.mxu1 %v572_v0  ;;  %2241 = vmatprep.mubr.f32.mxu0 %v5186_v5  ;;  %v3919_v3 = vsel %vm341_vm2, %v288_v33, %v290_v50  ;;  %v3925_v37 = vsel %vm341_vm2, %v3669_v46, %v288_v33 }
  0xbb   : > { %2262 = vmatprep.subr.mxu1 %v1679_v60  ;;  %3323 = vmatmul.mubr.msk.f32.vlgmr.msra.gmra.mxu1 %vm2031_vm6, %v3861_v25  ;;  %v1577_v46 = vmul.f32 %v3916_v24, %v3919_v3  ;;  %v1576_v15 = vmul.f32 %v3931_v34, %v3925_v37 }
  0xbc   : > { %2263 = vmatpush1.msra.mxu1 %v1678_v31  ;;  %835 = vrot.lane.b32.xlu1 %v3899_v55, %s3375_s21 }
  0xbd   : > { %833 = vrot.lane.b32.xlu0 %v3902_v57, %s3375_s21  ;;  %v3911_v54 = vpop.permute.xlu1 %293  ;;  %v292_v59 = vpop.permute.xlu0 %291  ;;  %2312 = vmatprep.mubr.f32.mxu1 %v5186_v5 }
  0xbe   : > { %v3951_v22 = vsel %vm341_vm2, %v292_v59, %v3911_v54 }
  0xbf   : > { %v1579_v0 = vmul.f32 %v3945_v58, %v3951_v22 }
  0xc0   : > { %313 = vrot.lane.b32.xlu1 %v3866_v62, %s3376_s22 }
  0xc1   : > { %311 = vrot.lane.b32.xlu0 %v3881_v4, %s3376_s22  ;;  %v647_v32 = vpop.permute.xlu1 %646  ;;  %v645_v38 = vpop.permute.xlu0 %644 }
  0xc2   : > { %v3934_v41 = vsel %vm698_vm1, %v645_v38, %v647_v32  ;;  %v3938_v12 = vsel %vm698_vm1, %v3694_v53, %v645_v38  ;;  %v3957_v53 = vsel %vm341_vm2, %v290_v50, %v292_v59 }
  0xc3   : > { %2193 = vmatprep.subr.mxu0 %v3934_v41  ;;  %v1578_v50 = vmul.f32 %v3965_v17, %v3957_v53 }
  0xc4   : > { %317 = vrot.lane.b32.xlu1 %v3899_v55, %s3376_s22  ;;  %2194 = vmatpush1.msra.mxu0 %v3938_v12 }
  0xc5   : > { %315 = vrot.lane.b32.xlu0 %v3902_v57, %s3376_s22  ;;  %v3961_v26 = vpop.permute.xlu1 %650  ;;  %2195 = vmatprep.subr.mxu0 %v1577_v46  ;;  %v649_v30 = vpop.permute.xlu0 %648 }
  0xc6   : > { %2196 = vmatpush1.msra.mxu0 %v1576_v15  ;;  %v3969_v60 = vsel %vm698_vm1, %v649_v30, %v3961_v26  ;;  %v3972_v31 = vsel %vm698_vm1, %v647_v32, %v649_v30 }
  0xc7   : > { %2264 = vmatprep.subr.mxu1 %v3969_v60 }
  0xc8   : > { %670 = vrot.lane.b32.xlu1 %v3866_v62, %s3377_s23  ;;  %2265 = vmatpush1.msra.mxu1 %v3972_v31 }
  0xc9   : > { %668 = vrot.lane.b32.xlu0 %v3881_v4, %s3377_s23  ;;  %v1390_v49 = vpop.permute.xlu1 %1389  ;;  %2266 = vmatprep.subr.mxu1 %v1579_v0  ;;  %v1388_v33 = vpop.permute.xlu0 %1387 }
  0xca   : > { %v1446_v59 = vsel %vm1441_vm3, %v3761_v47, %v1388_v33  ;;  %v1447_v32 = vsel %vm1441_vm3, %v1388_v33, %v1390_v49  ;;  %2267 = vmatpush1.msra.mxu1 %v1578_v50 }
  0xcb   : > { %v1510_v38 = vmul.f32 %v1446_v59, %v3823_v14  ;;  %v1511_v46 = vmul.f32 %v1447_v32, %v3815_v35 }
  0xcc   : > { %674 = vrot.lane.b32.xlu1 %v3899_v55, %s3377_s23 }
  0xcd   : > { %672 = vrot.lane.b32.xlu0 %v3902_v57, %s3377_s23  ;;  %v3993_v15 = vpop.permute.xlu1 %1393  ;;  %2197 = vmatprep.subr.mxu0 %v1511_v46  ;;  %v1392_v30 = vpop.permute.xlu0 %1391 }
  0xce   : > { %v1448_v0 = vsel %vm1441_vm3, %v1390_v49, %v1392_v30  ;;  %v1449_v47 = vsel %vm1441_vm3, %v1392_v30, %v3993_v15  ;;  %2198 = vmatpush1.msra.mxu0 %v1510_v38  ;;  %v1093_v30 = vmul.f32 %v3815_v35, %v3839_v45 }
  0xcf   : > { %v1512_v50 = vmul.f32 %v1448_v0, %v3870_v63  ;;  %v1513_v33 = vmul.f32 %v1449_v47, %v3830_v42  ;;  %2199 = vmatprep.subr.mxu0 %v3492_v7  ;;  %v1092_v0 = vmul.f32 %v3823_v14, %v3619_v28 }
  0xd0   : > { %1413 = vrot.lane.b32.xlu1 %v3866_v62, %s3378_s24  ;;  %2200 = vmatpush1.msra.mxu0 %v3434_v2 }
  0xd1   : > { %1411 = vrot.lane.b32.xlu0 %v3881_v4, %s3378_s24  ;;  %v1163_v59 = vpop.permute.xlu1 %1162  ;;  %2268 = vmatprep.subr.mxu1 %v1513_v33  ;;  %v1161_v49 = vpop.permute.xlu0 %1160 }
  0xd2   : > { %v1220_v32 = vsel %vm1216_vm4, %v3794_v61, %v1161_v49  ;;  %v1221_v38 = vsel %vm1216_vm4, %v1161_v49, %v1163_v59  ;;  %2269 = vmatpush1.msra.mxu1 %v1512_v50 }
  0xd3   : > { %v1285_v46 = vmul.f32 %v1220_v32, %v3931_v34  ;;  %v1286_v7 = vmul.f32 %v1221_v38, %v3916_v24  ;;  %2270 = vmatprep.subr.mxu1 %v3502_v9  ;;  %v4026_v9 = vld [vmem:[%s5182_s1 + $0x11] ss:$2 sm:$0xff] }
  0xd4   : > { %1417 = vrot.lane.b32.xlu1 %v3899_v55, %s3378_s24  ;;  %2271 = vmatpush1.msra.mxu1 %v3489_v6  ;;  %v4035_v35 = vrot.slane %v4026_v9, %v3591_v18  ;;  %v4041_v28 = vrot.slane %v4026_v9, %v3605_v23  ;;  %v4091_v38 = vrot.slane %v4026_v9, %v3594_v19 }
  0xd5   : > { %1415 = vrot.lane.b32.xlu0 %v3902_v57, %s3378_s24  ;;  %v4017_v2 = vpop.permute.xlu1 %1166  ;;  %2201 = vmatprep.subr.mxu0 %v1286_v7  ;;  %v1165_v61 = vpop.permute.xlu0 %1164 }
  0xd6   : > { %v1222_v6 = vsel %vm1216_vm4, %v1163_v59, %v1165_v61  ;;  %v1223_v47 = vsel %vm1216_vm4, %v1165_v61, %v4017_v2  ;;  %2202 = vmatpush1.msra.mxu0 %v1285_v46  ;;  %v575_v59 = vmul.f32 %v3916_v24, %v3925_v37  ;;  %v577_v46 = vmul.f32 %v3945_v58, %v3957_v53 }
  0xd7   : > { %v1287_v50 = vmul.f32 %v1222_v6, %v3965_v17  ;;  %2203 = vmatprep.subr.mxu0 %v1093_v30  ;;  %v1288_v33 = vmul.f32 %v1223_v47, %v3945_v58  ;;  %v576_v61 = vmul.f32 %v3965_v17, %v3919_v3  ;;  %v4114_v58 = vld [vmem:[%s3421_s20 + $0xb8] sm:$0xff] }
  0xd8   : > { %1186 = vrot.lane.b32.xlu1 %v3881_v4, %s3380_s25  ;;  %2204 = vmatpush1.msra.mxu0 %v1092_v0  ;;  %v4110_v0 = vld [vmem:[%s3421_s20 + $0xc0] sm:$0xff]  ;;  %v4125_v17 = vld [vmem:[%s5182_s1 + $0x10] ss:$2 sm:$0xff] }
  0xd9   : > { %1184 = vrot.lane.b32.xlu0 %v3664_v43, %s3380_s25  ;;  %v816_v14 = vpop.permute.xlu1 %815  ;;  %2205 = vmatprep.subr.mxu0 %v3938_v12  ;;  %v814_v45 = vpop.permute.xlu0 %813  ;;  %v1095_v43 = vmul.f32 %v3830_v42, %v3874_v20  ;;  %v574_v12 = vmul.f32 %v3931_v34, %v3690_v51  ;;  %v4070_v51 = vrot.slane %v4026_v9, %v3583_v16  ;;  %v4084_v20 = vld [vmem:[%s3421_s20 + $0xb0] sm:$0xff]  ;;  %v4087_v34 = vld [vmem:[%s3421_s20 + $0xa8] sm:$0xff] }
  0xda   : > { %2272 = vmatprep.subr.mxu1 %v1288_v33  ;;  %v4050_v49 = vsel %vm859_vm0, %v3863_v29, %v814_v45  ;;  %v4053_v32 = vsel %vm859_vm0, %v814_v45, %v816_v14  ;;  %2206 = vmatpush1.msra.mxu0 %v3705_v56  ;;  %v1094_v29 = vmul.f32 %v3870_v63, %v3842_v27 }
  0xdb   : > { %2273 = vmatpush1.msra.mxu1 %v1287_v50  ;;  %2207 = vmatprep.subr.mxu0 %v575_v59  ;;  %v1681_v24 = vmul.f32 %v4035_v35, %v4053_v32  ;;  %v1680_v37 = vmul.f32 %v4041_v28, %v4050_v49  ;;  %v4132_v6 = vrot.slane %v4125_v17, %v3591_v18 }
  0xdc   : > { %1190 = vrot.lane.b32.xlu1 %v3902_v57, %s3380_s25  ;;  %2274 = vmatprep.subr.mxu1 %v1095_v43  ;;  %v4145_v45 = vrot.slane %v4125_v17, %v3605_v23 }
  0xdd   : > { %1188 = vrot.lane.b32.xlu0 %v3866_v62, %s3380_s25  ;;  %2208 = vmatpush1.msra.mxu0 %v574_v12  ;;  %v4074_v56 = vpop.permute.xlu1 %819  ;;  %v818_v42 = vpop.permute.xlu0 %817  ;;  %v4161_v12 = vrot.slane %v4125_v17, %v3583_v16 }
  0xde   : > { %2275 = vmatpush1.msra.mxu1 %v1094_v29  ;;  %2333 = vmatprep.subr.mxu0 %v1681_v24  ;;  %v4077_v27 = vsel %vm859_vm0, %v816_v14, %v818_v42  ;;  %v4081_v63 = vsel %vm859_vm0, %v818_v42, %v4074_v56 }
  0xdf   : > { %2276 = vmatprep.subr.mxu1 %v3972_v31  ;;  %3324 = vmatmul.mubr.msk.f32.vlgmr.msra.gmra.mxu0 %vm2031_vm6, %v3861_v25  ;;  %v1683_v7 = vmul.f32 %v4070_v51, %v4081_v63  ;;  %v1682_v30 = vmul.f32 %v4091_v38, %v4077_v27 }
  0xe0   : > { %2277 = vmatpush1.msra.mxu1 %v3934_v41  ;;  %2334 = vmatpush1.msra.mxu0 %v1680_v37 }
  0xe1   : > { %839 = vrot.lane.b32.xlu1 %v4084_v20, %s3375_s21  ;;  %837 = vrot.lane.b32.xlu0 %v4087_v34, %s3375_s21  ;;  %v298_v41 = vpop.permute.xlu1 %297  ;;  %v296_v31 = vpop.permute.xlu0 %295 }
  0xe2   : > { %2278 = vmatprep.subr.mxu1 %v577_v46  ;;  %2383 = vmatprep.mubr.f32.mxu0 %v5186_v5  ;;  %v4135_v47 = vsel %vm341_vm2, %v296_v31, %v298_v41  ;;  %v4139_v50 = vsel %vm341_vm2, %v3911_v54, %v296_v31  ;;  %v4179_v46 = vrot.slane %v4125_v17, %v3594_v19 }
  0xe3   : > { %2279 = vmatpush1.msra.mxu1 %v576_v61  ;;  %v1581_v54 = vmul.f32 %v4132_v6, %v4135_v47  ;;  %v1580_v24 = vmul.f32 %v4145_v45, %v4139_v50 }
  0xe4   : > { %2404 = vmatprep.subr.mxu1 %v1683_v7  ;;  %3325 = vmatmul.mubr.msk.f32.vlgmr.msra.gmra.mxu1 %vm2031_vm6, %v3861_v25 }
  0xe5   : > { %2405 = vmatpush1.msra.mxu1 %v1682_v30  ;;  %843 = vrot.lane.b32.xlu1 %v4110_v0, %s3375_s21  ;;  %v4120_v3 = vpop.permute.xlu1 %301  ;;  %v300_v53 = vpop.permute.xlu0 %299 }
  0xe6   : > { %841 = vrot.lane.b32.xlu0 %v4114_v58, %s3375_s21  ;;  %2454 = vmatprep.mubr.f32.mxu1 %v5186_v5  ;;  %v4167_v29 = vsel %vm341_vm2, %v300_v53, %v4120_v3 }
  0xe7   : > { %v1583_v30 = vmul.f32 %v4161_v12, %v4167_v29 }
  0xe9   : > { %321 = vrot.lane.b32.xlu1 %v4084_v20, %s3376_s22  ;;  %v655_v33 = vpop.permute.xlu1 %654  ;;  %v653_v14 = vpop.permute.xlu0 %652 }
  0xea   : > { %319 = vrot.lane.b32.xlu0 %v4087_v34, %s3376_s22  ;;  %v4150_v59 = vsel %vm698_vm1, %v653_v14, %v655_v33  ;;  %v4154_v43 = vsel %vm698_vm1, %v3961_v26, %v653_v14  ;;  %v4171_v26 = vsel %vm341_vm2, %v298_v41, %v300_v53 }
  0xeb   : > { %2335 = vmatprep.subr.mxu0 %v4150_v59  ;;  %v1582_v41 = vmul.f32 %v4179_v46, %v4171_v26 }
  0xec   : > { %2336 = vmatpush1.msra.mxu0 %v4154_v43 }
  0xed   : > { %325 = vrot.lane.b32.xlu1 %v4110_v0, %s3376_s22  ;;  %v4175_v37 = vpop.permute.xlu1 %658  ;;  %2337 = vmatprep.subr.mxu0 %v1581_v54  ;;  %v657_v42 = vpop.permute.xlu0 %656 }
  0xee   : > { %323 = vrot.lane.b32.xlu0 %v4114_v58, %s3376_s22  ;;  %2338 = vmatpush1.msra.mxu0 %v1580_v24  ;;  %v4185_v7 = vsel %vm698_vm1, %v657_v42, %v4175_v37  ;;  %v4188_v61 = vsel %vm698_vm1, %v655_v33, %v657_v42 }
  0xef   : > { %2406 = vmatprep.subr.mxu1 %v4185_v7 }
  0xf0   : > { %2407 = vmatpush1.msra.mxu1 %v4188_v61 }
  0xf1   : > { %678 = vrot.lane.b32.xlu1 %v4084_v20, %s3377_s23  ;;  %v1398_v31 = vpop.permute.xlu1 %1397  ;;  %2408 = vmatprep.subr.mxu1 %v1583_v30  ;;  %v1396_v53 = vpop.permute.xlu0 %1395 }
  0xf2   : > { %676 = vrot.lane.b32.xlu0 %v4087_v34, %s3377_s23  ;;  %v1450_v33 = vsel %vm1441_vm3, %v3993_v15, %v1396_v53  ;;  %v1451_v14 = vsel %vm1441_vm3, %v1396_v53, %v1398_v31  ;;  %2409 = vmatpush1.msra.mxu1 %v1582_v41 }
  0xf3   : > { %v1514_v54 = vmul.f32 %v1450_v33, %v4041_v28  ;;  %v1515_v24 = vmul.f32 %v1451_v14, %v4035_v35 }
  0xf5   : > { %682 = vrot.lane.b32.xlu1 %v4110_v0, %s3377_s23  ;;  %v4207_v42 = vpop.permute.xlu1 %1401  ;;  %2339 = vmatprep.subr.mxu0 %v1515_v24  ;;  %v1400_v30 = vpop.permute.xlu0 %1399 }
  0xf6   : > { %680 = vrot.lane.b32.xlu0 %v4114_v58, %s3377_s23  ;;  %v1452_v5 = vsel %vm1441_vm3, %v1398_v31, %v1400_v30  ;;  %v1453_v15 = vsel %vm1441_vm3, %v1400_v30, %v4207_v42  ;;  %2340 = vmatpush1.msra.mxu0 %v1514_v54  ;;  %v1096_v30 = vmul.f32 %v4041_v28, %v3878_v36 }
  0xf7   : > { %v1516_v41 = vmul.f32 %v1452_v5, %v4091_v38  ;;  %v1517_v53 = vmul.f32 %v1453_v15, %v4070_v51  ;;  %2341 = vmatprep.subr.mxu0 %v3544_v11 }
  0xf8   : > { %2342 = vmatpush1.msra.mxu0 %v3499_v8 }
  0xf9   : > { %1421 = vrot.lane.b32.xlu1 %v4084_v20, %s3378_s24  ;;  %v1171_v33 = vpop.permute.xlu1 %1170  ;;  %2410 = vmatprep.subr.mxu1 %v1517_v53  ;;  %v1169_v14 = vpop.permute.xlu0 %1168 }
  0xfa   : > { %1419 = vrot.lane.b32.xlu0 %v4087_v34, %s3378_s24  ;;  %v1224_v31 = vsel %vm1216_vm4, %v4017_v2, %v1169_v14  ;;  %v1225_v5 = vsel %vm1216_vm4, %v1169_v14, %v1171_v33  ;;  %2411 = vmatpush1.msra.mxu1 %v1516_v41  ;;  %v1097_v2 = vmul.f32 %v4035_v35, %v4050_v49 }
  0xfb   : > { %v1289_v54 = vmul.f32 %v1224_v31, %v4145_v45  ;;  %v1290_v11 = vmul.f32 %v1225_v5, %v4132_v6  ;;  %2412 = vmatprep.subr.mxu1 %v3554_v13  ;;  %v4245_v41 = vrot.slane %v4026_v9, %v3784_v48  ;;  %v4264_v14 = vrot.slane %v4026_v9, %v3790_v1 }
  0xfc   : > { %2413 = vmatpush1.msra.mxu1 %v3541_v10  ;;  %v4302_v31 = vrot.slane %v4026_v9, %v3835_v52 }
  0xfd   : > { %1425 = vrot.lane.b32.xlu1 %v4110_v0, %s3378_s24  ;;  %v4231_v8 = vpop.permute.xlu1 %1174  ;;  %2343 = vmatprep.subr.mxu0 %v1290_v11  ;;  %v1173_v24 = vpop.permute.xlu0 %1172 }
  0xfe   : > { %1423 = vrot.lane.b32.xlu0 %v4114_v58, %s3378_s24  ;;  %v1226_v13 = vsel %vm1216_vm4, %v1171_v33, %v1173_v24  ;;  %v1227_v10 = vsel %vm1216_vm4, %v1173_v24, %v4231_v8  ;;  %2344 = vmatpush1.msra.mxu0 %v1289_v54  ;;  %v579_v33 = vmul.f32 %v4132_v6, %v4139_v50 }
  0xff   : > { %2345 = vmatprep.subr.mxu0 %v1097_v2  ;;  %v1292_v15 = vmul.f32 %v1227_v10, %v4161_v12  ;;  %v1291_v35 = vmul.f32 %v1226_v13, %v4179_v46  ;;  %v1098_v6 = vmul.f32 %v4091_v38, %v4053_v32  ;;  %v4295_v38 = vld [vmem:[%s3421_s20 + $0xd0] sm:$0xff]  ;;  %v581_v54 = vmul.f32 %v4161_v12, %v4171_v26  ;;  %v4324_v2 = vld [vmem:[%s3421_s20 + $0xd8] sm:$0xff] }
 0x100   : > { %2346 = vmatpush1.msra.mxu0 %v1096_v30  ;;  %v5190_v12 = vmov 0.0  }
 0x101   : > { %1194 = vrot.lane.b32.xlu1 %v4087_v34, %s3380_s25  ;;  %v824_v36 = vpop.permute.xlu1 %823  ;;  %2347 = vmatprep.subr.mxu0 %v4154_v43  ;;  %v822_v28 = vpop.permute.xlu0 %821 }
 0x102   : > { %1192 = vrot.lane.b32.xlu0 %v3899_v55, %s3380_s25  ;;  %2414 = vmatprep.subr.mxu1 %v1292_v15  ;;  %v4255_v49 = vsel %vm859_vm0, %v4074_v56, %v822_v28  ;;  %v4258_v53 = vsel %vm859_vm0, %v822_v28, %v824_v36  ;;  %v1099_v55 = vmul.f32 %v4070_v51, %v4077_v27 }
 0x103   : > { %v1685_v43 = vmul.f32 %v4245_v41, %v4258_v53  ;;  %2348 = vmatpush1.msra.mxu0 %v3969_v60  ;;  %v578_v56 = vmul.f32 %v4145_v45, %v3951_v22  ;;  %2415 = vmatpush1.msra.mxu1 %v1291_v35  ;;  %v1684_v50 = vmul.f32 %v4264_v14, %v4255_v49  ;;  %v4298_v45 = vld [vmem:[%s3421_s20 + $0xc8] sm:$0xff] }
 0x104   : > { %2349 = vmatprep.subr.mxu0 %v579_v33  ;;  %2416 = vmatprep.subr.mxu1 %v1099_v55  ;;  %v4283_v51 = vrot.slane %v4026_v9, %v3798_v21  ;;  %v580_v9 = vmul.f32 %v4179_v46, %v4135_v47  ;;  %v4337_v46 = vrot.slane %v4125_v17, %v3784_v48 }
 0x105   : > { %1198 = vrot.lane.b32.xlu1 %v4114_v58, %s3380_s25  ;;  %v4279_v60 = vpop.permute.xlu1 %827  ;;  %v826_v22 = vpop.permute.xlu0 %825  ;;  %2350 = vmatpush1.msra.mxu0 %v578_v56  ;;  %v4351_v35 = vrot.slane %v4125_v17, %v3790_v1  ;;  %v4366_v33 = vrot.slane %v4125_v17, %v3798_v21 }
 0x106   : > { %1196 = vrot.lane.b32.xlu0 %v4084_v20, %s3380_s25  ;;  %v4289_v32 = vsel %vm859_vm0, %v826_v22, %v4279_v60  ;;  %2417 = vmatpush1.msra.mxu1 %v1098_v6  ;;  %v4292_v27 = vsel %vm859_vm0, %v824_v36, %v826_v22  ;;  %v4385_v22 = vrot.slane %v4125_v17, %v3835_v52 }
 0x107   : > { %2475 = vmatprep.subr.mxu0 %v1685_v43  ;;  %2418 = vmatprep.subr.mxu1 %v4188_v61  ;;  %v1687_v5 = vmul.f32 %v4283_v51, %v4289_v32  ;;  %v1686_v61 = vmul.f32 %v4302_v31, %v4292_v27  ;;  %v3381_v43 = vmov 0  }
 0x108   : > { %3326 = vmatmul.mubr.msk.f32.vlgmr.msra.gmra.mxu0 %vm2031_vm6, %v3861_v25  ;;  %2419 = vmatpush1.msra.mxu1 %v4150_v59  ;;  %v4321_v59 = vld [vmem:[%s3421_s20 + $0xe0] sm:$0xff] }
 0x109   : > { %2476 = vmatpush1.msra.mxu0 %v1684_v50  ;;  %v306_v11 = vpop.permute.xlu1 %305  ;;  %v304_v24 = vpop.permute.xlu0 %303  ;;  %847 = vrot.lane.b32.xlu1 %v4295_v38, %s3375_s21 }
 0x10a   : > { %845 = vrot.lane.b32.xlu0 %v4298_v45, %s3375_s21  ;;  %2420 = vmatprep.subr.mxu1 %v581_v54  ;;  %v4341_v30 = vsel %vm341_vm2, %v304_v24, %v306_v11  ;;  %v4345_v10 = vsel %vm341_vm2, %v4120_v3, %v304_v24 }
 0x10b   : > { %2421 = vmatpush1.msra.mxu1 %v580_v9  ;;  %2525 = vmatprep.mubr.f32.mxu0 %v5190_v12  ;;  %v1585_v3 = vmul.f32 %v4337_v46, %v4341_v30  ;;  %v1584_v55 = vmul.f32 %v4351_v35, %v4345_v10 }
 0x10c   : > { %2546 = vmatprep.subr.mxu1 %v1687_v5  ;;  %3327 = vmatmul.mubr.msk.f32.vlgmr.msra.gmra.mxu1 %vm2031_vm6, %v3861_v25 }
 0x10d   : > { %v4329_v47 = vpop.permute.xlu1 %309  ;;  %v308_v26 = vpop.permute.xlu0 %307  ;;  %2547 = vmatpush1.msra.mxu1 %v1686_v61  ;;  %851 = vrot.lane.b32.xlu1 %v4321_v59, %s3375_s21 }
 0x10e   : > { %849 = vrot.lane.b32.xlu0 %v4324_v2, %s3375_s21  ;;  %2596 = vmatprep.mubr.f32.mxu1 %v5190_v12  ;;  %v4379_v6 = vsel %vm341_vm2, %v306_v11, %v308_v26 }
 0x10f   : > { %3360 = vset.pattern.permute.xlu0 %v3381_v43  ;;  %v1586_v17 = vmul.f32 %v4385_v22, %v4379_v6 }
 0x111   : > { %v663_v13 = vpop.permute.xlu1 %662  ;;  %329 = vrot.lane.b32.xlu1 %v4295_v38, %s3376_s22 }
 0x112   : > { %v661_v15 = vpop.permute.xlu0 %660  ;;  %327 = vrot.lane.b32.xlu0 %v4298_v45, %s3376_s22 }
 0x113   : > { %v4357_v36 = vsel %vm698_vm1, %v4175_v37, %v661_v15  ;;  %v4360_v28 = vsel %vm698_vm1, %v661_v15, %v663_v13  ;;  %v4373_v37 = vsel %vm341_vm2, %v308_v26, %v4329_v47 }
 0x114   : > { %2477 = vmatprep.subr.mxu0 %v4360_v28  ;;  %v1587_v11 = vmul.f32 %v4366_v33, %v4373_v37 }
 0x115   : > { %2478 = vmatpush1.msra.mxu0 %v4357_v36  ;;  %v4376_v56 = vpop.permute.xlu1 %666  ;;  %333 = vrot.lane.b32.xlu1 %v4321_v59, %s3376_s22 }
 0x116   : > { %2479 = vmatprep.subr.mxu0 %v1585_v3  ;;  %v665_v50 = vpop.permute.xlu0 %664  ;;  %331 = vrot.lane.b32.xlu0 %v4324_v2, %s3376_s22 }
 0x117   : > { %v4390_v5 = vsel %vm698_vm1, %v663_v13, %v665_v50  ;;  %2480 = vmatpush1.msra.mxu0 %v1584_v55  ;;  %v4394_v54 = vsel %vm698_vm1, %v665_v50, %v4376_v56 }
 0x118   : > { %2548 = vmatprep.subr.mxu1 %v4394_v54 }
 0x119   : > { %2549 = vmatpush1.msra.mxu1 %v4390_v5  ;;  %v1406_v24 = vpop.permute.xlu1 %1405  ;;  %686 = vrot.lane.b32.xlu1 %v4295_v38, %s3377_s23 }
 0x11a   : > { %2550 = vmatprep.subr.mxu1 %v1587_v11  ;;  %v1404_v9 = vpop.permute.xlu0 %1403  ;;  %684 = vrot.lane.b32.xlu0 %v4298_v45, %s3377_s23 }
 0x11b   : > { %v1454_v61 = vsel %vm1441_vm3, %v4207_v42, %v1404_v9  ;;  %v1455_v26 = vsel %vm1441_vm3, %v1404_v9, %v1406_v24  ;;  %2551 = vmatpush1.msra.mxu1 %v1586_v17  ;;  %v3361_v9 = vld [vmem:[%s3421_s20 + $0x60] sm:$0xff] }
 0x11c   : > { %v1518_v13 = vmul.f32 %v1454_v61, %v4264_v14  ;;  %v1519_v15 = vmul.f32 %v1455_v26, %v4245_v41 }
 0x11d   : > { %v4411_v3 = vpop.permute.xlu1 %1409  ;;  %690 = vrot.lane.b32.xlu1 %v4321_v59, %s3377_s23 }
 0x11e   : > { %2481 = vmatprep.subr.mxu0 %v1519_v15  ;;  %v1408_v43 = vpop.permute.xlu0 %1407  ;;  %688 = vrot.lane.b32.xlu0 %v4324_v2, %s3377_s23 }
 0x11f   : > { %v1456_v42 = vsel %vm1441_vm3, %v1406_v24, %v1408_v43  ;;  %v1457_v55 = vsel %vm1441_vm3, %v1408_v43, %v4411_v3  ;;  %2482 = vmatpush1.msra.mxu0 %v1518_v13  ;;  %v1101_v43 = vmul.f32 %v4245_v41, %v4255_v49 }
 0x120   : > { %v1520_v50 = vmul.f32 %v1456_v42, %v4302_v31  ;;  %v1521_v11 = vmul.f32 %v1457_v55, %v4283_v51  ;;  %2483 = vmatprep.subr.mxu0 %v3657_v40  ;;  %v1100_v42 = vmul.f32 %v4264_v14, %v4081_v63 }
 0x121   : > { %v1179_v17 = vpop.permute.xlu1 %1178  ;;  %2484 = vmatpush1.msra.mxu0 %v3361_v9  ;;  %1429 = vrot.lane.b32.xlu1 %v4295_v38, %s3378_s24 }
 0x122   : > { %2552 = vmatprep.subr.mxu1 %v1521_v11  ;;  %v1177_v61 = vpop.permute.xlu0 %1176  ;;  %1427 = vrot.lane.b32.xlu0 %v4298_v45, %s3378_s24 }
 0x123   : > { %v1228_v24 = vsel %vm1216_vm4, %v4231_v8, %v1177_v61  ;;  %v1229_v26 = vsel %vm1216_vm4, %v1177_v61, %v1179_v17  ;;  %2553 = vmatpush1.msra.mxu1 %v1520_v50  ;;  %v583_v50 = vmul.f32 %v4337_v46, %v4345_v10 }
 0x124   : > { %v1293_v13 = vmul.f32 %v1228_v24, %v4351_v35  ;;  %v1294_v40 = vmul.f32 %v1229_v26, %v4337_v46  ;;  %2554 = vmatprep.subr.mxu1 %v3667_v44  ;;  %v582_v46 = vmul.f32 %v4351_v35, %v4167_v29  ;;  %v4506_v35 = vld [vmem:[%s3421_s20 + $0xf0] sm:$0xff]  ;;  %v4514_v24 = vld [vmem:[%s3421_s20 + $0xe8] sm:$0xff]  ;;  %v585_v26 = vmul.f32 %v4366_v33, %v4379_v6  ;;  %v4532_v6 = vld [vmem:[%s3421_s20 + $0xf8] sm:$0xff] }
 0x125   : > { %v4434_v15 = vpop.permute.xlu1 %1182  ;;  %2555 = vmatpush1.msra.mxu1 %v3654_v39  ;;  %1433 = vrot.lane.b32.xlu1 %v4321_v59, %s3378_s24  ;;  %v4451_v39 = vld [vmem:[%s5182_s1 + $0x21] ss:$2 sm:$0xff] }
 0x126   : > { %2485 = vmatprep.subr.mxu0 %v1294_v40  ;;  %v1181_v8 = vpop.permute.xlu0 %1180  ;;  %1431 = vrot.lane.b32.xlu0 %v4324_v2, %s3378_s24  ;;  %v4457_v63 = vrot.slane %v4451_v39, %v3591_v18  ;;  %v4492_v29 = vrot.slane %v4451_v39, %v3583_v16 }
 0x127   : > { %v1230_v44 = vsel %vm1216_vm4, %v1179_v17, %v1181_v8  ;;  %v1231_v55 = vsel %vm1216_vm4, %v1181_v8, %v4434_v15  ;;  %2486 = vmatpush1.msra.mxu0 %v1293_v13  ;;  %v1103_v17 = vmul.f32 %v4283_v51, %v4292_v27 }
 0x128   : > { %v1295_v41 = vmul.f32 %v1230_v44, %v4385_v22  ;;  %v1296_v49 = vmul.f32 %v1231_v55, %v4366_v33  ;;  %2487 = vmatprep.subr.mxu0 %v1101_v43  ;;  %v584_v43 = vmul.f32 %v4385_v22, %v4341_v30  ;;  %v4543_v22 = vld [vmem:[%s5182_s1 + $0x20] ss:$2 sm:$0xff] }
 0x129   : > { %2488 = vmatpush1.msra.mxu0 %v1100_v42  ;;  %1202 = vrot.lane.b32.xlu1 %v4298_v45, %s3380_s25 }
 0x12a   : > { %v832_v14 = vpop.permute.xlu1 %831  ;;  %2489 = vmatprep.subr.mxu0 %v4357_v36  ;;  %1200 = vrot.lane.b32.xlu0 %v4110_v0, %s3380_s25  ;;  %v4480_v0 = vrot.slane %v4451_v39, %v3605_v23  ;;  %v4510_v36 = vrot.slane %v4451_v39, %v3594_v19 }
 0x12b   : > { %2556 = vmatprep.subr.mxu1 %v1296_v49  ;;  %v830_v11 = vpop.permute.xlu0 %829  ;;  %2490 = vmatpush1.msra.mxu0 %v4185_v7 }
 0x12c   : > { %v4470_v9 = vsel %vm859_vm0, %v4279_v60, %v830_v11  ;;  %v4473_v61 = vsel %vm859_vm0, %v830_v11, %v832_v14  ;;  %2557 = vmatpush1.msra.mxu1 %v1295_v41  ;;  %2491 = vmatprep.subr.mxu0 %v583_v50  ;;  %v1102_v60 = vmul.f32 %v4302_v31, %v4258_v53 }
 0x12d   : > { %v1689_v51 = vmul.f32 %v4457_v63, %v4473_v61  ;;  %1206 = vrot.lane.b32.xlu1 %v4324_v2, %s3380_s25  ;;  %2558 = vmatprep.subr.mxu1 %v1103_v17  ;;  %v1688_v27 = vmul.f32 %v4480_v0, %v4470_v9  ;;  %v4564_v41 = vrot.slane %v4543_v22, %v3605_v23 }
 0x12e   : > { %v4488_v7 = vpop.permute.xlu1 %835  ;;  %1204 = vrot.lane.b32.xlu0 %v4295_v38, %s3380_s25  ;;  %2492 = vmatpush1.msra.mxu0 %v582_v46  ;;  %v4579_v50 = vrot.slane %v4543_v22, %v3583_v16 }
 0x12f   : > { %v834_v10 = vpop.permute.xlu0 %833  ;;  %2559 = vmatpush1.msra.mxu1 %v1102_v60  ;;  %2617 = vmatprep.subr.mxu0 %v1689_v51  ;;  %v4598_v60 = vrot.slane %v4543_v22, %v3594_v19 }
 0x130   : > { %v4499_v53 = vsel %vm859_vm0, %v832_v14, %v834_v10  ;;  %v4503_v31 = vsel %vm859_vm0, %v834_v10, %v4488_v7  ;;  %2560 = vmatprep.subr.mxu1 %v4390_v5  ;;  %3328 = vmatmul.mubr.msk.f32.vlgmr.msra.gmra.mxu0 %vm2031_vm6, %v3861_v25 }
 0x131   : > { %v1691_v13 = vmul.f32 %v4492_v29, %v4503_v31  ;;  %2561 = vmatpush1.msra.mxu1 %v4360_v28  ;;  %v1690_v5 = vmul.f32 %v4510_v36, %v4499_v53  ;;  %2618 = vmatpush1.msra.mxu0 %v1688_v27 }
 0x132   : > { %v314_v40 = vpop.permute.xlu1 %313  ;;  %855 = vrot.lane.b32.xlu1 %v4506_v35, %s3375_s21  ;;  %853 = vrot.lane.b32.xlu0 %v4514_v24, %s3375_s21 }
 0x133   : > { %v312_v33 = vpop.permute.xlu0 %311  ;;  %2562 = vmatprep.subr.mxu1 %v585_v26  ;;  %2667 = vmatprep.mubr.f32.mxu0 %v5190_v12 }
 0x134   : > { %2563 = vmatpush1.msra.mxu1 %v584_v43  ;;  %v4554_v8 = vsel %vm341_vm2, %v312_v33, %v314_v40  ;;  %v4558_v44 = vsel %vm341_vm2, %v4329_v47, %v312_v33 }
 0x135   : > { %2688 = vmatprep.subr.mxu1 %v1691_v13  ;;  %3329 = vmatmul.mubr.msk.f32.vlgmr.msra.gmra.mxu1 %vm2031_vm6, %v3861_v25  ;;  %v4550_v25 = vrot.slane %v4543_v22, %v3591_v18  ;;  %v1588_v11 = vmul.f32 %v4564_v41, %v4558_v44 }
 0x136   : > { %v4536_v30 = vpop.permute.xlu1 %317  ;;  %2689 = vmatpush1.msra.mxu1 %v1690_v5  ;;  %335 = vrot.lane.b32.xlu1 %v4514_v24, %s3376_s22 }
 0x137   : > { %v316_v28 = vpop.permute.xlu0 %315  ;;  %857 = vrot.lane.b32.xlu0 %v4532_v6, %s3375_s21  ;;  %2738 = vmatprep.mubr.f32.mxu1 %v5190_v12  ;;  %v1589_v47 = vmul.f32 %v4550_v25, %v4554_v8 }
 0x138   : > { %v4586_v17 = vsel %vm341_vm2, %v316_v28, %v4536_v30  ;;  %v4592_v46 = vsel %vm341_vm2, %v314_v40, %v316_v28 }
 0x139   : > { %v1591_v26 = vmul.f32 %v4579_v50, %v4586_v17  ;;  %v1590_v13 = vmul.f32 %v4598_v60, %v4592_v46 }
 0x13a   : > { %v671_v42 = vpop.permute.xlu1 %670  ;;  %339 = vrot.lane.b32.xlu1 %v4532_v6, %s3376_s22 }
 0x13b   : > { %v669_v55 = vpop.permute.xlu0 %668  ;;  %337 = vrot.lane.b32.xlu0 %v4506_v35, %s3376_s22 }
 0x13c   : > { %v4570_v49 = vsel %vm698_vm1, %v4376_v56, %v669_v55  ;;  %v4573_v14 = vsel %vm698_vm1, %v669_v55, %v671_v42 }
 0x13d   : > { %2619 = vmatprep.subr.mxu0 %v4573_v14 }
 0x13e   : > { %2620 = vmatpush1.msra.mxu0 %v4570_v49  ;;  %v4589_v56 = vpop.permute.xlu1 %674  ;;  %694 = vrot.lane.b32.xlu1 %v4506_v35, %s3377_s23 }
 0x13f   : > { %2621 = vmatprep.subr.mxu0 %v1589_v47  ;;  %v673_v51 = vpop.permute.xlu0 %672  ;;  %692 = vrot.lane.b32.xlu0 %v4514_v24, %s3377_s23 }
 0x140   : > { %v4603_v27 = vsel %vm698_vm1, %v671_v42, %v673_v51  ;;  %2622 = vmatpush1.msra.mxu0 %v1588_v11  ;;  %v4607_v10 = vsel %vm698_vm1, %v673_v51, %v4589_v56 }
 0x141   : > { %2690 = vmatprep.subr.mxu1 %v4607_v10 }
 0x142   : > { %2691 = vmatpush1.msra.mxu1 %v4603_v27  ;;  %v1414_v40 = vpop.permute.xlu1 %1413  ;;  %1435 = vrot.lane.b32.xlu1 %v4514_v24, %s3378_s24 }
 0x143   : > { %2692 = vmatprep.subr.mxu1 %v1591_v26  ;;  %v1412_v43 = vpop.permute.xlu0 %1411  ;;  %696 = vrot.lane.b32.xlu0 %v4532_v6, %s3377_s23 }
 0x144   : > { %v1458_v5 = vsel %vm1441_vm3, %v4411_v3, %v1412_v43  ;;  %v1459_v33 = vsel %vm1441_vm3, %v1412_v43, %v1414_v40  ;;  %2693 = vmatpush1.msra.mxu1 %v1590_v13  ;;  %v3362_v43 = vld [vmem:[%s3421_s20 + $0x80] sm:$0xff] }
 0x145   : > { %v1522_v28 = vmul.f32 %v1458_v5, %v4480_v0  ;;  %v1523_v42 = vmul.f32 %v1459_v33, %v4457_v63 }
 0x146   : > { %v4624_v55 = vpop.permute.xlu1 %1417  ;;  %1439 = vrot.lane.b32.xlu1 %v4532_v6, %s3378_s24 }
 0x147   : > { %2623 = vmatprep.subr.mxu0 %v1523_v42  ;;  %v1416_v47 = vpop.permute.xlu0 %1415  ;;  %1437 = vrot.lane.b32.xlu0 %v4506_v35, %s3378_s24 }
 0x148   : > { %v1460_v3 = vsel %vm1441_vm3, %v1414_v40, %v1416_v47  ;;  %v1461_v11 = vsel %vm1441_vm3, %v1416_v47, %v4624_v55  ;;  %2624 = vmatpush1.msra.mxu0 %v1522_v28  ;;  %v1105_v47 = vmul.f32 %v4457_v63, %v4470_v9  ;;  %v4665_v9 = vrot.slane %v4451_v39, %v3784_v48 }
 0x149   : > { %v1524_v51 = vmul.f32 %v1460_v3, %v4510_v36  ;;  %v1525_v26 = vmul.f32 %v1461_v11, %v4492_v29  ;;  %2625 = vmatprep.subr.mxu0 %v3881_v4  ;;  %v587_v11 = vmul.f32 %v4550_v25, %v4558_v44 }
 0x14a   : > { %v1187_v13 = vpop.permute.xlu1 %1186  ;;  %2626 = vmatpush1.msra.mxu0 %v3362_v43  ;;  %1210 = vrot.lane.b32.xlu1 %v4514_v24, %s3380_s25 }
 0x14b   : > { %2694 = vmatprep.subr.mxu1 %v1525_v26  ;;  %v1185_v5 = vpop.permute.xlu0 %1184  ;;  %1208 = vrot.lane.b32.xlu0 %v4321_v59, %s3380_s25 }
 0x14c   : > { %v1232_v40 = vsel %vm1216_vm4, %v4434_v15, %v1185_v5  ;;  %v1233_v33 = vsel %vm1216_vm4, %v1185_v5, %v1187_v13  ;;  %2695 = vmatpush1.msra.mxu1 %v1524_v51  ;;  %v1104_v15 = vmul.f32 %v4480_v0, %v4289_v32  ;;  %v586_v32 = vmul.f32 %v4564_v41, %v4373_v37 }
 0x14d   : > { %v1297_v28 = vmul.f32 %v1232_v40, %v4564_v41  ;;  %v1298_v4 = vmul.f32 %v1233_v33, %v4550_v25  ;;  %2696 = vmatprep.subr.mxu1 %v3902_v57  ;;  %v4671_v0 = vrot.slane %v4451_v39, %v3790_v1  ;;  %v1106_v25 = vmul.f32 %v4510_v36, %v4473_v61  ;;  %v4708_v36 = vld [vmem:[%s5183_s2] sm:$0xf] }
 0x14e   : > { %v4647_v42 = vpop.permute.xlu1 %1190  ;;  %2697 = vmatpush1.msra.mxu1 %v3866_v62  ;;  %1214 = vrot.lane.b32.xlu1 %v4532_v6, %s3380_s25  ;;  %v4702_v61 = vrot.slane %v4451_v39, %v3835_v52  ;;  %v4737_v33 = vrot.slane %v4543_v22, %v3784_v48 }
 0x14f   : > { %2627 = vmatprep.subr.mxu0 %v1298_v4  ;;  %v1189_v59 = vpop.permute.xlu0 %1188  ;;  %1212 = vrot.lane.b32.xlu0 %v4506_v35, %s3380_s25 }
 0x150   : > { %v1234_v57 = vsel %vm1216_vm4, %v1187_v13, %v1189_v59  ;;  %v1235_v3 = vsel %vm1216_vm4, %v1189_v59, %v4647_v42  ;;  %2628 = vmatpush1.msra.mxu0 %v1297_v28  ;;  %v1107_v13 = vmul.f32 %v4492_v29, %v4499_v53 }
 0x151   : > { %v1299_v62 = vmul.f32 %v1234_v57, %v4598_v60  ;;  %v1300_v63 = vmul.f32 %v1235_v3, %v4579_v50  ;;  %2629 = vmatprep.subr.mxu0 %v1105_v47 }
 0x152   : > { %2630 = vmatpush1.msra.mxu0 %v1104_v15  ;;  %v4748_v15 = vrot.slane %v4543_v22, %v3790_v1 }
 0x153   : > { %v840_v51 = vpop.permute.xlu1 %839  ;;  %2631 = vmatprep.subr.mxu0 %v4570_v49  ;;  %2698 = vmatprep.subr.mxu1 %v1300_v63  ;;  %v838_v26 = vpop.permute.xlu0 %837  ;;  %v588_v49 = vmul.f32 %v4598_v60, %v4554_v8  ;;  %v2025_v8 = vld [vmem:[%s5184_s3] sm:$0xf]  ;;  %v4761_v63 = vrot.slane %v4543_v22, %v3798_v21 }
 0x154   : > { %v4680_v43 = vsel %vm859_vm0, %v4488_v7, %v838_v26  ;;  %v4683_v37 = vsel %vm859_vm0, %v838_v26, %v840_v51  ;;  %2632 = vmatpush1.msra.mxu0 %v4394_v54  ;;  %2699 = vmatpush1.msra.mxu1 %v1299_v62  ;;  %v4694_v7 = vrot.slane %v4451_v39, %v3798_v21 }
 0x155   : > { %v1692_v44 = vmul.f32 %v4671_v0, %v4680_v43  ;;  %v1693_v41 = vmul.f32 %v4665_v9, %v4683_v37  ;;  %2633 = vmatprep.subr.mxu0 %v587_v11  ;;  %2700 = vmatprep.subr.mxu1 %v1107_v13  ;;  %v589_v54 = vmul.f32 %v4579_v50, %v4592_v46 }
 0x156   : > { %2634 = vmatpush1.msra.mxu0 %v586_v32  ;;  %2701 = vmatpush1.msra.mxu1 %v1106_v25  ;;  %v4778_v26 = vrot.slane %v4543_v22, %v3835_v52 }
 0x157   : > { %v4696_v29 = vpop.permute.xlu1 %843  ;;  %2759 = vmatprep.subr.mxu0 %v1693_v41  ;;  %2702 = vmatprep.subr.mxu1 %v4603_v27 }
 0x158   : > { %v842_v53 = vpop.permute.xlu0 %841  ;;  %3330 = vmatmul.mubr.msk.f32.vlgmr.msra.gmra.mxu0 %vm2031_vm6, %v4708_v36  ;;  %2703 = vmatpush1.msra.mxu1 %v4573_v14 }
 0x159   : > { %v4715_v50 = vsel %vm859_vm0, %v840_v51, %v842_v53  ;;  %v4719_v39 = vsel %vm859_vm0, %v842_v53, %v4696_v29  ;;  %2760 = vmatpush1.msra.mxu0 %v1692_v44  ;;  %2704 = vmatprep.subr.mxu1 %v589_v54 }
 0x15a   : > { %v1694_v46 = vmul.f32 %v4702_v61, %v4715_v50  ;;  %v1695_v27 = vmul.f32 %v4694_v7, %v4719_v39  ;;  %2705 = vmatpush1.msra.mxu1 %v588_v49  ;;  %2809 = vmatprep.mubr.f32.mxu0 %v5190_v12 }
 0x15b   : > { %v322_v5 = vpop.permute.xlu1 %321  ;;  %3331 = vmatmul.mubr.msk.f32.vlgmr.msra.gmra.mxu1 %vm2031_vm6, %v4708_v36  ;;  %2028 = vperm.xlu0 %3360, %v2025_v8  }
 0x15c   : > { %2830 = vmatprep.subr.mxu1 %v1695_v27  ;;  %v320_v60 = vpop.permute.xlu0 %319  ;;  %2880 = vmatprep.mubr.f32.mxu1 %v5190_v12 }
 0x15d   : > { %2831 = vmatpush1.msra.mxu1 %v1694_v46  ;;  %v4740_v28 = vsel %vm341_vm2, %v320_v60, %v322_v5  ;;  %v4744_v47 = vsel %vm341_vm2, %v4536_v30, %v320_v60 }
 0x15e   : > { %v1593_v62 = vmul.f32 %v4737_v33, %v4740_v28  ;;  %v1592_v30 = vmul.f32 %v4748_v15, %v4744_v47 }
 0x15f   : > { %v4733_v14 = vpop.permute.xlu1 %325 }
 0x160   : > { %v324_v40 = vpop.permute.xlu0 %323 }
 0x161   : > { %v4768_v32 = vsel %vm341_vm2, %v324_v40, %v4733_v14  ;;  %v4774_v11 = vsel %vm341_vm2, %v322_v5, %v324_v40 }
 0x162   : > { %v1595_v44 = vmul.f32 %v4761_v63, %v4768_v32  ;;  %v1594_v41 = vmul.f32 %v4778_v26, %v4774_v11 }
 0x163   : > { %v679_v4 = vpop.permute.xlu1 %678 }
 0x164   : > { %v677_v59 = vpop.permute.xlu0 %676 }
 0x165   : > { %v4752_v57 = vsel %vm698_vm1, %v4589_v56, %v677_v59  ;;  %v4755_v3 = vsel %vm698_vm1, %v677_v59, %v679_v4 }
 0x166   : > { %2761 = vmatprep.subr.mxu0 %v4755_v3 }
 0x167   : > { %2762 = vmatpush1.msra.mxu0 %v4752_v57  ;;  %v4771_v56 = vpop.permute.xlu1 %682 }
 0x168   : > { %2763 = vmatprep.subr.mxu0 %v1593_v62  ;;  %v681_v51 = vpop.permute.xlu0 %680  ;;  %v3364_v62 = vld [vmem:[%s3421_s20 + $0xa0] sm:$0xff] }
 0x169   : > { %v4781_v13 = vsel %vm698_vm1, %v679_v4, %v681_v51  ;;  %2764 = vmatpush1.msra.mxu0 %v1592_v30  ;;  %v4785_v25 = vsel %vm698_vm1, %v681_v51, %v4771_v56 }
 0x16a   : > { %2832 = vmatprep.subr.mxu1 %v4785_v25 }
 0x16b   : > { %2833 = vmatpush1.msra.mxu1 %v4781_v13  ;;  %v1422_v22 = vpop.permute.xlu1 %1421 }
 0x16c   : > { %2834 = vmatprep.subr.mxu1 %v1595_v44  ;;  %v1420_v54 = vpop.permute.xlu0 %1419 }
 0x16d   : > { %v1462_v53 = vsel %vm1441_vm3, %v4624_v55, %v1420_v54  ;;  %v1463_v49 = vsel %vm1441_vm3, %v1420_v54, %v1422_v22  ;;  %2835 = vmatpush1.msra.mxu1 %v1594_v41 }
 0x16e   : > { %v1526_v46 = vmul.f32 %v1462_v53, %v4671_v0  ;;  %v1527_v27 = vmul.f32 %v1463_v49, %v4665_v9  ;;  %v4823_v49 = vld [vmem:[%s5182_s1 + $0x31] ss:$2 sm:$0xff] }
 0x16f   : > { %v4798_v5 = vpop.permute.xlu1 %1425 }
 0x170   : > { %2765 = vmatprep.subr.mxu0 %v1527_v27  ;;  %v1424_v8 = vpop.permute.xlu0 %1423  ;;  %v591_v27 = vmul.f32 %v4737_v33, %v4744_v47 }
 0x171   : > { %v1464_v60 = vsel %vm1441_vm3, %v1422_v22, %v1424_v8  ;;  %v1465_v40 = vsel %vm1441_vm3, %v1424_v8, %v4798_v5  ;;  %2766 = vmatpush1.msra.mxu0 %v1526_v46 }
 0x172   : > { %v1528_v4 = vmul.f32 %v1464_v60, %v4702_v61  ;;  %v1529_v55 = vmul.f32 %v1465_v40, %v4694_v7  ;;  %2767 = vmatprep.subr.mxu0 %v4087_v34  ;;  %v1109_v34 = vmul.f32 %v4665_v9, %v4680_v43  ;;  %v4832_v43 = vrot.slane %v4823_v49, %v3591_v18 }
 0x173   : > { %v1195_v59 = vpop.permute.xlu1 %1194  ;;  %2768 = vmatpush1.msra.mxu0 %v3364_v62  ;;  %v1111_v40 = vmul.f32 %v4694_v7, %v4715_v50  ;;  %v4861_v7 = vrot.slane %v4823_v49, %v3583_v16  ;;  %v592_v50 = vmul.f32 %v4778_v26, %v4740_v28 }
 0x174   : > { %2836 = vmatprep.subr.mxu1 %v1529_v55  ;;  %v1193_v30 = vpop.permute.xlu0 %1192 }
 0x175   : > { %v1236_v51 = vsel %vm1216_vm4, %v4647_v42, %v1193_v30  ;;  %v1237_v44 = vsel %vm1216_vm4, %v1193_v30, %v1195_v59  ;;  %2837 = vmatpush1.msra.mxu1 %v1528_v4  ;;  %v1108_v42 = vmul.f32 %v4671_v0, %v4503_v31  ;;  %v590_v31 = vmul.f32 %v4748_v15, %v4586_v17 }
 0x176   : > { %v1301_v41 = vmul.f32 %v1236_v51, %v4748_v15  ;;  %v1302_v22 = vmul.f32 %v1237_v44, %v4737_v33  ;;  %2838 = vmatprep.subr.mxu1 %v4114_v58  ;;  %v4838_v0 = vrot.slane %v4823_v49, %v3605_v23  ;;  %v1110_v33 = vmul.f32 %v4702_v61, %v4683_v37 }
 0x177   : > { %v4813_v54 = vpop.permute.xlu1 %1198  ;;  %2839 = vmatpush1.msra.mxu1 %v4084_v20  ;;  %v4869_v37 = vrot.slane %v4823_v49, %v3594_v19 }
 0x178   : > { %2769 = vmatprep.subr.mxu0 %v1302_v22  ;;  %v1197_v53 = vpop.permute.xlu0 %1196 }
 0x179   : > { %v1238_v46 = vsel %vm1216_vm4, %v1195_v59, %v1197_v53  ;;  %v1239_v58 = vsel %vm1216_vm4, %v1197_v53, %v4813_v54  ;;  %2770 = vmatpush1.msra.mxu0 %v1301_v41  ;;  %v4897_v59 = vld [vmem:[%s5182_s1 + $0x30] ss:$2 sm:$0xff] }
 0x17a   : > { %v1303_v20 = vmul.f32 %v1238_v46, %v4778_v26  ;;  %v1304_v9 = vmul.f32 %v1239_v58, %v4761_v63  ;;  %2771 = vmatprep.subr.mxu0 %v1109_v34  ;;  %v4901_v62 = vrot.slane %v4897_v59, %v3591_v18  ;;  %v4912_v22 = vrot.slane %v4897_v59, %v3605_v23 }
 0x17b   : > { %2772 = vmatpush1.msra.mxu0 %v1108_v42  ;;  %v848_v8 = vpop.permute.xlu1 %847  ;;  %v4925_v42 = vrot.slane %v4897_v59, %v3583_v16  ;;  %v4942_v16 = vrot.slane %v4897_v59, %v3594_v19 }
 0x17c   : > { %2773 = vmatprep.subr.mxu0 %v4752_v57  ;;  %2840 = vmatprep.subr.mxu1 %v1304_v9  ;;  %v846_v60 = vpop.permute.xlu0 %845 }
 0x17d   : > { %v4847_v4 = vsel %vm859_vm0, %v4696_v29, %v846_v60  ;;  %v4850_v17 = vsel %vm859_vm0, %v846_v60, %v848_v8  ;;  %2774 = vmatpush1.msra.mxu0 %v4607_v10  ;;  %2841 = vmatpush1.msra.mxu1 %v1303_v20  ;;  %v593_v10 = vmul.f32 %v4761_v63, %v4774_v11 }
 0x17e   : > { %v1696_v47 = vmul.f32 %v4838_v0, %v4847_v4  ;;  %v1697_v15 = vmul.f32 %v4832_v43, %v4850_v17  ;;  %2775 = vmatprep.subr.mxu0 %v591_v27  ;;  %2842 = vmatprep.subr.mxu1 %v1111_v40 }
 0x17f   : > { %2776 = vmatpush1.msra.mxu0 %v590_v31  ;;  %2843 = vmatpush1.msra.mxu1 %v1110_v33  ;;  %v4863_v29 = vpop.permute.xlu1 %851 }
 0x180   : > { %2901 = vmatprep.subr.mxu0 %v1697_v15  ;;  %2844 = vmatprep.subr.mxu1 %v4781_v13  ;;  %v850_v61 = vpop.permute.xlu0 %849 }
 0x181   : > { %3332 = vmatmul.mubr.msk.f32.vlgmr.msra.gmra.mxu0 %vm2031_vm6, %v4708_v36  ;;  %v4877_v57 = vsel %vm859_vm0, %v848_v8, %v850_v61  ;;  %v4881_v55 = vsel %vm859_vm0, %v850_v61, %v4863_v29  ;;  %2845 = vmatpush1.msra.mxu1 %v4755_v3 }
 0x182   : > { %2902 = vmatpush1.msra.mxu0 %v1696_v47  ;;  %v1698_v63 = vmul.f32 %v4869_v37, %v4877_v57  ;;  %v1699_v11 = vmul.f32 %v4861_v7, %v4881_v55  ;;  %2846 = vmatprep.subr.mxu1 %v593_v10 }
 0x183   : > { %2847 = vmatpush1.msra.mxu1 %v592_v50  ;;  %v330_v13 = vpop.permute.xlu1 %329  ;;  %2951 = vmatprep.mubr.f32.mxu0 %v5190_v12 }
 0x184   : > { %2972 = vmatprep.subr.mxu1 %v1699_v11  ;;  %v328_v28 = vpop.permute.xlu0 %327  ;;  %3333 = vmatmul.mubr.msk.f32.vlgmr.msra.gmra.mxu1 %vm2031_vm6, %v4708_v36 }
 0x185   : > { %2973 = vmatpush1.msra.mxu1 %v1698_v63  ;;  %3022 = vmatprep.mubr.f32.mxu1 %v5190_v12  ;;  %v4904_v30 = vsel %vm341_vm2, %v328_v28, %v330_v13  ;;  %v4908_v44 = vsel %vm341_vm2, %v4733_v14, %v328_v28 }
 0x186   : > { %v1597_v53 = vmul.f32 %v4901_v62, %v4904_v30  ;;  %v1596_v23 = vmul.f32 %v4912_v22, %v4908_v44 }
 0x187   : > { %v4892_v3 = vpop.permute.xlu1 %333 }
 0x188   : > { %v332_v26 = vpop.permute.xlu0 %331 }
 0x189   : > { %v4932_v14 = vsel %vm341_vm2, %v332_v26, %v4892_v3  ;;  %v4938_v46 = vsel %vm341_vm2, %v330_v13, %v332_v26  ;;  %v3365_v13 = vld [vmem:[%s3421_s20 + $0xc0] sm:$0xff] }
 0x18a   : > { %v1599_v31 = vmul.f32 %v4925_v42, %v4932_v14  ;;  %v1598_v27 = vmul.f32 %v4942_v16, %v4938_v46 }
 0x18b   : > { %v687_v51 = vpop.permute.xlu1 %686 }
 0x18c   : > { %v685_v41 = vpop.permute.xlu0 %684 }
 0x18d   : > { %v4916_v34 = vsel %vm698_vm1, %v4771_v56, %v685_v41  ;;  %v4919_v18 = vsel %vm698_vm1, %v685_v41, %v687_v51 }
 0x18e   : > { %2903 = vmatprep.subr.mxu0 %v4919_v18 }
 0x18f   : > { %2904 = vmatpush1.msra.mxu0 %v4916_v34  ;;  %v4935_v56 = vpop.permute.xlu1 %690 }
 0x190   : > { %2905 = vmatprep.subr.mxu0 %v1597_v53  ;;  %v689_v58 = vpop.permute.xlu0 %688 }
 0x191   : > { %v4945_v20 = vsel %vm698_vm1, %v687_v51, %v689_v58  ;;  %2906 = vmatpush1.msra.mxu0 %v1596_v23  ;;  %v4949_v9 = vsel %vm698_vm1, %v689_v58, %v4935_v56 }
 0x192   : > { %2974 = vmatprep.subr.mxu1 %v4949_v9 }
 0x193   : > { %2975 = vmatpush1.msra.mxu1 %v4945_v20  ;;  %v1430_v19 = vpop.permute.xlu1 %1429 }
 0x194   : > { %2976 = vmatprep.subr.mxu1 %v1599_v31  ;;  %v1428_v8 = vpop.permute.xlu0 %1427 }
 0x195   : > { %v1466_v60 = vsel %vm1441_vm3, %v4798_v5, %v1428_v8  ;;  %v1467_v40 = vsel %vm1441_vm3, %v1428_v8, %v1430_v19  ;;  %2977 = vmatpush1.msra.mxu1 %v1598_v27  ;;  %v5002_v8 = vrot.slane %v4823_v49, %v3790_v1 }
 0x196   : > { %v1530_v33 = vmul.f32 %v1466_v60, %v4838_v0  ;;  %v1531_v47 = vmul.f32 %v1467_v40, %v4832_v43 }
 0x197   : > { %v4962_v15 = vpop.permute.xlu1 %1433 }
 0x198   : > { %2907 = vmatprep.subr.mxu0 %v1531_v47  ;;  %v1432_v10 = vpop.permute.xlu0 %1431 }
 0x199   : > { %v1468_v61 = vsel %vm1441_vm3, %v1430_v19, %v1432_v10  ;;  %v1469_v50 = vsel %vm1441_vm3, %v1432_v10, %v4962_v15  ;;  %2908 = vmatpush1.msra.mxu0 %v1530_v33 }
 0x19a   : > { %v1532_v63 = vmul.f32 %v1468_v61, %v4869_v37  ;;  %v1533_v5 = vmul.f32 %v1469_v50, %v4861_v7  ;;  %2909 = vmatprep.subr.mxu0 %v4298_v45  ;;  %v1113_v45 = vmul.f32 %v4832_v43, %v4847_v4  ;;  %v1115_v43 = vmul.f32 %v4861_v7, %v4877_v57 }
 0x19b   : > { %v1203_v11 = vpop.permute.xlu1 %1202  ;;  %2910 = vmatpush1.msra.mxu0 %v3365_v13  ;;  %v594_v4 = vmul.f32 %v4912_v22, %v4768_v32  ;;  %v1114_v7 = vmul.f32 %v4869_v37, %v4850_v17  ;;  %v5028_v37 = vrot.slane %v4823_v49, %v3835_v52  ;;  %v5054_v61 = vrot.slane %v4897_v59, %v3790_v1 }
 0x19c   : > { %2978 = vmatprep.subr.mxu1 %v1533_v5  ;;  %v1201_v28 = vpop.permute.xlu0 %1200  ;;  %v5058_v50 = vrot.slane %v4897_v59, %v3798_v21 }
 0x19d   : > { %v1240_v26 = vsel %vm1216_vm4, %v4813_v54, %v1201_v28  ;;  %v1241_v51 = vsel %vm1216_vm4, %v1201_v28, %v1203_v11  ;;  %2979 = vmatpush1.msra.mxu1 %v1532_v63  ;;  %v1112_v54 = vmul.f32 %v4838_v0, %v4719_v39  ;;  %v595_v39 = vmul.f32 %v4901_v62, %v4908_v44 }
 0x19e   : > { %v1305_v41 = vmul.f32 %v1240_v26, %v4912_v22  ;;  %v1306_v53 = vmul.f32 %v1241_v51, %v4901_v62  ;;  %2980 = vmatprep.subr.mxu1 %v4324_v2 }
 0x19f   : > { %v4977_v23 = vpop.permute.xlu1 %1206  ;;  %2981 = vmatpush1.msra.mxu1 %v4295_v38  ;;  %v4991_v38 = vrot.slane %v4823_v49, %v3784_v48 }
 0x1a0   : > { %2911 = vmatprep.subr.mxu0 %v1306_v53  ;;  %v1205_v58 = vpop.permute.xlu0 %1204 }
 0x1a1   : > { %v1242_v31 = vsel %vm1216_vm4, %v1203_v11, %v1205_v58  ;;  %v1243_v27 = vsel %vm1216_vm4, %v1205_v58, %v4977_v23  ;;  %2912 = vmatpush1.msra.mxu0 %v1305_v41 }
 0x1a2   : > { %v1307_v2 = vmul.f32 %v1242_v31, %v4942_v16  ;;  %v1308_v19 = vmul.f32 %v1243_v27, %v4925_v42  ;;  %2913 = vmatprep.subr.mxu0 %v1113_v45 }
 0x1a3   : > { %2914 = vmatpush1.msra.mxu0 %v1112_v54 }
 0x1a4   : > { %v856_v0 = vpop.permute.xlu1 %855  ;;  %2915 = vmatprep.subr.mxu0 %v4916_v34  ;;  %2982 = vmatprep.subr.mxu1 %v1308_v19  ;;  %v854_v60 = vpop.permute.xlu0 %853  ;;  %v596_v34 = vmul.f32 %v4942_v16, %v4904_v30 }
 0x1a5   : > { %2916 = vmatpush1.msra.mxu0 %v4785_v25  ;;  %2983 = vmatpush1.msra.mxu1 %v1307_v2  ;;  %v5009_v57 = vsel %vm859_vm0, %v4863_v29, %v854_v60  ;;  %v5012_v62 = vsel %vm859_vm0, %v854_v60, %v856_v0  ;;  %v5020_v25 = vrot.slane %v4823_v49, %v3798_v21 }
 0x1a6   : > { %2917 = vmatprep.subr.mxu0 %v595_v39  ;;  %2984 = vmatprep.subr.mxu1 %v1115_v43  ;;  %v1700_v32 = vmul.f32 %v5002_v8, %v5009_v57  ;;  %v1701_v44 = vmul.f32 %v4991_v38, %v5012_v62  ;;  %v597_v29 = vmul.f32 %v4925_v42, %v4938_v46 }
 0x1a7   : > { %2918 = vmatpush1.msra.mxu0 %v594_v4  ;;  %2985 = vmatpush1.msra.mxu1 %v1114_v7  ;;  %v3366_v4 = vld [vmem:[%s3421_s20 + $0xe0] sm:$0xff]  ;;  %v1117_v7 = vmul.f32 %v4991_v38, %v5009_v57  ;;  %v2101_v57 = vpop.f32.mrf.mxu0  ;;  %s3341_s20 = sshll.u32 %s5192_s16, 7 }
 0x1a8   : > { %v336_v17 = vpop.permute.xlu1 %335  ;;  %3334 = vmatmul.mubr.msk.f32.vlgmr.msra.gmra.mxu0 %vm2031_vm6, %v4708_v36  ;;  %2986 = vmatprep.subr.mxu1 %v4945_v20  ;;  %v529_v20 = vrot.slane %v4897_v59, %v3784_v48  ;;  %s5132_s27 = scalar_lea.vmem %s5185_s4, %s3341_s20 }
 0x1a9   : > { %3043 = vmatprep.subr.mxu0 %v1701_v44  ;;  %v858_v22 = vpop.permute.xlu0 %857  ;;  %2987 = vmatpush1.msra.mxu1 %v4919_v18  ;;  %v370_v47 = vsel %vm341_vm2, %v4892_v3, %v336_v17  ;;  %v5068_v3 = vrot.slane %v4897_v59, %v3835_v52 }
 0x1aa   : > { %v5034_v40 = vsel %vm859_vm0, %v856_v0, %v858_v22  ;;  %v1671_v33 = vsel %vm859_vm0, %v858_v22, 0.0  ;;  %3044 = vmatpush1.msra.mxu0 %v1700_v32  ;;  %2988 = vmatprep.subr.mxu1 %v597_v29  ;;  %v1600_v1 = vmul.f32 %v5054_v61, %v370_v47  ;;  %v1116_v32 = vmul.f32 %v5002_v8, %v4881_v55 }
 0x1ab   : > { %v1702_v42 = vmul.f32 %v5028_v37, %v5034_v40  ;;  %v1703_v49 = vmul.f32 %v1671_v33, %v5020_v25  ;;  %3093 = vmatprep.mubr.f32.mxu0 %v5190_v12  ;;  %2989 = vmatpush1.msra.mxu1 %v596_v34  ;;  %v598_v55 = vmul.f32 %v5054_v61, %v4932_v14  ;;  %v2172_v14 = vpop.f32.mrf.mxu1 }
 0x1ac   : > { %v340_v46 = vpop.permute.xlu1 %339  ;;  %3335 = vmatmul.mubr.msk.f32.vlgmr.msra.gmra.mxu1 %vm2031_vm6, %v4708_v36 }
 0x1ad   : > { %3114 = vmatprep.subr.mxu1 %v1703_v49  ;;  %v338_v30 = vpop.permute.xlu0 %337  ;;  %3164 = vmatprep.mubr.f32.mxu1 %v5190_v12  ;;  %v1571_v48 = vsel %vm341_vm2, %v340_v46, 0.0 }
 0x1ae   : > { %3115 = vmatpush1.msra.mxu1 %v1702_v42  ;;  %v5046_v18 = vsel %vm341_vm2, %v336_v17, %v338_v30  ;;  %v5074_v21 = vsel %vm341_vm2, %v338_v30, %v340_v46  ;;  %v1603_v13 = vmul.f32 %v1571_v48, %v5058_v50  ;;  %v599_v17 = vmul.f32 %v529_v20, %v370_v47 }
 0x1af   : > { %v1601_v5 = vmul.f32 %v529_v20, %v5046_v18  ;;  %v1602_v52 = vmul.f32 %v5068_v3, %v5074_v21  ;;  %v601_v29 = vmul.f32 %v5058_v50, %v5074_v21 }
 0x1b0   : > { %v695_v16 = vpop.permute.xlu1 %694 }
 0x1b1   : > { %v693_v10 = vpop.permute.xlu0 %692 }
 0x1b2   : > { %v727_v12 = vsel %vm698_vm1, %v4935_v56, %v693_v10  ;;  %v5063_v63 = vsel %vm698_vm1, %v693_v10, %v695_v16 }
 0x1b3   : > { %3045 = vmatprep.subr.mxu0 %v5063_v63 }
 0x1b4   : > { %3046 = vmatpush1.msra.mxu0 %v727_v12  ;;  %v1436_v56 = vpop.permute.xlu1 %1435 }
 0x1b5   : > { %3047 = vmatprep.subr.mxu0 %v1601_v5  ;;  %v697_v11 = vpop.permute.xlu0 %696  ;;  %v1470_v26 = vsel %vm1441_vm3, %v4962_v15, %v1436_v56 }
 0x1b6   : > { %v729_v28 = vsel %vm698_vm1, %v695_v16, %v697_v11  ;;  %3048 = vmatpush1.msra.mxu0 %v1600_v1  ;;  %3344 = vmatprep.subr.msk.mxu1 %vm698_vm1, %v697_v11  ;;  %v1534_v27 = vmul.f32 %v1470_v26, %v5002_v8  ;;  %v1118_v8 = vmul.f32 %v5028_v37, %v5012_v62 }
 0x1b7   : > { %3117 = vmatpush1.msra.mxu1 %v729_v28  ;;  %v600_v62 = vmul.f32 %v5068_v3, %v5046_v18 }
 0x1b8   : > { %3118 = vmatprep.subr.mxu1 %v1603_v13  ;;  %v1440_v59 = vpop.permute.xlu1 %1439 }
 0x1b9   : > { %v1505_v51 = vsel %vm1441_vm3, %v1440_v59, 0.0  ;;  %3119 = vmatpush1.msra.mxu1 %v1602_v52  ;;  %v1438_v41 = vpop.permute.xlu0 %1437 }
 0x1ba   : > { %v1537_v53 = vmul.f32 %v1505_v51, %v5020_v25  ;;  %v1471_v45 = vsel %vm1441_vm3, %v1436_v56, %v1438_v41  ;;  %v1472_v58 = vsel %vm1441_vm3, %v1438_v41, %v1440_v59 }
 0x1bb   : > { %v1535_v54 = vmul.f32 %v1471_v45, %v4991_v38  ;;  %v1536_v31 = vmul.f32 %v1472_v58, %v5028_v37  ;;  %v1119_v38 = vmul.f32 %v5020_v25, %v5034_v40  ;;  %v2174_v25 = vpop.f32.mrf.mxu1 }
 0x1bc   : > { %v1211_v2 = vpop.permute.xlu1 %1210  ;;  %3120 = vmatprep.subr.mxu1 %v1537_v53 }
 0x1bd   : > { %3049 = vmatprep.subr.mxu0 %v1535_v54  ;;  %v1209_v15 = vpop.permute.xlu0 %1208  ;;  %3121 = vmatpush1.msra.mxu1 %v1536_v31  ;;  %v2314_v22 = vpop.f32.mrf.mxu1 }
 0x1be   : > { %v1244_v19 = vsel %vm1216_vm4, %v4977_v23, %v1209_v15  ;;  %v1245_v43 = vsel %vm1216_vm4, %v1209_v15, %v1211_v2  ;;  %3050 = vmatpush1.msra.mxu0 %v1534_v27  ;;  %3122 = vmatprep.subr.mxu1 %v4532_v6 }
 0x1bf   : > { %v1309_v39 = vmul.f32 %v1244_v19, %v5054_v61  ;;  %v1310_v0 = vmul.f32 %v1245_v43, %v529_v20  ;;  %3051 = vmatprep.subr.mxu0 %v4514_v24  ;;  %3123 = vmatpush1.msra.mxu1 %v4506_v35  ;;  %v2316_v40 = vpop.f32.mrf.mxu1 }
 0x1c0   : > { %3052 = vmatpush1.msra.mxu0 %v3366_v4  ;;  %v1215_v60 = vpop.permute.xlu1 %1214 }
 0x1c1   : > { %3053 = vmatprep.subr.mxu0 %v1310_v0  ;;  %v1213_v23 = vpop.permute.xlu0 %1212 }
 0x1c2   : > { %v1246_v6 = vsel %vm1216_vm4, %v1211_v2, %v1213_v23  ;;  %v1247_v44 = vsel %vm1216_vm4, %v1213_v23, %v1215_v60  ;;  %3054 = vmatpush1.msra.mxu0 %v1309_v39 }
 0x1c3   : > { %v1311_v24 = vmul.f32 %v1246_v6, %v5068_v3  ;;  %v1312_v35 = vmul.f32 %v1247_v44, %v5058_v50  ;;  %3055 = vmatprep.subr.mxu0 %v1117_v7 }
 0x1c4   : > { %3056 = vmatpush1.msra.mxu0 %v1116_v32 }
 0x1c5   : > { %3057 = vmatprep.subr.mxu0 %v727_v12  ;;  %3124 = vmatprep.subr.mxu1 %v1312_v35 }
 0x1c6   : > { %3058 = vmatpush1.msra.mxu0 %v4949_v9  ;;  %3125 = vmatpush1.msra.mxu1 %v1311_v24  ;;  %v2103_v9 = vpop.f32.mrf.mxu0 }
 0x1c7   : > { %3059 = vmatprep.subr.mxu0 %v599_v17  ;;  %3126 = vmatprep.subr.mxu1 %v1119_v38 }
 0x1c8   : > { %3060 = vmatpush1.msra.mxu0 %v598_v55  ;;  %3127 = vmatpush1.msra.mxu1 %v1118_v8  ;;  %v2243_v37 = vpop.f32.mrf.mxu0 }
 0x1c9   : > { %3128 = vmatprep.subr.mxu1 %v729_v28  ;;  %3336 = vmatmul.mubr.msk.f32.vlgmr.msra.gmra.mxu0 %vm2031_vm6, %v4708_v36 }
 0x1ca   : > { %3129 = vmatpush1.msra.mxu1 %v5063_v63  ;;  %v2245_v34 = vpop.f32.mrf.mxu0 }
 0x1cb   : > { %3130 = vmatprep.subr.mxu1 %v601_v29 }
 0x1cc   : > { %3131 = vmatpush1.msra.mxu1 %v600_v62  ;;  %v2385_v33 = vpop.f32.mrf.mxu0  ;;  %v2456_v42 = vpop.f32.mrf.mxu1 }
 0x1cd   : > { %3337 = vmatmul.mubr.msk.f32.vlgmr.msra.gmra.mxu1 %vm2031_vm6, %v4708_v36 }
 0x1ce   : > { %v2387_v46 = vpop.f32.mrf.mxu0  ;;  %v2458_v36 = vpop.f32.mrf.mxu1 }
 0x1d6   : > { %v5123_v49 = vpop.permute.xlu0 %2028 }
 0x1d7   : > { %v2244_v30 = vadd.f32 %v2243_v37, %v5123_v49  ;;  %v2315_v18 = vadd.f32 %v2314_v22, %v5123_v49  ;;  %v2102_v16 = vadd.f32 %v2101_v57, %v5123_v49  ;;  %v2104_v20 = vadd.f32 %v2103_v9, %v5123_v49 }
 0x1d8   : > { %v2173_v47 = vadd.f32 %v2172_v14, %v5123_v49  ;;  %v2175_v10 = vadd.f32 %v2174_v25, %v5123_v49  ;;  %v2246_v61 = vadd.f32 %v2245_v34, %v5123_v49  ;;  %v2317_v50 = vadd.f32 %v2316_v40, %v5123_v49 }
 0x1d9   : > { %v3203_v12 = vcombine.low %v2102_v16, %v2104_v20  ;;  %v2386_v63 = vadd.f32 %v2385_v33, %v5123_v49  ;;  %v2457_v48 = vadd.f32 %v2456_v42, %v5123_v49  ;;  %v2388_v3 = vadd.f32 %v2387_v46, %v5123_v49 }
 0x1da   : > { %v3204_v5 = vcombine.low %v2173_v47, %v2175_v10  ;;  %v3205_v1 = vcombine.low %v2244_v30, %v2246_v61  ;;  %v3206_v21 = vcombine.low %v2315_v18, %v2317_v50  ;;  %v2459_v56 = vadd.f32 %v2458_v36, %v5123_v49 }
 0x1db   : > { %3235 = vst [vmem:[%s5132_s27] sm:$0xff] %v3203_v12  ;;  %v3207_v11 = vcombine.low %v2386_v63, %v2388_v3 }
 0x1dc   : > { %3236 = vst [vmem:[%s5132_s27 + $0x8] sm:$0xff] %v3204_v5  ;;  %3237 = vst [vmem:[%s5132_s27 + $0x10] sm:$0xff] %v3205_v1  ;;  %v3208_v13 = vcombine.low %v2457_v48, %v2459_v56 }
 0x1dd   : > { %3238 = vst [vmem:[%s5132_s27 + $0x18] sm:$0xff] %v3206_v21  ;;  %3239 = vst [vmem:[%s5132_s27 + $0x20] sm:$0xff] %v3207_v11 }
 0x1de   : > { %3240 = vst [vmem:[%s5132_s27 + $0x28] sm:$0xff] %v3208_v13 }
 0x1f0   : > { %v2527_v28 = vpop.f32.mrf.mxu0 }
 0x1f1   : > { %v2528_v52 = vadd.f32 %v2527_v28, %v5123_v49 }
 0x1f2   : > { %v2529_v59 = vpop.f32.mrf.mxu0 }
 0x1f3   : > { %v2530_v26 = vadd.f32 %v2529_v59, %v5123_v49 }
 0x1f5   : > { %v2598_v51 = vpop.f32.mrf.mxu1  ;;  %v3209_v53 = vcombine.low %v2528_v52, %v2530_v26 }
 0x1f6   : > { %v2599_v41 = vadd.f32 %v2598_v51, %v5123_v49 }
 0x1f7   : > { %v2600_v45 = vpop.f32.mrf.mxu1  ;;  %3241 = vst [vmem:[%s5132_s27 + $0x30] sm:$0xff] %v3209_v53 }
 0x1f8   : > { %v2601_v58 = vadd.f32 %v2600_v45, %v5123_v49 }
 0x1fa   : > { %v3210_v54 = vcombine.low %v2599_v41, %v2601_v58 }
 0x1fc   : > { %3242 = vst [vmem:[%s5132_s27 + $0x38] sm:$0xff] %v3210_v54 }
 0x218   : > { %v2669_v31 = vpop.f32.mrf.mxu0 }
 0x219   : > { %v2670_v27 = vadd.f32 %v2669_v31, %v5123_v49 }
 0x21a   : > { %v2671_v2 = vpop.f32.mrf.mxu0 }
 0x21b   : > { %v2672_v15 = vadd.f32 %v2671_v2, %v5123_v49  ;;  %v2740_v19 = vpop.f32.mrf.mxu1 }
 0x21c   : > { %v2741_v43 = vadd.f32 %v2740_v19, %v5123_v49 }
 0x21d   : > { %v3211_v39 = vcombine.low %v2670_v27, %v2672_v15  ;;  %v2742_v0 = vpop.f32.mrf.mxu1 }
 0x21e   : > { %v2743_v4 = vadd.f32 %v2742_v0, %v5123_v49 }
 0x21f   : > { %3243 = vst [vmem:[%s5132_s27 + $0x40] sm:$0xff] %v3211_v39 }
 0x220   : > { %v3212_v60 = vcombine.low %v2741_v43, %v2743_v4 }
 0x222   : > { %3244 = vst [vmem:[%s5132_s27 + $0x48] sm:$0xff] %v3212_v60 }
 0x241   : > { %v2811_v7 = vpop.f32.mrf.mxu0 }
 0x242   : > { %v2812_v23 = vadd.f32 %v2811_v7, %v5123_v49 }
 0x243   : > { %v2813_v32 = vpop.f32.mrf.mxu0 }
 0x244   : > { %v2814_v6 = vadd.f32 %v2813_v32, %v5123_v49  ;;  %v2882_v44 = vpop.f32.mrf.mxu1 }
 0x245   : > { %v2883_v24 = vadd.f32 %v2882_v44, %v5123_v49 }
 0x246   : > { %v3213_v35 = vcombine.low %v2812_v23, %v2814_v6  ;;  %v2884_v17 = vpop.f32.mrf.mxu1 }
 0x247   : > { %v2885_v38 = vadd.f32 %v2884_v17, %v5123_v49 }
 0x248   : > { %3245 = vst [vmem:[%s5132_s27 + $0x50] sm:$0xff] %v3213_v35 }
 0x249   : > { %v3214_v55 = vcombine.low %v2883_v24, %v2885_v38 }
 0x24b   : > { %3246 = vst [vmem:[%s5132_s27 + $0x58] sm:$0xff] %v3214_v55 }
 0x268   : > { %v2953_v8 = vpop.f32.mrf.mxu0 }
 0x269   : > { %v2954_v57 = vadd.f32 %v2953_v8, %v5123_v49 }
 0x26a   : > { %v2955_v29 = vpop.f32.mrf.mxu0 }
 0x26b   : > { %v2956_v14 = vadd.f32 %v2955_v29, %v5123_v49 }
 0x26c   : > { %v3024_v62 = vpop.f32.mrf.mxu1 }
 0x26d   : > { %v3215_v9 = vcombine.low %v2954_v57, %v2956_v14  ;;  %v3025_v25 = vadd.f32 %v3024_v62, %v5123_v49 }
 0x26e   : > { %v3026_v37 = vpop.f32.mrf.mxu1 }
 0x26f   : > { %3247 = vst [vmem:[%s5132_s27 + $0x60] sm:$0xff] %v3215_v9  ;;  %v3027_v22 = vadd.f32 %v3026_v37, %v5123_v49 }
 0x271   : > { %v3216_v34 = vcombine.low %v3025_v25, %v3027_v22 }
 0x273   : > { %3248 = vst [vmem:[%s5132_s27 + $0x68] sm:$0xff] %v3216_v34 }
 0x289   : > { %v3095_v40 = vpop.f32.mrf.mxu0 }
 0x28a   : > { %v3096_v33 = vadd.f32 %v3095_v40, %v5123_v49 }
 0x28b   : > { %v3097_v42 = vpop.f32.mrf.mxu0 }
 0x28c   : > { %v3098_v46 = vadd.f32 %v3097_v42, %v5123_v49 }
 0x28d   : > { %v3166_v30 = vpop.f32.mrf.mxu1 }
 0x28e   : > { %v3217_v18 = vcombine.low %v3096_v33, %v3098_v46  ;;  %v3167_v20 = vadd.f32 %v3166_v30, %v5123_v49 }
 0x28f   : > { %v3168_v16 = vpop.f32.mrf.mxu1 }
 0x290   : > { %3249 = vst [vmem:[%s5132_s27 + $0x70] sm:$0xff] %v3217_v18  ;;  %v3169_v36 = vadd.f32 %v3168_v16, %v5123_v49 }
 0x292   : > { %v3218_v47 = vcombine.low %v3167_v20, %v3169_v36 }
 0x294   : > { %3250 = vst [vmem:[%s5132_s27 + $0x78] sm:$0xff] %v3218_v47 }
 0x295 PF: > { %s14_s15 = sadd.s32 1, %s3373_s15  }
 0x296   : > { %p11_p4 = scmp.ge.s32.totalorder %s14_s15, 4  }
 0x298   :  { %13 = sbr.rel (!%p11_p4) target bundleno = 1 (0x1), region = 73 }

</bundles_post_ra>
